<compile_context>
chip_gen: v7x
topology: tpu7x:2x2x1
jax: 0.10.0
libtpu: 0.0.40
codegen_flags: <defaults>
</compile_context>

<pallas_src>
import functools
import math

import jax
import jax.numpy as jnp
import numpy as np
from jax import lax
from jax.experimental import pallas as pl
from jax.experimental.pallas import tpu as pltpu

LRELU_SLOPE = 0.01


def _round_up(x, m):
    return (x + m - 1) // m * m


# --------------------------- selection matrices --------------------------------
def _phase_select_matrix(ho, wo, row_stride, pad, hp_next, wp_next):
    """0/1 matrix mapping conv-accumulator rows (q = yo*row_stride + xo, valid
    xo < wo) to the space-to-depth (stride-2 phase) layout of the zero-padded
    activation needed by the next stride-2 conv.  Padding rows are all-zero."""
    a_len = (ho - 1) * row_stride + wo
    hh, wh = hp_next // 2, wp_next // 2
    s = np.zeros((4 * hh * wh, a_len), np.float32)
    for a in range(2):
        for b in range(2):
            for y in range(hh):
                for x in range(wh):
                    yy = 2 * y + a - pad
                    xx = 2 * x + b - pad
                    if 0 <= yy < ho and 0 <= xx < wo:
                        r = ((a * 2 + b) * hh + y) * wh + x
                        s[r, yy * row_stride + xx] = 1.0
    return s


# ------------------------------ fused kernel -----------------------------------
def _fused_hyper_encoder_kernel(
    x_ref, w1_ref, w2_ref, w3_ref, b1_ref, b2_ref, b3_ref, s1_ref, s2_ref,
    o_ref, h1_scr, h2_scr, *, dims):
    (wp1, a1, hh1, wh1, a2, hh2, wh2, a3, ho3, wo3) = dims
    f32 = jnp.float32
    bf16 = jnp.bfloat16
    cp = w1_ref.shape[2]

    # ---------------- layer 1: 3x3, stride 1, pad 1, LeakyReLU ----------------
    xv = x_ref[0]                                   # (Hp1*Wp1, Cpi) bf16
    acc1 = jnp.zeros((a1, cp), f32)
    for i in range(3):
        for j in range(3):
            start = i * wp1 + j                      # shifted flat view
            acc1 += jnp.dot(xv[start:start + a1, :], w1_ref[i * 3 + j],
                            preferred_element_type=f32)
    h1 = acc1 + b1_ref[...]
    h1 = jnp.where(h1 >= 0.0, h1, h1 * LRELU_SLOPE)
    # zero-pad + space-to-depth via exact 0/1 selection matmul (MXU)
    h1_scr[...] = jnp.dot(s1_ref[...], h1.astype(bf16),
                          preferred_element_type=f32)

    # ---------------- layer 2: 5x5, stride 2, pad 2, LeakyReLU ----------------
    acc2 = jnp.zeros((a2, cp), f32)
    for i in range(5):
        for j in range(5):
            a, di = i % 2, i // 2
            b, dj = j % 2, j // 2
            start = (a * 2 + b) * (hh1 * wh1) + di * wh1 + dj
            patch = h1_scr[start:start + a2, :].astype(bf16)
            acc2 += jnp.dot(patch, w2_ref[i * 5 + j],
                            preferred_element_type=f32)
    h2 = acc2 + b2_ref[...]
    h2 = jnp.where(h2 >= 0.0, h2, h2 * LRELU_SLOPE)
    h2_scr[...] = jnp.dot(s2_ref[...], h2.astype(bf16),
                          preferred_element_type=f32)

    # ---------------- layer 3: 5x5, stride 2, pad 2 (no activation) -----------
    acc3 = jnp.zeros((a3, cp), f32)
    for i in range(5):
        for j in range(5):
            a, di = i % 2, i // 2
            b, dj = j % 2, j // 2
            start = (a * 2 + b) * (hh2 * wh2) + di * wh2 + dj
            patch = h2_scr[start:start + a3, :].astype(bf16)
            acc3 += jnp.dot(patch, w3_ref[i * 5 + j],
                            preferred_element_type=f32)
    out = acc3 + b3_ref[...]
    # drop the garbage columns (accumulator row-stride wh2 -> dense wo3)
    rows = [out[yo * wh2: yo * wh2 + wo3, :] for yo in range(ho3)]
    o_ref[0] = jnp.concatenate(rows, axis=0)         # (Ho3*Wo3, Cp), lane-dense


# ------------------------------ wrapper ----------------------------------------
def hyper_encoder_forward(params, x_nchw):
    """Forward pass. Input NCHW (PyTorch convention), output NCHW."""
    n, cin, h, w = x_nchw.shape
    cout = params["conv1"]["w"].shape[0]
    assert h % 4 == 0 and w % 4 == 0, "spatial dims must be multiples of 4"

    cpi = max(128, _round_up(cin, 128))
    cp = max(128, _round_up(cout, 128))

    # conv arithmetic (stride-1 3x3 pad1, then two stride-2 5x5 pad2)
    hp1, wp1 = h + 2, w + 2
    ho1, wo1 = h, w
    hp2, wp2 = ho1 + 4, wo1 + 4
    ho2, wo2 = ho1 // 2, wo1 // 2
    hp3, wp3 = ho2 + 4, wo2 + 4
    ho3, wo3 = ho2 // 2, wo2 // 2
    hh1, wh1 = hp2 // 2, wp2 // 2
    hh2, wh2 = hp3 // 2, wp3 // 2
    a1 = (ho1 - 1) * wp1 + wo1
    a2 = (ho2 - 1) * wh1 + wo2
    a3 = (ho3 - 1) * wh2 + wo3

    # input: NCHW -> NHWC, spatial pad 1, channel pad to 128, flatten, bf16
    x = jnp.transpose(x_nchw, (0, 2, 3, 1))
    x = jnp.pad(x, ((0, 0), (1, 1), (1, 1), (0, cpi - cin)))
    x = x.reshape(n, hp1 * wp1, cpi).astype(jnp.bfloat16)

    def prep_w(wt, c_in_pad, c_out_pad):
        co, ci, kh, kw = wt.shape
        m = jnp.transpose(wt, (2, 3, 1, 0)).reshape(kh * kw, ci, co)
        m = jnp.pad(m, ((0, 0), (0, c_in_pad - ci), (0, c_out_pad - co)))
        return m.astype(jnp.bfloat16)

    def prep_b(b, c_out_pad):
        return jnp.pad(b, (0, c_out_pad - b.shape[0])).reshape(1, c_out_pad).astype(jnp.float32)

    w1 = prep_w(params["conv1"]["w"], cpi, cp)
    w2 = prep_w(params["conv2"]["w"], cp, cp)
    w3 = prep_w(params["conv3"]["w"], cp, cp)
    b1 = prep_b(params["conv1"]["b"], cp)
    b2 = prep_b(params["conv2"]["b"], cp)
    b3 = prep_b(params["conv3"]["b"], cp)

    s1 = jnp.asarray(_phase_select_matrix(ho1, wo1, wp1, 2, hp2, wp2), jnp.bfloat16)
    s2 = jnp.asarray(_phase_select_matrix(ho2, wo2, wh1, 2, hp3, wp3), jnp.bfloat16)

    dims = (wp1, a1, hh1, wh1, a2, hh2, wh2, a3, ho3, wo3)
    kernel = functools.partial(_fused_hyper_encoder_kernel, dims=dims)

    out_flat = pl.pallas_call(
        kernel,
        out_shape=jax.ShapeDtypeStruct((n, ho3 * wo3, cp), jnp.float32),
        grid=(n,),
        in_specs=[
            pl.BlockSpec((1, hp1 * wp1, cpi), lambda i: (i, 0, 0)),
            pl.BlockSpec((9, cpi, cp), lambda i: (0, 0, 0)),
            pl.BlockSpec((25, cp, cp), lambda i: (0, 0, 0)),
            pl.BlockSpec((25, cp, cp), lambda i: (0, 0, 0)),
            pl.BlockSpec((1, cp), lambda i: (0, 0)),
            pl.BlockSpec((1, cp), lambda i: (0, 0)),
            pl.BlockSpec((1, cp), lambda i: (0, 0)),
            pl.BlockSpec((4 * hh1 * wh1, a1), lambda i: (0, 0)),
            pl.BlockSpec((4 * hh2 * wh2, a2), lambda i: (0, 0)),
        ],
        out_specs=pl.BlockSpec((1, ho3 * wo3, cp), lambda i: (i, 0, 0)),
        scratch_shapes=[
            pltpu.VMEM((4 * hh1 * wh1, cp), jnp.float32),
            pltpu.VMEM((4 * hh2 * wh2, cp), jnp.float32),
        ],
        compiler_params=pltpu.CompilerParams(
            dimension_semantics=("parallel",),
        ),
    )(x, w1, w2, w3, b1, b2, b3, s1, s2)

    out = out_flat.reshape(n, ho3, wo3, cp)[..., :cout]
    return jnp.transpose(out, (0, 3, 1, 2))  # NHWC -> NCHW


# --------------------------- params / reference --------------------------------
def init_hyper_encoder_params(key, channel_in, channel_out):
    """Deterministic init mimicking nn.Conv2d default (uniform +-1/sqrt(fan_in))."""
    params = {}
    specs = {
        "conv1": (channel_out, channel_in, 3, 3),
        "conv2": (channel_out, channel_out, 5, 5),
        "conv3": (channel_out, channel_out, 5, 5),
    }
    for name, shape in specs.items():
        key, kw_, kb_ = jax.random.split(key, 3)
        co, ci, kh, kw = shape
        bound = 1.0 / math.sqrt(ci * kh * kw)
        params[name] = {
            "w": jax.random.uniform(kw_, shape, jnp.float32, -bound, bound),
            "b": jax.random.uniform(kb_, (co,), jnp.float32, -bound, bound),
        }
    return params


def _reference_forward(params, x_nchw):
    """Pure-JAX f32 reference using lax.conv (NCHW / OIHW)."""
    def conv(x, w, b, stride, pad):
        y = lax.conv_general_dilated(
            x, w, window_strides=(stride, stride),
            padding=((pad, pad), (pad, pad)),
            dimension_numbers=("NCHW", "OIHW", "NCHW"))
        return y + b[None, :, None, None]

    def lrelu(x):
        return jnp.where(x >= 0.0, x, LRELU_SLOPE * x)

    x = lrelu(conv(x_nchw, params["conv1"]["w"], params["conv1"]["b"], 1, 1))
    x = lrelu(conv(x, params["conv2"]["w"], params["conv2"]["b"], 2, 2))
    x = conv(x, params["conv3"]["w"], params["conv3"]["b"], 2, 2)
    return x


# --------------------------------- main ----------------------------------------
if __name__ == "__main__":
    key = jax.random.PRNGKey(0)
    k_param, k_x = jax.random.split(key)

    batch, channel_in, channel_out, spatial = 2, 8, 8, 16
    params = init_hyper_encoder_params(k_param, channel_in, channel_out)
    x = jax.random.normal(k_x, (batch, channel_in, spatial, spatial), jnp.float32)

    fwd = jax.jit(hyper_encoder_forward)
    out = jax.block_until_ready(fwd(params, x))

    # Shape check: conv1 keeps 16x16, conv2 -> 8x8, conv3 -> 4x4.
    assert out.shape == (batch, channel_out, spatial // 4, spatial // 4), out.shape

    # Numerical check against f32 reference (kernel uses bf16 MXU matmuls).
    ref = jax.block_until_ready(_reference_forward(params, x))
    np.testing.assert_allclose(np.asarray(out), np.asarray(ref),
                               atol=1e-2, rtol=2e-2)

    print("KERNEL_OK")
</pallas_src>

<mosaic_0001>
module attributes {stable_mosaic.version = 11 : i64} {
  func.func @_fused_hyper_encoder_kernel(%arg0: i32, %arg1: memref<1x324x128xbf16, #tpu.memory_space<vmem>>, %arg2: memref<9x128x128xbf16, #tpu.memory_space<vmem>>, %arg3: memref<25x128x128xbf16, #tpu.memory_space<vmem>>, %arg4: memref<25x128x128xbf16, #tpu.memory_space<vmem>>, %arg5: memref<1x128xf32, #tpu.memory_space<vmem>>, %arg6: memref<1x128xf32, #tpu.memory_space<vmem>>, %arg7: memref<1x128xf32, #tpu.memory_space<vmem>>, %arg8: memref<400x286xbf16, #tpu.memory_space<vmem>>, %arg9: memref<144x78xbf16, #tpu.memory_space<vmem>>, %arg10: memref<1x16x128xf32, #tpu.memory_space<vmem>>, %arg11: memref<400x128xf32, #tpu.memory_space<vmem>>, %arg12: memref<144x128xf32, #tpu.memory_space<vmem>>) attributes {dimension_semantics = [#tpu.dimension_semantics<parallel>], iteration_bounds = array<i64: 2>, scalar_prefetch = 0 : i64, scratch_operands = 2 : i64, tpu.core_type = #tpu.core_type<tc>, window_params = [{transform_indices = @transform_0, window_bounds = array<i64: 1, 324, 128>}, {pipeline_mode = #tpu.pipeline_mode<synchronous>, transform_indices = @transform_1, window_bounds = array<i64: 9, 128, 128>}, {pipeline_mode = #tpu.pipeline_mode<synchronous>, transform_indices = @transform_2, window_bounds = array<i64: 25, 128, 128>}, {pipeline_mode = #tpu.pipeline_mode<synchronous>, transform_indices = @transform_3, window_bounds = array<i64: 25, 128, 128>}, {pipeline_mode = #tpu.pipeline_mode<synchronous>, transform_indices = @transform_4, window_bounds = array<i64: 1, 128>}, {pipeline_mode = #tpu.pipeline_mode<synchronous>, transform_indices = @transform_5, window_bounds = array<i64: 1, 128>}, {pipeline_mode = #tpu.pipeline_mode<synchronous>, transform_indices = @transform_6, window_bounds = array<i64: 1, 128>}, {pipeline_mode = #tpu.pipeline_mode<synchronous>, transform_indices = @transform_7, window_bounds = array<i64: 400, 286>}, {pipeline_mode = #tpu.pipeline_mode<synchronous>, transform_indices = @transform_8, window_bounds = array<i64: 144, 78>}, {transform_indices = @transform_9, window_bounds = array<i64: 1, 16, 128>}]} {
    %c0 = arith.constant 0 : index
    %c0_0 = arith.constant 0 : index
    %c0_1 = arith.constant 0 : index
    %0 = vector.load %arg1[%c0, %c0_0, %c0_1] : memref<1x324x128xbf16, #tpu.memory_space<vmem>>, vector<1x324x128xbf16>
    %1 = vector.shape_cast %0 : vector<1x324x128xbf16> to vector<324x128xbf16>
    %cst = arith.constant 0.000000e+00 : f32
    %2 = vector.broadcast %cst : f32 to vector<286x128xf32>
    %3 = vector.extract_strided_slice %1 {offsets = [0, 0], sizes = [286, 128], strides = [1, 1]} : vector<324x128xbf16> to vector<286x128xbf16>
    %c0_2 = arith.constant 0 : index
    %c0_3 = arith.constant 0 : index
    %c0_4 = arith.constant 0 : index
    %4 = vector.load %arg2[%c0_2, %c0_3, %c0_4] : memref<9x128x128xbf16, #tpu.memory_space<vmem>>, vector<1x128x128xbf16>
    %5 = vector.shape_cast %4 : vector<1x128x128xbf16> to vector<128x128xbf16>
    %cst_5 = arith.constant dense<0.000000e+00> : vector<286x128xf32>
    %6 = tpu.matmul %3, %5, %cst_5 {dimension_numbers = #tpu.dot_dimension_numbers<[1], [0], [0], [1], [0, 0, 1, 1], [], []>} : vector<286x128xbf16>, vector<128x128xbf16>, vector<286x128xf32> -> vector<286x128xf32>
    %7 = arith.addf %2, %6 : vector<286x128xf32>
    %8 = vector.extract_strided_slice %1 {offsets = [1, 0], sizes = [286, 128], strides = [1, 1]} : vector<324x128xbf16> to vector<286x128xbf16>
    %c1 = arith.constant 1 : index
    %c0_6 = arith.constant 0 : index
    %c0_7 = arith.constant 0 : index
    %9 = vector.load %arg2[%c1, %c0_6, %c0_7] : memref<9x128x128xbf16, #tpu.memory_space<vmem>>, vector<1x128x128xbf16>
    %10 = vector.shape_cast %9 : vector<1x128x128xbf16> to vector<128x128xbf16>
    %cst_8 = arith.constant dense<0.000000e+00> : vector<286x128xf32>
    %11 = tpu.matmul %8, %10, %cst_8 {dimension_numbers = #tpu.dot_dimension_numbers<[1], [0], [0], [1], [0, 0, 1, 1], [], []>} : vector<286x128xbf16>, vector<128x128xbf16>, vector<286x128xf32> -> vector<286x128xf32>
    %12 = arith.addf %7, %11 : vector<286x128xf32>
    %13 = vector.extract_strided_slice %1 {offsets = [2, 0], sizes = [286, 128], strides = [1, 1]} : vector<324x128xbf16> to vector<286x128xbf16>
    %c2 = arith.constant 2 : index
    %c0_9 = arith.constant 0 : index
    %c0_10 = arith.constant 0 : index
    %14 = vector.load %arg2[%c2, %c0_9, %c0_10] : memref<9x128x128xbf16, #tpu.memory_space<vmem>>, vector<1x128x128xbf16>
    %15 = vector.shape_cast %14 : vector<1x128x128xbf16> to vector<128x128xbf16>
    %cst_11 = arith.constant dense<0.000000e+00> : vector<286x128xf32>
    %16 = tpu.matmul %13, %15, %cst_11 {dimension_numbers = #tpu.dot_dimension_numbers<[1], [0], [0], [1], [0, 0, 1, 1], [], []>} : vector<286x128xbf16>, vector<128x128xbf16>, vector<286x128xf32> -> vector<286x128xf32>
    %17 = arith.addf %12, %16 : vector<286x128xf32>
    %18 = vector.extract_strided_slice %1 {offsets = [18, 0], sizes = [286, 128], strides = [1, 1]} : vector<324x128xbf16> to vector<286x128xbf16>
    %c3 = arith.constant 3 : index
    %c0_12 = arith.constant 0 : index
    %c0_13 = arith.constant 0 : index
    %19 = vector.load %arg2[%c3, %c0_12, %c0_13] : memref<9x128x128xbf16, #tpu.memory_space<vmem>>, vector<1x128x128xbf16>
    %20 = vector.shape_cast %19 : vector<1x128x128xbf16> to vector<128x128xbf16>
    %cst_14 = arith.constant dense<0.000000e+00> : vector<286x128xf32>
    %21 = tpu.matmul %18, %20, %cst_14 {dimension_numbers = #tpu.dot_dimension_numbers<[1], [0], [0], [1], [0, 0, 1, 1], [], []>} : vector<286x128xbf16>, vector<128x128xbf16>, vector<286x128xf32> -> vector<286x128xf32>
    %22 = arith.addf %17, %21 : vector<286x128xf32>
    %23 = vector.extract_strided_slice %1 {offsets = [19, 0], sizes = [286, 128], strides = [1, 1]} : vector<324x128xbf16> to vector<286x128xbf16>
    %c4 = arith.constant 4 : index
    %c0_15 = arith.constant 0 : index
    %c0_16 = arith.constant 0 : index
    %24 = vector.load %arg2[%c4, %c0_15, %c0_16] : memref<9x128x128xbf16, #tpu.memory_space<vmem>>, vector<1x128x128xbf16>
    %25 = vector.shape_cast %24 : vector<1x128x128xbf16> to vector<128x128xbf16>
    %cst_17 = arith.constant dense<0.000000e+00> : vector<286x128xf32>
    %26 = tpu.matmul %23, %25, %cst_17 {dimension_numbers = #tpu.dot_dimension_numbers<[1], [0], [0], [1], [0, 0, 1, 1], [], []>} : vector<286x128xbf16>, vector<128x128xbf16>, vector<286x128xf32> -> vector<286x128xf32>
    %27 = arith.addf %22, %26 : vector<286x128xf32>
    %28 = vector.extract_strided_slice %1 {offsets = [20, 0], sizes = [286, 128], strides = [1, 1]} : vector<324x128xbf16> to vector<286x128xbf16>
    %c5 = arith.constant 5 : index
    %c0_18 = arith.constant 0 : index
    %c0_19 = arith.constant 0 : index
    %29 = vector.load %arg2[%c5, %c0_18, %c0_19] : memref<9x128x128xbf16, #tpu.memory_space<vmem>>, vector<1x128x128xbf16>
    %30 = vector.shape_cast %29 : vector<1x128x128xbf16> to vector<128x128xbf16>
    %cst_20 = arith.constant dense<0.000000e+00> : vector<286x128xf32>
    %31 = tpu.matmul %28, %30, %cst_20 {dimension_numbers = #tpu.dot_dimension_numbers<[1], [0], [0], [1], [0, 0, 1, 1], [], []>} : vector<286x128xbf16>, vector<128x128xbf16>, vector<286x128xf32> -> vector<286x128xf32>
    %32 = arith.addf %27, %31 : vector<286x128xf32>
    %33 = vector.extract_strided_slice %1 {offsets = [36, 0], sizes = [286, 128], strides = [1, 1]} : vector<324x128xbf16> to vector<286x128xbf16>
    %c6 = arith.constant 6 : index
    %c0_21 = arith.constant 0 : index
    %c0_22 = arith.constant 0 : index
    %34 = vector.load %arg2[%c6, %c0_21, %c0_22] : memref<9x128x128xbf16, #tpu.memory_space<vmem>>, vector<1x128x128xbf16>
    %35 = vector.shape_cast %34 : vector<1x128x128xbf16> to vector<128x128xbf16>
    %cst_23 = arith.constant dense<0.000000e+00> : vector<286x128xf32>
    %36 = tpu.matmul %33, %35, %cst_23 {dimension_numbers = #tpu.dot_dimension_numbers<[1], [0], [0], [1], [0, 0, 1, 1], [], []>} : vector<286x128xbf16>, vector<128x128xbf16>, vector<286x128xf32> -> vector<286x128xf32>
    %37 = arith.addf %32, %36 : vector<286x128xf32>
    %38 = vector.extract_strided_slice %1 {offsets = [37, 0], sizes = [286, 128], strides = [1, 1]} : vector<324x128xbf16> to vector<286x128xbf16>
    %c7 = arith.constant 7 : index
    %c0_24 = arith.constant 0 : index
    %c0_25 = arith.constant 0 : index
    %39 = vector.load %arg2[%c7, %c0_24, %c0_25] : memref<9x128x128xbf16, #tpu.memory_space<vmem>>, vector<1x128x128xbf16>
    %40 = vector.shape_cast %39 : vector<1x128x128xbf16> to vector<128x128xbf16>
    %cst_26 = arith.constant dense<0.000000e+00> : vector<286x128xf32>
    %41 = tpu.matmul %38, %40, %cst_26 {dimension_numbers = #tpu.dot_dimension_numbers<[1], [0], [0], [1], [0, 0, 1, 1], [], []>} : vector<286x128xbf16>, vector<128x128xbf16>, vector<286x128xf32> -> vector<286x128xf32>
    %42 = arith.addf %37, %41 : vector<286x128xf32>
    %43 = vector.extract_strided_slice %1 {offsets = [38, 0], sizes = [286, 128], strides = [1, 1]} : vector<324x128xbf16> to vector<286x128xbf16>
    %c8 = arith.constant 8 : index
    %c0_27 = arith.constant 0 : index
    %c0_28 = arith.constant 0 : index
    %44 = vector.load %arg2[%c8, %c0_27, %c0_28] : memref<9x128x128xbf16, #tpu.memory_space<vmem>>, vector<1x128x128xbf16>
    %45 = vector.shape_cast %44 : vector<1x128x128xbf16> to vector<128x128xbf16>
    %cst_29 = arith.constant dense<0.000000e+00> : vector<286x128xf32>
    %46 = tpu.matmul %43, %45, %cst_29 {dimension_numbers = #tpu.dot_dimension_numbers<[1], [0], [0], [1], [0, 0, 1, 1], [], []>} : vector<286x128xbf16>, vector<128x128xbf16>, vector<286x128xf32> -> vector<286x128xf32>
    %47 = arith.addf %42, %46 : vector<286x128xf32>
    %c0_30 = arith.constant 0 : index
    %c0_31 = arith.constant 0 : index
    %48 = vector.load %arg5[%c0_30, %c0_31] : memref<1x128xf32, #tpu.memory_space<vmem>>, vector<1x128xf32>
    %49 = vector.broadcast %48 : vector<1x128xf32> to vector<286x128xf32>
    %50 = arith.addf %47, %49 : vector<286x128xf32>
    %cst_32 = arith.constant 0.000000e+00 : f32
    %51 = vector.broadcast %cst_32 : f32 to vector<286x128xf32>
    %52 = arith.cmpf oge, %50, %51 : vector<286x128xf32>
    %cst_33 = arith.constant 0.00999999977 : f32
    %53 = vector.broadcast %cst_33 : f32 to vector<286x128xf32>
    %54 = arith.mulf %50, %53 : vector<286x128xf32>
    %55 = arith.select %52, %50, %54 : vector<286x128xi1>, vector<286x128xf32>
    %c0_34 = arith.constant 0 : index
    %c0_35 = arith.constant 0 : index
    %56 = vector.load %arg8[%c0_34, %c0_35] : memref<400x286xbf16, #tpu.memory_space<vmem>>, vector<400x286xbf16>
    %57 = arith.truncf %55 : vector<286x128xf32> to vector<286x128xbf16>
    %cst_36 = arith.constant dense<0.000000e+00> : vector<400x128xf32>
    %58 = tpu.matmul %56, %57, %cst_36 {dimension_numbers = #tpu.dot_dimension_numbers<[1], [0], [0], [1], [0, 0, 1, 1], [], []>} : vector<400x286xbf16>, vector<286x128xbf16>, vector<400x128xf32> -> vector<400x128xf32>
    %c0_37 = arith.constant 0 : index
    %c0_38 = arith.constant 0 : index
    %59 = vector.load %arg11[%c0_37, %c0_38] : memref<400x128xf32, #tpu.memory_space<vmem>>, vector<400x128xf32>
    tpu.vector_store %arg11[%c0_37, %c0_38], %58 {strides = array<i32>} : memref<400x128xf32, #tpu.memory_space<vmem>>, vector<400x128xf32>,
    %cst_39 = arith.constant 0.000000e+00 : f32
    %60 = vector.broadcast %cst_39 : f32 to vector<78x128xf32>
    %c0_40 = arith.constant 0 : index
    %c0_41 = arith.constant 0 : index
    %61 = vector.load %arg11[%c0_40, %c0_41] : memref<400x128xf32, #tpu.memory_space<vmem>>, vector<78x128xf32>
    %62 = arith.truncf %61 : vector<78x128xf32> to vector<78x128xbf16>
    %c0_42 = arith.constant 0 : index
    %c0_43 = arith.constant 0 : index
    %c0_44 = arith.constant 0 : index
    %63 = vector.load %arg3[%c0_42, %c0_43, %c0_44] : memref<25x128x128xbf16, #tpu.memory_space<vmem>>, vector<1x128x128xbf16>
    %64 = vector.shape_cast %63 : vector<1x128x128xbf16> to vector<128x128xbf16>
    %cst_45 = arith.constant dense<0.000000e+00> : vector<78x128xf32>
    %65 = tpu.matmul %62, %64, %cst_45 {dimension_numbers = #tpu.dot_dimension_numbers<[1], [0], [0], [1], [0, 0, 1, 1], [], []>} : vector<78x128xbf16>, vector<128x128xbf16>, vector<78x128xf32> -> vector<78x128xf32>
    %66 = arith.addf %60, %65 : vector<78x128xf32>
    %c100 = arith.constant 100 : index
    %c0_46 = arith.constant 0 : index
    %67 = vector.load %arg11[%c100, %c0_46] : memref<400x128xf32, #tpu.memory_space<vmem>>, vector<78x128xf32>
    %68 = arith.truncf %67 : vector<78x128xf32> to vector<78x128xbf16>
    %c1_47 = arith.constant 1 : index
    %c0_48 = arith.constant 0 : index
    %c0_49 = arith.constant 0 : index
    %69 = vector.load %arg3[%c1_47, %c0_48, %c0_49] : memref<25x128x128xbf16, #tpu.memory_space<vmem>>, vector<1x128x128xbf16>
    %70 = vector.shape_cast %69 : vector<1x128x128xbf16> to vector<128x128xbf16>
    %cst_50 = arith.constant dense<0.000000e+00> : vector<78x128xf32>
    %71 = tpu.matmul %68, %70, %cst_50 {dimension_numbers = #tpu.dot_dimension_numbers<[1], [0], [0], [1], [0, 0, 1, 1], [], []>} : vector<78x128xbf16>, vector<128x128xbf16>, vector<78x128xf32> -> vector<78x128xf32>
    %72 = arith.addf %66, %71 : vector<78x128xf32>
    %c1_51 = arith.constant 1 : index
    %c0_52 = arith.constant 0 : index
    %73 = vector.load %arg11[%c1_51, %c0_52] : memref<400x128xf32, #tpu.memory_space<vmem>>, vector<78x128xf32>
    %74 = arith.truncf %73 : vector<78x128xf32> to vector<78x128xbf16>
    %c2_53 = arith.constant 2 : index
    %c0_54 = arith.constant 0 : index
    %c0_55 = arith.constant 0 : index
    %75 = vector.load %arg3[%c2_53, %c0_54, %c0_55] : memref<25x128x128xbf16, #tpu.memory_space<vmem>>, vector<1x128x128xbf16>
    %76 = vector.shape_cast %75 : vector<1x128x128xbf16> to vector<128x128xbf16>
    %cst_56 = arith.constant dense<0.000000e+00> : vector<78x128xf32>
    %77 = tpu.matmul %74, %76, %cst_56 {dimension_numbers = #tpu.dot_dimension_numbers<[1], [0], [0], [1], [0, 0, 1, 1], [], []>} : vector<78x128xbf16>, vector<128x128xbf16>, vector<78x128xf32> -> vector<78x128xf32>
    %78 = arith.addf %72, %77 : vector<78x128xf32>
    %c101 = arith.constant 101 : index
    %c0_57 = arith.constant 0 : index
    %79 = vector.load %arg11[%c101, %c0_57] : memref<400x128xf32, #tpu.memory_space<vmem>>, vector<78x128xf32>
    %80 = arith.truncf %79 : vector<78x128xf32> to vector<78x128xbf16>
    %c3_58 = arith.constant 3 : index
    %c0_59 = arith.constant 0 : index
    %c0_60 = arith.constant 0 : index
    %81 = vector.load %arg3[%c3_58, %c0_59, %c0_60] : memref<25x128x128xbf16, #tpu.memory_space<vmem>>, vector<1x128x128xbf16>
    %82 = vector.shape_cast %81 : vector<1x128x128xbf16> to vector<128x128xbf16>
    %cst_61 = arith.constant dense<0.000000e+00> : vector<78x128xf32>
    %83 = tpu.matmul %80, %82, %cst_61 {dimension_numbers = #tpu.dot_dimension_numbers<[1], [0], [0], [1], [0, 0, 1, 1], [], []>} : vector<78x128xbf16>, vector<128x128xbf16>, vector<78x128xf32> -> vector<78x128xf32>
    %84 = arith.addf %78, %83 : vector<78x128xf32>
    %c2_62 = arith.constant 2 : index
    %c0_63 = arith.constant 0 : index
    %85 = vector.load %arg11[%c2_62, %c0_63] : memref<400x128xf32, #tpu.memory_space<vmem>>, vector<78x128xf32>
    %86 = arith.truncf %85 : vector<78x128xf32> to vector<78x128xbf16>
    %c4_64 = arith.constant 4 : index
    %c0_65 = arith.constant 0 : index
    %c0_66 = arith.constant 0 : index
    %87 = vector.load %arg3[%c4_64, %c0_65, %c0_66] : memref<25x128x128xbf16, #tpu.memory_space<vmem>>, vector<1x128x128xbf16>
    %88 = vector.shape_cast %87 : vector<1x128x128xbf16> to vector<128x128xbf16>
    %cst_67 = arith.constant dense<0.000000e+00> : vector<78x128xf32>
    %89 = tpu.matmul %86, %88, %cst_67 {dimension_numbers = #tpu.dot_dimension_numbers<[1], [0], [0], [1], [0, 0, 1, 1], [], []>} : vector<78x128xbf16>, vector<128x128xbf16>, vector<78x128xf32> -> vector<78x128xf32>
    %90 = arith.addf %84, %89 : vector<78x128xf32>
    %c200 = arith.constant 200 : index
    %c0_68 = arith.constant 0 : index
    %91 = vector.load %arg11[%c200, %c0_68] : memref<400x128xf32, #tpu.memory_space<vmem>>, vector<78x128xf32>
    %92 = arith.truncf %91 : vector<78x128xf32> to vector<78x128xbf16>
    %c5_69 = arith.constant 5 : index
    %c0_70 = arith.constant 0 : index
    %c0_71 = arith.constant 0 : index
    %93 = vector.load %arg3[%c5_69, %c0_70, %c0_71] : memref<25x128x128xbf16, #tpu.memory_space<vmem>>, vector<1x128x128xbf16>
    %94 = vector.shape_cast %93 : vector<1x128x128xbf16> to vector<128x128xbf16>
    %cst_72 = arith.constant dense<0.000000e+00> : vector<78x128xf32>
    %95 = tpu.matmul %92, %94, %cst_72 {dimension_numbers = #tpu.dot_dimension_numbers<[1], [0], [0], [1], [0, 0, 1, 1], [], []>} : vector<78x128xbf16>, vector<128x128xbf16>, vector<78x128xf32> -> vector<78x128xf32>
    %96 = arith.addf %90, %95 : vector<78x128xf32>
    %c300 = arith.constant 300 : index
    %c0_73 = arith.constant 0 : index
    %97 = vector.load %arg11[%c300, %c0_73] : memref<400x128xf32, #tpu.memory_space<vmem>>, vector<78x128xf32>
    %98 = arith.truncf %97 : vector<78x128xf32> to vector<78x128xbf16>
    %c6_74 = arith.constant 6 : index
    %c0_75 = arith.constant 0 : index
    %c0_76 = arith.constant 0 : index
    %99 = vector.load %arg3[%c6_74, %c0_75, %c0_76] : memref<25x128x128xbf16, #tpu.memory_space<vmem>>, vector<1x128x128xbf16>
    %100 = vector.shape_cast %99 : vector<1x128x128xbf16> to vector<128x128xbf16>
    %cst_77 = arith.constant dense<0.000000e+00> : vector<78x128xf32>
    %101 = tpu.matmul %98, %100, %cst_77 {dimension_numbers = #tpu.dot_dimension_numbers<[1], [0], [0], [1], [0, 0, 1, 1], [], []>} : vector<78x128xbf16>, vector<128x128xbf16>, vector<78x128xf32> -> vector<78x128xf32>
    %102 = arith.addf %96, %101 : vector<78x128xf32>
    %c201 = arith.constant 201 : index
    %c0_78 = arith.constant 0 : index
    %103 = vector.load %arg11[%c201, %c0_78] : memref<400x128xf32, #tpu.memory_space<vmem>>, vector<78x128xf32>
    %104 = arith.truncf %103 : vector<78x128xf32> to vector<78x128xbf16>
    %c7_79 = arith.constant 7 : index
    %c0_80 = arith.constant 0 : index
    %c0_81 = arith.constant 0 : index
    %105 = vector.load %arg3[%c7_79, %c0_80, %c0_81] : memref<25x128x128xbf16, #tpu.memory_space<vmem>>, vector<1x128x128xbf16>
    %106 = vector.shape_cast %105 : vector<1x128x128xbf16> to vector<128x128xbf16>
    %cst_82 = arith.constant dense<0.000000e+00> : vector<78x128xf32>
    %107 = tpu.matmul %104, %106, %cst_82 {dimension_numbers = #tpu.dot_dimension_numbers<[1], [0], [0], [1], [0, 0, 1, 1], [], []>} : vector<78x128xbf16>, vector<128x128xbf16>, vector<78x128xf32> -> vector<78x128xf32>
    %108 = arith.addf %102, %107 : vector<78x128xf32>
    %c301 = arith.constant 301 : index
    %c0_83 = arith.constant 0 : index
    %109 = vector.load %arg11[%c301, %c0_83] : memref<400x128xf32, #tpu.memory_space<vmem>>, vector<78x128xf32>
    %110 = arith.truncf %109 : vector<78x128xf32> to vector<78x128xbf16>
    %c8_84 = arith.constant 8 : index
    %c0_85 = arith.constant 0 : index
    %c0_86 = arith.constant 0 : index
    %111 = vector.load %arg3[%c8_84, %c0_85, %c0_86] : memref<25x128x128xbf16, #tpu.memory_space<vmem>>, vector<1x128x128xbf16>
    %112 = vector.shape_cast %111 : vector<1x128x128xbf16> to vector<128x128xbf16>
    %cst_87 = arith.constant dense<0.000000e+00> : vector<78x128xf32>
    %113 = tpu.matmul %110, %112, %cst_87 {dimension_numbers = #tpu.dot_dimension_numbers<[1], [0], [0], [1], [0, 0, 1, 1], [], []>} : vector<78x128xbf16>, vector<128x128xbf16>, vector<78x128xf32> -> vector<78x128xf32>
    %114 = arith.addf %108, %113 : vector<78x128xf32>
    %c202 = arith.constant 202 : index
    %c0_88 = arith.constant 0 : index
    %115 = vector.load %arg11[%c202, %c0_88] : memref<400x128xf32, #tpu.memory_space<vmem>>, vector<78x128xf32>
    %116 = arith.truncf %115 : vector<78x128xf32> to vector<78x128xbf16>
    %c9 = arith.constant 9 : index
    %c0_89 = arith.constant 0 : index
    %c0_90 = arith.constant 0 : index
    %117 = vector.load %arg3[%c9, %c0_89, %c0_90] : memref<25x128x128xbf16, #tpu.memory_space<vmem>>, vector<1x128x128xbf16>
    %118 = vector.shape_cast %117 : vector<1x128x128xbf16> to vector<128x128xbf16>
    %cst_91 = arith.constant dense<0.000000e+00> : vector<78x128xf32>
    %119 = tpu.matmul %116, %118, %cst_91 {dimension_numbers = #tpu.dot_dimension_numbers<[1], [0], [0], [1], [0, 0, 1, 1], [], []>} : vector<78x128xbf16>, vector<128x128xbf16>, vector<78x128xf32> -> vector<78x128xf32>
    %120 = arith.addf %114, %119 : vector<78x128xf32>
    %c10 = arith.constant 10 : index
    %c0_92 = arith.constant 0 : index
    %121 = vector.load %arg11[%c10, %c0_92] : memref<400x128xf32, #tpu.memory_space<vmem>>, vector<78x128xf32>
    %122 = arith.truncf %121 : vector<78x128xf32> to vector<78x128xbf16>
    %c10_93 = arith.constant 10 : index
    %c0_94 = arith.constant 0 : index
    %c0_95 = arith.constant 0 : index
    %123 = vector.load %arg3[%c10_93, %c0_94, %c0_95] : memref<25x128x128xbf16, #tpu.memory_space<vmem>>, vector<1x128x128xbf16>
    %124 = vector.shape_cast %123 : vector<1x128x128xbf16> to vector<128x128xbf16>
    %cst_96 = arith.constant dense<0.000000e+00> : vector<78x128xf32>
    %125 = tpu.matmul %122, %124, %cst_96 {dimension_numbers = #tpu.dot_dimension_numbers<[1], [0], [0], [1], [0, 0, 1, 1], [], []>} : vector<78x128xbf16>, vector<128x128xbf16>, vector<78x128xf32> -> vector<78x128xf32>
    %126 = arith.addf %120, %125 : vector<78x128xf32>
    %c110 = arith.constant 110 : index
    %c0_97 = arith.constant 0 : index
    %127 = vector.load %arg11[%c110, %c0_97] : memref<400x128xf32, #tpu.memory_space<vmem>>, vector<78x128xf32>
    %128 = arith.truncf %127 : vector<78x128xf32> to vector<78x128xbf16>
    %c11 = arith.constant 11 : index
    %c0_98 = arith.constant 0 : index
    %c0_99 = arith.constant 0 : index
    %129 = vector.load %arg3[%c11, %c0_98, %c0_99] : memref<25x128x128xbf16, #tpu.memory_space<vmem>>, vector<1x128x128xbf16>
    %130 = vector.shape_cast %129 : vector<1x128x128xbf16> to vector<128x128xbf16>
    %cst_100 = arith.constant dense<0.000000e+00> : vector<78x128xf32>
    %131 = tpu.matmul %128, %130, %cst_100 {dimension_numbers = #tpu.dot_dimension_numbers<[1], [0], [0], [1], [0, 0, 1, 1], [], []>} : vector<78x128xbf16>, vector<128x128xbf16>, vector<78x128xf32> -> vector<78x128xf32>
    %132 = arith.addf %126, %131 : vector<78x128xf32>
    %c11_101 = arith.constant 11 : index
    %c0_102 = arith.constant 0 : index
    %133 = vector.load %arg11[%c11_101, %c0_102] : memref<400x128xf32, #tpu.memory_space<vmem>>, vector<78x128xf32>
    %134 = arith.truncf %133 : vector<78x128xf32> to vector<78x128xbf16>
    %c12 = arith.constant 12 : index
    %c0_103 = arith.constant 0 : index
    %c0_104 = arith.constant 0 : index
    %135 = vector.load %arg3[%c12, %c0_103, %c0_104] : memref<25x128x128xbf16, #tpu.memory_space<vmem>>, vector<1x128x128xbf16>
    %136 = vector.shape_cast %135 : vector<1x128x128xbf16> to vector<128x128xbf16>
    %cst_105 = arith.constant dense<0.000000e+00> : vector<78x128xf32>
    %137 = tpu.matmul %134, %136, %cst_105 {dimension_numbers = #tpu.dot_dimension_numbers<[1], [0], [0], [1], [0, 0, 1, 1], [], []>} : vector<78x128xbf16>, vector<128x128xbf16>, vector<78x128xf32> -> vector<78x128xf32>
    %138 = arith.addf %132, %137 : vector<78x128xf32>
    %c111 = arith.constant 111 : index
    %c0_106 = arith.constant 0 : index
    %139 = vector.load %arg11[%c111, %c0_106] : memref<400x128xf32, #tpu.memory_space<vmem>>, vector<78x128xf32>
    %140 = arith.truncf %139 : vector<78x128xf32> to vector<78x128xbf16>
    %c13 = arith.constant 13 : index
    %c0_107 = arith.constant 0 : index
    %c0_108 = arith.constant 0 : index
    %141 = vector.load %arg3[%c13, %c0_107, %c0_108] : memref<25x128x128xbf16, #tpu.memory_space<vmem>>, vector<1x128x128xbf16>
    %142 = vector.shape_cast %141 : vector<1x128x128xbf16> to vector<128x128xbf16>
    %cst_109 = arith.constant dense<0.000000e+00> : vector<78x128xf32>
    %143 = tpu.matmul %140, %142, %cst_109 {dimension_numbers = #tpu.dot_dimension_numbers<[1], [0], [0], [1], [0, 0, 1, 1], [], []>} : vector<78x128xbf16>, vector<128x128xbf16>, vector<78x128xf32> -> vector<78x128xf32>
    %144 = arith.addf %138, %143 : vector<78x128xf32>
    %c12_110 = arith.constant 12 : index
    %c0_111 = arith.constant 0 : index
    %145 = vector.load %arg11[%c12_110, %c0_111] : memref<400x128xf32, #tpu.memory_space<vmem>>, vector<78x128xf32>
    %146 = arith.truncf %145 : vector<78x128xf32> to vector<78x128xbf16>
    %c14 = arith.constant 14 : index
    %c0_112 = arith.constant 0 : index
    %c0_113 = arith.constant 0 : index
    %147 = vector.load %arg3[%c14, %c0_112, %c0_113] : memref<25x128x128xbf16, #tpu.memory_space<vmem>>, vector<1x128x128xbf16>
    %148 = vector.shape_cast %147 : vector<1x128x128xbf16> to vector<128x128xbf16>
    %cst_114 = arith.constant dense<0.000000e+00> : vector<78x128xf32>
    %149 = tpu.matmul %146, %148, %cst_114 {dimension_numbers = #tpu.dot_dimension_numbers<[1], [0], [0], [1], [0, 0, 1, 1], [], []>} : vector<78x128xbf16>, vector<128x128xbf16>, vector<78x128xf32> -> vector<78x128xf32>
    %150 = arith.addf %144, %149 : vector<78x128xf32>
    %c210 = arith.constant 210 : index
    %c0_115 = arith.constant 0 : index
    %151 = vector.load %arg11[%c210, %c0_115] : memref<400x128xf32, #tpu.memory_space<vmem>>, vector<78x128xf32>
    %152 = arith.truncf %151 : vector<78x128xf32> to vector<78x128xbf16>
    %c15 = arith.constant 15 : index
    %c0_116 = arith.constant 0 : index
    %c0_117 = arith.constant 0 : index
    %153 = vector.load %arg3[%c15, %c0_116, %c0_117] : memref<25x128x128xbf16, #tpu.memory_space<vmem>>, vector<1x128x128xbf16>
    %154 = vector.shape_cast %153 : vector<1x128x128xbf16> to vector<128x128xbf16>
    %cst_118 = arith.constant dense<0.000000e+00> : vector<78x128xf32>
    %155 = tpu.matmul %152, %154, %cst_118 {dimension_numbers = #tpu.dot_dimension_numbers<[1], [0], [0], [1], [0, 0, 1, 1], [], []>} : vector<78x128xbf16>, vector<128x128xbf16>, vector<78x128xf32> -> vector<78x128xf32>
    %156 = arith.addf %150, %155 : vector<78x128xf32>
    %c310 = arith.constant 310 : index
    %c0_119 = arith.constant 0 : index
    %157 = vector.load %arg11[%c310, %c0_119] : memref<400x128xf32, #tpu.memory_space<vmem>>, vector<78x128xf32>
    %158 = arith.truncf %157 : vector<78x128xf32> to vector<78x128xbf16>
    %c16 = arith.constant 16 : index
    %c0_120 = arith.constant 0 : index
    %c0_121 = arith.constant 0 : index
    %159 = vector.load %arg3[%c16, %c0_120, %c0_121] : memref<25x128x128xbf16, #tpu.memory_space<vmem>>, vector<1x128x128xbf16>
    %160 = vector.shape_cast %159 : vector<1x128x128xbf16> to vector<128x128xbf16>
    %cst_122 = arith.constant dense<0.000000e+00> : vector<78x128xf32>
    %161 = tpu.matmul %158, %160, %cst_122 {dimension_numbers = #tpu.dot_dimension_numbers<[1], [0], [0], [1], [0, 0, 1, 1], [], []>} : vector<78x128xbf16>, vector<128x128xbf16>, vector<78x128xf32> -> vector<78x128xf32>
    %162 = arith.addf %156, %161 : vector<78x128xf32>
    %c211 = arith.constant 211 : index
    %c0_123 = arith.constant 0 : index
    %163 = vector.load %arg11[%c211, %c0_123] : memref<400x128xf32, #tpu.memory_space<vmem>>, vector<78x128xf32>
    %164 = arith.truncf %163 : vector<78x128xf32> to vector<78x128xbf16>
    %c17 = arith.constant 17 : index
    %c0_124 = arith.constant 0 : index
    %c0_125 = arith.constant 0 : index
    %165 = vector.load %arg3[%c17, %c0_124, %c0_125] : memref<25x128x128xbf16, #tpu.memory_space<vmem>>, vector<1x128x128xbf16>
    %166 = vector.shape_cast %165 : vector<1x128x128xbf16> to vector<128x128xbf16>
    %cst_126 = arith.constant dense<0.000000e+00> : vector<78x128xf32>
    %167 = tpu.matmul %164, %166, %cst_126 {dimension_numbers = #tpu.dot_dimension_numbers<[1], [0], [0], [1], [0, 0, 1, 1], [], []>} : vector<78x128xbf16>, vector<128x128xbf16>, vector<78x128xf32> -> vector<78x128xf32>
    %168 = arith.addf %162, %167 : vector<78x128xf32>
    %c311 = arith.constant 311 : index
    %c0_127 = arith.constant 0 : index
    %169 = vector.load %arg11[%c311, %c0_127] : memref<400x128xf32, #tpu.memory_space<vmem>>, vector<78x128xf32>
    %170 = arith.truncf %169 : vector<78x128xf32> to vector<78x128xbf16>
    %c18 = arith.constant 18 : index
    %c0_128 = arith.constant 0 : index
    %c0_129 = arith.constant 0 : index
    %171 = vector.load %arg3[%c18, %c0_128, %c0_129] : memref<25x128x128xbf16, #tpu.memory_space<vmem>>, vector<1x128x128xbf16>
    %172 = vector.shape_cast %171 : vector<1x128x128xbf16> to vector<128x128xbf16>
    %cst_130 = arith.constant dense<0.000000e+00> : vector<78x128xf32>
    %173 = tpu.matmul %170, %172, %cst_130 {dimension_numbers = #tpu.dot_dimension_numbers<[1], [0], [0], [1], [0, 0, 1, 1], [], []>} : vector<78x128xbf16>, vector<128x128xbf16>, vector<78x128xf32> -> vector<78x128xf32>
    %174 = arith.addf %168, %173 : vector<78x128xf32>
    %c212 = arith.constant 212 : index
    %c0_131 = arith.constant 0 : index
    %175 = vector.load %arg11[%c212, %c0_131] : memref<400x128xf32, #tpu.memory_space<vmem>>, vector<78x128xf32>
    %176 = arith.truncf %175 : vector<78x128xf32> to vector<78x128xbf16>
    %c19 = arith.constant 19 : index
    %c0_132 = arith.constant 0 : index
    %c0_133 = arith.constant 0 : index
    %177 = vector.load %arg3[%c19, %c0_132, %c0_133] : memref<25x128x128xbf16, #tpu.memory_space<vmem>>, vector<1x128x128xbf16>
    %178 = vector.shape_cast %177 : vector<1x128x128xbf16> to vector<128x128xbf16>
    %cst_134 = arith.constant dense<0.000000e+00> : vector<78x128xf32>
    %179 = tpu.matmul %176, %178, %cst_134 {dimension_numbers = #tpu.dot_dimension_numbers<[1], [0], [0], [1], [0, 0, 1, 1], [], []>} : vector<78x128xbf16>, vector<128x128xbf16>, vector<78x128xf32> -> vector<78x128xf32>
    %180 = arith.addf %174, %179 : vector<78x128xf32>
    %c20 = arith.constant 20 : index
    %c0_135 = arith.constant 0 : index
    %181 = vector.load %arg11[%c20, %c0_135] : memref<400x128xf32, #tpu.memory_space<vmem>>, vector<78x128xf32>
    %182 = arith.truncf %181 : vector<78x128xf32> to vector<78x128xbf16>
    %c20_136 = arith.constant 20 : index
    %c0_137 = arith.constant 0 : index
    %c0_138 = arith.constant 0 : index
    %183 = vector.load %arg3[%c20_136, %c0_137, %c0_138] : memref<25x128x128xbf16, #tpu.memory_space<vmem>>, vector<1x128x128xbf16>
    %184 = vector.shape_cast %183 : vector<1x128x128xbf16> to vector<128x128xbf16>
    %cst_139 = arith.constant dense<0.000000e+00> : vector<78x128xf32>
    %185 = tpu.matmul %182, %184, %cst_139 {dimension_numbers = #tpu.dot_dimension_numbers<[1], [0], [0], [1], [0, 0, 1, 1], [], []>} : vector<78x128xbf16>, vector<128x128xbf16>, vector<78x128xf32> -> vector<78x128xf32>
    %186 = arith.addf %180, %185 : vector<78x128xf32>
    %c120 = arith.constant 120 : index
    %c0_140 = arith.constant 0 : index
    %187 = vector.load %arg11[%c120, %c0_140] : memref<400x128xf32, #tpu.memory_space<vmem>>, vector<78x128xf32>
    %188 = arith.truncf %187 : vector<78x128xf32> to vector<78x128xbf16>
    %c21 = arith.constant 21 : index
    %c0_141 = arith.constant 0 : index
    %c0_142 = arith.constant 0 : index
    %189 = vector.load %arg3[%c21, %c0_141, %c0_142] : memref<25x128x128xbf16, #tpu.memory_space<vmem>>, vector<1x128x128xbf16>
    %190 = vector.shape_cast %189 : vector<1x128x128xbf16> to vector<128x128xbf16>
    %cst_143 = arith.constant dense<0.000000e+00> : vector<78x128xf32>
    %191 = tpu.matmul %188, %190, %cst_143 {dimension_numbers = #tpu.dot_dimension_numbers<[1], [0], [0], [1], [0, 0, 1, 1], [], []>} : vector<78x128xbf16>, vector<128x128xbf16>, vector<78x128xf32> -> vector<78x128xf32>
    %192 = arith.addf %186, %191 : vector<78x128xf32>
    %c21_144 = arith.constant 21 : index
    %c0_145 = arith.constant 0 : index
    %193 = vector.load %arg11[%c21_144, %c0_145] : memref<400x128xf32, #tpu.memory_space<vmem>>, vector<78x128xf32>
    %194 = arith.truncf %193 : vector<78x128xf32> to vector<78x128xbf16>
    %c22 = arith.constant 22 : index
    %c0_146 = arith.constant 0 : index
    %c0_147 = arith.constant 0 : index
    %195 = vector.load %arg3[%c22, %c0_146, %c0_147] : memref<25x128x128xbf16, #tpu.memory_space<vmem>>, vector<1x128x128xbf16>
    %196 = vector.shape_cast %195 : vector<1x128x128xbf16> to vector<128x128xbf16>
    %cst_148 = arith.constant dense<0.000000e+00> : vector<78x128xf32>
    %197 = tpu.matmul %194, %196, %cst_148 {dimension_numbers = #tpu.dot_dimension_numbers<[1], [0], [0], [1], [0, 0, 1, 1], [], []>} : vector<78x128xbf16>, vector<128x128xbf16>, vector<78x128xf32> -> vector<78x128xf32>
    %198 = arith.addf %192, %197 : vector<78x128xf32>
    %c121 = arith.constant 121 : index
    %c0_149 = arith.constant 0 : index
    %199 = vector.load %arg11[%c121, %c0_149] : memref<400x128xf32, #tpu.memory_space<vmem>>, vector<78x128xf32>
    %200 = arith.truncf %199 : vector<78x128xf32> to vector<78x128xbf16>
    %c23 = arith.constant 23 : index
    %c0_150 = arith.constant 0 : index
    %c0_151 = arith.constant 0 : index
    %201 = vector.load %arg3[%c23, %c0_150, %c0_151] : memref<25x128x128xbf16, #tpu.memory_space<vmem>>, vector<1x128x128xbf16>
    %202 = vector.shape_cast %201 : vector<1x128x128xbf16> to vector<128x128xbf16>
    %cst_152 = arith.constant dense<0.000000e+00> : vector<78x128xf32>
    %203 = tpu.matmul %200, %202, %cst_152 {dimension_numbers = #tpu.dot_dimension_numbers<[1], [0], [0], [1], [0, 0, 1, 1], [], []>} : vector<78x128xbf16>, vector<128x128xbf16>, vector<78x128xf32> -> vector<78x128xf32>
    %204 = arith.addf %198, %203 : vector<78x128xf32>
    %c22_153 = arith.constant 22 : index
    %c0_154 = arith.constant 0 : index
    %205 = vector.load %arg11[%c22_153, %c0_154] : memref<400x128xf32, #tpu.memory_space<vmem>>, vector<78x128xf32>
    %206 = arith.truncf %205 : vector<78x128xf32> to vector<78x128xbf16>
    %c24 = arith.constant 24 : index
    %c0_155 = arith.constant 0 : index
    %c0_156 = arith.constant 0 : index
    %207 = vector.load %arg3[%c24, %c0_155, %c0_156] : memref<25x128x128xbf16, #tpu.memory_space<vmem>>, vector<1x128x128xbf16>
    %208 = vector.shape_cast %207 : vector<1x128x128xbf16> to vector<128x128xbf16>
    %cst_157 = arith.constant dense<0.000000e+00> : vector<78x128xf32>
    %209 = tpu.matmul %206, %208, %cst_157 {dimension_numbers = #tpu.dot_dimension_numbers<[1], [0], [0], [1], [0, 0, 1, 1], [], []>} : vector<78x128xbf16>, vector<128x128xbf16>, vector<78x128xf32> -> vector<78x128xf32>
    %210 = arith.addf %204, %209 : vector<78x128xf32>
    %c0_158 = arith.constant 0 : index
    %c0_159 = arith.constant 0 : index
    %211 = vector.load %arg6[%c0_158, %c0_159] : memref<1x128xf32, #tpu.memory_space<vmem>>, vector<1x128xf32>
    %212 = vector.broadcast %211 : vector<1x128xf32> to vector<78x128xf32>
    %213 = arith.addf %210, %212 : vector<78x128xf32>
    %cst_160 = arith.constant 0.000000e+00 : f32
    %214 = vector.broadcast %cst_160 : f32 to vector<78x128xf32>
    %215 = arith.cmpf oge, %213, %214 : vector<78x128xf32>
    %cst_161 = arith.constant 0.00999999977 : f32
    %216 = vector.broadcast %cst_161 : f32 to vector<78x128xf32>
    %217 = arith.mulf %213, %216 : vector<78x128xf32>
    %218 = arith.select %215, %213, %217 : vector<78x128xi1>, vector<78x128xf32>
    %c0_162 = arith.constant 0 : index
    %c0_163 = arith.constant 0 : index
    %219 = vector.load %arg9[%c0_162, %c0_163] : memref<144x78xbf16, #tpu.memory_space<vmem>>, vector<144x78xbf16>
    %220 = arith.truncf %218 : vector<78x128xf32> to vector<78x128xbf16>
    %cst_164 = arith.constant dense<0.000000e+00> : vector<144x128xf32>
    %221 = tpu.matmul %219, %220, %cst_164 {dimension_numbers = #tpu.dot_dimension_numbers<[1], [0], [0], [1], [0, 0, 1, 1], [], []>} : vector<144x78xbf16>, vector<78x128xbf16>, vector<144x128xf32> -> vector<144x128xf32>
    %c0_165 = arith.constant 0 : index
    %c0_166 = arith.constant 0 : index
    %222 = vector.load %arg12[%c0_165, %c0_166] : memref<144x128xf32, #tpu.memory_space<vmem>>, vector<144x128xf32>
    tpu.vector_store %arg12[%c0_165, %c0_166], %221 {strides = array<i32>} : memref<144x128xf32, #tpu.memory_space<vmem>>, vector<144x128xf32>,
    %cst_167 = arith.constant 0.000000e+00 : f32
    %223 = vector.broadcast %cst_167 : f32 to vector<22x128xf32>
    %c0_168 = arith.constant 0 : index
    %c0_169 = arith.constant 0 : index
    %224 = vector.load %arg12[%c0_168, %c0_169] : memref<144x128xf32, #tpu.memory_space<vmem>>, vector<22x128xf32>
    %225 = arith.truncf %224 : vector<22x128xf32> to vector<22x128xbf16>
    %c0_170 = arith.constant 0 : index
    %c0_171 = arith.constant 0 : index
    %c0_172 = arith.constant 0 : index
    %226 = vector.load %arg4[%c0_170, %c0_171, %c0_172] : memref<25x128x128xbf16, #tpu.memory_space<vmem>>, vector<1x128x128xbf16>
    %227 = vector.shape_cast %226 : vector<1x128x128xbf16> to vector<128x128xbf16>
    %cst_173 = arith.constant dense<0.000000e+00> : vector<22x128xf32>
    %228 = tpu.matmul %225, %227, %cst_173 {dimension_numbers = #tpu.dot_dimension_numbers<[1], [0], [0], [1], [0, 0, 1, 1], [], []>} : vector<22x128xbf16>, vector<128x128xbf16>, vector<22x128xf32> -> vector<22x128xf32>
    %229 = arith.addf %223, %228 : vector<22x128xf32>
    %c36 = arith.constant 36 : index
    %c0_174 = arith.constant 0 : index
    %230 = vector.load %arg12[%c36, %c0_174] : memref<144x128xf32, #tpu.memory_space<vmem>>, vector<22x128xf32>
    %231 = arith.truncf %230 : vector<22x128xf32> to vector<22x128xbf16>
    %c1_175 = arith.constant 1 : index
    %c0_176 = arith.constant 0 : index
    %c0_177 = arith.constant 0 : index
    %232 = vector.load %arg4[%c1_175, %c0_176, %c0_177] : memref<25x128x128xbf16, #tpu.memory_space<vmem>>, vector<1x128x128xbf16>
    %233 = vector.shape_cast %232 : vector<1x128x128xbf16> to vector<128x128xbf16>
    %cst_178 = arith.constant dense<0.000000e+00> : vector<22x128xf32>
    %234 = tpu.matmul %231, %233, %cst_178 {dimension_numbers = #tpu.dot_dimension_numbers<[1], [0], [0], [1], [0, 0, 1, 1], [], []>} : vector<22x128xbf16>, vector<128x128xbf16>, vector<22x128xf32> -> vector<22x128xf32>
    %235 = arith.addf %229, %234 : vector<22x128xf32>
    %c1_179 = arith.constant 1 : index
    %c0_180 = arith.constant 0 : index
    %236 = vector.load %arg12[%c1_179, %c0_180] : memref<144x128xf32, #tpu.memory_space<vmem>>, vector<22x128xf32>
    %237 = arith.truncf %236 : vector<22x128xf32> to vector<22x128xbf16>
    %c2_181 = arith.constant 2 : index
    %c0_182 = arith.constant 0 : index
    %c0_183 = arith.constant 0 : index
    %238 = vector.load %arg4[%c2_181, %c0_182, %c0_183] : memref<25x128x128xbf16, #tpu.memory_space<vmem>>, vector<1x128x128xbf16>
    %239 = vector.shape_cast %238 : vector<1x128x128xbf16> to vector<128x128xbf16>
    %cst_184 = arith.constant dense<0.000000e+00> : vector<22x128xf32>
    %240 = tpu.matmul %237, %239, %cst_184 {dimension_numbers = #tpu.dot_dimension_numbers<[1], [0], [0], [1], [0, 0, 1, 1], [], []>} : vector<22x128xbf16>, vector<128x128xbf16>, vector<22x128xf32> -> vector<22x128xf32>
    %241 = arith.addf %235, %240 : vector<22x128xf32>
    %c37 = arith.constant 37 : index
    %c0_185 = arith.constant 0 : index
    %242 = vector.load %arg12[%c37, %c0_185] : memref<144x128xf32, #tpu.memory_space<vmem>>, vector<22x128xf32>
    %243 = arith.truncf %242 : vector<22x128xf32> to vector<22x128xbf16>
    %c3_186 = arith.constant 3 : index
    %c0_187 = arith.constant 0 : index
    %c0_188 = arith.constant 0 : index
    %244 = vector.load %arg4[%c3_186, %c0_187, %c0_188] : memref<25x128x128xbf16, #tpu.memory_space<vmem>>, vector<1x128x128xbf16>
    %245 = vector.shape_cast %244 : vector<1x128x128xbf16> to vector<128x128xbf16>
    %cst_189 = arith.constant dense<0.000000e+00> : vector<22x128xf32>
    %246 = tpu.matmul %243, %245, %cst_189 {dimension_numbers = #tpu.dot_dimension_numbers<[1], [0], [0], [1], [0, 0, 1, 1], [], []>} : vector<22x128xbf16>, vector<128x128xbf16>, vector<22x128xf32> -> vector<22x128xf32>
    %247 = arith.addf %241, %246 : vector<22x128xf32>
    %c2_190 = arith.constant 2 : index
    %c0_191 = arith.constant 0 : index
    %248 = vector.load %arg12[%c2_190, %c0_191] : memref<144x128xf32, #tpu.memory_space<vmem>>, vector<22x128xf32>
    %249 = arith.truncf %248 : vector<22x128xf32> to vector<22x128xbf16>
    %c4_192 = arith.constant 4 : index
    %c0_193 = arith.constant 0 : index
    %c0_194 = arith.constant 0 : index
    %250 = vector.load %arg4[%c4_192, %c0_193, %c0_194] : memref<25x128x128xbf16, #tpu.memory_space<vmem>>, vector<1x128x128xbf16>
    %251 = vector.shape_cast %250 : vector<1x128x128xbf16> to vector<128x128xbf16>
    %cst_195 = arith.constant dense<0.000000e+00> : vector<22x128xf32>
    %252 = tpu.matmul %249, %251, %cst_195 {dimension_numbers = #tpu.dot_dimension_numbers<[1], [0], [0], [1], [0, 0, 1, 1], [], []>} : vector<22x128xbf16>, vector<128x128xbf16>, vector<22x128xf32> -> vector<22x128xf32>
    %253 = arith.addf %247, %252 : vector<22x128xf32>
    %c72 = arith.constant 72 : index
    %c0_196 = arith.constant 0 : index
    %254 = vector.load %arg12[%c72, %c0_196] : memref<144x128xf32, #tpu.memory_space<vmem>>, vector<22x128xf32>
    %255 = arith.truncf %254 : vector<22x128xf32> to vector<22x128xbf16>
    %c5_197 = arith.constant 5 : index
    %c0_198 = arith.constant 0 : index
    %c0_199 = arith.constant 0 : index
    %256 = vector.load %arg4[%c5_197, %c0_198, %c0_199] : memref<25x128x128xbf16, #tpu.memory_space<vmem>>, vector<1x128x128xbf16>
    %257 = vector.shape_cast %256 : vector<1x128x128xbf16> to vector<128x128xbf16>
    %cst_200 = arith.constant dense<0.000000e+00> : vector<22x128xf32>
    %258 = tpu.matmul %255, %257, %cst_200 {dimension_numbers = #tpu.dot_dimension_numbers<[1], [0], [0], [1], [0, 0, 1, 1], [], []>} : vector<22x128xbf16>, vector<128x128xbf16>, vector<22x128xf32> -> vector<22x128xf32>
    %259 = arith.addf %253, %258 : vector<22x128xf32>
    %c108 = arith.constant 108 : index
    %c0_201 = arith.constant 0 : index
    %260 = vector.load %arg12[%c108, %c0_201] : memref<144x128xf32, #tpu.memory_space<vmem>>, vector<22x128xf32>
    %261 = arith.truncf %260 : vector<22x128xf32> to vector<22x128xbf16>
    %c6_202 = arith.constant 6 : index
    %c0_203 = arith.constant 0 : index
    %c0_204 = arith.constant 0 : index
    %262 = vector.load %arg4[%c6_202, %c0_203, %c0_204] : memref<25x128x128xbf16, #tpu.memory_space<vmem>>, vector<1x128x128xbf16>
    %263 = vector.shape_cast %262 : vector<1x128x128xbf16> to vector<128x128xbf16>
    %cst_205 = arith.constant dense<0.000000e+00> : vector<22x128xf32>
    %264 = tpu.matmul %261, %263, %cst_205 {dimension_numbers = #tpu.dot_dimension_numbers<[1], [0], [0], [1], [0, 0, 1, 1], [], []>} : vector<22x128xbf16>, vector<128x128xbf16>, vector<22x128xf32> -> vector<22x128xf32>
    %265 = arith.addf %259, %264 : vector<22x128xf32>
    %c73 = arith.constant 73 : index
    %c0_206 = arith.constant 0 : index
    %266 = vector.load %arg12[%c73, %c0_206] : memref<144x128xf32, #tpu.memory_space<vmem>>, vector<22x128xf32>
    %267 = arith.truncf %266 : vector<22x128xf32> to vector<22x128xbf16>
    %c7_207 = arith.constant 7 : index
    %c0_208 = arith.constant 0 : index
    %c0_209 = arith.constant 0 : index
    %268 = vector.load %arg4[%c7_207, %c0_208, %c0_209] : memref<25x128x128xbf16, #tpu.memory_space<vmem>>, vector<1x128x128xbf16>
    %269 = vector.shape_cast %268 : vector<1x128x128xbf16> to vector<128x128xbf16>
    %cst_210 = arith.constant dense<0.000000e+00> : vector<22x128xf32>
    %270 = tpu.matmul %267, %269, %cst_210 {dimension_numbers = #tpu.dot_dimension_numbers<[1], [0], [0], [1], [0, 0, 1, 1], [], []>} : vector<22x128xbf16>, vector<128x128xbf16>, vector<22x128xf32> -> vector<22x128xf32>
    %271 = arith.addf %265, %270 : vector<22x128xf32>
    %c109 = arith.constant 109 : index
    %c0_211 = arith.constant 0 : index
    %272 = vector.load %arg12[%c109, %c0_211] : memref<144x128xf32, #tpu.memory_space<vmem>>, vector<22x128xf32>
    %273 = arith.truncf %272 : vector<22x128xf32> to vector<22x128xbf16>
    %c8_212 = arith.constant 8 : index
    %c0_213 = arith.constant 0 : index
    %c0_214 = arith.constant 0 : index
    %274 = vector.load %arg4[%c8_212, %c0_213, %c0_214] : memref<25x128x128xbf16, #tpu.memory_space<vmem>>, vector<1x128x128xbf16>
    %275 = vector.shape_cast %274 : vector<1x128x128xbf16> to vector<128x128xbf16>
    %cst_215 = arith.constant dense<0.000000e+00> : vector<22x128xf32>
    %276 = tpu.matmul %273, %275, %cst_215 {dimension_numbers = #tpu.dot_dimension_numbers<[1], [0], [0], [1], [0, 0, 1, 1], [], []>} : vector<22x128xbf16>, vector<128x128xbf16>, vector<22x128xf32> -> vector<22x128xf32>
    %277 = arith.addf %271, %276 : vector<22x128xf32>
    %c74 = arith.constant 74 : index
    %c0_216 = arith.constant 0 : index
    %278 = vector.load %arg12[%c74, %c0_216] : memref<144x128xf32, #tpu.memory_space<vmem>>, vector<22x128xf32>
    %279 = arith.truncf %278 : vector<22x128xf32> to vector<22x128xbf16>
    %c9_217 = arith.constant 9 : index
    %c0_218 = arith.constant 0 : index
    %c0_219 = arith.constant 0 : index
    %280 = vector.load %arg4[%c9_217, %c0_218, %c0_219] : memref<25x128x128xbf16, #tpu.memory_space<vmem>>, vector<1x128x128xbf16>
    %281 = vector.shape_cast %280 : vector<1x128x128xbf16> to vector<128x128xbf16>
    %cst_220 = arith.constant dense<0.000000e+00> : vector<22x128xf32>
    %282 = tpu.matmul %279, %281, %cst_220 {dimension_numbers = #tpu.dot_dimension_numbers<[1], [0], [0], [1], [0, 0, 1, 1], [], []>} : vector<22x128xbf16>, vector<128x128xbf16>, vector<22x128xf32> -> vector<22x128xf32>
    %283 = arith.addf %277, %282 : vector<22x128xf32>
    %c6_221 = arith.constant 6 : index
    %c0_222 = arith.constant 0 : index
    %284 = vector.load %arg12[%c6_221, %c0_222] : memref<144x128xf32, #tpu.memory_space<vmem>>, vector<22x128xf32>
    %285 = arith.truncf %284 : vector<22x128xf32> to vector<22x128xbf16>
    %c10_223 = arith.constant 10 : index
    %c0_224 = arith.constant 0 : index
    %c0_225 = arith.constant 0 : index
    %286 = vector.load %arg4[%c10_223, %c0_224, %c0_225] : memref<25x128x128xbf16, #tpu.memory_space<vmem>>, vector<1x128x128xbf16>
    %287 = vector.shape_cast %286 : vector<1x128x128xbf16> to vector<128x128xbf16>
    %cst_226 = arith.constant dense<0.000000e+00> : vector<22x128xf32>
    %288 = tpu.matmul %285, %287, %cst_226 {dimension_numbers = #tpu.dot_dimension_numbers<[1], [0], [0], [1], [0, 0, 1, 1], [], []>} : vector<22x128xbf16>, vector<128x128xbf16>, vector<22x128xf32> -> vector<22x128xf32>
    %289 = arith.addf %283, %288 : vector<22x128xf32>
    %c42 = arith.constant 42 : index
    %c0_227 = arith.constant 0 : index
    %290 = vector.load %arg12[%c42, %c0_227] : memref<144x128xf32, #tpu.memory_space<vmem>>, vector<22x128xf32>
    %291 = arith.truncf %290 : vector<22x128xf32> to vector<22x128xbf16>
    %c11_228 = arith.constant 11 : index
    %c0_229 = arith.constant 0 : index
    %c0_230 = arith.constant 0 : index
    %292 = vector.load %arg4[%c11_228, %c0_229, %c0_230] : memref<25x128x128xbf16, #tpu.memory_space<vmem>>, vector<1x128x128xbf16>
    %293 = vector.shape_cast %292 : vector<1x128x128xbf16> to vector<128x128xbf16>
    %cst_231 = arith.constant dense<0.000000e+00> : vector<22x128xf32>
    %294 = tpu.matmul %291, %293, %cst_231 {dimension_numbers = #tpu.dot_dimension_numbers<[1], [0], [0], [1], [0, 0, 1, 1], [], []>} : vector<22x128xbf16>, vector<128x128xbf16>, vector<22x128xf32> -> vector<22x128xf32>
    %295 = arith.addf %289, %294 : vector<22x128xf32>
    %c7_232 = arith.constant 7 : index
    %c0_233 = arith.constant 0 : index
    %296 = vector.load %arg12[%c7_232, %c0_233] : memref<144x128xf32, #tpu.memory_space<vmem>>, vector<22x128xf32>
    %297 = arith.truncf %296 : vector<22x128xf32> to vector<22x128xbf16>
    %c12_234 = arith.constant 12 : index
    %c0_235 = arith.constant 0 : index
    %c0_236 = arith.constant 0 : index
    %298 = vector.load %arg4[%c12_234, %c0_235, %c0_236] : memref<25x128x128xbf16, #tpu.memory_space<vmem>>, vector<1x128x128xbf16>
    %299 = vector.shape_cast %298 : vector<1x128x128xbf16> to vector<128x128xbf16>
    %cst_237 = arith.constant dense<0.000000e+00> : vector<22x128xf32>
    %300 = tpu.matmul %297, %299, %cst_237 {dimension_numbers = #tpu.dot_dimension_numbers<[1], [0], [0], [1], [0, 0, 1, 1], [], []>} : vector<22x128xbf16>, vector<128x128xbf16>, vector<22x128xf32> -> vector<22x128xf32>
    %301 = arith.addf %295, %300 : vector<22x128xf32>
    %c43 = arith.constant 43 : index
    %c0_238 = arith.constant 0 : index
    %302 = vector.load %arg12[%c43, %c0_238] : memref<144x128xf32, #tpu.memory_space<vmem>>, vector<22x128xf32>
    %303 = arith.truncf %302 : vector<22x128xf32> to vector<22x128xbf16>
    %c13_239 = arith.constant 13 : index
    %c0_240 = arith.constant 0 : index
    %c0_241 = arith.constant 0 : index
    %304 = vector.load %arg4[%c13_239, %c0_240, %c0_241] : memref<25x128x128xbf16, #tpu.memory_space<vmem>>, vector<1x128x128xbf16>
    %305 = vector.shape_cast %304 : vector<1x128x128xbf16> to vector<128x128xbf16>
    %cst_242 = arith.constant dense<0.000000e+00> : vector<22x128xf32>
    %306 = tpu.matmul %303, %305, %cst_242 {dimension_numbers = #tpu.dot_dimension_numbers<[1], [0], [0], [1], [0, 0, 1, 1], [], []>} : vector<22x128xbf16>, vector<128x128xbf16>, vector<22x128xf32> -> vector<22x128xf32>
    %307 = arith.addf %301, %306 : vector<22x128xf32>
    %c8_243 = arith.constant 8 : index
    %c0_244 = arith.constant 0 : index
    %308 = vector.load %arg12[%c8_243, %c0_244] : memref<144x128xf32, #tpu.memory_space<vmem>>, vector<22x128xf32>
    %309 = arith.truncf %308 : vector<22x128xf32> to vector<22x128xbf16>
    %c14_245 = arith.constant 14 : index
    %c0_246 = arith.constant 0 : index
    %c0_247 = arith.constant 0 : index
    %310 = vector.load %arg4[%c14_245, %c0_246, %c0_247] : memref<25x128x128xbf16, #tpu.memory_space<vmem>>, vector<1x128x128xbf16>
    %311 = vector.shape_cast %310 : vector<1x128x128xbf16> to vector<128x128xbf16>
    %cst_248 = arith.constant dense<0.000000e+00> : vector<22x128xf32>
    %312 = tpu.matmul %309, %311, %cst_248 {dimension_numbers = #tpu.dot_dimension_numbers<[1], [0], [0], [1], [0, 0, 1, 1], [], []>} : vector<22x128xbf16>, vector<128x128xbf16>, vector<22x128xf32> -> vector<22x128xf32>
    %313 = arith.addf %307, %312 : vector<22x128xf32>
    %c78 = arith.constant 78 : index
    %c0_249 = arith.constant 0 : index
    %314 = vector.load %arg12[%c78, %c0_249] : memref<144x128xf32, #tpu.memory_space<vmem>>, vector<22x128xf32>
    %315 = arith.truncf %314 : vector<22x128xf32> to vector<22x128xbf16>
    %c15_250 = arith.constant 15 : index
    %c0_251 = arith.constant 0 : index
    %c0_252 = arith.constant 0 : index
    %316 = vector.load %arg4[%c15_250, %c0_251, %c0_252] : memref<25x128x128xbf16, #tpu.memory_space<vmem>>, vector<1x128x128xbf16>
    %317 = vector.shape_cast %316 : vector<1x128x128xbf16> to vector<128x128xbf16>
    %cst_253 = arith.constant dense<0.000000e+00> : vector<22x128xf32>
    %318 = tpu.matmul %315, %317, %cst_253 {dimension_numbers = #tpu.dot_dimension_numbers<[1], [0], [0], [1], [0, 0, 1, 1], [], []>} : vector<22x128xbf16>, vector<128x128xbf16>, vector<22x128xf32> -> vector<22x128xf32>
    %319 = arith.addf %313, %318 : vector<22x128xf32>
    %c114 = arith.constant 114 : index
    %c0_254 = arith.constant 0 : index
    %320 = vector.load %arg12[%c114, %c0_254] : memref<144x128xf32, #tpu.memory_space<vmem>>, vector<22x128xf32>
    %321 = arith.truncf %320 : vector<22x128xf32> to vector<22x128xbf16>
    %c16_255 = arith.constant 16 : index
    %c0_256 = arith.constant 0 : index
    %c0_257 = arith.constant 0 : index
    %322 = vector.load %arg4[%c16_255, %c0_256, %c0_257] : memref<25x128x128xbf16, #tpu.memory_space<vmem>>, vector<1x128x128xbf16>
    %323 = vector.shape_cast %322 : vector<1x128x128xbf16> to vector<128x128xbf16>
    %cst_258 = arith.constant dense<0.000000e+00> : vector<22x128xf32>
    %324 = tpu.matmul %321, %323, %cst_258 {dimension_numbers = #tpu.dot_dimension_numbers<[1], [0], [0], [1], [0, 0, 1, 1], [], []>} : vector<22x128xbf16>, vector<128x128xbf16>, vector<22x128xf32> -> vector<22x128xf32>
    %325 = arith.addf %319, %324 : vector<22x128xf32>
    %c79 = arith.constant 79 : index
    %c0_259 = arith.constant 0 : index
    %326 = vector.load %arg12[%c79, %c0_259] : memref<144x128xf32, #tpu.memory_space<vmem>>, vector<22x128xf32>
    %327 = arith.truncf %326 : vector<22x128xf32> to vector<22x128xbf16>
    %c17_260 = arith.constant 17 : index
    %c0_261 = arith.constant 0 : index
    %c0_262 = arith.constant 0 : index
    %328 = vector.load %arg4[%c17_260, %c0_261, %c0_262] : memref<25x128x128xbf16, #tpu.memory_space<vmem>>, vector<1x128x128xbf16>
    %329 = vector.shape_cast %328 : vector<1x128x128xbf16> to vector<128x128xbf16>
    %cst_263 = arith.constant dense<0.000000e+00> : vector<22x128xf32>
    %330 = tpu.matmul %327, %329, %cst_263 {dimension_numbers = #tpu.dot_dimension_numbers<[1], [0], [0], [1], [0, 0, 1, 1], [], []>} : vector<22x128xbf16>, vector<128x128xbf16>, vector<22x128xf32> -> vector<22x128xf32>
    %331 = arith.addf %325, %330 : vector<22x128xf32>
    %c115 = arith.constant 115 : index
    %c0_264 = arith.constant 0 : index
    %332 = vector.load %arg12[%c115, %c0_264] : memref<144x128xf32, #tpu.memory_space<vmem>>, vector<22x128xf32>
    %333 = arith.truncf %332 : vector<22x128xf32> to vector<22x128xbf16>
    %c18_265 = arith.constant 18 : index
    %c0_266 = arith.constant 0 : index
    %c0_267 = arith.constant 0 : index
    %334 = vector.load %arg4[%c18_265, %c0_266, %c0_267] : memref<25x128x128xbf16, #tpu.memory_space<vmem>>, vector<1x128x128xbf16>
    %335 = vector.shape_cast %334 : vector<1x128x128xbf16> to vector<128x128xbf16>
    %cst_268 = arith.constant dense<0.000000e+00> : vector<22x128xf32>
    %336 = tpu.matmul %333, %335, %cst_268 {dimension_numbers = #tpu.dot_dimension_numbers<[1], [0], [0], [1], [0, 0, 1, 1], [], []>} : vector<22x128xbf16>, vector<128x128xbf16>, vector<22x128xf32> -> vector<22x128xf32>
    %337 = arith.addf %331, %336 : vector<22x128xf32>
    %c80 = arith.constant 80 : index
    %c0_269 = arith.constant 0 : index
    %338 = vector.load %arg12[%c80, %c0_269] : memref<144x128xf32, #tpu.memory_space<vmem>>, vector<22x128xf32>
    %339 = arith.truncf %338 : vector<22x128xf32> to vector<22x128xbf16>
    %c19_270 = arith.constant 19 : index
    %c0_271 = arith.constant 0 : index
    %c0_272 = arith.constant 0 : index
    %340 = vector.load %arg4[%c19_270, %c0_271, %c0_272] : memref<25x128x128xbf16, #tpu.memory_space<vmem>>, vector<1x128x128xbf16>
    %341 = vector.shape_cast %340 : vector<1x128x128xbf16> to vector<128x128xbf16>
    %cst_273 = arith.constant dense<0.000000e+00> : vector<22x128xf32>
    %342 = tpu.matmul %339, %341, %cst_273 {dimension_numbers = #tpu.dot_dimension_numbers<[1], [0], [0], [1], [0, 0, 1, 1], [], []>} : vector<22x128xbf16>, vector<128x128xbf16>, vector<22x128xf32> -> vector<22x128xf32>
    %343 = arith.addf %337, %342 : vector<22x128xf32>
    %c12_274 = arith.constant 12 : index
    %c0_275 = arith.constant 0 : index
    %344 = vector.load %arg12[%c12_274, %c0_275] : memref<144x128xf32, #tpu.memory_space<vmem>>, vector<22x128xf32>
    %345 = arith.truncf %344 : vector<22x128xf32> to vector<22x128xbf16>
    %c20_276 = arith.constant 20 : index
    %c0_277 = arith.constant 0 : index
    %c0_278 = arith.constant 0 : index
    %346 = vector.load %arg4[%c20_276, %c0_277, %c0_278] : memref<25x128x128xbf16, #tpu.memory_space<vmem>>, vector<1x128x128xbf16>
    %347 = vector.shape_cast %346 : vector<1x128x128xbf16> to vector<128x128xbf16>
    %cst_279 = arith.constant dense<0.000000e+00> : vector<22x128xf32>
    %348 = tpu.matmul %345, %347, %cst_279 {dimension_numbers = #tpu.dot_dimension_numbers<[1], [0], [0], [1], [0, 0, 1, 1], [], []>} : vector<22x128xbf16>, vector<128x128xbf16>, vector<22x128xf32> -> vector<22x128xf32>
    %349 = arith.addf %343, %348 : vector<22x128xf32>
    %c48 = arith.constant 48 : index
    %c0_280 = arith.constant 0 : index
    %350 = vector.load %arg12[%c48, %c0_280] : memref<144x128xf32, #tpu.memory_space<vmem>>, vector<22x128xf32>
    %351 = arith.truncf %350 : vector<22x128xf32> to vector<22x128xbf16>
    %c21_281 = arith.constant 21 : index
    %c0_282 = arith.constant 0 : index
    %c0_283 = arith.constant 0 : index
    %352 = vector.load %arg4[%c21_281, %c0_282, %c0_283] : memref<25x128x128xbf16, #tpu.memory_space<vmem>>, vector<1x128x128xbf16>
    %353 = vector.shape_cast %352 : vector<1x128x128xbf16> to vector<128x128xbf16>
    %cst_284 = arith.constant dense<0.000000e+00> : vector<22x128xf32>
    %354 = tpu.matmul %351, %353, %cst_284 {dimension_numbers = #tpu.dot_dimension_numbers<[1], [0], [0], [1], [0, 0, 1, 1], [], []>} : vector<22x128xbf16>, vector<128x128xbf16>, vector<22x128xf32> -> vector<22x128xf32>
    %355 = arith.addf %349, %354 : vector<22x128xf32>
    %c13_285 = arith.constant 13 : index
    %c0_286 = arith.constant 0 : index
    %356 = vector.load %arg12[%c13_285, %c0_286] : memref<144x128xf32, #tpu.memory_space<vmem>>, vector<22x128xf32>
    %357 = arith.truncf %356 : vector<22x128xf32> to vector<22x128xbf16>
    %c22_287 = arith.constant 22 : index
    %c0_288 = arith.constant 0 : index
    %c0_289 = arith.constant 0 : index
    %358 = vector.load %arg4[%c22_287, %c0_288, %c0_289] : memref<25x128x128xbf16, #tpu.memory_space<vmem>>, vector<1x128x128xbf16>
    %359 = vector.shape_cast %358 : vector<1x128x128xbf16> to vector<128x128xbf16>
    %cst_290 = arith.constant dense<0.000000e+00> : vector<22x128xf32>
    %360 = tpu.matmul %357, %359, %cst_290 {dimension_numbers = #tpu.dot_dimension_numbers<[1], [0], [0], [1], [0, 0, 1, 1], [], []>} : vector<22x128xbf16>, vector<128x128xbf16>, vector<22x128xf32> -> vector<22x128xf32>
    %361 = arith.addf %355, %360 : vector<22x128xf32>
    %c49 = arith.constant 49 : index
    %c0_291 = arith.constant 0 : index
    %362 = vector.load %arg12[%c49, %c0_291] : memref<144x128xf32, #tpu.memory_space<vmem>>, vector<22x128xf32>
    %363 = arith.truncf %362 : vector<22x128xf32> to vector<22x128xbf16>
    %c23_292 = arith.constant 23 : index
    %c0_293 = arith.constant 0 : index
    %c0_294 = arith.constant 0 : index
    %364 = vector.load %arg4[%c23_292, %c0_293, %c0_294] : memref<25x128x128xbf16, #tpu.memory_space<vmem>>, vector<1x128x128xbf16>
    %365 = vector.shape_cast %364 : vector<1x128x128xbf16> to vector<128x128xbf16>
    %cst_295 = arith.constant dense<0.000000e+00> : vector<22x128xf32>
    %366 = tpu.matmul %363, %365, %cst_295 {dimension_numbers = #tpu.dot_dimension_numbers<[1], [0], [0], [1], [0, 0, 1, 1], [], []>} : vector<22x128xbf16>, vector<128x128xbf16>, vector<22x128xf32> -> vector<22x128xf32>
    %367 = arith.addf %361, %366 : vector<22x128xf32>
    %c14_296 = arith.constant 14 : index
    %c0_297 = arith.constant 0 : index
    %368 = vector.load %arg12[%c14_296, %c0_297] : memref<144x128xf32, #tpu.memory_space<vmem>>, vector<22x128xf32>
    %369 = arith.truncf %368 : vector<22x128xf32> to vector<22x128xbf16>
    %c24_298 = arith.constant 24 : index
    %c0_299 = arith.constant 0 : index
    %c0_300 = arith.constant 0 : index
    %370 = vector.load %arg4[%c24_298, %c0_299, %c0_300] : memref<25x128x128xbf16, #tpu.memory_space<vmem>>, vector<1x128x128xbf16>
    %371 = vector.shape_cast %370 : vector<1x128x128xbf16> to vector<128x128xbf16>
    %cst_301 = arith.constant dense<0.000000e+00> : vector<22x128xf32>
    %372 = tpu.matmul %369, %371, %cst_301 {dimension_numbers = #tpu.dot_dimension_numbers<[1], [0], [0], [1], [0, 0, 1, 1], [], []>} : vector<22x128xbf16>, vector<128x128xbf16>, vector<22x128xf32> -> vector<22x128xf32>
    %373 = arith.addf %367, %372 : vector<22x128xf32>
    %c0_302 = arith.constant 0 : index
    %c0_303 = arith.constant 0 : index
    %374 = vector.load %arg7[%c0_302, %c0_303] : memref<1x128xf32, #tpu.memory_space<vmem>>, vector<1x128xf32>
    %375 = vector.broadcast %374 : vector<1x128xf32> to vector<22x128xf32>
    %376 = arith.addf %373, %375 : vector<22x128xf32>
    %377 = vector.extract_strided_slice %376 {offsets = [0, 0], sizes = [4, 128], strides = [1, 1]} : vector<22x128xf32> to vector<4x128xf32>
    %378 = vector.extract_strided_slice %376 {offsets = [6, 0], sizes = [4, 128], strides = [1, 1]} : vector<22x128xf32> to vector<4x128xf32>
    %379 = vector.extract_strided_slice %376 {offsets = [12, 0], sizes = [4, 128], strides = [1, 1]} : vector<22x128xf32> to vector<4x128xf32>
    %380 = vector.extract_strided_slice %376 {offsets = [18, 0], sizes = [4, 128], strides = [1, 1]} : vector<22x128xf32> to vector<4x128xf32>
    %381 = tpu.concatenate %377, %378, %379, %380 in 0 : vector<4x128xf32>, vector<4x128xf32>, vector<4x128xf32>, vector<4x128xf32> -> vector<16x128xf32>
    %c0_304 = arith.constant 0 : index
    %c0_305 = arith.constant 0 : index
    %c0_306 = arith.constant 0 : index
    %382 = vector.load %arg10[%c0_304, %c0_305, %c0_306] : memref<1x16x128xf32, #tpu.memory_space<vmem>>, vector<1x16x128xf32>
    %383 = vector.shape_cast %382 : vector<1x16x128xf32> to vector<16x128xf32>
    %384 = vector.shape_cast %381 : vector<16x128xf32> to vector<1x16x128xf32>
    tpu.vector_store %arg10[%c0_304, %c0_305, %c0_306], %384 {strides = array<i32>} : memref<1x16x128xf32, #tpu.memory_space<vmem>>, vector<1x16x128xf32>,
    return
  }
  func.func @transform_0(%arg0: i32) -> (i32, i32, i32) {
    %c0_i32 = arith.constant 0 : i32
    %c0_i32_0 = arith.constant 0 : i32
    %c0_i32_1 = arith.constant 0 : i32
    return %arg0, %c0_i32, %c0_i32_0 : i32, i32, i32
  }
  func.func @transform_1(%arg0: i32) -> (i32, i32, i32) {
    %c0_i32 = arith.constant 0 : i32
    %c0_i32_0 = arith.constant 0 : i32
    %c0_i32_1 = arith.constant 0 : i32
    %c0_i32_2 = arith.constant 0 : i32
    return %c0_i32, %c0_i32_0, %c0_i32_1 : i32, i32, i32
  }
  func.func @transform_2(%arg0: i32) -> (i32, i32, i32) {
    %c0_i32 = arith.constant 0 : i32
    %c0_i32_0 = arith.constant 0 : i32
    %c0_i32_1 = arith.constant 0 : i32
    %c0_i32_2 = arith.constant 0 : i32
    return %c0_i32, %c0_i32_0, %c0_i32_1 : i32, i32, i32
  }
  func.func @transform_3(%arg0: i32) -> (i32, i32, i32) {
    %c0_i32 = arith.constant 0 : i32
    %c0_i32_0 = arith.constant 0 : i32
    %c0_i32_1 = arith.constant 0 : i32
    %c0_i32_2 = arith.constant 0 : i32
    return %c0_i32, %c0_i32_0, %c0_i32_1 : i32, i32, i32
  }
  func.func @transform_4(%arg0: i32) -> (i32, i32) {
    %c0_i32 = arith.constant 0 : i32
    %c0_i32_0 = arith.constant 0 : i32
    %c0_i32_1 = arith.constant 0 : i32
    return %c0_i32, %c0_i32_0 : i32, i32
  }
  func.func @transform_5(%arg0: i32) -> (i32, i32) {
    %c0_i32 = arith.constant 0 : i32
    %c0_i32_0 = arith.constant 0 : i32
    %c0_i32_1 = arith.constant 0 : i32
    return %c0_i32, %c0_i32_0 : i32, i32
  }
  func.func @transform_6(%arg0: i32) -> (i32, i32) {
    %c0_i32 = arith.constant 0 : i32
    %c0_i32_0 = arith.constant 0 : i32
    %c0_i32_1 = arith.constant 0 : i32
    return %c0_i32, %c0_i32_0 : i32, i32
  }
  func.func @transform_7(%arg0: i32) -> (i32, i32) {
    %c0_i32 = arith.constant 0 : i32
    %c0_i32_0 = arith.constant 0 : i32
    %c0_i32_1 = arith.constant 0 : i32
    return %c0_i32, %c0_i32_0 : i32, i32
  }
  func.func @transform_8(%arg0: i32) -> (i32, i32) {
    %c0_i32 = arith.constant 0 : i32
    %c0_i32_0 = arith.constant 0 : i32
    %c0_i32_1 = arith.constant 0 : i32
    return %c0_i32, %c0_i32_0 : i32, i32
  }
  func.func @transform_9(%arg0: i32) -> (i32, i32, i32) {
    %c0_i32 = arith.constant 0 : i32
    %c0_i32_0 = arith.constant 0 : i32
    %c0_i32_1 = arith.constant 0 : i32
    return %arg0, %c0_i32, %c0_i32_0 : i32, i32, i32
  }
}

</mosaic_0001>

<bundles_post_ra>
// kernel: hyper_encoder_forward.1
= control target key start
LH: loop header
LB: loop body
LE: loop exit
PB: predicated region body
PF: predicated region fallthrough
CT: control target
= control target key end

     0   :  { %s17623_s30 = smov 0   ;;  %s21372_s0 = inlined_call_operand.vmem [shape: bf16[2,324,128], index: 0, kind: input, shape index: {}]   ;;  %s21373_s1 = inlined_call_operand.vmem [shape: bf16[9,128,128], index: 1, kind: input, shape index: {}]   ;;  %s21374_s2 = inlined_call_operand.vmem [shape: bf16[25,128,128], index: 2, kind: input, shape index: {}]   ;;  %s21375_s3 = inlined_call_operand.vmem [shape: bf16[25,128,128], index: 3, kind: input, shape index: {}]   ;;  %s21376_s4 = inlined_call_operand.vmem [shape: f32[1,128], index: 4, kind: input, shape index: {}]   ;;  %s21377_s5 = inlined_call_operand.vmem [shape: f32[1,128], index: 5, kind: input, shape index: {}]   ;;  %s21378_s6 = inlined_call_operand.vmem [shape: f32[1,128], index: 6, kind: input, shape index: {}]   ;;  %s21379_s7 = inlined_call_operand.vmem [shape: bf16[400,286], index: 7, kind: input, shape index: {}]   ;;  %s21380_s8 = inlined_call_operand.vmem [shape: bf16[144,78], index: 8, kind: input, shape index: {}]   ;;  %s21381_s9 = inlined_call_operand.vmem [shape: f32[2,16,128], index: 9, kind: output, shape index: {}]  }
   0x1 LB: > { %s12131_s10 = sadd.s32 4294967295, %s17568_s30   ;;  %p12135_p0 = scmp.ge.s32.totalorder %s17568_s30, 1  ;;  %s17568_s30 = sphi %s17623_s30, %s19_s30  }
   0x2   : > { %p287_p1 = scmp.lt.s32.totalorder %s17568_s30, 3 }
   0x4   : > { %p288_p2 = pnand %p12135_p0, %p287_p1 }
   0x6   : > { %291 = sbr.rel (%p288_p2) target bundleno = 3064 (0xbf8), region = 56 }
   0xd   : > { %v16921_v0 = vld [vmem:[%s21373_s1 + $0x40] sm:$0xff]   ;;  %p323_p3 = scmp.lt.s32.totalorder %s12131_s10, 1  ;;  %v16922_v1 = vld [vmem:[%s21373_s1 + $0x48] sm:$0xff]   ;;  %v16923_v2 = vld [vmem:[%s21373_s1 + $0x50] sm:$0xff]   ;;  %vm498_vm0 = vsmask.f32 7424 }
   0xe   : > { %14503 = vmatprep.subr.bf16.mxu0 %v16921_v0  ;;  %v16924_v3 = vld [vmem:[%s21373_s1 + $0x58] sm:$0xff]   ;;  %v16925_v9 = vld [vmem:[%s21373_s1 + $0x60] sm:$0xff]   ;;  %v16926_v13 = vld [vmem:[%s21373_s1 + $0x68] sm:$0xff]   ;;  %vm1145_vm1 = vcmask 1046528   ;;  %vm1767_vm2 = vsmask.f32 6400 }
   0xf   : > { %s21425_s10 = smov (!%p323_p3, %s12131_s10), 1  ;;  %14504 = vmatpush3.bf16.msra.mxu0 %v16921_v0  ;;  %v16927_v16 = vld [vmem:[%s21373_s1 + $0x70] sm:$0xff]   ;;  %v16928_v20 = vld [vmem:[%s21373_s1 + $0x78] sm:$0xff]   ;;  %v16932_v25 = vld [vmem:[%s21373_s1] sm:$0xff]   ;;  %vm2145_vm3 = vcmask 1045504   ;;  %vm3151_vm5 = vcmask 1044480  }
  0x10   : > { %14505 = vmatprep.subr.bf16.mxu0 %v16922_v1  ;;  %s16909_s17 = smul.u32 164, %s21425_s10  ;;  %v16935_v36 = vld [vmem:[%s21373_s1 + $0x8] sm:$0xff]   ;;  %v16938_v44 = vld [vmem:[%s21373_s1 + $0x10] sm:$0xff]   ;;  %v16942_v63 = vld [vmem:[%s21373_s1 + $0x18] sm:$0xff]   ;;  %vm2769_vm4 = vsmask.f32 5376 }
  0x12   : > { %s17646_s20 = scalar_lea.vmem %s21372_s0, %s16909_s17 }
  0x13   : > { %14506 = vmatpush3.bf16.msra.mxu0 %v16922_v1  ;;  %v17652_v4 = vld [vmem:[%s17646_s20] sm:$0xff]   ;;  %v17655_v5 = vld [vmem:[%s17646_s20 + $0x8] sm:$0xff]   ;;  %v17670_v15 = vld [vmem:[%s17646_s20 + $0x10] sm:$0xff]  }
  0x14   : > { %14507 = vmatprep.subr.bf16.mxu0 %v16923_v2  ;;  %v500_v6 = vshrl.u32 %v17652_v4, 16  ;;  %v502_v7 = vshll.u32 %v17652_v4, 16  ;;  %v21382_v8 = vshll.u32 %v17655_v5, 16  ;;  %v17676_v17 = vld [vmem:[%s17646_s20 + $0x18] sm:$0xff]   ;;  %v17679_v18 = vshll.u32 %v17670_v15, 16  ;;  %v17692_v23 = vld [vmem:[%s17646_s20 + $0x20] sm:$0xff]  }
  0x15   : > { %v511_v19 = vshrl.u32 %v17655_v5, 16  ;;  %v17686_v21 = vshrl.u32 %v17670_v15, 16  ;;  %v17689_v22 = vshll.u32 %v17676_v17, 16  ;;  %v17701_v27 = vld [vmem:[%s17646_s20 + $0x28] sm:$0xff]   ;;  %v17706_v30 = vld [vmem:[%s17646_s20 + $0x30] sm:$0xff]   ;;  %v17709_v31 = vshll.u32 %v17692_v23, 16 }
  0x16   : > { %v504_v10 = vrot.slane %v502_v7, 1  ;;  %v509_v11 = vrot.slane %v21382_v8, 1  ;;  %v517_v24 = vrot.slane %v17679_v18, 1  ;;  %v17712_v32 = vld [vmem:[%s17646_s20 + $0x38] sm:$0xff]   ;;  %v17715_v33 = vld [vmem:[%s17646_s20 + $0x40] sm:$0xff]   ;;  %v17719_v35 = vshrl.u32 %v17676_v17, 16 }
  0x17   : > { %14508 = vmatpush3.bf16.msra.mxu0 %v16923_v2  ;;  %v525_v29 = vrot.slane %v17689_v22, 1  ;;  %v17725_v37 = vshrl.u32 %v17692_v23, 16  ;;  %v17728_v38 = vld [vmem:[%s17646_s20 + $0x48] sm:$0xff]   ;;  %v17732_v40 = vshll.u32 %v17701_v27, 16  ;;  %v17735_v41 = vshll.u32 %v17706_v30, 16  ;;  %v17748_v46 = vld [vmem:[%s17646_s20 + $0x50] sm:$0xff]  }
  0x18   : > { %14509 = vmatprep.subr.bf16.mxu0 %v16924_v3  ;;  %v505_v12 = vor.u32 %v504_v10, %v500_v6  ;;  %v513_v26 = vor.u32 %v511_v19, %v509_v11  ;;  %v521_v28 = vor.u32 %v17686_v21, %v517_v24  ;;  %v533_v42 = vrot.slane %v17709_v31, 1  ;;  %v17764_v54 = vld [vmem:[%s17646_s20 + $0x58] sm:$0xff]   ;;  %v17770_v56 = vld [vmem:[%s17646_s20 + $0x60] sm:$0xff]  }
  0x19   : > { %v17739_v43 = vshll.u32 %v17712_v32, 16  ;;  %v17745_v45 = vshll.u32 %v17715_v33, 16  ;;  %v529_v47 = vor.u32 %v17719_v35, %v525_v29  ;;  %v17752_v48 = vshrl.u32 %v17701_v27, 16 }
  0x1a   : > { %v510_v14 = vsel %vm498_vm0, %v505_v12, %v509_v11  ;;  %v518_v34 = vsel %vm498_vm0, %v513_v26, %v517_v24  ;;  %v526_v39 = vsel %vm498_vm0, %v521_v28, %v525_v29  ;;  %v17755_v49 = vshll.u32 %v17728_v38, 16  ;;  %v16946_v12 = vld [vmem:[%s21373_s1 + $0x20] sm:$0xff]   ;;  %v17816_v24 = vld [vmem:[%s17646_s20 + $0x70] sm:$0xff]   ;;  %v16949_v26 = vld [vmem:[%s21373_s1 + $0x28] sm:$0xff]  }
  0x1b   : > { %14510 = vmatpush3.bf16.msra.mxu0 %v16924_v3  ;;  %14519 = vmatprep.mubr.bf16.mxu0 %v510_v14  ;;  %v537_v50 = vor.u32 %v17725_v37, %v533_v42  ;;  %v541_v51 = vrot.slane %v17732_v40, 1  ;;  %v549_v52 = vrot.slane %v17735_v41, 1  ;;  %v17761_v53 = vshrl.u32 %v17706_v30, 16 }
  0x1c   : > { %14511 = vmatprep.subr.bf16.mxu0 %v16925_v9  ;;  %v17767_v55 = vshrl.u32 %v17712_v32, 16  ;;  %v557_v57 = vrot.slane %v17739_v43, 1  ;;  %v565_v58 = vrot.slane %v17745_v45, 1  ;;  %v17775_v59 = vshrl.u32 %v17715_v33, 16 }
  0x1d   : > { %v17778_v60 = vshll.u32 %v17748_v46, 16  ;;  %v534_v61 = vsel %vm498_vm0, %v529_v47, %v533_v42  ;;  %v573_v62 = vrot.slane %v17755_v49, 1  ;;  %v542_v0 = vsel %vm498_vm0, %v537_v50, %v541_v51  ;;  %v16954_v50 = vld [vmem:[%s21373_s1 + $0x38] sm:$0xff]  }
  0x1e   : > { %v17787_v1 = vshrl.u32 %v17728_v38, 16  ;;  %v17790_v2 = vshll.u32 %v17764_v54, 16  ;;  %v17793_v3 = vshrl.u32 %v17748_v46, 16  ;;  %v17796_v6 = vshll.u32 %v17770_v56, 16 }
  0x1f   : > { %14512 = vmatpush3.bf16.msra.mxu0 %v16925_v9  ;;  %21396 = vst [vmem:[#allocation4_spill] sm:$0xff] %v17778_v60  ;;  %v581_v7 = vrot.slane %v17778_v60, 1  ;;  %v17800_v9 = vld [vmem:[%s17646_s20 + $0x68] sm:$0xff]   ;;  %v545_v10 = vor.u32 %v17752_v48, %v541_v51  ;;  %v17804_v11 = vshrl.u32 %v17764_v54, 16  ;;  %v17832_v42 = vshll.u32 %v17816_v24, 16 }
  0x20   : > { %14513 = vmatprep.subr.bf16.mxu0 %v16926_v13  ;;  %21397 = vst [vmem:[#allocation5_spill] sm:$0xff] %v17793_v3  ;;  %v589_v14 = vrot.slane %v17790_v2, 1  ;;  %v569_v47 = vor.u32 %v17775_v59, %v565_v58 }
  0x21   : > { %v550_v28 = vsel %vm498_vm0, %v545_v10, %v549_v52  ;;  %v17853_v10 = vld [vmem:[%s17646_s20 + $0x78] sm:$0xff]  }
  0x23   : > { %14514 = vmatpush3.bf16.msra.mxu0 %v16926_v13  ;;  %v553_v13 = vor.u32 %v17761_v53, %v549_v52  ;;  %v574_v52 = vsel %vm498_vm0, %v569_v47, %v573_v62 }
  0x24   : > { %14515 = vmatprep.subr.bf16.mxu0 %v16927_v16 }
  0x25   : > { %v558_v29 = vsel %vm498_vm0, %v553_v13, %v557_v57 }
  0x27   : > { %14516 = vmatpush3.bf16.msra.mxu0 %v16927_v16  ;;  %v17812_v16 = vshrl.u32 %v17770_v56, 16 }
  0x28   : > { %14517 = vmatprep.subr.bf16.mxu0 %v16928_v20 }
  0x2b   : > { %14518 = vmatpush3.bf16.msra.mxu0 %v16928_v20  ;;  %v597_v20 = vrot.slane %v17796_v6, 1 }
  0x2c   : > { %14555 = vmatprep.subr.bf16.mxu0 %v16932_v25 }
  0x2e   : > { %14520 = vmatmul.mubr.bf16.vlgmr.msra.gmra.mrb[0].mxu0 %v518_v34 }
  0x2f   : > { %14556 = vmatpush3.bf16.msra.mxu0 %v16932_v25  ;;  %14523 = vmatprep.mubr.bf16.mxu0 %v526_v39  ;;  %v17819_v25 = vshll.u32 %v17800_v9, 16  ;;  %v561_v39 = vor.u32 %v17767_v55, %v557_v57  ;;  %v17844_v57 = vshrl.u32 %v17816_v24, 16 }
  0x30   : > { %14557 = vmatprep.subr.bf16.mxu0 %v16935_v36 }
  0x31   : > { %v605_v34 = vrot.slane %v17819_v25, 1  ;;  %v566_v51 = vsel %vm498_vm0, %v561_v39, %v565_v58  ;;  %v585_v58 = vor.u32 %v17793_v3, %v581_v7 }
  0x33   : > { %14558 = vmatpush3.bf16.msra.mxu0 %v16935_v36  ;;  %v17828_v36 = vshrl.u32 %v17800_v9, 16 }
  0x34   : > { %14559 = vmatprep.subr.bf16.mxu0 %v16938_v44 }
  0x36   : > { %14524 = vmatmul.mubr.bf16.gmra.mrb[4].mxu0 %v534_v61  ;;  %v16955_v61 = vld [vmem:[%s21373_s1 + $0x80] sm:$0xff]  }
  0x37   : > { %14527 = vmatprep.mubr.bf16.mxu0 %v542_v0  ;;  %14560 = vmatpush3.bf16.msra.mxu0 %v16938_v44  ;;  %v16952_v44 = vld [vmem:[%s21373_s1 + $0x30] sm:$0xff]   ;;  %v613_v0 = vrot.slane %v17832_v42, 1 }
  0x38   : > { %14561 = vmatprep.subr.bf16.mxu0 %v16942_v63 }
  0x3b   : > { %14562 = vmatpush3.bf16.msra.mxu0 %v16942_v63  ;;  %v577_v63 = vor.u32 %v17787_v1, %v573_v62  ;;  %v17861_v62 = vshll.u32 %v17853_v10, 16 }
  0x3c   : > { %14563 = vmatprep.subr.bf16.mxu0 %v16946_v12 }
  0x3d   : > { %v582_v13 = vsel %vm498_vm0, %v577_v63, %v581_v7  ;;  %v17872_v7 = vld [vmem:[%s17646_s20 + $0x88] sm:$0xff]  }
  0x3e   : > { %14528 = vmatmul.mubr.bf16.gmra.mrb[8].mxu0 %v550_v28  ;;  %v17864_v28 = vshrl.u32 %v17853_v10, 16  ;;  %v17882_v63 = vshll.u32 %v17872_v7, 16  ;;  %v17894_v8 = vshrl.u32 %v17872_v7, 16 }
  0x3f   : > { %14531 = vmatprep.mubr.bf16.mxu0 %v558_v29  ;;  %14564 = vmatpush3.bf16.msra.mxu0 %v16946_v12  ;;  %v17856_v12 = vld [vmem:[%s17646_s20 + $0x80] sm:$0xff]   ;;  %v593_v29 = vor.u32 %v17804_v11, %v589_v14 }
  0x40   : > { %14565 = vmatprep.subr.bf16.mxu0 %v16949_v26  ;;  %v17868_v39 = vshll.u32 %v17856_v12, 16 }
  0x41   : > { %v598_v47 = vsel %vm498_vm0, %v593_v29, %v597_v20 }
  0x43   : > { %14566 = vmatpush3.bf16.msra.mxu0 %v16949_v26  ;;  %v590_v26 = vsel %vm498_vm0, %v585_v58, %v589_v14  ;;  %v621_v14 = vrot.slane %v17861_v62, 1  ;;  %v617_v58 = vor.u32 %v17844_v57, %v613_v0 }
  0x44   : > { %14567 = vmatprep.subr.bf16.mxu0 %v16952_v44 }
  0x45   : > { %v625_v29 = vor.u32 %v17864_v28, %v621_v14 }
  0x46   : > { %14532 = vmatmul.mubr.bf16.gmra.mrb[12].mxu0 %v566_v51  ;;  %v17877_v51 = vshrl.u32 %v17856_v12, 16 }
  0x47   : > { %14535 = vmatprep.mubr.bf16.mxu0 %v574_v52  ;;  %14568 = vmatpush3.bf16.msra.mxu0 %v16952_v44  ;;  %v601_v44 = vor.u32 %v17812_v16, %v597_v20  ;;  %v609_v52 = vor.u32 %v17828_v36, %v605_v34  ;;  %v622_v20 = vsel %vm498_vm0, %v617_v58, %v621_v14  ;;  %v16957_v14 = vld [vmem:[%s21373_s1 + $0x90] sm:$0xff]   ;;  %v16958_v58 = vld [vmem:[%s21373_s1 + $0x98] sm:$0xff]  }
  0x48   : > { %14569 = vmatprep.subr.bf16.mxu0 %v16954_v50 }
  0x4b   : > { %14570 = vmatpush3.bf16.msra.mxu0 %v16954_v50  ;;  %v606_v50 = vsel %vm498_vm0, %v601_v44, %v605_v34  ;;  %v637_v34 = vrot.slane %v17882_v63, 1 }
  0x4c   : > { %14607 = vmatprep.subr.bf16.mxu0 %v16955_v61 }
  0x4e   : > { %14536 = vmatmul.mubr.bf16.gmra.mrb[16].mxu0 %v582_v13  ;;  %v614_v13 = vsel %vm498_vm0, %v609_v52, %v613_v0  ;;  %v641_v0 = vor.u32 %v17894_v8, %v637_v34  ;;  %v16956_v52 = vld [vmem:[%s21373_s1 + $0x88] sm:$0xff]  }
  0x4f   : > { %14539 = vmatprep.mubr.bf16.mxu0 %v590_v26  ;;  %v629_v26 = vrot.slane %v17868_v39, 1 }
  0x51   : > { %v633_v44 = vor.u32 %v17877_v51, %v629_v26 }
  0x56   : > { %14540 = vmatmul.mubr.bf16.gmra.mrb[20].mxu0 %v598_v47  ;;  %v630_v47 = vsel %vm498_vm0, %v625_v29, %v629_v26  ;;  %v16965_v29 = vld [vmem:[%s21373_s1 + $0xd0] sm:$0xff]  }
  0x57   : > { %14543 = vmatprep.mubr.bf16.mxu0 %v606_v50  ;;  %v638_v50 = vsel %vm498_vm0, %v633_v44, %v637_v34  ;;  %v16966_v44 = vld [vmem:[%s21373_s1 + $0xd8] sm:$0xff]  }
  0x5e   : > { %14544 = vmatmul.mubr.bf16.gmra.mrb[24].mxu0 %v614_v13 }
  0x5f   : > { %14547 = vmatprep.mubr.bf16.mxu0 %v622_v20  ;;  %v17529_v20 = vld [vmem:[%s17646_s20 + $0x28] sm:$0xff]  }
  0x60   : > { %v1155_v26 = vrot.slane %v17529_v20, 1 }
  0x66   : > { %14548 = vmatmul.mubr.bf16.gmra.mrb[28].mxu0 %v630_v47 }
  0x67   : > { %14551 = vmatprep.mubr.bf16.mxu0 %v638_v50  ;;  %v17530_v50 = vld [vmem:[%s17646_s20 + $0x30] sm:$0xff]  }
  0x6e   : > { %14552 = vmatmul.mubr.bf16.gmra.mrb[32].mxu0 %v641_v0  ;;  %v1157_v0 = vrot.slane %v17530_v50, 1 }
  0x6f   : > { %14571 = vmatprep.mubr.bf16.mxu0 %v17652_v4  ;;  %v16959_v4 = vld [vmem:[%s21373_s1 + $0xa0] sm:$0xff]  }
  0x76   : > { %14572 = vmatmul.mubr.bf16.vlgmr.msra.gmra.mrb[0].mxu0 %v17655_v5 }
  0x77   : > { %14608 = vmatpush3.bf16.msra.mxu0 %v16955_v61  ;;  %14575 = vmatprep.mubr.bf16.mxu0 %v17670_v15  ;;  %v16960_v15 = vld [vmem:[%s21373_s1 + $0xa8] sm:$0xff]  }
  0x78   : > { %14609 = vmatprep.subr.bf16.mxu0 %v16956_v52 }
  0x7b   : > { %14610 = vmatpush3.bf16.msra.mxu0 %v16956_v52  ;;  %v17531_v52 = vld [vmem:[%s17646_s20 + $0x38] sm:$0xff]  }
  0x7c   : > { %14611 = vmatprep.subr.bf16.mxu0 %v16957_v14 }
  0x7e   : > { %14576 = vmatmul.mubr.bf16.gmra.mrb[4].mxu0 %v17676_v17  ;;  %v16961_v17 = vld [vmem:[%s21373_s1 + $0xb0] sm:$0xff]  }
  0x7f   : > { %14579 = vmatprep.mubr.bf16.mxu0 %v17692_v23  ;;  %14612 = vmatpush3.bf16.msra.mxu0 %v16957_v14  ;;  %v16962_v23 = vld [vmem:[%s21373_s1 + $0xb8] sm:$0xff]   ;;  %v1159_v14 = vrot.slane %v17531_v52, 1 }
  0x80   : > { %14613 = vmatprep.subr.bf16.mxu0 %v16958_v58 }
  0x83   : > { %14614 = vmatpush3.bf16.msra.mxu0 %v16958_v58  ;;  %v16967_v58 = vld [vmem:[%s21373_s1 + $0xe0] sm:$0xff]  }
  0x84   : > { %14615 = vmatprep.subr.bf16.mxu0 %v16959_v4 }
  0x86   : > { %14580 = vmatmul.mubr.bf16.gmra.mrb[8].mxu0 %v17701_v27  ;;  %v16963_v27 = vld [vmem:[%s21373_s1 + $0xc0] sm:$0xff]  }
  0x87   : > { %14583 = vmatprep.mubr.bf16.mxu0 %v17706_v30  ;;  %14616 = vmatpush3.bf16.msra.mxu0 %v16959_v4  ;;  %v17524_v30 = vld [vmem:[%s17646_s20] sm:$0xff]   ;;  %v16968_v4 = vld [vmem:[%s21373_s1 + $0xe8] sm:$0xff]  }
  0x88   : > { %14617 = vmatprep.subr.bf16.mxu0 %v16960_v15 }
  0x8b   : > { %14618 = vmatpush3.bf16.msra.mxu0 %v16960_v15  ;;  %v17980_v15 = vsel %vm1145_vm1, %v1155_v26, %v1157_v0 }
  0x8c   : > { %14619 = vmatprep.subr.bf16.mxu0 %v16961_v17 }
  0x8e   : > { %14584 = vmatmul.mubr.bf16.gmra.mrb[12].mxu0 %v17712_v32  ;;  %v1146_v32 = vrot.slane %v17524_v30, 1  ;;  %v17533_v30 = vld [vmem:[%s17646_s20 + $0x48] sm:$0xff]  }
  0x8f   : > { %14587 = vmatprep.mubr.bf16.mxu0 %v17715_v33  ;;  %14620 = vmatpush3.bf16.msra.mxu0 %v16961_v17  ;;  %v17525_v33 = vld [vmem:[%s17646_s20 + $0x8] sm:$0xff]   ;;  %v17983_v17 = vsel %vm1145_vm1, %v1157_v0, %v1159_v14 }
  0x90   : > { %14621 = vmatprep.subr.bf16.mxu0 %v16962_v23  ;;  %v1147_v61 = vrot.slane %v17525_v33, 1  ;;  %v16969_v33 = vld [vmem:[%s21373_s1 + $0xf0] sm:$0xff]  }
  0x93   : > { %14622 = vmatpush3.bf16.msra.mxu0 %v16962_v23  ;;  %v17532_v23 = vld [vmem:[%s17646_s20 + $0x40] sm:$0xff]  }
  0x94   : > { %14659 = vmatprep.subr.bf16.mxu0 %v16963_v27 }
  0x96   : > { %14588 = vmatmul.mubr.bf16.gmra.mrb[16].mxu0 %v17728_v38  ;;  %v1148_v38 = vsel %vm1145_vm1, %v1146_v32, %v1147_v61  ;;  %v1163_v32 = vrot.slane %v17533_v30, 1 }
  0x97   : > { %14591 = vmatprep.mubr.bf16.mxu0 %v17748_v46  ;;  %v17526_v46 = vld [vmem:[%s17646_s20 + $0x10] sm:$0xff]  }
  0x9e   : > { %14592 = vmatmul.mubr.bf16.gmra.mrb[20].mxu0 %v17764_v54  ;;  %v1149_v54 = vrot.slane %v17526_v46, 1 }
  0x9f   : > { %14595 = vmatprep.mubr.bf16.mxu0 %v17770_v56  ;;  %v17527_v56 = vld [vmem:[%s17646_s20 + $0x18] sm:$0xff]  }
  0xa6   : > { %14596 = vmatmul.mubr.bf16.gmra.mrb[24].mxu0 %v17800_v9  ;;  %v1151_v9 = vrot.slane %v17527_v56, 1 }
  0xa7   : > { %14599 = vmatprep.mubr.bf16.mxu0 %v17816_v24  ;;  %v16964_v24 = vld [vmem:[%s21373_s1 + $0xc8] sm:$0xff]  }
  0xa8   : > { %v17951_v13 = vsel %vm1145_vm1, %v1149_v54, %v1151_v9 }
  0xae   : > { %14600 = vmatmul.mubr.bf16.gmra.mrb[28].mxu0 %v17853_v10  ;;  %v17948_v10 = vsel %vm1145_vm1, %v1147_v61, %v1149_v54  ;;  %v16970_v61 = vld [vmem:[%s21373_s1 + $0xf8] sm:$0xff]   ;;  %v17534_v54 = vld [vmem:[%s17646_s20 + $0x50] sm:$0xff]  }
  0xaf   : > { %14603 = vmatprep.mubr.bf16.mxu0 %v17856_v12  ;;  %v17528_v12 = vld [vmem:[%s17646_s20 + $0x20] sm:$0xff]   ;;  %v1165_v56 = vrot.slane %v17534_v54, 1 }
  0xb6   : > { %14604 = vmatmul.mubr.bf16.gmra.mrb[32].mxu0 %v17872_v7  ;;  %v1153_v7 = vrot.slane %v17528_v12, 1  ;;  %v16971_v12 = vld [vmem:[%s21373_s1 + $0x100] sm:$0xff]  }
  0xb7   : > { %14623 = vmatprep.mubr.bf16.mxu0 %v1148_v38 }
  0xb8   : > { %v17964_v34 = vsel %vm1145_vm1, %v1151_v9, %v1153_v7  ;;  %v17967_v47 = vsel %vm1145_vm1, %v1153_v7, %v1155_v26  ;;  %v17535_v9 = vld [vmem:[%s17646_s20 + $0x58] sm:$0xff]   ;;  %v18009_v7 = vsel %vm1145_vm1, %v1163_v32, %v1165_v56  ;;  %v17536_v26 = vld [vmem:[%s17646_s20 + $0x60] sm:$0xff]  }
  0xbe   : > { %14624 = vmatmul.mubr.bf16.vlgmr.msra.gmra.mrb[0].mxu0 %v17948_v10 }
  0xbf   : > { %14660 = vmatpush3.bf16.msra.mxu0 %v16963_v27  ;;  %14627 = vmatprep.mubr.bf16.mxu0 %v17951_v13  ;;  %v1161_v27 = vrot.slane %v17532_v23, 1 }
  0xc0   : > { %14661 = vmatprep.subr.bf16.mxu0 %v16964_v24 }
  0xc1   : > { %v17996_v38 = vsel %vm1145_vm1, %v1159_v14, %v1161_v27  ;;  %v17999_v46 = vsel %vm1145_vm1, %v1161_v27, %v1163_v32  ;;  %v17538_v14 = vld [vmem:[%s17646_s20 + $0x70] sm:$0xff]   ;;  %v17540_v32 = vld [vmem:[%s17646_s20 + $0x80] sm:$0xff]  }
  0xc3   : > { %14662 = vmatpush3.bf16.msra.mxu0 %v16964_v24  ;;  %v1167_v24 = vrot.slane %v17535_v9, 1 }
  0xc4   : > { %14663 = vmatprep.subr.bf16.mxu0 %v16965_v29 }
  0xc5   : > { %v18012_v20 = vsel %vm1145_vm1, %v1165_v56, %v1167_v24 }
  0xc6   : > { %14628 = vmatmul.mubr.bf16.gmra.mrb[4].mxu0 %v17964_v34 }
  0xc7   : > { %14631 = vmatprep.mubr.bf16.mxu0 %v17967_v47  ;;  %14664 = vmatpush3.bf16.msra.mxu0 %v16965_v29  ;;  %v1169_v29 = vrot.slane %v17536_v26, 1  ;;  %v16973_v26 = vld [vmem:[%s21373_s1 + $0x110] sm:$0xff]  }
  0xc8   : > { %14665 = vmatprep.subr.bf16.mxu0 %v16966_v44 }
  0xc9   : > { %v18019_v0 = vsel %vm1145_vm1, %v1167_v24, %v1169_v29  ;;  %v16972_v24 = vld [vmem:[%s21373_s1 + $0x108] sm:$0xff]  }
  0xcb   : > { %14666 = vmatpush3.bf16.msra.mxu0 %v16966_v44  ;;  %v17537_v44 = vld [vmem:[%s17646_s20 + $0x68] sm:$0xff]  }
  0xcc   : > { %14667 = vmatprep.subr.bf16.mxu0 %v16967_v58  ;;  %v1171_v50 = vrot.slane %v17537_v44, 1  ;;  %v16976_v44 = vld [vmem:[%s21373_s1 + $0x128] sm:$0xff]  }
  0xce   : > { %14632 = vmatmul.mubr.bf16.gmra.mrb[8].mxu0 %v17980_v15  ;;  %v18022_v52 = vsel %vm1145_vm1, %v1169_v29, %v1171_v50  ;;  %v16974_v29 = vld [vmem:[%s21373_s1 + $0x118] sm:$0xff]  }
  0xcf   : > { %14635 = vmatprep.mubr.bf16.mxu0 %v17983_v17  ;;  %14668 = vmatpush3.bf16.msra.mxu0 %v16967_v58  ;;  %v1173_v58 = vrot.slane %v17538_v14, 1  ;;  %v1771_v14 = vrot.slane %v17686_v21, 1 }
  0xd0   : > { %14669 = vmatprep.subr.bf16.mxu0 %v16968_v4 }
  0xd1   : > { %v18029_v27 = vsel %vm1145_vm1, %v1171_v50, %v1173_v58 }
  0xd3   : > { %14670 = vmatpush3.bf16.msra.mxu0 %v16968_v4  ;;  %v17539_v4 = vld [vmem:[%s17646_s20 + $0x78] sm:$0xff]  }
  0xd4   : > { %14671 = vmatprep.subr.bf16.mxu0 %v16969_v33  ;;  %v1175_v23 = vrot.slane %v17539_v4, 1  ;;  %v1779_v4 = vrot.slane %v17725_v37, 1 }
  0xd6   : > { %14636 = vmatmul.mubr.bf16.gmra.mrb[12].mxu0 %v17996_v38  ;;  %v18032_v30 = vsel %vm1145_vm1, %v1173_v58, %v1175_v23  ;;  %v1775_v58 = vrot.slane %v17719_v35, 1 }
  0xd7   : > { %14639 = vmatprep.mubr.bf16.mxu0 %v17999_v46  ;;  %14672 = vmatpush3.bf16.msra.mxu0 %v16969_v33  ;;  %v1177_v33 = vrot.slane %v17540_v32, 1  ;;  %v1784_v32 = vrot.slane %v17732_v40, 2 }
  0xd8   : > { %14673 = vmatprep.subr.bf16.mxu0 %v16970_v61 }
  0xd9   : > { %v1178_v56 = vsel %vm1145_vm1, %v1175_v23, %v1177_v33  ;;  %v1780_v23 = vrot.slane %v17709_v31, 2 }
  0xdb   : > { %14674 = vmatpush3.bf16.msra.mxu0 %v16970_v61  ;;  %v17541_v61 = vld [vmem:[%s17646_s20 + $0x88] sm:$0xff]  }
  0xdc   : > { %14711 = vmatprep.subr.bf16.mxu0 %v16971_v12  ;;  %v18038_v54 = vrot.slane %v17541_v61, 1  ;;  %v1791_v61 = vrot.slane %v17767_v55, 1 }
  0xde   : > { %14640 = vmatmul.mubr.bf16.gmra.mrb[16].mxu0 %v18009_v7  ;;  %v18043_v9 = vsel %vm1145_vm1, %v1177_v33, %v18038_v54  ;;  %v1787_v33 = vrot.slane %v17761_v53, 1 }
  0xdf   : > { %14643 = vmatprep.mubr.bf16.mxu0 %v18012_v20 }
  0xe6   : > { %14644 = vmatmul.mubr.bf16.gmra.mrb[20].mxu0 %v18019_v0 }
  0xe7   : > { %14647 = vmatprep.mubr.bf16.mxu0 %v18022_v52 }
  0xee   : > { %14648 = vmatmul.mubr.bf16.gmra.mrb[24].mxu0 %v18029_v27 }
  0xef   : > { %14651 = vmatprep.mubr.bf16.mxu0 %v18032_v30 }
  0xf6   : > { %14652 = vmatmul.mubr.bf16.gmra.mrb[28].mxu0 %v1178_v56 }
  0xf7   : > { %14655 = vmatprep.mubr.bf16.mxu0 %v18043_v9 }
  0xfe   : > { %14656 = vmatmul.mubr.bf16.gmra.mrb[32].mxu0 %v18038_v54 }
  0xff   : > { %14675 = vmatprep.mubr.bf16.mxu0 %v17948_v10  ;;  %v18060_v10 = vld [vmem:[%s17646_s20 + $0x90] sm:$0xff]  }
 0x106   : > { %14676 = vmatmul.mubr.bf16.vlgmr.msra.gmra.mrb[0].mxu0 %v17951_v13  ;;  %v16975_v13 = vld [vmem:[%s21373_s1 + $0x120] sm:$0xff]  }
 0x107   : > { %14712 = vmatpush3.bf16.msra.mxu0 %v16971_v12  ;;  %14679 = vmatprep.mubr.bf16.mxu0 %v17964_v34  ;;  %v1482_v34 = vrot.slane %v18060_v10, 1  ;;  %v1768_v12 = vrot.slane %v511_v19, 1  ;;  %v1772_v19 = vrot.slane %v17679_v18, 2 }
 0x108   : > { %14713 = vmatprep.subr.bf16.mxu0 %v16972_v24 }
 0x10b   : > { %14714 = vmatpush3.bf16.msra.mxu0 %v16972_v24  ;;  %v1792_v24 = vrot.slane %v17739_v43, 2 }
 0x10c   : > { %14715 = vmatprep.subr.bf16.mxu0 %v16973_v26 }
 0x10e   : > { %14680 = vmatmul.mubr.bf16.gmra.mrb[4].mxu0 %v17967_v47  ;;  %v16977_v47 = vld [vmem:[%s21373_s1 + $0x130] sm:$0xff]  }
 0x10f   : > { %14683 = vmatprep.mubr.bf16.mxu0 %v17980_v15  ;;  %14716 = vmatpush3.bf16.msra.mxu0 %v16973_v26  ;;  %v21398_v15 = vshll.u32 %v17655_v5, 16  ;;  %v1776_v5 = vrot.slane %v17689_v22, 2  ;;  %v1796_v26 = vrot.slane %v17745_v45, 2 }
 0x110   : > { %14717 = vmatprep.subr.bf16.mxu0 %v16974_v29 }
 0x111   : > { %v1769_v50 = vrot.slane %v21398_v15, 2  ;;  %v16981_v15 = vld [vmem:[%s21373_s1 + $0x148] sm:$0xff]  }
 0x113   : > { %14718 = vmatpush3.bf16.msra.mxu0 %v16974_v29  ;;  %v1800_v29 = vrot.slane %v17755_v49, 2 }
 0x114   : > { %14719 = vmatprep.subr.bf16.mxu0 %v16975_v13 }
 0x116   : > { %14684 = vmatmul.mubr.bf16.gmra.mrb[8].mxu0 %v17983_v17  ;;  %v16979_v17 = vld [vmem:[%s21373_s1 + $0x138] sm:$0xff]  }
 0x117   : > { %14687 = vmatprep.mubr.bf16.mxu0 %v17996_v38  ;;  %14720 = vmatpush3.bf16.msra.mxu0 %v16975_v13  ;;  %v16980_v38 = vld [vmem:[%s21373_s1 + $0x140] sm:$0xff]   ;;  %v1803_v13 = vrot.slane %v17793_v3, 1 }
 0x118   : > { %14721 = vmatprep.subr.bf16.mxu0 %v16976_v44 }
 0x11b   : > { %14722 = vmatpush3.bf16.msra.mxu0 %v16976_v44  ;;  %v1483_v44 = vsel %vm1145_vm1, %v18038_v54, %v1482_v34  ;;  %v1816_v54 = vrot.slane %v17819_v25, 2 }
 0x11c   : > { %14723 = vmatprep.subr.bf16.mxu0 %v16977_v47 }
 0x11e   : > { %14688 = vmatmul.mubr.bf16.gmra.mrb[12].mxu0 %v17999_v46  ;;  %v1783_v46 = vrot.slane %v17752_v48, 1 }
 0x11f   : > { %14691 = vmatprep.mubr.bf16.mxu0 %v18009_v7  ;;  %14724 = vmatpush3.bf16.msra.mxu0 %v16977_v47  ;;  %v1788_v7 = vrot.slane %v17735_v41, 2  ;;  %v1820_v47 = vrot.slane %v17832_v42, 2 }
 0x120   : > { %14725 = vmatprep.subr.bf16.mxu0 %v16979_v17 }
 0x123   : > { %14726 = vmatpush3.bf16.msra.mxu0 %v16979_v17  ;;  %v1773_v17 = vor.u32 %v1772_v19, %v1771_v14  ;;  %v1824_v14 = vrot.slane %v17861_v62, 2  ;;  %v1785_v19 = vor.u32 %v1784_v32, %v1783_v46  ;;  %v1831_v46 = vrot.slane %v17894_v8, 1 }
 0x124   : > { %14763 = vmatprep.subr.bf16.mxu0 %v16980_v38  ;;  %v1832_v32 = vrot.slane %v17882_v63, 2 }
 0x126   : > { %14692 = vmatmul.mubr.bf16.gmra.mrb[16].mxu0 %v18012_v20  ;;  %v1795_v20 = vrot.slane %v17775_v59, 1 }
 0x127   : > { %14695 = vmatprep.mubr.bf16.mxu0 %v18019_v0  ;;  %v1799_v0 = vrot.slane %v17787_v1, 1 }
 0x12e   : > { %14696 = vmatmul.mubr.bf16.gmra.mrb[20].mxu0 %v18022_v52  ;;  %v1804_v52 = vrot.slane %v17778_v60, 2  ;;  %v1815_v60 = vrot.slane %v17828_v36, 1 }
 0x12f   : > { %14699 = vmatprep.mubr.bf16.mxu0 %v18029_v27  ;;  %v1819_v27 = vrot.slane %v17844_v57, 1 }
 0x136   : > { %14700 = vmatmul.mubr.bf16.gmra.mrb[24].mxu0 %v18032_v30  ;;  %v1811_v30 = vrot.slane %v17812_v16, 1 }
 0x137   : > { %14703 = vmatprep.mubr.bf16.mxu0 %v1178_v56  ;;  %v1770_v56 = vor.u32 %v1769_v50, %v1768_v12 }
 0x139   : > { %v1774_v3 = vsel %vm1767_vm2, %v1770_v56, %v1773_v17 }
 0x13e   : > { %14704 = vmatmul.mubr.bf16.gmra.mrb[28].mxu0 %v18043_v9  ;;  %v1777_v9 = vor.u32 %v1776_v5, %v1775_v58  ;;  %v1827_v58 = vrot.slane %v17877_v51, 1  ;;  %v1828_v5 = vrot.slane %v17868_v39, 2 }
 0x13f   : > { %14707 = vmatprep.mubr.bf16.mxu0 %v1483_v44  ;;  %v1781_v44 = vor.u32 %v1780_v23, %v1779_v4  ;;  %v1789_v4 = vor.u32 %v1788_v7, %v1787_v33  ;;  %v16983_v23 = vld [vmem:[%s21373_s1 + $0x158] sm:$0xff]   ;;  %v1793_v33 = vor.u32 %v1792_v24, %v1791_v61  ;;  %v1797_v7 = vor.u32 %v1796_v26, %v1795_v20 }
 0x140   : > { %v1778_v12 = vsel %vm1767_vm2, %v1773_v17, %v1777_v9  ;;  %v21386_v61 = vshrl.u32 %v18060_v10, 16  ;;  %v1801_v24 = vor.u32 %v1800_v29, %v1799_v0  ;;  %v1805_v20 = vor.u32 %v1804_v52, %v1803_v13  ;;  %v16989_v26 = vld [vmem:[%s21373_s1 + $0x178] sm:$0xff]   ;;  %v16990_v0 = vld [vmem:[%s21373_s1 + $0x180] sm:$0xff]  }
 0x141   : > { %v1782_v50 = vsel %vm1767_vm2, %v1777_v9, %v1781_v44  ;;  %v1786_v56 = vsel %vm1767_vm2, %v1781_v44, %v1785_v19  ;;  %v1790_v17 = vsel %vm1767_vm2, %v1785_v19, %v1789_v4  ;;  %v1794_v9 = vsel %vm1767_vm2, %v1789_v4, %v1793_v33  ;;  %v18160_v19 = vld [vmem:[%s17646_s20 + $0x98] sm:$0xf] }
 0x142   : > { %v1798_v44 = vsel %vm1767_vm2, %v1793_v33, %v1797_v7  ;;  %v21385_v4 = vshll.u32 %v18060_v10, 16  ;;  %v21399_v29 = vrot.slane %v17804_v11, 1  ;;  %v21400_v13 = vrot.slane %v17790_v2, 2 }
 0x144   : > { %v1809_v52 = vor.u32 %v21400_v13, %v21399_v29  ;;  %v18207_v13 = vld [vmem:[%s17646_s20 + $0x10] sm:$0xff]  }
 0x146   : > { %14708 = vmatmul.mubr.bf16.gmra.mrb[32].mxu0 %v1482_v34  ;;  %v16982_v34 = vld [vmem:[%s21373_s1 + $0x150] sm:$0xff]  }
 0x147   : > { %14727 = vmatprep.mubr.bf16.mxu0 %v1774_v3  ;;  %v1823_v3 = vrot.slane %v17864_v28, 1 }
 0x14e   : > { %14728 = vmatmul.mubr.bf16.vlgmr.msra.gmra.mrb[0].mxu0 %v1778_v12  ;;  %v16986_v12 = vld [vmem:[%s21373_s1 + $0x170] sm:$0xff]  }
 0x14f   : > { %14764 = vmatpush3.bf16.msra.mxu0 %v16980_v38  ;;  %14731 = vmatprep.mubr.bf16.mxu0 %v1782_v50  ;;  %v16984_v38 = vld [vmem:[%s21373_s1 + $0x160] sm:$0xff]   ;;  %v1802_v50 = vsel %vm1767_vm2, %v1797_v7, %v1801_v24  ;;  %v1838_v7 = vrot.slane %v21386_v61, 1 }
 0x150   : > { %14765 = vmatprep.subr.bf16.mxu0 %v16981_v15 }
 0x153   : > { %14766 = vmatpush3.bf16.msra.mxu0 %v16981_v15  ;;  %v16985_v15 = vld [vmem:[%s21373_s1 + $0x168] sm:$0xff]  }
 0x154   : > { %14767 = vmatprep.subr.bf16.mxu0 %v16982_v34 }
 0x156   : > { %14732 = vmatmul.mubr.bf16.gmra.mrb[4].mxu0 %v1786_v56 }
 0x157   : > { %14735 = vmatprep.mubr.bf16.mxu0 %v1790_v17  ;;  %14768 = vmatpush3.bf16.msra.mxu0 %v16982_v34  ;;  %v1806_v34 = vsel %vm1767_vm2, %v1801_v24, %v1805_v20  ;;  %v18176_v17 = vcombine.low %v18160_v19, %v18160_v19  ;;  %v1825_v24 = vor.u32 %v1824_v14, %v1823_v3 }
 0x158   : > { %14769 = vmatprep.subr.bf16.mxu0 %v16983_v23 }
 0x15b   : > { %14770 = vmatpush3.bf16.msra.mxu0 %v16983_v23  ;;  %v21401_v23 = vrot.slane %v17796_v6, 2 }
 0x15c   : > { %14771 = vmatprep.subr.bf16.mxu0 %v16984_v38 }
 0x15d   : > { %v1813_v56 = vor.u32 %v21401_v23, %v1811_v30  ;;  %v1817_v30 = vor.u32 %v1816_v54, %v1815_v60  ;;  %v1841_v60 = vrot.slane %v21385_v4, 2  ;;  %v18217_v23 = vld [vmem:[%s17646_s20 + $0x20] sm:$0xff]  }
 0x15e   : > { %14736 = vmatmul.mubr.bf16.gmra.mrb[8].mxu0 %v1794_v9  ;;  %v1821_v9 = vor.u32 %v1820_v47, %v1819_v27  ;;  %v1829_v27 = vor.u32 %v1828_v5, %v1827_v58  ;;  %v2147_v58 = vrot.slane %v18207_v13, 2 }
 0x15f   : > { %14739 = vmatprep.mubr.bf16.mxu0 %v1798_v44  ;;  %14772 = vmatpush3.bf16.msra.mxu0 %v16984_v38  ;;  %v1810_v38 = vsel %vm1767_vm2, %v1805_v20, %v1809_v52  ;;  %v1814_v33 = vsel %vm1767_vm2, %v1809_v52, %v1813_v56  ;;  %v1818_v44 = vsel %vm1767_vm2, %v1813_v56, %v1817_v30  ;;  %v2151_v56 = vrot.slane %v18217_v23, 2 }
 0x160   : > { %14773 = vmatprep.subr.bf16.mxu0 %v16985_v15  ;;  %v1826_v47 = vsel %vm1767_vm2, %v1821_v9, %v1825_v24  ;;  %v1830_v20 = vsel %vm1767_vm2, %v1825_v24, %v1829_v27 }
 0x163   : > { %14774 = vmatpush3.bf16.msra.mxu0 %v16985_v15  ;;  %v1845_v15 = vshll.u32 %v18176_v17, 16 }
 0x164   : > { %14775 = vmatprep.subr.bf16.mxu0 %v16986_v12 }
 0x165   : > { %v1847_v54 = vrot.slane %v1845_v15, 2  ;;  %v18232_v15 = vld [vmem:[%s17646_s20 + $0x28] sm:$0xff]  }
 0x166   : > { %14740 = vmatmul.mubr.bf16.gmra.mrb[12].mxu0 %v1802_v50  ;;  %v1842_v50 = vor.u32 %v1841_v60, %v1838_v7 }
 0x167   : > { %14743 = vmatprep.mubr.bf16.mxu0 %v1806_v34  ;;  %14776 = vmatpush3.bf16.msra.mxu0 %v16986_v12  ;;  %v1822_v12 = vsel %vm1767_vm2, %v1817_v30, %v1821_v9  ;;  %v17542_v34 = vld [vmem:[%s17646_s20 + $0x8] sm:$0xff]   ;;  %v2153_v30 = vrot.slane %v18232_v15, 2  ;;  %v18236_v9 = vld [vmem:[%s17646_s20 + $0x30] sm:$0xff]  }
 0x168   : > { %14777 = vmatprep.subr.bf16.mxu0 %v16989_v26  ;;  %v2146_v29 = vrot.slane %v17542_v34, 2  ;;  %v1848_v5 = vsel %vm1767_vm2, %v1842_v50, %v1847_v54  ;;  %v18254_v54 = vld [vmem:[%s17646_s20 + $0x38] sm:$0xff]   ;;  %v18276_v34 = vld [vmem:[%s17646_s20 + $0x48] sm:$0xff]  }
 0x169   : > { %v18246_v24 = vsel %vm2145_vm3, %v2151_v56, %v2153_v30  ;;  %21403 = vst [vmem:[#allocation7_spill] sm:$0xff] %v18276_v34 }
 0x16b   : > { %14778 = vmatpush3.bf16.msra.mxu0 %v16989_v26  ;;  %v1833_v26 = vor.u32 %v1832_v32, %v1831_v46  ;;  %v2148_v46 = vsel %vm2145_vm3, %v2146_v29, %v2147_v58  ;;  %v18213_v32 = vld [vmem:[%s17646_s20 + $0x18] sm:$0xff]   ;;  %v2161_v29 = vrot.slane %v18276_v34, 2 }
 0x16c   : > { %14815 = vmatprep.subr.bf16.mxu0 %v16990_v0  ;;  %v2149_v52 = vrot.slane %v18213_v32, 2 }
 0x16d   : > { %v1834_v3 = vsel %vm1767_vm2, %v1829_v27, %v1833_v26  ;;  %v1843_v14 = vsel %vm1767_vm2, %v1833_v26, %v1842_v50  ;;  %v2157_v27 = vrot.slane %v18254_v54, 2  ;;  %v16994_v26 = vld [vmem:[%s21373_s1 + $0x1a0] sm:$0xff]   ;;  %v16995_v50 = vld [vmem:[%s21373_s1 + $0x1a8] sm:$0xff]  }
 0x16e   : > { %14744 = vmatmul.mubr.bf16.gmra.mrb[16].mxu0 %v1810_v38  ;;  %v16991_v38 = vld [vmem:[%s21373_s1 + $0x188] sm:$0xff]   ;;  %v18227_v7 = vsel %vm2145_vm3, %v2149_v52, %v2151_v56 }
 0x16f   : > { %14747 = vmatprep.mubr.bf16.mxu0 %v1814_v33  ;;  %v18224_v33 = vsel %vm2145_vm3, %v2147_v58, %v2149_v52  ;;  %v18280_v58 = vld [vmem:[%s17646_s20 + $0x50] sm:$0xff]  }
 0x170   : > { %21404 = vst [vmem:[#allocation8_spill] sm:$0xff] %v18280_v58 }
 0x176   : > { %14748 = vmatmul.mubr.bf16.gmra.mrb[20].mxu0 %v1818_v44  ;;  %v2155_v44 = vrot.slane %v18236_v9, 2 }
 0x177   : > { %14751 = vmatprep.mubr.bf16.mxu0 %v1822_v12  ;;  %v16992_v12 = vld [vmem:[%s21373_s1 + $0x190] sm:$0xff]  }
 0x178   : > { %v18249_v60 = vsel %vm2145_vm3, %v2153_v30, %v2155_v44  ;;  %v18298_v30 = vld [vmem:[%s17646_s20 + $0x58] sm:$0xff]  }
 0x179   : > { %21405 = vst [vmem:[#allocation9_spill] sm:$0xff] %v18298_v30 }
 0x17e   : > { %14752 = vmatmul.mubr.bf16.gmra.mrb[24].mxu0 %v1826_v47  ;;  %v18258_v47 = vld [vmem:[%s17646_s20 + $0x40] sm:$0xff]  }
 0x17f   : > { %14755 = vmatprep.mubr.bf16.mxu0 %v1830_v20  ;;  %21402 = vst [vmem:[#allocation6_spill] sm:$0xff] %v18258_v47  ;;  %v2159_v20 = vrot.slane %v18258_v47, 2 }
 0x181   : > { %v18287_v52 = vsel %vm2145_vm3, %v2159_v20, %v2161_v29 }
 0x186   : > { %14756 = vmatmul.mubr.bf16.gmra.mrb[28].mxu0 %v1834_v3  ;;  %v18268_v3 = vsel %vm2145_vm3, %v2155_v44, %v2157_v27  ;;  %v2165_v44 = vrot.slane %v18298_v30, 2 }
 0x187   : > { %14759 = vmatprep.mubr.bf16.mxu0 %v1843_v14  ;;  %v18271_v14 = vsel %vm2145_vm3, %v2157_v27, %v2159_v20  ;;  %v16998_v27 = vld [vmem:[%s21373_s1 + $0x1c0] sm:$0xff]  }
 0x18e   : > { %14760 = vmatmul.mubr.bf16.gmra.mrb[32].mxu0 %v1848_v5  ;;  %v2163_v5 = vrot.slane %v18280_v58, 2 }
 0x18f   : > { %14779 = vmatprep.mubr.bf16.mxu0 %v2148_v46  ;;  %v16996_v46 = vld [vmem:[%s21373_s1 + $0x1b0] sm:$0xff]  }
 0x190   : > { %v18290_v56 = vsel %vm2145_vm3, %v2161_v29, %v2163_v5  ;;  %v2166_v20 = vsel %vm2145_vm3, %v2163_v5, %v2165_v44 }
 0x196   : > { %14780 = vmatmul.mubr.bf16.vlgmr.msra.gmra.mrb[0].mxu0 %v18224_v33 }
 0x197   : > { %14816 = vmatpush3.bf16.msra.mxu0 %v16990_v0  ;;  %14783 = vmatprep.mubr.bf16.mxu0 %v18227_v7  ;;  %v16993_v0 = vld [vmem:[%s21373_s1 + $0x198] sm:$0xff]  }
 0x198   : > { %14817 = vmatprep.subr.bf16.mxu0 %v16991_v38 }
 0x19b   : > { %14818 = vmatpush3.bf16.msra.mxu0 %v16991_v38  ;;  %v16997_v38 = vld [vmem:[%s21373_s1 + $0x1b8] sm:$0xff]  }
 0x19c   : > { %14819 = vmatprep.subr.bf16.mxu0 %v16992_v12 }
 0x19e   : > { %14784 = vmatmul.mubr.bf16.gmra.mrb[4].mxu0 %v18246_v24 }
 0x19f   : > { %14787 = vmatprep.mubr.bf16.mxu0 %v18249_v60  ;;  %14820 = vmatpush3.bf16.msra.mxu0 %v16992_v12  ;;  %v18302_v12 = vld [vmem:[%s17646_s20 + $0x60] sm:$0xff]  }
 0x1a0   : > { %14821 = vmatprep.subr.bf16.mxu0 %v16993_v0  ;;  %21406 = vst [vmem:[#allocation10_spill] sm:$0xff] %v18302_v12 }
 0x1a3   : > { %14822 = vmatpush3.bf16.msra.mxu0 %v16993_v0  ;;  %v2167_v0 = vrot.slane %v18302_v12, 2  ;;  %v18328_v12 = vld [vmem:[%s17646_s20 + $0x80] sm:$0xff]  }
 0x1a4   : > { %14823 = vmatprep.subr.bf16.mxu0 %v16994_v26  ;;  %v2175_v30 = vrot.slane %v18328_v12, 2 }
 0x1a6   : > { %14788 = vmatmul.mubr.bf16.gmra.mrb[8].mxu0 %v18268_v3 }
 0x1a7   : > { %14791 = vmatprep.mubr.bf16.mxu0 %v18271_v14  ;;  %14824 = vmatpush3.bf16.msra.mxu0 %v16994_v26  ;;  %v18310_v26 = vsel %vm2145_vm3, %v2165_v44, %v2167_v0  ;;  %v18324_v44 = vld [vmem:[%s17646_s20 + $0x78] sm:$0xff]  }
 0x1a8   : > { %14825 = vmatprep.subr.bf16.mxu0 %v16995_v50  ;;  %21409 = vst [vmem:[#allocation13_spill] sm:$0xff] %v18324_v44  ;;  %v2173_v61 = vrot.slane %v18324_v44, 2 }
 0x1aa   : > { %v2176_v58 = vsel %vm2145_vm3, %v2173_v61, %v2175_v30 }
 0x1ab   : > { %14826 = vmatpush3.bf16.msra.mxu0 %v16995_v50  ;;  %v18314_v50 = vld [vmem:[%s17646_s20 + $0x68] sm:$0xff]  }
 0x1ac   : > { %14827 = vmatprep.subr.bf16.mxu0 %v16996_v46  ;;  %21407 = vst [vmem:[#allocation11_spill] sm:$0xff] %v18314_v50  ;;  %v2169_v29 = vrot.slane %v18314_v50, 2 }
 0x1ae   : > { %14792 = vmatmul.mubr.bf16.gmra.mrb[12].mxu0 %v18287_v52  ;;  %v2170_v5 = vsel %vm2145_vm3, %v2167_v0, %v2169_v29 }
 0x1af   : > { %14795 = vmatprep.mubr.bf16.mxu0 %v18290_v56  ;;  %14828 = vmatpush3.bf16.msra.mxu0 %v16996_v46  ;;  %v18318_v46 = vld [vmem:[%s17646_s20 + $0x70] sm:$0xff]  }
 0x1b0   : > { %14829 = vmatprep.subr.bf16.mxu0 %v16997_v38  ;;  %21408 = vst [vmem:[#allocation12_spill] sm:$0xff] %v18318_v46  ;;  %v2171_v4 = vrot.slane %v18318_v46, 2  ;;  %v18334_v46 = vld [vmem:[%s17646_s20 + $0x88] sm:$0xff]  }
 0x1b1   : > { %21410 = vst [vmem:[#allocation14_spill] sm:$0xff] %v18334_v46  ;;  %v2177_v0 = vrot.slane %v18334_v46, 2  ;;  %v16999_v46 = vld [vmem:[%s21373_s1 + $0x1c8] sm:$0xff]  }
 0x1b2   : > { %v2174_v50 = vsel %vm2145_vm3, %v2171_v4, %v2173_v61 }
 0x1b3   : > { %14830 = vmatpush3.bf16.msra.mxu0 %v16997_v38  ;;  %v2172_v38 = vsel %vm2145_vm3, %v2169_v29, %v2171_v4  ;;  %v18338_v29 = vld [vmem:[%s17646_s20 + $0x90] sm:$0xff]   ;;  %v2178_v44 = vsel %vm2145_vm3, %v2175_v30, %v2177_v0  ;;  %v2181_v4 = vrot.slane %v18176_v17, 2  ;;  %v17001_v17 = vld [vmem:[%s21373_s1 + $0x1d8] sm:$0xff]  }
 0x1b4   : > { %14867 = vmatprep.subr.bf16.mxu0 %v16998_v27  ;;  %v2179_v34 = vrot.slane %v18338_v29, 2  ;;  %v17000_v30 = vld [vmem:[%s21373_s1 + $0x1d0] sm:$0xff]  }
 0x1b6   : > { %14796 = vmatmul.mubr.bf16.gmra.mrb[16].mxu0 %v2166_v20  ;;  %v2180_v47 = vsel %vm2145_vm3, %v2177_v0, %v2179_v34  ;;  %v2182_v61 = vsel %vm2145_vm3, %v2179_v34, %v2181_v4  ;;  %v2771_v0 = vrot.slane %v17679_v18, 3  ;;  %v2781_v18 = vrot.slane %v17752_v48, 2 }
 0x1b7   : > { %14799 = vmatprep.mubr.bf16.mxu0 %v18310_v26  ;;  %v2789_v48 = vrot.slane %v17767_v55, 2 }
 0x1be   : > { %14800 = vmatmul.mubr.bf16.gmra.mrb[20].mxu0 %v2170_v5 }
 0x1bf   : > { %14803 = vmatprep.mubr.bf16.mxu0 %v2172_v38 }
 0x1c6   : > { %14804 = vmatmul.mubr.bf16.gmra.mrb[24].mxu0 %v2174_v50 }
 0x1c7   : > { %14807 = vmatprep.mubr.bf16.mxu0 %v2176_v58 }
 0x1ce   : > { %14808 = vmatmul.mubr.bf16.gmra.mrb[28].mxu0 %v2178_v44 }
 0x1cf   : > { %14811 = vmatprep.mubr.bf16.mxu0 %v2180_v47 }
 0x1d6   : > { %14812 = vmatmul.mubr.bf16.gmra.mrb[32].mxu0 %v2182_v61  ;;  %v2785_v61 = vrot.slane %v17761_v53, 2 }
 0x1d7   : > { %14831 = vmatprep.mubr.bf16.mxu0 %v18224_v33  ;;  %v17002_v33 = vld [vmem:[%s21373_s1 + $0x1e0] sm:$0xff]  }
 0x1de   : > { %14832 = vmatmul.mubr.bf16.vlgmr.msra.gmra.mrb[0].mxu0 %v18227_v7  ;;  %v17003_v7 = vld [vmem:[%s21373_s1 + $0x1e8] sm:$0xff]  }
 0x1df   : > { %14868 = vmatpush3.bf16.msra.mxu0 %v16998_v27  ;;  %14835 = vmatprep.mubr.bf16.mxu0 %v18246_v24  ;;  %v17004_v24 = vld [vmem:[%s21373_s1 + $0x1f0] sm:$0xff]  }
 0x1e0   : > { %14869 = vmatprep.subr.bf16.mxu0 %v16999_v46 }
 0x1e3   : > { %14870 = vmatpush3.bf16.msra.mxu0 %v16999_v46  ;;  %v2770_v46 = vrot.slane %v17686_v21, 2 }
 0x1e4   : > { %14871 = vmatprep.subr.bf16.mxu0 %v17000_v30 }
 0x1e6   : > { %14836 = vmatmul.mubr.bf16.gmra.mrb[4].mxu0 %v18249_v60  ;;  %v17006_v60 = vld [vmem:[%s21373_s1 + $0x1f8] sm:$0xff]  }
 0x1e7   : > { %14839 = vmatprep.mubr.bf16.mxu0 %v18268_v3  ;;  %14872 = vmatpush3.bf16.msra.mxu0 %v17000_v30  ;;  %v17007_v3 = vld [vmem:[%s21373_s1 + $0x200] sm:$0xff]   ;;  %v2786_v30 = vrot.slane %v17735_v41, 3  ;;  %v17009_v41 = vld [vmem:[%s21373_s1 + $0x210] sm:$0xff]  }
 0x1e8   : > { %14873 = vmatprep.subr.bf16.mxu0 %v17001_v17 }
 0x1eb   : > { %14874 = vmatpush3.bf16.msra.mxu0 %v17001_v17  ;;  %v2787_v17 = vor.u32 %v2786_v30, %v2785_v61  ;;  %v2822_v61 = vrot.slane %v17861_v62, 3 }
 0x1ec   : > { %14875 = vmatprep.subr.bf16.mxu0 %v17002_v33 }
 0x1ee   : > { %14840 = vmatmul.mubr.bf16.gmra.mrb[8].mxu0 %v18271_v14  ;;  %v373_v14 = vld [vmem:[%s17646_s20 + $0x9c] sm:$0xf] }
 0x1ef   : > { %14843 = vmatprep.mubr.bf16.mxu0 %v18287_v52  ;;  %14876 = vmatpush3.bf16.msra.mxu0 %v17002_v33  ;;  %v18380_v52 = vcombine.low %v18160_v19, %v373_v14 }
 0x1f0   : > { %14877 = vmatprep.subr.bf16.mxu0 %v17003_v7 }
 0x1f3   : > { %14878 = vmatpush3.bf16.msra.mxu0 %v17003_v7  ;;  %v2793_v7 = vrot.slane %v17775_v59, 2 }
 0x1f4   : > { %14879 = vmatprep.subr.bf16.mxu0 %v17004_v24 }
 0x1f6   : > { %14844 = vmatmul.mubr.bf16.gmra.mrb[12].mxu0 %v18290_v56  ;;  %v2485_v56 = vrot.slane %v18380_v52, 2 }
 0x1f7   : > { %14847 = vmatprep.mubr.bf16.mxu0 %v2166_v20  ;;  %14880 = vmatpush3.bf16.msra.mxu0 %v17004_v24  ;;  %v18385_v20 = vld [vmem:[%s17646_s20 + $0xa0] ss:$0 sps:$4 sm:$0x33]   ;;  %v2794_v24 = vrot.slane %v17745_v45, 3  ;;  %s13652_s20 = sshll.u32 %s21425_s10, 4 }
 0x1f8   : > { %14881 = vmatprep.subr.bf16.mxu0 %v17006_v60  ;;  %v2486_v27 = vsel %vm2145_vm3, %v2179_v34, %v2485_v56  ;;  %v2487_v19 = vrot.slane %v18385_v20, 2  ;;  %v2777_v34 = vrot.slane %v17725_v37, 2  ;;  %v17011_v45 = vld [vmem:[%s21373_s1 + $0x220] sm:$0xff]   ;;  %s332_s21 = scalar_lea.vmem %s21381_s9, %s13652_s20 }
 0x1f9   : > { %v2795_v14 = vor.u32 %v2794_v24, %v2793_v7 }
 0x1fb   : > { %14882 = vmatpush3.bf16.msra.mxu0 %v17006_v60  ;;  %v2798_v60 = vrot.slane %v17755_v49, 3 }
 0x1fc   : > { %14919 = vmatprep.subr.bf16.mxu0 %v17007_v3 }
 0x1fe   : > { %14848 = vmatmul.mubr.bf16.gmra.mrb[16].mxu0 %v18310_v26  ;;  %v2773_v26 = vrot.slane %v17719_v35, 2  ;;  %v2782_v35 = vrot.slane %v17732_v40, 3  ;;  %v2790_v40 = vrot.slane %v17739_v43, 3  ;;  %v2797_v43 = vrot.slane %v17787_v1, 2 }
 0x1ff   : > { %14851 = vmatprep.mubr.bf16.mxu0 %v2170_v5 }
 0x200   : > { %v2791_v33 = vor.u32 %v2790_v40, %v2789_v48  ;;  %v2825_v48 = vrot.slane %v17877_v51, 2  ;;  %v2826_v40 = vrot.slane %v17868_v39, 3  ;;  %v21413_v51 = vshrl.u32 %v18060_v10, 16 }
 0x201   : > { %v21414_v39 = vshll.u32 %v18060_v10, 16 }
 0x202   : > { %v2792_v55 = vsel %vm2769_vm4, %v2787_v17, %v2791_v33  ;;  %v2796_v59 = vsel %vm2769_vm4, %v2791_v33, %v2795_v14  ;;  %v2838_v33 = vshrl.u32 %v18380_v52, 16  ;;  %v2833_v7 = vrot.slane %v21413_v51, 2 }
 0x203   : > { %v2834_v24 = vrot.slane %v21414_v39, 3  ;;  %v17570_v39 = vmov 0  }
 0x204   : > { %4192 = vmatprep.subr.bf16.mxu1 %v17570_v39 }
 0x206   : > { %14852 = vmatmul.mubr.bf16.gmra.mrb[20].mxu0 %v2172_v38  ;;  %v2488_v38 = vsel %vm2145_vm3, %v2485_v56, %v2487_v19  ;;  %v2799_v56 = vor.u32 %v2798_v60, %v2797_v43  ;;  %v17012_v19 = vld [vmem:[%s21373_s1 + $0x228] sm:$0xff]   ;;  %v2835_v43 = vor.u32 %v2834_v24, %v2833_v7  ;;  %v2847_v60 = vshrl.u32 %v18385_v20, 16  ;;  %v18513_v24 = vld [vmem:[%s21376_s4] ss:$0 sm:$0xff] }
 0x207   : > { %14855 = vmatprep.mubr.bf16.mxu0 %v2174_v50  ;;  %v2774_v50 = vrot.slane %v17689_v22, 3 }
 0x209   : > { %v2775_v5 = vor.u32 %v2774_v50, %v2773_v26  ;;  %v2805_v26 = vrot.slane %v17804_v11, 2  ;;  %v2806_v50 = vrot.slane %v17790_v2, 3  ;;  %v2809_v11 = vrot.slane %v17812_v16, 2 }
 0x20a   : > { %v2810_v2 = vrot.slane %v17796_v6, 3  ;;  %v2817_v16 = vrot.slane %v17844_v57, 2 }
 0x20e   : > { %14856 = vmatmul.mubr.bf16.gmra.mrb[24].mxu0 %v2176_v58  ;;  %v2772_v58 = vor.u32 %v2771_v0, %v2770_v46  ;;  %v21412_v46 = vld [vmem:[#allocation4_spill] sm:$0xff]  ;;  %v2800_v0 = vsel %vm2769_vm4, %v2795_v14, %v2799_v56 }
 0x20f   : > { %14859 = vmatprep.mubr.bf16.mxu0 %v2178_v44  ;;  %v2778_v44 = vrot.slane %v17709_v31, 3  ;;  %v17008_v31 = vld [vmem:[%s21373_s1 + $0x208] sm:$0xff]   ;;  %v2802_v49 = vrot.slane %v21412_v46, 3  ;;  %v3153_v46 = vrot.slane %v18213_v32, 3  ;;  %v3161_v32 = vrot.slane %v18254_v54, 3 }
 0x210   : > { %v2776_v21 = vsel %vm2769_vm4, %v2772_v58, %v2775_v5 }
 0x211   : > { %v2779_v22 = vor.u32 %v2778_v44, %v2777_v34 }
 0x213   : > { %v2780_v4 = vsel %vm2769_vm4, %v2775_v5, %v2779_v22  ;;  %v2807_v5 = vor.u32 %v2806_v50, %v2805_v26  ;;  %v3155_v26 = vrot.slane %v18217_v23, 3  ;;  %v3157_v50 = vrot.slane %v18232_v15, 3 }
 0x216   : > { %14860 = vmatmul.mubr.bf16.gmra.mrb[28].mxu0 %v2180_v47  ;;  %v2783_v47 = vor.u32 %v2782_v35, %v2781_v18  ;;  %v2814_v18 = vrot.slane %v17819_v25, 3  ;;  %v17014_v35 = vld [vmem:[%s21373_s1 + $0x238] sm:$0xff]  }
 0x217   : > { %14863 = vmatprep.mubr.bf16.mxu0 %v2486_v27  ;;  %v21411_v27 = vld [vmem:[#allocation5_spill] sm:$0xff] }
 0x218   : > { %v2784_v37 = vsel %vm2769_vm4, %v2779_v22, %v2783_v47  ;;  %v2788_v53 = vsel %vm2769_vm4, %v2783_v47, %v2787_v17  ;;  %v2801_v1 = vrot.slane %v21411_v27, 2  ;;  %v2811_v22 = vor.u32 %v2810_v2, %v2809_v11  ;;  %v21416_v11 = vld [vmem:[#allocation7_spill] sm:$0xff] }
 0x219   : > { %v2830_v17 = vrot.slane %v17882_v63, 3  ;;  %v3165_v15 = vrot.slane %v21416_v11, 3 }
 0x21a   : > { %v2803_v58 = vor.u32 %v2802_v49, %v2801_v1  ;;  %v2812_v6 = vsel %vm2769_vm4, %v2807_v5, %v2811_v22  ;;  %v3152_v1 = vrot.slane %v18207_v13, 3  ;;  %v3159_v13 = vrot.slane %v18236_v9, 3 }
 0x21c   : > { %v2804_v34 = vsel %vm2769_vm4, %v2799_v56, %v2803_v58  ;;  %v2808_v44 = vsel %vm2769_vm4, %v2803_v58, %v2807_v5  ;;  %v3158_v58 = vsel %vm3151_vm5, %v3155_v26, %v3157_v50  ;;  %v3160_v5 = vsel %vm3151_vm5, %v3157_v50, %v3159_v13 }
 0x21e   : > { %14864 = vmatmul.mubr.bf16.gmra.mrb[32].mxu0 %v2488_v38  ;;  %v17013_v38 = vld [vmem:[%s21373_s1 + $0x230] sm:$0xff]  }
 0x21f   : > { %14883 = vmatprep.mubr.bf16.mxu0 %v2776_v21  ;;  %v2813_v21 = vrot.slane %v17828_v36, 2  ;;  %v2821_v36 = vrot.slane %v17864_v28, 2  ;;  %v2827_v28 = vor.u32 %v2826_v40, %v2825_v48 }
 0x221   : > { %v2815_v47 = vor.u32 %v2814_v18, %v2813_v21  ;;  %v21417_v21 = vld [vmem:[#allocation8_spill] sm:$0xff]  ;;  %v21418_v18 = vld [vmem:[#allocation9_spill] sm:$0xff] }
 0x222   : > { %v3167_v9 = vrot.slane %v21417_v21, 3  ;;  %v3169_v54 = vrot.slane %v21418_v18, 3 }
 0x223   : > { %v2816_v25 = vsel %vm2769_vm4, %v2811_v22, %v2815_v47 }
 0x224   : > { %v3170_v22 = vsel %vm3151_vm5, %v3167_v9, %v3169_v54 }
 0x226   : > { %14884 = vmatmul.mubr.bf16.vlgmr.msra.gmra.mrb[0].mxu0 %v2780_v4  ;;  %v2818_v4 = vrot.slane %v17832_v42, 3  ;;  %v2829_v42 = vrot.slane %v17894_v8, 2 }
 0x227   : > { %14920 = vmatpush3.bf16.msra.mxu0 %v17007_v3  ;;  %14887 = vmatprep.mubr.bf16.mxu0 %v2784_v37  ;;  %v17010_v3 = vld [vmem:[%s21373_s1 + $0x218] sm:$0xff]   ;;  %v2823_v37 = vor.u32 %v2822_v61, %v2821_v36  ;;  %v21421_v61 = vld [vmem:[#allocation12_spill] sm:$0xff] }
 0x228   : > { %14921 = vmatprep.subr.bf16.mxu0 %v17008_v31  ;;  %v2819_v30 = vor.u32 %v2818_v4, %v2817_v16  ;;  %v2831_v62 = vor.u32 %v2830_v17, %v2829_v42  ;;  %v21420_v16 = vld [vmem:[#allocation11_spill] sm:$0xff]  ;;  %v21423_v42 = vld [vmem:[#allocation14_spill] sm:$0xff] }
 0x229   : > { %v3173_v4 = vrot.slane %v21420_v16, 3  ;;  %v3181_v17 = vrot.slane %v21423_v42, 3 }
 0x22a   : > { %v2824_v57 = vsel %vm2769_vm4, %v2819_v30, %v2823_v37  ;;  %v2832_v8 = vsel %vm2769_vm4, %v2827_v28, %v2831_v62  ;;  %v2836_v56 = vsel %vm2769_vm4, %v2831_v62, %v2835_v43 }
 0x22b   : > { %14922 = vmatpush3.bf16.msra.mxu0 %v17008_v31  ;;  %v2820_v31 = vsel %vm2769_vm4, %v2815_v47, %v2819_v30  ;;  %v21419_v47 = vld [vmem:[#allocation10_spill] sm:$0xff]  ;;  %v3175_v30 = vrot.slane %v21421_v61, 3 }
 0x22c   : > { %14923 = vmatprep.subr.bf16.mxu0 %v17009_v41 }
 0x22d   : > { %v3176_v48 = vsel %vm3151_vm5, %v3173_v4, %v3175_v30 }
 0x22e   : > { %14888 = vmatmul.mubr.bf16.gmra.mrb[4].mxu0 %v2788_v53  ;;  %v2828_v53 = vsel %vm2769_vm4, %v2823_v37, %v2827_v28  ;;  %v21422_v37 = vld [vmem:[#allocation13_spill] sm:$0xff] }
 0x22f   : > { %14891 = vmatprep.mubr.bf16.mxu0 %v2792_v55  ;;  %14924 = vmatpush3.bf16.msra.mxu0 %v17009_v41  ;;  %v2841_v41 = vshll.u32 %v18380_v52, 16  ;;  %v2840_v55 = vrot.slane %v2838_v33, 2  ;;  %v3183_v33 = vrot.slane %v18338_v29, 3  ;;  %v17017_v29 = vld [vmem:[%s21379_s7 + $0x4] ss:$12 sps:$4 sm:$0xff]  }
 0x230   : > { %14925 = vmatprep.subr.bf16.mxu0 %v17010_v3  ;;  %4224 = vmatprep.mubr.bf16.mxu1 %v17017_v29 }
 0x231   : > { %v2843_v63 = vrot.slane %v2841_v41, 3  ;;  %v3185_v41 = vrot.slane %v18380_v52, 3  ;;  %v17571_v52 = vmov 0.0  }
 0x233   : > { %14926 = vmatpush3.bf16.msra.mxu0 %v17010_v3  ;;  %v2850_v3 = vshll.u32 %v18385_v20, 16  ;;  %v2844_v14 = vor.u32 %v2843_v63, %v2840_v55  ;;  %v3186_v51 = vsel %vm3151_vm5, %v3183_v33, %v3185_v41 }
 0x234   : > { %14927 = vmatprep.subr.bf16.mxu0 %v17011_v45 }
 0x235   : > { %v2845_v27 = vsel %vm2769_vm4, %v2835_v43, %v2844_v14 }
 0x236   : > { %14892 = vmatmul.mubr.bf16.gmra.mrb[8].mxu0 %v2796_v59  ;;  %v2852_v59 = vrot.slane %v2850_v3, 3 }
 0x237   : > { %14895 = vmatprep.mubr.bf16.mxu0 %v2800_v0  ;;  %14928 = vmatpush3.bf16.msra.mxu0 %v17011_v45  ;;  %v2849_v45 = vrot.slane %v2847_v60, 2  ;;  %v3154_v0 = vsel %vm3151_vm5, %v3152_v1, %v3153_v46 }
 0x238   : > { %14929 = vmatprep.subr.bf16.mxu0 %v17012_v19 }
 0x239   : > { %v2853_v10 = vor.u32 %v2852_v59, %v2849_v45 }
 0x23b   : > { %14930 = vmatpush3.bf16.msra.mxu0 %v17012_v19  ;;  %v2854_v49 = vsel %vm2769_vm4, %v2844_v14, %v2853_v10  ;;  %v3156_v19 = vsel %vm3151_vm5, %v3153_v46, %v3155_v26 }
 0x23c   : > { %14931 = vmatprep.subr.bf16.mxu0 %v17013_v38 }
 0x23e   : > { %14896 = vmatmul.mubr.bf16.gmra.mrb[12].mxu0 %v2804_v34  ;;  %v21415_v34 = vld [vmem:[#allocation6_spill] sm:$0xff] }
 0x23f   : > { %14899 = vmatprep.mubr.bf16.mxu0 %v2808_v44  ;;  %14932 = vmatpush3.bf16.msra.mxu0 %v17013_v38  ;;  %v3162_v38 = vsel %vm3151_vm5, %v3159_v13, %v3161_v32  ;;  %v3163_v23 = vrot.slane %v21415_v34, 3 }
 0x240   : > { %14933 = vmatprep.subr.bf16.mxu0 %v17014_v35 }
 0x241   : > { %v3164_v2 = vsel %vm3151_vm5, %v3161_v32, %v3163_v23  ;;  %v3166_v44 = vsel %vm3151_vm5, %v3163_v23, %v3165_v15 }
 0x243   : > { %14934 = vmatpush3.bf16.msra.mxu0 %v17014_v35  ;;  %v3168_v35 = vsel %vm3151_vm5, %v3165_v15, %v3167_v9 }
 0x244   : > { %15291 = vmatprep.subr.bf16.mxu0 %v17571_v52 }
 0x246   : > { %14900 = vmatmul.mubr.bf16.gmra.mrb[16].mxu0 %v2812_v6  ;;  %v3171_v6 = vrot.slane %v21419_v47, 3 }
 0x247   : > { %14903 = vmatprep.mubr.bf16.mxu0 %v2816_v25 }
 0x248   : > { %v3172_v25 = vsel %vm3151_vm5, %v3169_v54, %v3171_v6  ;;  %v3174_v36 = vsel %vm3151_vm5, %v3171_v6, %v3173_v4 }
 0x24e   : > { %14904 = vmatmul.mubr.bf16.gmra.mrb[20].mxu0 %v2820_v31  ;;  %v3177_v31 = vrot.slane %v21422_v37, 3 }
 0x24f   : > { %14907 = vmatprep.mubr.bf16.mxu0 %v2824_v57  ;;  %v3179_v57 = vrot.slane %v18328_v12, 3  ;;  %v3187_v12 = vrot.slane %v18385_v20, 3 }
 0x250   : > { %v3178_v40 = vsel %vm3151_vm5, %v3175_v30, %v3177_v31 }
 0x251   : > { %v3180_v28 = vsel %vm3151_vm5, %v3177_v31, %v3179_v57  ;;  %v3182_v62 = vsel %vm3151_vm5, %v3179_v57, %v3181_v17  ;;  %v3188_v7 = vsel %vm3151_vm5, %v3185_v41, %v3187_v12 }
 0x256   : > { %14908 = vmatmul.mubr.bf16.gmra.mrb[24].mxu0 %v2828_v53  ;;  %v3184_v53 = vsel %vm3151_vm5, %v3181_v17, %v3183_v33 }
 0x257   : > { %14911 = vmatprep.mubr.bf16.mxu0 %v2832_v8 }
 0x25e   : > { %14912 = vmatmul.mubr.bf16.gmra.mrb[28].mxu0 %v2836_v56 }
 0x25f   : > { %14915 = vmatprep.mubr.bf16.mxu0 %v2845_v27 }
 0x266   : > { %14916 = vmatmul.mubr.bf16.gmra.mrb[32].mxu0 %v2854_v49 }
 0x267   : > { %14935 = vmatprep.mubr.bf16.mxu0 %v3154_v0 }
 0x26e   : > { %14936 = vmatmul.mubr.bf16.vlgmr.msra.gmra.mrb[0].mxu0 %v3156_v19 }
 0x26f   : > { %14939 = vmatprep.mubr.bf16.mxu0 %v3158_v58 }
 0x276   : > { %14940 = vmatmul.mubr.bf16.gmra.mrb[4].mxu0 %v3160_v5 }
 0x277   : > { %14943 = vmatprep.mubr.bf16.mxu0 %v3162_v38 }
 0x27e   : > { %14944 = vmatmul.mubr.bf16.gmra.mrb[8].mxu0 %v3164_v2 }
 0x27f   : > { %14947 = vmatprep.mubr.bf16.mxu0 %v3166_v44 }
 0x286   : > { %14948 = vmatmul.mubr.bf16.gmra.mrb[12].mxu0 %v3168_v35 }
 0x287   : > { %14951 = vmatprep.mubr.bf16.mxu0 %v3170_v22 }
 0x28e   : > { %14952 = vmatmul.mubr.bf16.gmra.mrb[16].mxu0 %v3172_v25 }
 0x28f   : > { %14955 = vmatprep.mubr.bf16.mxu0 %v3174_v36 }
 0x296   : > { %14956 = vmatmul.mubr.bf16.gmra.mrb[20].mxu0 %v3176_v48 }
 0x297   : > { %14959 = vmatprep.mubr.bf16.mxu0 %v3178_v40 }
 0x29e   : > { %14960 = vmatmul.mubr.bf16.gmra.mrb[24].mxu0 %v3180_v28 }
 0x29f   : > { %14963 = vmatprep.mubr.bf16.mxu0 %v3182_v62 }
 0x2a6   : > { %14964 = vmatmul.mubr.bf16.gmra.mrb[28].mxu0 %v3184_v53 }
 0x2a7   : > { %14967 = vmatprep.mubr.bf16.mxu0 %v3186_v51 }
 0x2ae   : > { %14968 = vmatmul.mubr.bf16.gmra.mrb[32].mxu0 %v3188_v7 }
 0x341   : > { %v14937_v20 = vpop.f32.mrb[0].mxu0 }
 0x342   : > { %v3477_v8 = vadd.f32 %v14937_v20, %v18513_v24  ;;  %v3289_v55 = vpop.f32.mrb[1].mxu0 }
 0x343   : > { %v3475_v63 = vadd.f32 %v18513_v24, %v3289_v55  ;;  %v14938_v43 = vpop.f32.mrb[2].mxu0 }
 0x344   : > { %v3549_v60 = vmul.f32 0.01, %v3477_v8  ;;  %v3478_v3 = vadd.f32 %v14938_v43, %v18513_v24  ;;  %v3292_v14 = vpop.f32.mrb[3].mxu0  ;;  %vm3513_vm6 = vcmp.ge.f32.partialorder %v3477_v8, 0.0 }
 0x345   : > { %v3476_v56 = vadd.f32 %v18513_v24, %v3292_v14  ;;  %v3547_v45 = vmul.f32 0.01, %v3475_v63  ;;  %vm3511_vm7 = vcmp.ge.f32.partialorder %v3475_v63, 0.0 }
 0x346   : > { %v3550_v59 = vmul.f32 0.01, %v3478_v3  ;;  %vm3514_vm8 = vcmp.ge.f32.partialorder %v3478_v3, 0.0  ;;  %v3585_v10 = vsel %vm3513_vm6, %v3477_v8, %v3549_v60 }
 0x347   : > { %vm3512_vm9 = vcmp.ge.f32.partialorder %v3476_v56, 0.0  ;;  %v3548_v27 = vmul.f32 0.01, %v3476_v56  ;;  %v3583_v49 = vsel %vm3511_vm7, %v3475_v63, %v3547_v45 }
 0x348   : > { %v3586_v1 = vsel %vm3514_vm8, %v3478_v3, %v3550_v59 }
 0x349   : > { %v14941_v46 = vpop.f32.mrb[4].mxu0  ;;  %v3584_v0 = vsel %vm3512_vm9, %v3476_v56, %v3548_v27  ;;  %v3720_v26 = vpack.c.bf16 %v3586_v1, %v3585_v10 }
 0x34a   : > { %v3481_v50 = vadd.f32 %v14941_v46, %v18513_v24  ;;  %v3305_v19 = vpop.f32.mrb[5].mxu0  ;;  %v3719_v58 = vpack.c.bf16 %v3584_v0, %v3583_v49 }
 0x34b   : > { %v3479_v13 = vadd.f32 %v18513_v24, %v3305_v19  ;;  %v14942_v32 = vpop.f32.mrb[6].mxu0 }
 0x34c   : > { %v3553_v5 = vmul.f32 0.01, %v3481_v50  ;;  %v3482_v38 = vadd.f32 %v14942_v32, %v18513_v24  ;;  %v3308_v34 = vpop.f32.mrb[7].mxu0  ;;  %4193 = vmatpush1.bf16.msra.mxu1 %v3719_v58  ;;  %vm3517_vm10 = vcmp.ge.f32.partialorder %v3481_v50, 0.0 }
 0x34d   : > { %v3551_v23 = vmul.f32 0.01, %v3479_v13  ;;  %v3480_v11 = vadd.f32 %v18513_v24, %v3308_v34  ;;  %4194 = vmatprep.subr.bf16.mxu1 %v17570_v39  ;;  %vm3515_vm11 = vcmp.ge.f32.partialorder %v3479_v13, 0.0 }
 0x34e   : > { %v3554_v15 = vmul.f32 0.01, %v3482_v38  ;;  %vm3518_vm12 = vcmp.ge.f32.partialorder %v3482_v38, 0.0  ;;  %v3589_v44 = vsel %vm3517_vm10, %v3481_v50, %v3553_v5 }
 0x34f   : > { %v3552_v2 = vmul.f32 0.01, %v3480_v11  ;;  %vm3516_vm13 = vcmp.ge.f32.partialorder %v3480_v11, 0.0  ;;  %v3587_v18 = vsel %vm3515_vm11, %v3479_v13, %v3551_v23 }
 0x350   : > { %4195 = vmatpush1.bf16.msra.mxu1 %v3720_v26  ;;  %v3590_v21 = vsel %vm3518_vm12, %v3482_v38, %v3554_v15 }
 0x351   : > { %v14945_v9 = vpop.f32.mrb[8].mxu0  ;;  %4196 = vmatprep.subr.bf16.mxu1 %v17570_v39  ;;  %v3588_v54 = vsel %vm3516_vm13, %v3480_v11, %v3552_v2  ;;  %v3722_v35 = vpack.c.bf16 %v3590_v21, %v3589_v44 }
 0x352   : > { %v3485_v22 = vadd.f32 %v14945_v9, %v18513_v24  ;;  %v3321_v47 = vpop.f32.mrb[9].mxu0  ;;  %v3721_v6 = vpack.c.bf16 %v3588_v54, %v3587_v18 }
 0x353   : > { %v3483_v16 = vadd.f32 %v18513_v24, %v3321_v47  ;;  %v14946_v4 = vpop.f32.mrb[10].mxu0 }
 0x354   : > { %v3557_v25 = vmul.f32 0.01, %v3485_v22  ;;  %v3486_v36 = vadd.f32 %v14946_v4, %v18513_v24  ;;  %v3324_v61 = vpop.f32.mrb[11].mxu0  ;;  %4197 = vmatpush1.bf16.msra.mxu1 %v3721_v6  ;;  %vm3521_vm14 = vcmp.ge.f32.partialorder %v3485_v22, 0.0 }
 0x355   : > { %v3555_v30 = vmul.f32 0.01, %v3483_v16  ;;  %v3484_v37 = vadd.f32 %v18513_v24, %v3324_v61  ;;  %4198 = vmatprep.subr.bf16.mxu1 %v17570_v39  ;;  %vm3519_vm15 = vcmp.ge.f32.partialorder %v3483_v16, 0.0 }
 0x356   : > { %v3558_v31 = vmul.f32 0.01, %v3486_v36  ;;  %vm3522_vm0 = vcmp.ge.f32.partialorder %v3486_v36, 0.0  ;;  %v3593_v40 = vsel %vm3521_vm14, %v3485_v22, %v3557_v25 }
 0x357   : > { %v3556_v48 = vmul.f32 0.01, %v3484_v37  ;;  %vm3520_vm2 = vcmp.ge.f32.partialorder %v3484_v37, 0.0  ;;  %v3591_v17 = vsel %vm3519_vm15, %v3483_v16, %v3555_v30 }
 0x358   : > { %4199 = vmatpush1.bf16.msra.mxu1 %v3722_v35  ;;  %v3594_v57 = vsel %vm3522_vm0, %v3486_v36, %v3558_v31 }
 0x359   : > { %v14949_v42 = vpop.f32.mrb[12].mxu0  ;;  %4200 = vmatprep.subr.bf16.mxu1 %v17570_v39  ;;  %v3592_v28 = vsel %vm3520_vm2, %v3484_v37, %v3556_v48  ;;  %v3724_v62 = vpack.c.bf16 %v3594_v57, %v3593_v40 }
 0x35a   : > { %v3489_v33 = vadd.f32 %v14949_v42, %v18513_v24  ;;  %v3337_v41 = vpop.f32.mrb[13].mxu0  ;;  %v3723_v53 = vpack.c.bf16 %v3592_v28, %v3591_v17 }
 0x35b   : > { %v3487_v51 = vadd.f32 %v18513_v24, %v3337_v41  ;;  %v14950_v12 = vpop.f32.mrb[14].mxu0 }
 0x35c   : > { %v3561_v7 = vmul.f32 0.01, %v3489_v33  ;;  %v3490_v29 = vadd.f32 %v14950_v12, %v18513_v24  ;;  %v3340_v20 = vpop.f32.mrb[15].mxu0  ;;  %4201 = vmatpush1.bf16.msra.mxu1 %v3723_v53  ;;  %vm3525_vm4 = vcmp.ge.f32.partialorder %v3489_v33, 0.0 }
 0x35d   : > { %v3559_v8 = vmul.f32 0.01, %v3487_v51  ;;  %v3488_v55 = vadd.f32 %v18513_v24, %v3340_v20  ;;  %4202 = vmatprep.subr.bf16.mxu1 %v17570_v39  ;;  %vm3523_vm5 = vcmp.ge.f32.partialorder %v3487_v51, 0.0 }
 0x35e   : > { %v3562_v63 = vmul.f32 0.01, %v3490_v29  ;;  %vm3526_vm6 = vcmp.ge.f32.partialorder %v3490_v29, 0.0  ;;  %v3597_v60 = vsel %vm3525_vm4, %v3489_v33, %v3561_v7 }
 0x35f   : > { %v3560_v43 = vmul.f32 0.01, %v3488_v55  ;;  %vm3524_vm7 = vcmp.ge.f32.partialorder %v3488_v55, 0.0  ;;  %v3595_v56 = vsel %vm3523_vm5, %v3487_v51, %v3559_v8 }
 0x360   : > { %4203 = vmatpush1.bf16.msra.mxu1 %v3724_v62  ;;  %v3598_v3 = vsel %vm3526_vm6, %v3490_v29, %v3562_v63 }
 0x361   : > { %v14953_v14 = vpop.f32.mrb[16].mxu0  ;;  %4204 = vmatprep.subr.bf16.mxu1 %v17570_v39  ;;  %v3596_v45 = vsel %vm3524_vm7, %v3488_v55, %v3560_v43  ;;  %v3726_v59 = vpack.c.bf16 %v3598_v3, %v3597_v60 }
 0x362   : > { %v3493_v27 = vadd.f32 %v14953_v14, %v18513_v24  ;;  %v3353_v10 = vpop.f32.mrb[17].mxu0  ;;  %v3725_v1 = vpack.c.bf16 %v3596_v45, %v3595_v56 }
 0x363   : > { %v3491_v46 = vadd.f32 %v18513_v24, %v3353_v10  ;;  %v14954_v49 = vpop.f32.mrb[18].mxu0 }
 0x364   : > { %v3565_v0 = vmul.f32 0.01, %v3493_v27  ;;  %v3494_v26 = vadd.f32 %v14954_v49, %v18513_v24  ;;  %v3356_v50 = vpop.f32.mrb[19].mxu0  ;;  %4205 = vmatpush1.bf16.msra.mxu1 %v3725_v1  ;;  %vm3529_vm8 = vcmp.ge.f32.partialorder %v3493_v27, 0.0 }
 0x365   : > { %v3563_v19 = vmul.f32 0.01, %v3491_v46  ;;  %v3492_v58 = vadd.f32 %v18513_v24, %v3356_v50  ;;  %4206 = vmatprep.subr.bf16.mxu1 %v17570_v39  ;;  %vm3527_vm9 = vcmp.ge.f32.partialorder %v3491_v46, 0.0 }
 0x366   : > { %v3566_v13 = vmul.f32 0.01, %v3494_v26  ;;  %vm3530_vm10 = vcmp.ge.f32.partialorder %v3494_v26, 0.0  ;;  %v3601_v5 = vsel %vm3529_vm8, %v3493_v27, %v3565_v0 }
 0x367   : > { %v3564_v32 = vmul.f32 0.01, %v3492_v58  ;;  %vm3528_vm11 = vcmp.ge.f32.partialorder %v3492_v58, 0.0  ;;  %v3599_v23 = vsel %vm3527_vm9, %v3491_v46, %v3563_v19 }
 0x368   : > { %4207 = vmatpush1.bf16.msra.mxu1 %v3726_v59  ;;  %v3602_v38 = vsel %vm3530_vm10, %v3494_v26, %v3566_v13 }
 0x369   : > { %v14957_v34 = vpop.f32.mrb[20].mxu0  ;;  %4208 = vmatprep.subr.bf16.mxu1 %v17570_v39  ;;  %v3600_v11 = vsel %vm3528_vm11, %v3492_v58, %v3564_v32  ;;  %v3728_v15 = vpack.c.bf16 %v3602_v38, %v3601_v5 }
 0x36a   : > { %v3497_v2 = vadd.f32 %v14957_v34, %v18513_v24  ;;  %v3369_v44 = vpop.f32.mrb[21].mxu0  ;;  %v3727_v21 = vpack.c.bf16 %v3600_v11, %v3599_v23 }
 0x36b   : > { %v3495_v9 = vadd.f32 %v18513_v24, %v3369_v44  ;;  %v14958_v18 = vpop.f32.mrb[22].mxu0 }
 0x36c   : > { %v3569_v54 = vmul.f32 0.01, %v3497_v2  ;;  %v3498_v35 = vadd.f32 %v14958_v18, %v18513_v24  ;;  %v3372_v22 = vpop.f32.mrb[23].mxu0  ;;  %4209 = vmatpush1.bf16.msra.mxu1 %v3727_v21  ;;  %vm3533_vm12 = vcmp.ge.f32.partialorder %v3497_v2, 0.0 }
 0x36d   : > { %v3567_v47 = vmul.f32 0.01, %v3495_v9  ;;  %v3496_v6 = vadd.f32 %v18513_v24, %v3372_v22  ;;  %4210 = vmatprep.subr.bf16.mxu1 %v17570_v39  ;;  %vm3531_vm13 = vcmp.ge.f32.partialorder %v3495_v9, 0.0 }
 0x36e   : > { %v3570_v16 = vmul.f32 0.01, %v3498_v35  ;;  %vm3534_vm14 = vcmp.ge.f32.partialorder %v3498_v35, 0.0  ;;  %v3605_v25 = vsel %vm3533_vm12, %v3497_v2, %v3569_v54  ;;  %v17015_v54 = vld [vmem:[%s21379_s7] ss:$12 sps:$4 sm:$0xff]  }
 0x36f   : > { %v3568_v4 = vmul.f32 0.01, %v3496_v6  ;;  %vm3532_vm15 = vcmp.ge.f32.partialorder %v3496_v6, 0.0  ;;  %v3603_v30 = vsel %vm3531_vm13, %v3495_v9, %v3567_v47  ;;  %v17018_v47 = vld [vmem:[%s21379_s7 + $0x1c] ss:$12 sps:$4 sm:$0xff]  }
 0x370   : > { %4211 = vmatpush1.bf16.msra.mxu1 %v3728_v15  ;;  %v3606_v36 = vsel %vm3534_vm14, %v3498_v35, %v3570_v16  ;;  %vm17572_vm14 = vmmov 0  }
 0x371   : > { %v14961_v61 = vpop.f32.mrb[24].mxu0  ;;  %4212 = vmatprep.subr.bf16.mxu1 %v17570_v39  ;;  %v3604_v37 = vsel %vm3532_vm15, %v3496_v6, %v3568_v4  ;;  %v3730_v31 = vpack.c.bf16 %v3606_v36, %v3605_v25  ;;  %v17020_v25 = vld [vmem:[%s21379_s7 + $0x18] ss:$12 sps:$4 sm:$0xff]   ;;  %v17021_v36 = vld [vmem:[%s21379_s7 + $0x34] ss:$12 sps:$4 sm:$0xff]   ;;  %15307 = vmatprep.mubr.msk.bf16.mxu0 %vm17572_vm14, %v17571_v52  ;;  %vm4112_vm15 = vcmask 244736  }
 0x372   : > { %v3501_v48 = vadd.f32 %v14961_v61, %v18513_v24  ;;  %v3385_v40 = vpop.f32.mrb[25].mxu0  ;;  %v3729_v57 = vpack.c.bf16 %v3604_v37, %v3603_v30  ;;  %v17023_v61 = vld [vmem:[%s21379_s7 + $0x30] ss:$12 sps:$4 sm:$0xff]   ;;  %v17024_v30 = vld [vmem:[%s21379_s7 + $0x4c] ss:$12 sps:$4 sm:$0xff]  }
 0x373   : > { %v3499_v42 = vadd.f32 %v18513_v24, %v3385_v40  ;;  %v14962_v17 = vpop.f32.mrb[26].mxu0  ;;  %v17026_v37 = vld [vmem:[%s21379_s7 + $0x48] ss:$12 sps:$4 sm:$0xff]  }
 0x374   : > { %v3573_v28 = vmul.f32 0.01, %v3501_v48  ;;  %v3502_v62 = vadd.f32 %v14962_v17, %v18513_v24  ;;  %v3388_v33 = vpop.f32.mrb[27].mxu0  ;;  %4213 = vmatpush1.bf16.msra.mxu1 %v3729_v57  ;;  %vm3537_vm0 = vcmp.ge.f32.partialorder %v3501_v48, 0.0  ;;  %v17030_v40 = vld [vmem:[%s21379_s7 + $0x7c] ss:$12 sps:$4 sm:$0xff]  }
 0x375   : > { %v3571_v41 = vmul.f32 0.01, %v3499_v42  ;;  %v3500_v53 = vadd.f32 %v18513_v24, %v3388_v33  ;;  %4214 = vmatprep.subr.bf16.mxu1 %v17570_v39  ;;  %vm3535_vm2 = vcmp.ge.f32.partialorder %v3499_v42, 0.0  ;;  %v17032_v57 = vld [vmem:[%s21379_s7 + $0x78] ss:$12 sps:$4 sm:$0xff]  }
 0x376   : > { %v3574_v51 = vmul.f32 0.01, %v3502_v62  ;;  %vm3538_vm4 = vcmp.ge.f32.partialorder %v3502_v62, 0.0  ;;  %v3609_v7 = vsel %vm3537_vm0, %v3501_v48, %v3573_v28  ;;  %v17029_v48 = vld [vmem:[%s21379_s7 + $0x60] ss:$12 sps:$4 sm:$0xff]  }
 0x377   : > { %v3572_v12 = vmul.f32 0.01, %v3500_v53  ;;  %vm3536_vm5 = vcmp.ge.f32.partialorder %v3500_v53, 0.0  ;;  %v3607_v8 = vsel %vm3535_vm2, %v3499_v42, %v3571_v41  ;;  %v17033_v42 = vld [vmem:[%s21379_s7 + $0x94] ss:$12 sps:$4 sm:$0xff]  }
 0x378   : > { %4215 = vmatpush1.bf16.msra.mxu1 %v3730_v31  ;;  %v3610_v29 = vsel %vm3538_vm4, %v3502_v62, %v3574_v51  ;;  %v17027_v31 = vld [vmem:[%s21379_s7 + $0x64] ss:$12 sps:$4 sm:$0xff]   ;;  %v17036_v28 = vld [vmem:[%s21379_s7 + $0xac] ss:$12 sps:$4 sm:$0xff]   ;;  %v17038_v62 = vld [vmem:[%s21379_s7 + $0xa8] ss:$12 sps:$4 sm:$0xff]  }
 0x379   : > { %v14965_v20 = vpop.f32.mrb[28].mxu0  ;;  %4216 = vmatprep.subr.bf16.mxu1 %v17570_v39  ;;  %v3608_v55 = vsel %vm3536_vm5, %v3500_v53, %v3572_v12  ;;  %v3732_v63 = vpack.c.bf16 %v3610_v29, %v3609_v7  ;;  %v17035_v17 = vld [vmem:[%s21379_s7 + $0x90] ss:$12 sps:$4 sm:$0xff]   ;;  %v17041_v41 = vld [vmem:[%s21379_s7 + $0xc0] ss:$12 sps:$4 sm:$0xff]  }
 0x37a   : > { %v3505_v43 = vadd.f32 %v14965_v20, %v18513_v24  ;;  %v3401_v60 = vpop.f32.mrb[29].mxu0  ;;  %v3731_v3 = vpack.c.bf16 %v3608_v55, %v3607_v8  ;;  %v17039_v33 = vld [vmem:[%s21379_s7 + $0xc4] ss:$12 sps:$4 sm:$0xff]   ;;  %v17042_v53 = vld [vmem:[%s21379_s7 + $0xdc] ss:$12 sps:$4 sm:$0xff]  }
 0x37b   : > { %v3503_v14 = vadd.f32 %v18513_v24, %v3401_v60  ;;  %v14966_v56 = vpop.f32.mrb[30].mxu0  ;;  %v17044_v51 = vld [vmem:[%s21379_s7 + $0xd8] ss:$12 sps:$4 sm:$0xff]   ;;  %v17045_v12 = vld [vmem:[%s21379_s7 + $0xf4] ss:$12 sps:$4 sm:$0xff]  }
 0x37c   : > { %v3577_v45 = vmul.f32 0.01, %v3505_v43  ;;  %v3506_v59 = vadd.f32 %v14966_v56, %v18513_v24  ;;  %v3404_v27 = vpop.f32.mrb[31].mxu0  ;;  %4217 = vmatpush1.bf16.msra.mxu1 %v3731_v3  ;;  %vm3541_vm6 = vcmp.ge.f32.partialorder %v3505_v43, 0.0  ;;  %v17047_v7 = vld [vmem:[%s21379_s7 + $0xf0] ss:$12 sps:$4 sm:$0xff]  }
 0x37d   : > { %v3575_v10 = vmul.f32 0.01, %v3503_v14  ;;  %v3504_v1 = vadd.f32 %v18513_v24, %v3404_v27  ;;  %4218 = vmatprep.subr.bf16.mxu1 %v17570_v39  ;;  %vm3539_vm7 = vcmp.ge.f32.partialorder %v3503_v14, 0.0  ;;  %v17048_v29 = vld [vmem:[%s21379_s7 + $0x10c] ss:$12 sps:$4 sm:$0xff]  }
 0x37e   : > { %v3578_v46 = vmul.f32 0.01, %v3506_v59  ;;  %vm3542_vm8 = vcmp.ge.f32.partialorder %v3506_v59, 0.0  ;;  %v3613_v0 = vsel %vm3541_vm6, %v3505_v43, %v3577_v45  ;;  %v17050_v20 = vld [vmem:[%s21379_s7 + $0x108] ss:$12 sps:$4 sm:$0xff]  }
 0x37f   : > { %v3576_v49 = vmul.f32 0.01, %v3504_v1  ;;  %vm3540_vm9 = vcmp.ge.f32.partialorder %v3504_v1, 0.0  ;;  %v3611_v19 = vsel %vm3539_vm7, %v3503_v14, %v3575_v10  ;;  %v17051_v8 = vld [vmem:[%s21379_s7 + $0x124] ss:$12 sps:$4 sm:$0xff]  }
 0x380   : > { %4219 = vmatpush1.bf16.msra.mxu1 %v3732_v63  ;;  %v3614_v26 = vsel %vm3542_vm8, %v3506_v59, %v3578_v46  ;;  %v17053_v55 = vld [vmem:[%s21379_s7 + $0x120] ss:$12 sps:$4 sm:$0xff]   ;;  %v17054_v63 = vld [vmem:[%s21379_s7 + $0x13c] ss:$12 sps:$4 sm:$0xff]   ;;  %v17056_v43 = vld [vmem:[%s21379_s7 + $0x138] ss:$12 sps:$4 sm:$0xff]  }
 0x381   : > { %v14969_v50 = vpop.f32.mrb[32].mxu0  ;;  %4220 = vmatprep.subr.bf16.mxu1 %v17570_v39  ;;  %v3612_v58 = vsel %vm3540_vm9, %v3504_v1, %v3576_v49  ;;  %v3734_v13 = vpack.c.bf16 %v3614_v26, %v3613_v0  ;;  %v17057_v60 = vld [vmem:[%s21379_s7 + $0x154] ss:$12 sps:$4 sm:$0xff]   ;;  %v17059_v3 = vld [vmem:[%s21379_s7 + $0x150] ss:$12 sps:$4 sm:$0xff]  }
 0x382   : > { %v3509_v32 = vadd.f32 %v14969_v50, %v18513_v24  ;;  %v3417_v5 = vpop.f32.mrb[33].mxu0  ;;  %v3733_v38 = vpack.c.bf16 %v3612_v58, %v3611_v19  ;;  %v17060_v14 = vld [vmem:[%s21379_s7 + $0x16c] ss:$12 sps:$4 sm:$0xff]   ;;  %v17062_v56 = vld [vmem:[%s21379_s7 + $0x168] ss:$12 sps:$4 sm:$0xff]  }
 0x383   : > { %v3507_v34 = vadd.f32 %v18513_v24, %v3417_v5  ;;  %v14970_v23 = vpop.f32.mrb[34].mxu0  ;;  %v17063_v45 = vld [vmem:[%s21379_s7 + $0x184] ss:$12 sps:$4 sm:$0xff]   ;;  %v17065_v59 = vld [vmem:[%s21379_s7 + $0x180] ss:$12 sps:$4 sm:$0xff]  }
 0x384   : > { %v3581_v11 = vmul.f32 0.01, %v3509_v32  ;;  %v3510_v15 = vadd.f32 %v14970_v23, %v18513_v24  ;;  %v3420_v2 = vpop.f32.mrb[35].mxu0  ;;  %4221 = vmatpush1.bf16.msra.mxu1 %v3733_v38  ;;  %vm3545_vm10 = vcmp.ge.f32.partialorder %v3509_v32, 0.0  ;;  %v17066_v27 = vld [vmem:[%s21379_s7 + $0x19c] ss:$12 sps:$4 sm:$0xff]  }
 0x385   : > { %v3579_v44 = vmul.f32 0.01, %v3507_v34  ;;  %v3508_v21 = vadd.f32 %v18513_v24, %v3420_v2  ;;  %4222 = vmatprep.subr.bf16.mxu1 %v17570_v39  ;;  %vm3543_vm11 = vcmp.ge.f32.partialorder %v3507_v34, 0.0  ;;  %v17068_v10 = vld [vmem:[%s21379_s7 + $0x198] ss:$12 sps:$4 sm:$0xff]   ;;  %v17105_v2 = vld [vmem:[%s21374_s2 + $0x48] sm:$0xff]  }
 0x386   : > { %vm3546_vm12 = vcmp.ge.f32.partialorder %v3510_v15, 0.0  ;;  %v3582_v9 = vmul.f32 0.01, %v3510_v15  ;;  %v3617_v35 = vsel %vm3545_vm10, %v3509_v32, %v3581_v11  ;;  %v17069_v1 = vld [vmem:[%s21379_s7 + $0x1b4] ss:$12 sps:$4 sm:$0xff]  }
 0x387   : > { %vm3544_vm13 = vcmp.ge.f32.partialorder %v3508_v21, 0.0  ;;  %v3580_v18 = vmul.f32 0.01, %v3508_v21  ;;  %v3615_v6 = vsel %vm3543_vm11, %v3507_v34, %v3579_v44  ;;  %v17071_v46 = vld [vmem:[%s21379_s7 + $0x1b0] ss:$12 sps:$4 sm:$0xff]  }
 0x388   : > { %v3618_v22 = vsel %vm3546_vm12, %v3510_v15, %v3582_v9  ;;  %4223 = vmatpush1.bf16.msra.mxu1 %v3734_v13  ;;  %v17072_v49 = vld [vmem:[%s21379_s7 + $0x1cc] ss:$12 sps:$4 sm:$0xff]   ;;  %v17074_v0 = vld [vmem:[%s21379_s7 + $0x1c8] ss:$12 sps:$4 sm:$0xff]   ;;  %v17075_v26 = vld [vmem:[%s21379_s7 + $0x1e4] ss:$12 sps:$4 sm:$0xff]  }
 0x389   : > { %v3616_v24 = vsel %vm3544_vm13, %v3508_v21, %v3580_v18  ;;  %14971 = vmatprep.subr.bf16.mxu1 %v17571_v52  ;;  %v3736_v39 = vpack.c.bf16 %v3618_v22, %v3617_v35  ;;  %v17077_v50 = vld [vmem:[%s21379_s7 + $0x1e0] ss:$12 sps:$4 sm:$0xff]   ;;  %v17078_v19 = vld [vmem:[%s21379_s7 + $0x1fc] ss:$12 sps:$4 sm:$0xff]   ;;  %v17080_v58 = vld [vmem:[%s21379_s7 + $0x1f8] ss:$12 sps:$4 sm:$0xff]  }
 0x38a   : > { %v3735_v16 = vpack.c.bf16 %v3616_v24, %v3615_v6  ;;  %v17081_v13 = vld [vmem:[%s21379_s7 + $0x214] ss:$12 sps:$4 sm:$0xff]   ;;  %v17083_v32 = vld [vmem:[%s21379_s7 + $0x210] ss:$12 sps:$4 sm:$0xff]   ;;  %v17084_v5 = vld [vmem:[%s21379_s7 + $0x22c] ss:$12 sps:$4 sm:$0xff]  }
 0x38b   : > { %4225 = vmatmul.mubr.bf16.vlgmr.msra.gmra.mrb[0].mxu1 %v17015_v54  ;;  %v4190_v4 = vsel %vm1145_vm1, %v3736_v39, 0  ;;  %v17086_v38 = vld [vmem:[%s21379_s7 + $0x228] ss:$12 sps:$4 sm:$0xff]   ;;  %v17087_v34 = vld [vmem:[%s21379_s7 + $0x244] ss:$12 sps:$4 sm:$0xff]   ;;  %v17113_v54 = vld [vmem:[%s21374_s2 + $0x58] sm:$0xff]  }
 0x38c   : > { %14972 = vmatpush3.bf16.msra.mxu1 %v3735_v16  ;;  %4232 = vmatprep.mubr.bf16.mxu1 %v17018_v47  ;;  %v17089_v23 = vld [vmem:[%s21379_s7 + $0x240] ss:$12 sps:$4 sm:$0xff]   ;;  %v17090_v11 = vld [vmem:[%s21379_s7 + $0x8] ss:$12 sps:$4 sm:$0xff]   ;;  %v17092_v9 = vld [vmem:[%s21379_s7 + $0x38] ss:$12 sps:$4 sm:$0xff]  }
 0x38d   : > { %14973 = vmatprep.subr.bf16.mxu1 %v17571_v52  ;;  %v17101_v15 = vld [vmem:[%s21374_s2 + $0x40] sm:$0xff]   ;;  %v17109_v21 = vld [vmem:[%s21374_s2 + $0x50] sm:$0xff]   ;;  %v17120_v16 = vld [vmem:[%s21374_s2 + $0x68] sm:$0xff]   ;;  %vm8877_vm12 = vcmask 637952  }
 0x38e   : > { %v17091_v44 = vld [vmem:[%s21379_s7 + $0x20] ss:$12 sps:$4 sm:$0xff]   ;;  %v17093_v18 = vld [vmem:[%s21379_s7 + $0x50] ss:$12 sps:$4 sm:$0xff]   ;;  %v17094_v35 = vld [vmem:[%s21379_s7 + $0x68] ss:$12 sps:$4 sm:$0xff]  }
 0x38f   : > { %v17095_v22 = vld [vmem:[%s21379_s7 + $0x80] ss:$12 sps:$4 sm:$0xff]   ;;  %v17096_v47 = vld [vmem:[%s21379_s7 + $0x98] ss:$12 sps:$4 sm:$0xff]   ;;  %v17097_v24 = vld [vmem:[%s21379_s7 + $0xb0] ss:$12 sps:$4 sm:$0xff]  }
 0x390   : > { %14974 = vmatpush3.bf16.msra.mxu1 %v4190_v4  ;;  %v17117_v6 = vld [vmem:[%s21374_s2 + $0x60] sm:$0xff]   ;;  %v17098_v39 = vld [vmem:[%s21379_s7 + $0xc8] ss:$12 sps:$4 sm:$0xff]  }
 0x391   : > { %15075 = vmatprep.subr.bf16.mxu1 %v17571_v52  ;;  %v17099_v4 = vld [vmem:[%s21379_s7 + $0xe0] ss:$12 sps:$4 sm:$0xff]  }
 0x393   : > { %4233 = vmatmul.mubr.bf16.gmra.mrb[4].mxu1 %v17020_v25  ;;  %v17100_v25 = vld [vmem:[%s21379_s7 + $0xf8] ss:$12 sps:$4 sm:$0xff]  }
 0x394   : > { %4240 = vmatprep.mubr.bf16.mxu1 %v17021_v36  ;;  %v17102_v36 = vld [vmem:[%s21379_s7 + $0x110] ss:$12 sps:$4 sm:$0xff]  }
 0x39b   : > { %4241 = vmatmul.mubr.bf16.gmra.mrb[8].mxu1 %v17023_v61  ;;  %v17103_v61 = vld [vmem:[%s21379_s7 + $0x128] ss:$12 sps:$4 sm:$0xff]  }
 0x39c   : > { %4248 = vmatprep.mubr.bf16.mxu1 %v17024_v30  ;;  %v17104_v30 = vld [vmem:[%s21379_s7 + $0x140] ss:$12 sps:$4 sm:$0xff]  }
 0x3a3   : > { %4249 = vmatmul.mubr.bf16.gmra.mrb[12].mxu1 %v17026_v37  ;;  %v17121_v37 = vld [vmem:[%s21374_s2 + $0x70] sm:$0xff]  }
 0x3a4   : > { %4256 = vmatprep.mubr.bf16.mxu1 %v17027_v31  ;;  %v17106_v31 = vld [vmem:[%s21379_s7 + $0x158] ss:$12 sps:$4 sm:$0xff]  }
 0x3ab   : > { %4257 = vmatmul.mubr.bf16.gmra.mrb[16].mxu1 %v17029_v48  ;;  %v17107_v48 = vld [vmem:[%s21379_s7 + $0x170] ss:$12 sps:$4 sm:$0xff]  }
 0x3ac   : > { %4264 = vmatprep.mubr.bf16.mxu1 %v17030_v40  ;;  %v17108_v40 = vld [vmem:[%s21379_s7 + $0x188] ss:$12 sps:$4 sm:$0xff]  }
 0x3b3   : > { %4265 = vmatmul.mubr.bf16.gmra.mrb[20].mxu1 %v17032_v57  ;;  %v17122_v57 = vld [vmem:[%s21374_s2 + $0x78] sm:$0xff]  }
 0x3b4   : > { %4272 = vmatprep.mubr.bf16.mxu1 %v17033_v42  ;;  %v17110_v42 = vld [vmem:[%s21379_s7 + $0x1a0] ss:$12 sps:$4 sm:$0xff]  }
 0x3bb   : > { %4273 = vmatmul.mubr.bf16.gmra.mrb[24].mxu1 %v17035_v17  ;;  %v17111_v17 = vld [vmem:[%s21379_s7 + $0x1b8] ss:$12 sps:$4 sm:$0xff]  }
 0x3bc   : > { %4280 = vmatprep.mubr.bf16.mxu1 %v17036_v28  ;;  %v17112_v28 = vld [vmem:[%s21379_s7 + $0x1d0] ss:$12 sps:$4 sm:$0xff]  }
 0x3c3   : > { %4281 = vmatmul.mubr.bf16.gmra.mrb[28].mxu1 %v17038_v62  ;;  %v17114_v62 = vld [vmem:[%s21379_s7 + $0x1e8] ss:$12 sps:$4 sm:$0xff]  }
 0x3c4   : > { %4288 = vmatprep.mubr.bf16.mxu1 %v17039_v33  ;;  %v17115_v33 = vld [vmem:[%s21379_s7 + $0x200] ss:$12 sps:$4 sm:$0xff]  }
 0x3cb   : > { %4289 = vmatmul.mubr.bf16.gmra.mrb[32].mxu1 %v17041_v41  ;;  %v17116_v41 = vld [vmem:[%s21379_s7 + $0x218] ss:$12 sps:$4 sm:$0xff]  }
 0x3cc   : > { %4296 = vmatprep.mubr.bf16.mxu1 %v17042_v53  ;;  %v17118_v53 = vld [vmem:[%s21379_s7 + $0x230] ss:$12 sps:$4 sm:$0xff]  }
 0x3d3   : > { %4297 = vmatmul.mubr.bf16.gmra.mrb[36].mxu1 %v17044_v51  ;;  %v17119_v51 = vld [vmem:[%s21379_s7 + $0x248] ss:$12 sps:$4 sm:$0xff]  }
 0x3d4   : > { %4304 = vmatprep.mubr.bf16.mxu1 %v17045_v12 }
 0x3db   : > { %4305 = vmatmul.mubr.bf16.gmra.mrb[40].mxu1 %v17047_v7 }
 0x3dc   : > { %4312 = vmatprep.mubr.bf16.mxu1 %v17048_v29 }
 0x3e3   : > { %4313 = vmatmul.mubr.bf16.gmra.mrb[44].mxu1 %v17050_v20 }
 0x3e4   : > { %4320 = vmatprep.mubr.bf16.mxu1 %v17051_v8 }
 0x3eb   : > { %4321 = vmatmul.mubr.bf16.gmra.mrb[48].mxu1 %v17053_v55  ;;  %v17136_v55 = vld [vmem:[%s21374_s2 + $0x180] sm:$0xff]  }
 0x3ec   : > { %4328 = vmatprep.mubr.bf16.mxu1 %v17054_v63  ;;  %15292 = vmatpush3.bf16.msra.mxu0 %v17136_v55  ;;  %v17126_v55 = vld [vmem:[%s21374_s2 + $0x18] sm:$0xff]  }
 0x3ed   : > { %15293 = vmatprep.subr.bf16.mxu0 %v17571_v52 }
 0x3f3   : > { %4329 = vmatmul.mubr.bf16.gmra.mrb[52].mxu1 %v17056_v43  ;;  %v17138_v43 = vld [vmem:[%s21374_s2 + $0x188] sm:$0xff]  }
 0x3f4   : > { %4336 = vmatprep.mubr.bf16.mxu1 %v17057_v60  ;;  %15294 = vmatpush3.bf16.msra.mxu0 %v17138_v43 }
 0x3f5   : > { %15295 = vmatprep.subr.bf16.mxu0 %v17571_v52 }
 0x3fb   : > { %4337 = vmatmul.mubr.bf16.gmra.mrb[56].mxu1 %v17059_v3 }
 0x3fc   : > { %4344 = vmatprep.mubr.bf16.mxu1 %v17060_v14 }
 0x403   : > { %4345 = vmatmul.mubr.bf16.gmra.mrb[60].mxu1 %v17062_v56 }
 0x404   : > { %4352 = vmatprep.mubr.bf16.mxu1 %v17063_v45  ;;  %v17140_v45 = vld [vmem:[%s21374_s2 + $0x190] sm:$0xff]  }
 0x405   : > { %15296 = vmatpush3.bf16.msra.mxu0 %v17140_v45  ;;  %v17127_v45 = vld [vmem:[%s21374_s2 + $0x20] sm:$0xff]  }
 0x406   : > { %15297 = vmatprep.subr.bf16.mxu0 %v17571_v52 }
 0x40b   : > { %4353 = vmatmul.mubr.bf16.gmra.mrb[64].mxu1 %v17065_v59 }
 0x40c   : > { %4360 = vmatprep.mubr.bf16.mxu1 %v17066_v27  ;;  %v17142_v27 = vld [vmem:[%s21374_s2 + $0x198] sm:$0xff]  }
 0x40d   : > { %15298 = vmatpush3.bf16.msra.mxu0 %v17142_v27 }
 0x40e   : > { %15299 = vmatprep.subr.bf16.mxu0 %v17571_v52 }
 0x413   : > { %4361 = vmatmul.mubr.bf16.gmra.mrb[68].mxu1 %v17068_v10 }
 0x414   : > { %4368 = vmatprep.mubr.bf16.mxu1 %v17069_v1 }
 0x41b   : > { %4369 = vmatmul.mubr.bf16.gmra.mrb[72].mxu1 %v17071_v46 }
 0x41c   : > { %4376 = vmatprep.mubr.bf16.mxu1 %v17072_v49 }
 0x423   : > { %4377 = vmatmul.mubr.bf16.gmra.mrb[76].mxu1 %v17074_v0  ;;  %v17143_v0 = vld [vmem:[%s21374_s2 + $0x1a0] sm:$0xff]  }
 0x424   : > { %4384 = vmatprep.mubr.bf16.mxu1 %v17075_v26  ;;  %15300 = vmatpush3.bf16.msra.mxu0 %v17143_v0 }
 0x425   : > { %15301 = vmatprep.subr.bf16.mxu0 %v17571_v52 }
 0x42b   : > { %4385 = vmatmul.mubr.bf16.gmra.mrb[80].mxu1 %v17077_v50  ;;  %v17145_v50 = vld [vmem:[%s21374_s2 + $0x1a8] sm:$0xff]  }
 0x42c   : > { %4392 = vmatprep.mubr.bf16.mxu1 %v17078_v19  ;;  %15302 = vmatpush3.bf16.msra.mxu0 %v17145_v50  ;;  %v17128_v50 = vld [vmem:[%s21374_s2 + $0x28] sm:$0xff]  }
 0x42d   : > { %15303 = vmatprep.subr.bf16.mxu0 %v17571_v52 }
 0x433   : > { %4393 = vmatmul.mubr.bf16.gmra.mrb[84].mxu1 %v17080_v58 }
 0x434   : > { %4400 = vmatprep.mubr.bf16.mxu1 %v17081_v13 }
 0x43b   : > { %4401 = vmatmul.mubr.bf16.gmra.mrb[88].mxu1 %v17083_v32 }
 0x43c   : > { %4408 = vmatprep.mubr.bf16.mxu1 %v17084_v5 }
 0x443   : > { %4409 = vmatmul.mubr.bf16.gmra.mrb[92].mxu1 %v17086_v38 }
 0x444   : > { %4416 = vmatprep.mubr.bf16.mxu1 %v17087_v34 }
 0x44b   : > { %4417 = vmatmul.mubr.bf16.gmra.mrb[96].mxu1 %v17089_v23  ;;  %v17147_v23 = vld [vmem:[%s21374_s2 + $0x1b0] sm:$0xff]  }
 0x44c   : > { %14975 = vmatprep.mubr.msk.bf16.mxu1 %vm17572_vm14, %v17571_v52  ;;  %15304 = vmatpush3.bf16.msra.mxu0 %v17147_v23 }
 0x44d   : > { %15305 = vmatprep.subr.bf16.mxu0 %v17571_v52 }
 0x453   : > { %14976 = vmatmul.mubr.msk.bf16.vlgmr.msra.gmra.mrb[0].mxu1 %vm4112_vm15, %v17090_v11 }
 0x454   : > { %14979 = vmatprep.mubr.msk.bf16.mxu1 %vm17572_vm14, %v17571_v52  ;;  %15076 = vmatpush3.bf16.msra.mxu1 %v17101_v15  ;;  %v17149_v15 = vld [vmem:[%s21374_s2 + $0x1b8] sm:$0xff]  }
 0x455   : > { %15077 = vmatprep.subr.bf16.mxu1 %v17571_v52  ;;  %15306 = vmatpush3.bf16.msra.mxu0 %v17149_v15  ;;  %v17129_v15 = vld [vmem:[%s21374_s2 + $0x30] sm:$0xff]  }
 0x456   : > { %15363 = vmatprep.subr.bf16.mxu0 %v17571_v52 }
 0x458   : > { %15078 = vmatpush3.bf16.msra.mxu1 %v17105_v2 }
 0x459   : > { %15079 = vmatprep.subr.bf16.mxu1 %v17571_v52 }
 0x45b   : > { %14980 = vmatmul.mubr.msk.bf16.gmra.mrb[4].mxu1 %vm4112_vm15, %v17091_v44 }
 0x45c   : > { %14983 = vmatprep.mubr.msk.bf16.mxu1 %vm17572_vm14, %v17571_v52  ;;  %15080 = vmatpush3.bf16.msra.mxu1 %v17109_v21 }
 0x45d   : > { %15081 = vmatprep.subr.bf16.mxu1 %v17571_v52 }
 0x460   : > { %15082 = vmatpush3.bf16.msra.mxu1 %v17113_v54 }
 0x461   : > { %15083 = vmatprep.subr.bf16.mxu1 %v17571_v52 }
 0x463   : > { %14984 = vmatmul.mubr.msk.bf16.gmra.mrb[8].mxu1 %vm4112_vm15, %v17092_v9 }
 0x464   : > { %14987 = vmatprep.mubr.msk.bf16.mxu1 %vm17572_vm14, %v17571_v52  ;;  %15084 = vmatpush3.bf16.msra.mxu1 %v17117_v6 }
 0x465   : > { %15085 = vmatprep.subr.bf16.mxu1 %v17571_v52 }
 0x468   : > { %15086 = vmatpush3.bf16.msra.mxu1 %v17120_v16 }
 0x469   : > { %15087 = vmatprep.subr.bf16.mxu1 %v17571_v52 }
 0x46b   : > { %14988 = vmatmul.mubr.msk.bf16.gmra.mrb[12].mxu1 %vm4112_vm15, %v17093_v18 }
 0x46c   : > { %14991 = vmatprep.mubr.msk.bf16.mxu1 %vm17572_vm14, %v17571_v52  ;;  %15088 = vmatpush3.bf16.msra.mxu1 %v17121_v37  ;;  %v17123_v37 = vld [vmem:[%s21374_s2] sm:$0xff]  }
 0x46d   : > { %15089 = vmatprep.subr.bf16.mxu1 %v17571_v52 }
 0x470   : > { %15090 = vmatpush3.bf16.msra.mxu1 %v17122_v57 }
 0x471   : > { %15111 = vmatprep.subr.bf16.mxu1 %v17571_v52 }
 0x473   : > { %14992 = vmatmul.mubr.msk.bf16.gmra.mrb[16].mxu1 %vm4112_vm15, %v17094_v35 }
 0x474   : > { %14995 = vmatprep.mubr.msk.bf16.mxu1 %vm17572_vm14, %v17571_v52 }
 0x47b   : > { %14996 = vmatmul.mubr.msk.bf16.gmra.mrb[20].mxu1 %vm4112_vm15, %v17095_v22 }
 0x47c   : > { %14999 = vmatprep.mubr.msk.bf16.mxu1 %vm17572_vm14, %v17571_v52 }
 0x483   : > { %15000 = vmatmul.mubr.msk.bf16.gmra.mrb[24].mxu1 %vm4112_vm15, %v17096_v47 }
 0x484   : > { %15003 = vmatprep.mubr.msk.bf16.mxu1 %vm17572_vm14, %v17571_v52 }
 0x48b   : > { %15004 = vmatmul.mubr.msk.bf16.gmra.mrb[28].mxu1 %vm4112_vm15, %v17097_v24 }
 0x48c   : > { %15007 = vmatprep.mubr.msk.bf16.mxu1 %vm17572_vm14, %v17571_v52 }
 0x493   : > { %15008 = vmatmul.mubr.msk.bf16.gmra.mrb[32].mxu1 %vm4112_vm15, %v17098_v39 }
 0x494   : > { %15011 = vmatprep.mubr.msk.bf16.mxu1 %vm17572_vm14, %v17571_v52 }
 0x49b   : > { %15012 = vmatmul.mubr.msk.bf16.gmra.mrb[36].mxu1 %vm4112_vm15, %v17099_v4 }
 0x49c   : > { %15015 = vmatprep.mubr.msk.bf16.mxu1 %vm17572_vm14, %v17571_v52 }
 0x4a3   : > { %15016 = vmatmul.mubr.msk.bf16.gmra.mrb[40].mxu1 %vm4112_vm15, %v17100_v25 }
 0x4a4   : > { %15019 = vmatprep.mubr.msk.bf16.mxu1 %vm17572_vm14, %v17571_v52 }
 0x4ab   : > { %15020 = vmatmul.mubr.msk.bf16.gmra.mrb[44].mxu1 %vm4112_vm15, %v17102_v36 }
 0x4ac   : > { %15023 = vmatprep.mubr.msk.bf16.mxu1 %vm17572_vm14, %v17571_v52 }
 0x4b3   : > { %15024 = vmatmul.mubr.msk.bf16.gmra.mrb[48].mxu1 %vm4112_vm15, %v17103_v61 }
 0x4b4   : > { %15027 = vmatprep.mubr.msk.bf16.mxu1 %vm17572_vm14, %v17571_v52 }
 0x4bb   : > { %15028 = vmatmul.mubr.msk.bf16.gmra.mrb[52].mxu1 %vm4112_vm15, %v17104_v30 }
 0x4bc   : > { %15031 = vmatprep.mubr.msk.bf16.mxu1 %vm17572_vm14, %v17571_v52 }
 0x4c3   : > { %15032 = vmatmul.mubr.msk.bf16.gmra.mrb[56].mxu1 %vm4112_vm15, %v17106_v31 }
 0x4c4   : > { %15035 = vmatprep.mubr.msk.bf16.mxu1 %vm17572_vm14, %v17571_v52 }
 0x4cb   : > { %15036 = vmatmul.mubr.msk.bf16.gmra.mrb[60].mxu1 %vm4112_vm15, %v17107_v48 }
 0x4cc   : > { %15039 = vmatprep.mubr.msk.bf16.mxu1 %vm17572_vm14, %v17571_v52 }
 0x4d3   : > { %15040 = vmatmul.mubr.msk.bf16.gmra.mrb[64].mxu1 %vm4112_vm15, %v17108_v40 }
 0x4d4   : > { %15043 = vmatprep.mubr.msk.bf16.mxu1 %vm17572_vm14, %v17571_v52 }
 0x4db   : > { %15044 = vmatmul.mubr.msk.bf16.gmra.mrb[68].mxu1 %vm4112_vm15, %v17110_v42 }
 0x4dc   : > { %15047 = vmatprep.mubr.msk.bf16.mxu1 %vm17572_vm14, %v17571_v52 }
 0x4e3   : > { %15048 = vmatmul.mubr.msk.bf16.gmra.mrb[72].mxu1 %vm4112_vm15, %v17111_v17  ;;  %v17124_v17 = vld [vmem:[%s21374_s2 + $0x8] sm:$0xff]  }
 0x4e4   : > { %15051 = vmatprep.mubr.msk.bf16.mxu1 %vm17572_vm14, %v17571_v52 }
 0x4eb   : > { %15052 = vmatmul.mubr.msk.bf16.gmra.mrb[76].mxu1 %vm4112_vm15, %v17112_v28 }
 0x4ec   : > { %15055 = vmatprep.mubr.msk.bf16.mxu1 %vm17572_vm14, %v17571_v52 }
 0x4f3   : > { %15056 = vmatmul.mubr.msk.bf16.gmra.mrb[80].mxu1 %vm4112_vm15, %v17114_v62 }
 0x4f4   : > { %15059 = vmatprep.mubr.msk.bf16.mxu1 %vm17572_vm14, %v17571_v52 }
 0x4fb   : > { %15060 = vmatmul.mubr.msk.bf16.gmra.mrb[84].mxu1 %vm4112_vm15, %v17115_v33 }
 0x4fc   : > { %15063 = vmatprep.mubr.msk.bf16.mxu1 %vm17572_vm14, %v17571_v52 }
 0x503   : > { %15064 = vmatmul.mubr.msk.bf16.gmra.mrb[88].mxu1 %vm4112_vm15, %v17116_v41  ;;  %v17125_v41 = vld [vmem:[%s21374_s2 + $0x10] sm:$0xff]  }
 0x504   : > { %15067 = vmatprep.mubr.msk.bf16.mxu1 %vm17572_vm14, %v17571_v52 }
 0x50b   : > { %15068 = vmatmul.mubr.msk.bf16.gmra.mrb[92].mxu1 %vm4112_vm15, %v17118_v53 }
 0x50c   : > { %15071 = vmatprep.mubr.msk.bf16.mxu1 %vm17572_vm14, %v17571_v52 }
 0x513   : > { %15072 = vmatmul.mubr.msk.bf16.gmra.mrb[96].mxu1 %vm4112_vm15, %v17119_v51 }
 0x514   : > { %15091 = vmatprep.mubr.msk.bf16.mxu1 %vm17572_vm14, %v17571_v52 }
 0x526   : > { %v18903_v12 = vpop.f32.mrb[0].mxu1 }
 0x527   : > { %4658 = vst [vmem:[#allocation2] sm:$0xff] %v18903_v12  ;;  %v14977_v7 = vpop.f32.mrb[1].mxu1 }
 0x528   : > { %v18906_v29 = vpop.f32.mrb[2].mxu1 }
 0x529   : > { %4659 = vst [vmem:[#allocation2 + $0x8] sm:$0xff] %v18906_v29  ;;  %v14978_v20 = vpop.f32.mrb[3].mxu1  ;;  %v4718_v8 = vpack.c.bf16 %v18906_v29, %v18903_v12 }
 0x52e   : > { %v18915_v63 = vpop.f32.mrb[4].mxu1 }
 0x52f   : > { %4660 = vst [vmem:[#allocation2 + $0x10] sm:$0xff] %v18915_v63  ;;  %v14981_v60 = vpop.f32.mrb[5].mxu1 }
 0x530   : > { %v18921_v3 = vpop.f32.mrb[6].mxu1 }
 0x531   : > { %4661 = vst [vmem:[#allocation2 + $0x18] sm:$0xff] %v18921_v3  ;;  %v14982_v14 = vpop.f32.mrb[7].mxu1  ;;  %v4719_v56 = vpack.c.bf16 %v18921_v3, %v18915_v63 }
 0x536   : > { %v18931_v59 = vpop.f32.mrb[8].mxu1 }
 0x537   : > { %4662 = vst [vmem:[#allocation2 + $0x20] sm:$0xff] %v18931_v59  ;;  %v14985_v10 = vpop.f32.mrb[9].mxu1 }
 0x538   : > { %v18937_v1 = vpop.f32.mrb[10].mxu1  ;;  %v18953_v58 = vld [vmem:[#allocation2 + $0x14] sm:$0xff] }
 0x539   : > { %4663 = vst [vmem:[#allocation2 + $0x28] sm:$0xff] %v18937_v1  ;;  %v14986_v46 = vpop.f32.mrb[11].mxu1  ;;  %v4720_v49 = vpack.c.bf16 %v18937_v1, %v18931_v59 }
 0x53e   : > { %v18947_v26 = vpop.f32.mrb[12].mxu1  ;;  %v18955_v13 = vld [vmem:[#allocation2 + $0x1c] sm:$0xff] }
 0x53f   : > { %4664 = vst [vmem:[#allocation2 + $0x30] sm:$0xff] %v18947_v26  ;;  %v14989_v19 = vpop.f32.mrb[13].mxu1  ;;  %v7957_v5 = vpack.c.bf16 %v18955_v13, %v18953_v58 }
 0x540   : > { %v18957_v32 = vpop.f32.mrb[14].mxu1 }
 0x541   : > { %4665 = vst [vmem:[#allocation2 + $0x38] sm:$0xff] %v18957_v32  ;;  %v14990_v38 = vpop.f32.mrb[15].mxu1  ;;  %v4721_v34 = vpack.c.bf16 %v18957_v32, %v18947_v26 }
 0x546   : > { %v18969_v11 = vpop.f32.mrb[16].mxu1 }
 0x547   : > { %4666 = vst [vmem:[#allocation2 + $0x40] sm:$0xff] %v18969_v11  ;;  %v14993_v2 = vpop.f32.mrb[17].mxu1 }
 0x548   : > { %v4494_v44 = vpop.f32.mrb[18].mxu1 }
 0x549   : > { %4667 = vst [vmem:[#allocation2 + $0x48] sm:$0xff] %v4494_v44  ;;  %v14994_v21 = vpop.f32.mrb[19].mxu1 }
 0x54e   : > { %v4499_v9 = vpop.f32.mrb[20].mxu1 }
 0x54f   : > { %4668 = vst [vmem:[#allocation2 + $0x50] sm:$0xff] %v4499_v9  ;;  %v14997_v18 = vpop.f32.mrb[21].mxu1 }
 0x550   : > { %v4502_v54 = vpop.f32.mrb[22].mxu1  ;;  %v17130_v18 = vld [vmem:[%s21374_s2 + $0x38] sm:$0xff]  }
 0x551   : > { %4669 = vst [vmem:[#allocation2 + $0x58] sm:$0xff] %v4502_v54  ;;  %v14998_v35 = vpop.f32.mrb[23].mxu1 }
 0x556   : > { %v4507_v22 = vpop.f32.mrb[24].mxu1 }
 0x557   : > { %4670 = vst [vmem:[#allocation2 + $0x60] sm:$0xff] %v4507_v22  ;;  %v15001_v47 = vpop.f32.mrb[25].mxu1 }
 0x558   : > { %v4510_v6 = vpop.f32.mrb[26].mxu1 }
 0x559   : > { %4671 = vst [vmem:[#allocation2 + $0x68] sm:$0xff] %v4510_v6  ;;  %v15002_v24 = vpop.f32.mrb[27].mxu1 }
 0x55e   : > { %v4515_v39 = vpop.f32.mrb[28].mxu1 }
 0x55f   : > { %4672 = vst [vmem:[#allocation2 + $0x70] sm:$0xff] %v4515_v39  ;;  %v15005_v16 = vpop.f32.mrb[29].mxu1 }
 0x560   : > { %v18976_v4 = vpop.f32.mrb[30].mxu1  ;;  %v4739_v61 = vld [vmem:[#allocation2 + $0x64] sm:$0xff] }
 0x561   : > { %4673 = vst [vmem:[#allocation2 + $0x78] sm:$0xff] %v18976_v4  ;;  %v15006_v25 = vpop.f32.mrb[31].mxu1 }
 0x562   : > { %v17131_v25 = vld [vmem:[%s21374_s2 + $0x80] sm:$0xff]  }
 0x566   : > { %v18979_v36 = vpop.f32.mrb[32].mxu1  ;;  %v4740_v30 = vld [vmem:[#allocation2 + $0x6c] sm:$0xff] }
 0x567   : > { %4674 = vst [vmem:[#allocation2 + $0x80] sm:$0xff] %v18979_v36  ;;  %v8120_v31 = vpack.c.bf16 %v18979_v36, %v18976_v4  ;;  %v15009_v48 = vpop.f32.mrb[33].mxu1  ;;  %v4749_v40 = vpack.c.bf16 %v4740_v30, %v4739_v61 }
 0x568   : > { %v4526_v57 = vpop.f32.mrb[34].mxu1  ;;  %v4741_v62 = vld [vmem:[#allocation2 + $0x74] sm:$0xff]  ;;  %v17132_v48 = vld [vmem:[%s21374_s2 + $0x88] sm:$0xff]  }
 0x569   : > { %4675 = vst [vmem:[#allocation2 + $0x88] sm:$0xff] %v4526_v57  ;;  %v15010_v42 = vpop.f32.mrb[35].mxu1  ;;  %15092 = vmatmul.mubr.bf16.vlgmr.msra.gmra.mrb[100].mxu1 %v4749_v40  ;;  %v17133_v57 = vld [vmem:[%s21374_s2 + $0x90] sm:$0xff]  }
 0x56a   : > { %15112 = vmatpush3.bf16.msra.mxu1 %v17123_v37  ;;  %15095 = vmatprep.mubr.msk.bf16.mxu1 %vm17572_vm14, %v17571_v52 }
 0x56b   : > { %15113 = vmatprep.subr.bf16.mxu1 %v17571_v52 }
 0x56e   : > { %v4531_v28 = vpop.f32.mrb[36].mxu1  ;;  %v4742_v33 = vld [vmem:[#allocation2 + $0x7c] sm:$0xff]  ;;  %15114 = vmatpush3.bf16.msra.mxu1 %v17124_v17 }
 0x56f   : > { %4676 = vst [vmem:[#allocation2 + $0x90] sm:$0xff] %v4531_v28  ;;  %v15013_v53 = vpop.f32.mrb[37].mxu1  ;;  %v4750_v51 = vpack.c.bf16 %v4742_v33, %v4741_v62  ;;  %15115 = vmatprep.subr.bf16.mxu1 %v17571_v52  ;;  %v17135_v28 = vld [vmem:[%s21374_s2 + $0xa0] sm:$0xff]  }
 0x570   : > { %v4534_v7 = vpop.f32.mrb[38].mxu1  ;;  %v4743_v60 = vld [vmem:[#allocation2 + $0x84] sm:$0xff] }
 0x571   : > { %4677 = vst [vmem:[#allocation2 + $0x98] sm:$0xff] %v4534_v7  ;;  %v15014_v20 = vpop.f32.mrb[39].mxu1  ;;  %15096 = vmatmul.mubr.bf16.gmra.mrb[104].mxu1 %v4750_v51  ;;  %v4717_v51 = vld [vmem:[#allocation2 + $0x48] sm:$0x3f] }
 0x572   : > { %15099 = vmatprep.mubr.msk.bf16.mxu1 %vm17572_vm14, %v17571_v52  ;;  %15116 = vmatpush3.bf16.msra.mxu1 %v17125_v41  ;;  %v17139_v41 = vld [vmem:[%s21374_s2 + $0xb0] sm:$0xff]  }
 0x573   : > { %15117 = vmatprep.subr.bf16.mxu1 %v17571_v52 }
 0x576   : > { %v4539_v43 = vpop.f32.mrb[40].mxu1  ;;  %v4744_v14 = vld [vmem:[#allocation2 + $0x8c] sm:$0xff]  ;;  %15118 = vmatpush3.bf16.msra.mxu1 %v17126_v55  ;;  %v4722_v55 = vpack.c.bf16 %v4717_v51, %v18969_v11 }
 0x577   : > { %4678 = vst [vmem:[#allocation2 + $0xa0] sm:$0xff] %v4539_v43  ;;  %v15017_v27 = vpop.f32.mrb[41].mxu1  ;;  %v4751_v10 = vpack.c.bf16 %v4744_v14, %v4743_v60  ;;  %15119 = vmatprep.subr.bf16.mxu1 %v17571_v52  ;;  %v5013_v60 = vld [vmem:[#allocation2 + $0x1] sm:$0xff] }
 0x578   : > { %v4542_v46 = vpop.f32.mrb[42].mxu1  ;;  %v4745_v38 = vld [vmem:[#allocation2 + $0x94] sm:$0xff]  ;;  %v17144_v14 = vld [vmem:[%s21374_s2 + $0xc0] sm:$0xff]  }
 0x579   : > { %4679 = vst [vmem:[#allocation2 + $0xa8] sm:$0xff] %v4542_v46  ;;  %v15018_v0 = vpop.f32.mrb[43].mxu1  ;;  %15100 = vmatmul.mubr.bf16.gmra.mrb[108].mxu1 %v4751_v10  ;;  %v17146_v46 = vld [vmem:[%s21374_s2 + $0xc8] sm:$0xff]  }
 0x57a   : > { %15103 = vmatprep.mubr.msk.bf16.mxu1 %vm17572_vm14, %v17571_v52  ;;  %15120 = vmatpush3.bf16.msra.mxu1 %v17127_v45  ;;  %v5016_v0 = vld [vmem:[#allocation2 + $0x19] sm:$0xff] }
 0x57b   : > { %15121 = vmatprep.subr.bf16.mxu1 %v17571_v52 }
 0x57e   : > { %v4547_v19 = vpop.f32.mrb[44].mxu1  ;;  %v4746_v23 = vld [vmem:[#allocation2 + $0x9c] sm:$0xff]  ;;  %15122 = vmatpush3.bf16.msra.mxu1 %v17128_v50 }
 0x57f   : > { %4680 = vst [vmem:[#allocation2 + $0xb0] sm:$0xff] %v4547_v19  ;;  %v15021_v2 = vpop.f32.mrb[45].mxu1  ;;  %v4752_v44 = vpack.c.bf16 %v4746_v23, %v4745_v38  ;;  %15123 = vmatprep.subr.bf16.mxu1 %v17571_v52  ;;  %v5015_v19 = vld [vmem:[#allocation2 + $0x11] sm:$0xff] }
 0x580   : > { %v4550_v21 = vpop.f32.mrb[46].mxu1  ;;  %v4747_v35 = vld [vmem:[#allocation2 + $0xa4] sm:$0xff]  ;;  %v17148_v38 = vld [vmem:[%s21374_s2 + $0xd0] sm:$0xff]  }
 0x581   : > { %4681 = vst [vmem:[#allocation2 + $0xb8] sm:$0xff] %v4550_v21  ;;  %v15022_v9 = vpop.f32.mrb[47].mxu1  ;;  %15104 = vmatmul.mubr.bf16.gmra.mrb[112].mxu1 %v4752_v44  ;;  %v17150_v21 = vld [vmem:[%s21374_s2 + $0xd8] sm:$0xff]  }
 0x582   : > { %15107 = vmatprep.mubr.msk.bf16.mxu1 %vm17572_vm14, %v17571_v52  ;;  %15124 = vmatpush3.bf16.msra.mxu1 %v17129_v15  ;;  %v5024_v15 = vpack.c.bf16 %v5016_v0, %v5015_v19  ;;  %v5018_v9 = vld [vmem:[#allocation2 + $0x29] sm:$0xff] }
 0x583   : > { %15125 = vmatprep.subr.bf16.mxu1 %v17571_v52 }
 0x586   : > { %v4555_v54 = vpop.f32.mrb[48].mxu1  ;;  %v4748_v22 = vld [vmem:[#allocation2 + $0xac] sm:$0x3f]  ;;  %15126 = vmatpush3.bf16.msra.mxu1 %v17130_v18 }
 0x587   : > { %4682 = vst [vmem:[#allocation2 + $0xc0] sm:$0xff] %v4555_v54  ;;  %v15025_v47 = vpop.f32.mrb[49].mxu1  ;;  %v4753_v6 = vpack.c.bf16 %v4748_v22, %v4747_v35  ;;  %15147 = vmatprep.subr.bf16.mxu1 %v17571_v52  ;;  %v5017_v54 = vld [vmem:[#allocation2 + $0x21] sm:$0xff] }
 0x588   : > { %v4558_v24 = vpop.f32.mrb[50].mxu1  ;;  %v17151_v35 = vld [vmem:[%s21374_s2 + $0xe0] sm:$0xff]   ;;  %v5025_v47 = vpack.c.bf16 %v5018_v9, %v5017_v54  ;;  %v17164_v9 = vld [vmem:[%s21374_s2 + $0x110] sm:$0xff]  }
 0x589   : > { %4683 = vst [vmem:[#allocation2 + $0xc8] sm:$0xff] %v4558_v24  ;;  %v15026_v39 = vpop.f32.mrb[51].mxu1  ;;  %15108 = vmatmul.mubr.bf16.gmra.mrb[116].mxu1 %v4753_v6 }
 0x58a   : > { %15127 = vmatprep.mubr.msk.bf16.mxu1 %vm17572_vm14, %v17571_v52 }
 0x58e   : > { %v4563_v16 = vpop.f32.mrb[52].mxu1 }
 0x58f   : > { %4684 = vst [vmem:[#allocation2 + $0xd0] sm:$0xff] %v4563_v16  ;;  %v15029_v61 = vpop.f32.mrb[53].mxu1  ;;  %v17152_v16 = vld [vmem:[%s21374_s2 + $0x200] sm:$0xff]  }
 0x590   : > { %v4566_v30 = vpop.f32.mrb[54].mxu1 }
 0x591   : > { %4685 = vst [vmem:[#allocation2 + $0xd8] sm:$0xff] %v4566_v30  ;;  %v15030_v37 = vpop.f32.mrb[55].mxu1  ;;  %15128 = vmatmul.mubr.bf16.vlgmr.msra.gmra.mrb[120].mxu1 %v4718_v8  ;;  %v17134_v8 = vld [vmem:[%s21374_s2 + $0x98] sm:$0xff]   ;;  %v17153_v30 = vld [vmem:[%s21374_s2 + $0xe8] sm:$0xff]  }
 0x592   : > { %15148 = vmatpush3.bf16.msra.mxu1 %v17131_v25  ;;  %15131 = vmatprep.mubr.msk.bf16.mxu1 %vm17572_vm14, %v17571_v52  ;;  %v5020_v37 = vld [vmem:[#allocation2 + $0x39] sm:$0xff] }
 0x593   : > { %15149 = vmatprep.subr.bf16.mxu1 %v17571_v52 }
 0x596   : > { %v4571_v40 = vpop.f32.mrb[56].mxu1  ;;  %15150 = vmatpush3.bf16.msra.mxu1 %v17132_v48  ;;  %v17154_v48 = vld [vmem:[%s21374_s2 + $0x208] sm:$0xff]  }
 0x597   : > { %4686 = vst [vmem:[#allocation2 + $0xe0] sm:$0xff] %v4571_v40  ;;  %v15033_v42 = vpop.f32.mrb[57].mxu1  ;;  %15151 = vmatprep.subr.bf16.mxu1 %v17571_v52 }
 0x598   : > { %v4574_v12 = vpop.f32.mrb[58].mxu1  ;;  %v17155_v42 = vld [vmem:[%s21374_s2 + $0xf0] sm:$0xff]  }
 0x599   : > { %4687 = vst [vmem:[#allocation2 + $0xe8] sm:$0xff] %v4574_v12  ;;  %v15034_v29 = vpop.f32.mrb[59].mxu1  ;;  %15132 = vmatmul.mubr.bf16.gmra.mrb[124].mxu1 %v4719_v56  ;;  %v17137_v56 = vld [vmem:[%s21374_s2 + $0xa8] sm:$0xff]  }
 0x59a   : > { %15135 = vmatprep.mubr.msk.bf16.mxu1 %vm17572_vm14, %v17571_v52  ;;  %15152 = vmatpush3.bf16.msra.mxu1 %v17133_v57  ;;  %v5019_v57 = vld [vmem:[#allocation2 + $0x31] sm:$0xff] }
 0x59b   : > { %15153 = vmatprep.subr.bf16.mxu1 %v17571_v52  ;;  %v5026_v29 = vpack.c.bf16 %v5020_v37, %v5019_v57 }
 0x59e   : > { %v4579_v17 = vpop.f32.mrb[60].mxu1  ;;  %15154 = vmatpush3.bf16.msra.mxu1 %v17134_v8 }
 0x59f   : > { %4688 = vst [vmem:[#allocation2 + $0xf0] sm:$0xff] %v4579_v17  ;;  %v15037_v62 = vpop.f32.mrb[61].mxu1  ;;  %15155 = vmatprep.subr.bf16.mxu1 %v17571_v52 }
 0x5a0   : > { %v4582_v63 = vpop.f32.mrb[62].mxu1  ;;  %v17156_v62 = vld [vmem:[%s21374_s2 + $0x210] sm:$0xff]  }
 0x5a1   : > { %4689 = vst [vmem:[#allocation2 + $0xf8] sm:$0xff] %v4582_v63  ;;  %v15038_v3 = vpop.f32.mrb[63].mxu1  ;;  %15136 = vmatmul.mubr.bf16.gmra.mrb[128].mxu1 %v4720_v49  ;;  %v17141_v49 = vld [vmem:[%s21374_s2 + $0xb8] sm:$0xff]  }
 0x5a2   : > { %15139 = vmatprep.mubr.msk.bf16.mxu1 %vm17572_vm14, %v17571_v52  ;;  %15156 = vmatpush3.bf16.msra.mxu1 %v17135_v28 }
 0x5a3   : > { %15157 = vmatprep.subr.bf16.mxu1 %v17571_v52 }
 0x5a6   : > { %v4587_v33 = vpop.f32.mrb[64].mxu1  ;;  %15158 = vmatpush3.bf16.msra.mxu1 %v17137_v56  ;;  %v17157_v56 = vld [vmem:[%s21374_s2 + $0xf8] sm:$0xff]  }
 0x5a7   : > { %4690 = vst [vmem:[#allocation2 + $0x100] sm:$0xff] %v4587_v33  ;;  %v15041_v53 = vpop.f32.mrb[65].mxu1  ;;  %15159 = vmatprep.subr.bf16.mxu1 %v17571_v52  ;;  %v5021_v33 = vld [vmem:[#allocation2 + $0x41] sm:$0xff] }
 0x5a8   : > { %v4590_v59 = vpop.f32.mrb[66].mxu1  ;;  %v17158_v53 = vld [vmem:[%s21374_s2 + $0x218] sm:$0xff]  }
 0x5a9   : > { %4691 = vst [vmem:[#allocation2 + $0x108] sm:$0xff] %v4590_v59  ;;  %v15042_v1 = vpop.f32.mrb[67].mxu1  ;;  %15140 = vmatmul.mubr.bf16.gmra.mrb[132].mxu1 %v4721_v34  ;;  %v5014_v34 = vld [vmem:[#allocation2 + $0x9] sm:$0xff] }
 0x5aa   : > { %15143 = vmatprep.mubr.msk.bf16.mxu1 %vm17572_vm14, %v17571_v52  ;;  %15160 = vmatpush3.bf16.msra.mxu1 %v17139_v41  ;;  %v5023_v27 = vpack.c.bf16 %v5014_v34, %v5013_v60  ;;  %v5022_v41 = vld [vmem:[#allocation2 + $0x49] sm:$0x3f] }
 0x5ab   : > { %15161 = vmatprep.subr.bf16.mxu1 %v17571_v52  ;;  %v5177_v34 = vld [vmem:[#allocation2 + $0x6d] sm:$0xff] }
 0x5ae   : > { %v4595_v7 = vpop.f32.mrb[68].mxu1  ;;  %15162 = vmatpush3.bf16.msra.mxu1 %v17141_v49  ;;  %v5027_v49 = vpack.c.bf16 %v5022_v41, %v5021_v33  ;;  %v17173_v33 = vld [vmem:[%s21374_s2 + $0x138] sm:$0xff]   ;;  %v5185_v41 = vld [vmem:[#allocation2 + $0xad] sm:$0x3f] }
 0x5af   : > { %4692 = vst [vmem:[#allocation2 + $0x110] sm:$0xff] %v4595_v7  ;;  %v15045_v20 = vpop.f32.mrb[69].mxu1  ;;  %15183 = vmatprep.subr.bf16.mxu1 %v17571_v52 }
 0x5b0   : > { %v4598_v26 = vpop.f32.mrb[70].mxu1 }
 0x5b1   : > { %4693 = vst [vmem:[#allocation2 + $0x118] sm:$0xff] %v4598_v26  ;;  %v15046_v32 = vpop.f32.mrb[71].mxu1  ;;  %15144 = vmatmul.mubr.bf16.gmra.mrb[136].mxu1 %v4722_v55  ;;  %v17159_v55 = vld [vmem:[%s21374_s2 + $0x220] sm:$0xff]  }
 0x5b2   : > { %15163 = vmatprep.mubr.msk.bf16.mxu1 %vm17572_vm14, %v17571_v52 }
 0x5b6   : > { %v4603_v43 = vpop.f32.mrb[72].mxu1 }
 0x5b7   : > { %4694 = vst [vmem:[#allocation2 + $0x120] sm:$0xff] %v4603_v43  ;;  %v15049_v45 = vpop.f32.mrb[73].mxu1  ;;  %v17161_v43 = vld [vmem:[%s21374_s2 + $0x228] sm:$0xff]  }
 0x5b8   : > { %v4606_v11 = vpop.f32.mrb[74].mxu1  ;;  %v17160_v45 = vld [vmem:[%s21374_s2 + $0x100] sm:$0xff]  }
 0x5b9   : > { %4695 = vst [vmem:[#allocation2 + $0x128] sm:$0xff] %v4606_v11  ;;  %v15050_v10 = vpop.f32.mrb[75].mxu1  ;;  %15164 = vmatmul.mubr.bf16.vlgmr.msra.gmra.mrb[140].mxu1 %v5023_v27 }
 0x5ba   : > { %15184 = vmatpush3.bf16.msra.mxu1 %v17144_v14  ;;  %15167 = vmatprep.mubr.msk.bf16.mxu1 %vm17572_vm14, %v17571_v52  ;;  %v5176_v14 = vld [vmem:[#allocation2 + $0x65] sm:$0xff] }
 0x5bb   : > { %15185 = vmatprep.subr.bf16.mxu1 %v17571_v52  ;;  %v5186_v11 = vpack.c.bf16 %v5177_v34, %v5176_v14 }
 0x5be   : > { %v4611_v50 = vpop.f32.mrb[76].mxu1  ;;  %15186 = vmatpush3.bf16.msra.mxu1 %v17146_v46 }
 0x5bf   : > { %4696 = vst [vmem:[#allocation2 + $0x130] sm:$0xff] %v4611_v50  ;;  %v15053_v23 = vpop.f32.mrb[77].mxu1  ;;  %15187 = vmatprep.subr.bf16.mxu1 %v17571_v52  ;;  %v17163_v50 = vld [vmem:[%s21374_s2 + $0x230] sm:$0xff]  }
 0x5c0   : > { %v4614_v2 = vpop.f32.mrb[78].mxu1  ;;  %v17162_v23 = vld [vmem:[%s21374_s2 + $0x108] sm:$0xff]  }
 0x5c1   : > { %4697 = vst [vmem:[#allocation2 + $0x138] sm:$0xff] %v4614_v2  ;;  %v15054_v44 = vpop.f32.mrb[79].mxu1  ;;  %15168 = vmatmul.mubr.bf16.gmra.mrb[144].mxu1 %v5024_v15  ;;  %v5179_v15 = vld [vmem:[#allocation2 + $0x7d] sm:$0xff] }
 0x5c2   : > { %15171 = vmatprep.mubr.msk.bf16.mxu1 %vm17572_vm14, %v17571_v52  ;;  %15188 = vmatpush3.bf16.msra.mxu1 %v17148_v38  ;;  %v17165_v2 = vld [vmem:[%s21374_s2 + $0x238] sm:$0xff]  }
 0x5c3   : > { %15189 = vmatprep.subr.bf16.mxu1 %v17571_v52 }
 0x5c6   : > { %v4619_v18 = vpop.f32.mrb[80].mxu1  ;;  %15190 = vmatpush3.bf16.msra.mxu1 %v17150_v21  ;;  %v5665_v24 = vld [vmem:[#allocation2 + $0x12c] sm:$0xff]  ;;  %v5178_v21 = vld [vmem:[#allocation2 + $0x75] sm:$0xff] }
 0x5c7   : > { %4698 = vst [vmem:[#allocation2 + $0x140] sm:$0xff] %v4619_v18  ;;  %v15057_v22 = vpop.f32.mrb[81].mxu1  ;;  %15191 = vmatprep.subr.bf16.mxu1 %v17571_v52  ;;  %v5187_v54 = vpack.c.bf16 %v5179_v15, %v5178_v21  ;;  %v5343_v21 = vld [vmem:[#allocation2 + $0x22] sm:$0xff] }
 0x5c8   : > { %v4622_v6 = vpop.f32.mrb[82].mxu1  ;;  %v5666_v39 = vld [vmem:[#allocation2 + $0x134] sm:$0xff] }
 0x5c9   : > { %4699 = vst [vmem:[#allocation2 + $0x148] sm:$0xff] %v4622_v6  ;;  %v15058_v25 = vpop.f32.mrb[83].mxu1  ;;  %15172 = vmatmul.mubr.bf16.gmra.mrb[148].mxu1 %v5025_v47  ;;  %v5675_v61 = vpack.c.bf16 %v5666_v39, %v5665_v24  ;;  %v17166_v39 = vld [vmem:[%s21374_s2 + $0x118] sm:$0xff]  }
 0x5ca   : > { %15175 = vmatprep.mubr.msk.bf16.mxu1 %vm17572_vm14, %v17571_v52  ;;  %15192 = vmatpush3.bf16.msra.mxu1 %v17151_v35  ;;  %v5180_v25 = vld [vmem:[#allocation2 + $0x85] sm:$0xff] }
 0x5cb   : > { %15308 = vmatmul.mubr.bf16.vlgmr.msra.gmra.mrb[36].mxu0 %v5675_v61  ;;  %15193 = vmatprep.subr.bf16.mxu1 %v17571_v52  ;;  %v5992_v61 = vld [vmem:[#allocation2 + $0x135] sm:$0xff] }
 0x5cc   : > { %15311 = vmatprep.mubr.msk.bf16.mxu0 %vm17572_vm14, %v17571_v52  ;;  %15364 = vmatpush3.bf16.msra.mxu0 %v17152_v16  ;;  %v5181_v16 = vld [vmem:[#allocation2 + $0x8d] sm:$0xff] }
 0x5cd   : > { %15365 = vmatprep.subr.bf16.mxu0 %v17571_v52  ;;  %v5188_v37 = vpack.c.bf16 %v5181_v16, %v5180_v25  ;;  %v17188_v25 = vld [vmem:[%s21374_s2 + $0x310] sm:$0xff]  }
 0x5ce   : > { %v4627_v40 = vpop.f32.mrb[84].mxu1  ;;  %15194 = vmatpush3.bf16.msra.mxu1 %v17153_v30  ;;  %v5667_v17 = vld [vmem:[#allocation2 + $0x13c] sm:$0xff] }
 0x5cf   : > { %4700 = vst [vmem:[#allocation2 + $0x150] sm:$0xff] %v4627_v40  ;;  %v15061_v12 = vpop.f32.mrb[85].mxu1  ;;  %15195 = vmatprep.subr.bf16.mxu1 %v17571_v52  ;;  %v17167_v30 = vld [vmem:[%s21374_s2 + $0x120] sm:$0xff]  }
 0x5d0   : > { %v4630_v8 = vpop.f32.mrb[86].mxu1  ;;  %v5668_v28 = vld [vmem:[#allocation2 + $0x144] sm:$0xff]  ;;  %15366 = vmatpush3.bf16.msra.mxu0 %v17154_v48  ;;  %v5991_v48 = vld [vmem:[#allocation2 + $0x12d] sm:$0xff] }
 0x5d1   : > { %4701 = vst [vmem:[#allocation2 + $0x158] sm:$0xff] %v4630_v8  ;;  %v15062_v63 = vpop.f32.mrb[87].mxu1  ;;  %15176 = vmatmul.mubr.bf16.gmra.mrb[152].mxu1 %v5026_v29  ;;  %v5676_v3 = vpack.c.bf16 %v5668_v28, %v5667_v17  ;;  %15367 = vmatprep.subr.bf16.mxu0 %v17571_v52  ;;  %v17168_v40 = vld [vmem:[%s21374_s2 + $0x280] sm:$0xff]   ;;  %v6001_v57 = vpack.c.bf16 %v5992_v61, %v5991_v48  ;;  %v17170_v29 = vld [vmem:[%s21374_s2 + $0x288] sm:$0xff]   ;;  %v5182_v8 = vld [vmem:[#allocation2 + $0x95] sm:$0xff] }
 0x5d2   : > { %15179 = vmatprep.mubr.msk.bf16.mxu1 %vm17572_vm14, %v17571_v52  ;;  %15196 = vmatpush3.bf16.msra.mxu1 %v17155_v42  ;;  %v17169_v42 = vld [vmem:[%s21374_s2 + $0x128] sm:$0xff]   ;;  %v5183_v12 = vld [vmem:[#allocation2 + $0x9d] sm:$0xff]  ;;  %v17171_v28 = vld [vmem:[%s21374_s2 + $0x130] sm:$0xff]  }
 0x5d3   : > { %15312 = vmatmul.mubr.bf16.gmra.mrb[40].mxu0 %v5676_v3  ;;  %15197 = vmatprep.subr.bf16.mxu1 %v17571_v52  ;;  %v5994_v17 = vld [vmem:[#allocation2 + $0x145] sm:$0xff]  ;;  %v5993_v63 = vld [vmem:[#allocation2 + $0x13d] sm:$0xff]  ;;  %v17172_v3 = vld [vmem:[%s21374_s2 + $0x290] sm:$0xff]  }
 0x5d4   : > { %15315 = vmatprep.mubr.msk.bf16.mxu0 %vm17572_vm14, %v17571_v52  ;;  %15368 = vmatpush3.bf16.msra.mxu0 %v17156_v62  ;;  %v5189_v62 = vpack.c.bf16 %v5183_v12, %v5182_v8  ;;  %v5348_v48 = vld [vmem:[#allocation2 + $0x4a] sm:$0x3f] }
 0x5d5   : > { %15369 = vmatprep.subr.bf16.mxu0 %v17571_v52  ;;  %v17193_v8 = vld [vmem:[%s21374_s2 + $0x328] sm:$0xff]  }
 0x5d6   : > { %v4635_v59 = vpop.f32.mrb[88].mxu1  ;;  %15198 = vmatpush3.bf16.msra.mxu1 %v17157_v56  ;;  %v5669_v7 = vld [vmem:[#allocation2 + $0x14c] sm:$0xff]  ;;  %v6002_v56 = vpack.c.bf16 %v5994_v17, %v5993_v63 }
 0x5d7   : > { %4702 = vst [vmem:[#allocation2 + $0x160] sm:$0xff] %v4635_v59  ;;  %v15065_v1 = vpop.f32.mrb[89].mxu1  ;;  %15219 = vmatprep.subr.bf16.mxu1 %v17571_v52  ;;  %v5184_v59 = vld [vmem:[#allocation2 + $0xa5] sm:$0xff]  ;;  %v17195_v63 = vld [vmem:[%s21374_s2 + $0x330] sm:$0xff]  }
 0x5d8   : > { %v4638_v51 = vpop.f32.mrb[90].mxu1  ;;  %v5670_v20 = vld [vmem:[#allocation2 + $0x154] sm:$0xff]  ;;  %15370 = vmatpush3.bf16.msra.mxu0 %v17158_v53  ;;  %v5502_v17 = vld [vmem:[#allocation2 + $0xc8] sm:$0xff] }
 0x5d9   : > { %4703 = vst [vmem:[#allocation2 + $0x168] sm:$0xff] %v4638_v51  ;;  %v15066_v26 = vpop.f32.mrb[91].mxu1  ;;  %15180 = vmatmul.mubr.bf16.gmra.mrb[156].mxu1 %v5027_v49  ;;  %v5677_v32 = vpack.c.bf16 %v5670_v20, %v5669_v7  ;;  %15371 = vmatprep.subr.bf16.mxu0 %v17571_v52  ;;  %v17174_v53 = vld [vmem:[%s21374_s2 + $0x298] sm:$0xff]   ;;  %v5190_v49 = vpack.c.bf16 %v5185_v41, %v5184_v59  ;;  %v5995_v51 = vld [vmem:[#allocation2 + $0x14d] sm:$0xff]  ;;  %v17175_v7 = vld [vmem:[%s21374_s2 + $0x2a0] sm:$0xff]  }
 0x5da   : > { %15199 = vmatprep.mubr.msk.bf16.mxu1 %vm17572_vm14, %v17571_v52  ;;  %v5996_v1 = vld [vmem:[#allocation2 + $0x155] sm:$0xff]  ;;  %v17177_v26 = vld [vmem:[%s21374_s2 + $0x2a8] sm:$0xff]  }
 0x5db   : > { %15316 = vmatmul.mubr.bf16.gmra.mrb[44].mxu0 %v5677_v32  ;;  %v6003_v20 = vpack.c.bf16 %v5996_v1, %v5995_v51  ;;  %v5339_v32 = vld [vmem:[#allocation2 + $0x2] sm:$0xff]  ;;  %v17197_v41 = vld [vmem:[%s21374_s2 + $0x338] sm:$0xff]   ;;  %v6326_v1 = vld [vmem:[#allocation2 + $0x52] sm:$0x3f] }
 0x5dc   : > { %15319 = vmatprep.mubr.msk.bf16.mxu0 %vm17572_vm14, %v17571_v52  ;;  %15372 = vmatpush3.bf16.msra.mxu0 %v17159_v55  ;;  %v5340_v55 = vld [vmem:[#allocation2 + $0xa] sm:$0xff]  ;;  %v5504_v59 = vld [vmem:[#allocation2 + $0xd8] sm:$0xff] }
 0x5dd   : > { %15373 = vmatprep.subr.bf16.mxu0 %v17571_v52 }
 0x5de   : > { %v4643_v60 = vpop.f32.mrb[92].mxu1  ;;  %v5671_v46 = vld [vmem:[#allocation2 + $0x15c] sm:$0xff] }
 0x5df   : > { %4704 = vst [vmem:[#allocation2 + $0x170] sm:$0xff] %v4643_v60  ;;  %v15069_v27 = vpop.f32.mrb[93].mxu1  ;;  %v5349_v60 = vpack.c.bf16 %v5340_v55, %v5339_v32  ;;  %v5997_v14 = vld [vmem:[#allocation2 + $0x15d] sm:$0xff] }
 0x5e0   : > { %v4646_v10 = vpop.f32.mrb[94].mxu1  ;;  %v5672_v0 = vld [vmem:[#allocation2 + $0x164] sm:$0xff]  ;;  %15374 = vmatpush3.bf16.msra.mxu0 %v17161_v43 }
 0x5e1   : > { %4705 = vst [vmem:[#allocation2 + $0x178] sm:$0xff] %v4646_v10  ;;  %v15070_v19 = vpop.f32.mrb[95].mxu1  ;;  %15200 = vmatmul.mubr.bf16.vlgmr.msra.gmra.mrb[160].mxu1 %v5186_v11  ;;  %v5678_v38 = vpack.c.bf16 %v5672_v0, %v5671_v46  ;;  %15375 = vmatprep.subr.bf16.mxu0 %v17571_v52  ;;  %v5998_v34 = vld [vmem:[#allocation2 + $0x165] sm:$0xff]  ;;  %v5342_v10 = vld [vmem:[#allocation2 + $0x1a] sm:$0xff]  ;;  %v5341_v0 = vld [vmem:[#allocation2 + $0x12] sm:$0xff] }
 0x5e2   : > { %15220 = vmatpush3.bf16.msra.mxu1 %v17160_v45  ;;  %15203 = vmatprep.mubr.msk.bf16.mxu1 %vm17572_vm14, %v17571_v52  ;;  %v17176_v43 = vld [vmem:[%s21374_s2 + $0x140] sm:$0xff]   ;;  %v17179_v45 = vld [vmem:[%s21374_s2 + $0x2b0] sm:$0xff]   ;;  %v6004_v27 = vpack.c.bf16 %v5998_v34, %v5997_v14  ;;  %v17178_v11 = vld [vmem:[%s21374_s2 + $0x148] sm:$0xff]   ;;  %v6328_v61 = vpack.c.bf16 %v5343_v21, %v5342_v10 }
 0x5e3   : > { %15320 = vmatmul.mubr.bf16.gmra.mrb[48].mxu0 %v5678_v38  ;;  %15221 = vmatprep.subr.bf16.mxu1 %v17571_v52  ;;  %v17181_v46 = vld [vmem:[%s21374_s2 + $0x2b8] sm:$0xff]   ;;  %v17180_v19 = vld [vmem:[%s21374_s2 + $0x150] sm:$0xff]   ;;  %v5350_v38 = vpack.c.bf16 %v5342_v10, %v5341_v0  ;;  %v17199_v14 = vld [vmem:[%s21374_s2 + $0x1e0] sm:$0xff]  }
 0x5e4   : > { %15323 = vmatprep.mubr.msk.bf16.mxu0 %vm17572_vm14, %v17571_v52  ;;  %15376 = vmatpush3.bf16.msra.mxu0 %v17163_v50  ;;  %v17200_v10 = vld [vmem:[%s21374_s2 + $0x380] sm:$0xff]  }
 0x5e5   : > { %15377 = vmatprep.subr.bf16.mxu0 %v17571_v52 }
 0x5e6   : > { %v4651_v44 = vpop.f32.mrb[96].mxu1  ;;  %15222 = vmatpush3.bf16.msra.mxu1 %v17162_v23  ;;  %v5673_v22 = vld [vmem:[#allocation2 + $0x16c] sm:$0xff] }
 0x5e7   : > { %4706 = vst [vmem:[#allocation2 + $0x180] sm:$0xff] %v4651_v44  ;;  %v15073_v18 = vpop.f32.mrb[97].mxu1  ;;  %15223 = vmatprep.subr.bf16.mxu1 %v17571_v52  ;;  %v5999_v23 = vld [vmem:[#allocation2 + $0x16d] sm:$0xff] }
 0x5e8   : > { %v4654_v35 = vpop.f32.mrb[98].mxu1  ;;  %v5674_v47 = vld [vmem:[#allocation2 + $0x174] sm:$0x3f]  ;;  %15378 = vmatpush3.bf16.msra.mxu0 %v17165_v2  ;;  %v5344_v44 = vld [vmem:[#allocation2 + $0x2a] sm:$0xff] }
 0x5e9   : > { %v15074_v6 = vpop.f32.mrb[99].mxu1  ;;  %15204 = vmatmul.mubr.bf16.gmra.mrb[164].mxu1 %v5187_v54  ;;  %v5679_v24 = vpack.c.bf16 %v5674_v47, %v5673_v22  ;;  %15435 = vmatprep.subr.bf16.mxu0 %v17571_v52  ;;  %v6000_v50 = vld [vmem:[#allocation2 + $0x175] sm:$0x3f]  ;;  %v5351_v18 = vpack.c.bf16 %v5344_v44, %v5343_v21  ;;  %v17184_v54 = vld [vmem:[%s21374_s2 + $0x300] sm:$0xff]   ;;  %v6327_v35 = vpack.c.bf16 %v5341_v0, %v5340_v55  ;;  %v17185_v22 = vld [vmem:[%s21374_s2 + $0x168] sm:$0xff]  }
 0x5ea   : > { %15207 = vmatprep.mubr.msk.bf16.mxu1 %vm17572_vm14, %v17571_v52  ;;  %15224 = vmatpush3.bf16.msra.mxu1 %v17164_v9  ;;  %v6005_v15 = vpack.c.bf16 %v6000_v50, %v5999_v23  ;;  %v17182_v2 = vld [vmem:[%s21374_s2 + $0x158] sm:$0xff]   ;;  %v17183_v9 = vld [vmem:[%s21374_s2 + $0x160] sm:$0xff]   ;;  %v17186_v6 = vld [vmem:[%s21374_s2 + $0x308] sm:$0xff]  }
 0x5eb   : > { %15324 = vmatmul.mubr.bf16.gmra.mrb[52].mxu0 %v5679_v24  ;;  %15225 = vmatprep.subr.bf16.mxu1 %v17571_v52  ;;  %v5346_v47 = vld [vmem:[#allocation2 + $0x3a] sm:$0xff]  ;;  %v5345_v24 = vld [vmem:[#allocation2 + $0x32] sm:$0xff]  ;;  %v17201_v0 = vld [vmem:[%s21374_s2 + $0x1e8] sm:$0xff]  }
 0x5ec   : > { %15379 = vmatprep.mubr.msk.bf16.mxu0 %vm17572_vm14, %v17571_v52  ;;  %v5352_v16 = vpack.c.bf16 %v5346_v47, %v5345_v24  ;;  %v6329_v12 = vpack.c.bf16 %v5345_v24, %v5344_v44  ;;  %v6646_v44 = vld [vmem:[#allocation2 + $0x23] sm:$0xff]  ;;  %v17203_v21 = vld [vmem:[%s21374_s2 + $0x1f0] sm:$0xff]  }
 0x5ed   : > { %v5511_v24 = vld [vmem:[#allocation2 + $0x110] sm:$0x3f] }
 0x5ee   : > { %15226 = vmatpush3.bf16.msra.mxu1 %v17166_v39  ;;  %v17187_v39 = vld [vmem:[%s21374_s2 + $0x170] sm:$0xff]  }
 0x5ef   : > { %15227 = vmatprep.subr.bf16.mxu1 %v17571_v52 }
 0x5f1   : > { %15208 = vmatmul.mubr.bf16.gmra.mrb[168].mxu1 %v5188_v37  ;;  %v5347_v37 = vld [vmem:[#allocation2 + $0x42] sm:$0xff] }
 0x5f2   : > { %15211 = vmatprep.mubr.msk.bf16.mxu1 %vm17572_vm14, %v17571_v52  ;;  %15228 = vmatpush3.bf16.msra.mxu1 %v17167_v30  ;;  %v17189_v30 = vld [vmem:[%s21374_s2 + $0x178] sm:$0xff]  }
 0x5f3   : > { %15380 = vmatmul.mubr.bf16.vlgmr.msra.gmra.mrb[56].mxu0 %v6001_v57  ;;  %15229 = vmatprep.subr.bf16.mxu1 %v17571_v52  ;;  %v5353_v57 = vpack.c.bf16 %v5348_v48, %v5347_v37 }
 0x5f4   : > { %15383 = vmatprep.mubr.msk.bf16.mxu0 %vm17572_vm14, %v17571_v52  ;;  %15436 = vmatpush3.bf16.msra.mxu0 %v17168_v40  ;;  %v17190_v40 = vld [vmem:[%s21374_s2 + $0x318] sm:$0xff]  }
 0x5f5   : > { %15437 = vmatprep.subr.bf16.mxu0 %v17571_v52 }
 0x5f6   : > { %15230 = vmatpush3.bf16.msra.mxu1 %v17169_v42  ;;  %v17191_v42 = vld [vmem:[%s21374_s2 + $0x320] sm:$0xff]  }
 0x5f7   : > { %15231 = vmatprep.subr.bf16.mxu1 %v17571_v52 }
 0x5f8   : > { %15438 = vmatpush3.bf16.msra.mxu0 %v17170_v29  ;;  %v5503_v29 = vld [vmem:[#allocation2 + $0xd0] sm:$0xff] }
 0x5f9   : > { %15212 = vmatmul.mubr.bf16.gmra.mrb[172].mxu1 %v5189_v62  ;;  %15439 = vmatprep.subr.bf16.mxu0 %v17571_v52  ;;  %v5512_v62 = vpack.c.bf16 %v5503_v29, %v5502_v17  ;;  %v5829_v29 = vld [vmem:[#allocation2 + $0xd1] sm:$0xff] }
 0x5fa   : > { %15215 = vmatprep.mubr.msk.bf16.mxu1 %vm17572_vm14, %v17571_v52  ;;  %15232 = vmatpush3.bf16.msra.mxu1 %v17171_v28  ;;  %v17192_v28 = vld [vmem:[%s21374_s2 + $0x1c0] sm:$0xff]  }
 0x5fb   : > { %15384 = vmatmul.mubr.bf16.gmra.mrb[60].mxu0 %v6002_v56  ;;  %15233 = vmatprep.subr.bf16.mxu1 %v17571_v52  ;;  %v17194_v56 = vld [vmem:[%s21374_s2 + $0x1c8] sm:$0xff]  }
 0x5fc   : > { %15387 = vmatprep.mubr.msk.bf16.mxu0 %vm17572_vm14, %v17571_v52  ;;  %15440 = vmatpush3.bf16.msra.mxu0 %v17172_v3  ;;  %v6330_v3 = vpack.c.bf16 %v5347_v37, %v5346_v47  ;;  %v17205_v47 = vld [vmem:[%s21374_s2 + $0x1f8] sm:$0xff]  }
 0x5fd   : > { %15441 = vmatprep.subr.bf16.mxu0 %v17571_v52 }
 0x5fe   : > { %15234 = vmatpush3.bf16.msra.mxu1 %v17173_v33  ;;  %v5505_v33 = vld [vmem:[#allocation2 + $0xe0] sm:$0xff] }
 0x5ff   : > { %15255 = vmatprep.subr.bf16.mxu1 %v17571_v52  ;;  %v5513_v51 = vpack.c.bf16 %v5505_v33, %v5504_v59 }
 0x600   : > { %15442 = vmatpush3.bf16.msra.mxu0 %v17174_v53  ;;  %v6325_v53 = vld [vmem:[#allocation2 + $0x4a] sm:$0xff] }
 0x601   : > { %15216 = vmatmul.mubr.bf16.gmra.mrb[176].mxu1 %v5190_v49  ;;  %15443 = vmatprep.subr.bf16.mxu0 %v17571_v52  ;;  %v17196_v49 = vld [vmem:[%s21374_s2 + $0x1d0] sm:$0xff]  }
 0x602   : > { %15235 = vmatprep.mubr.msk.bf16.mxu1 %vm17572_vm14, %v17571_v52 }
 0x603   : > { %15388 = vmatmul.mubr.bf16.gmra.mrb[64].mxu0 %v6003_v20  ;;  %v17198_v20 = vld [vmem:[%s21374_s2 + $0x1d8] sm:$0xff]  }
 0x604   : > { %15391 = vmatprep.mubr.msk.bf16.mxu0 %vm17572_vm14, %v17571_v52  ;;  %15444 = vmatpush3.bf16.msra.mxu0 %v17175_v7  ;;  %v6331_v7 = vpack.c.bf16 %v6326_v1, %v6325_v53  ;;  %v17211_v53 = vld [vmem:[%s21374_s2 + $0x3b0] sm:$0xff]   ;;  %v17210_v1 = vld [vmem:[%s21374_s2 + $0x248] sm:$0xff]  }
 0x605   : > { %15445 = vmatprep.subr.bf16.mxu0 %v17571_v52 }
 0x608   : > { %15446 = vmatpush3.bf16.msra.mxu0 %v17177_v26  ;;  %v5507_v26 = vld [vmem:[#allocation2 + $0xf0] sm:$0xff] }
 0x609   : > { %15236 = vmatmul.mubr.bf16.vlgmr.msra.gmra.mrb[180].mxu1 %v5349_v60  ;;  %15447 = vmatprep.subr.bf16.mxu0 %v17571_v52  ;;  %v6644_v60 = vld [vmem:[#allocation2 + $0x13] sm:$0xff] }
 0x60a   : > { %15256 = vmatpush3.bf16.msra.mxu1 %v17176_v43  ;;  %15239 = vmatprep.mubr.msk.bf16.mxu1 %vm17572_vm14, %v17571_v52  ;;  %v5506_v43 = vld [vmem:[#allocation2 + $0xe8] sm:$0xff] }
 0x60b   : > { %15392 = vmatmul.mubr.bf16.gmra.mrb[68].mxu0 %v6004_v27  ;;  %15257 = vmatprep.subr.bf16.mxu1 %v17571_v52  ;;  %v5514_v27 = vpack.c.bf16 %v5507_v26, %v5506_v43  ;;  %v6652_v43 = vld [vmem:[#allocation2 + $0x53] sm:$0x3f] }
 0x60c   : > { %15395 = vmatprep.mubr.msk.bf16.mxu0 %vm17572_vm14, %v17571_v52  ;;  %15448 = vmatpush3.bf16.msra.mxu0 %v17179_v45 }
 0x60d   : > { %15449 = vmatprep.subr.bf16.mxu0 %v17571_v52 }
 0x60e   : > { %15258 = vmatpush3.bf16.msra.mxu1 %v17178_v11  ;;  %v6643_v11 = vld [vmem:[#allocation2 + $0xb] sm:$0xff] }
 0x60f   : > { %15259 = vmatprep.subr.bf16.mxu1 %v17571_v52 }
 0x610   : > { %15450 = vmatpush3.bf16.msra.mxu0 %v17181_v46  ;;  %v6653_v46 = vpack.c.bf16 %v6644_v60, %v6643_v11  ;;  %v17212_v60 = vld [vmem:[%s21374_s2 + $0x250] sm:$0xff]  }
 0x611   : > { %15240 = vmatmul.mubr.bf16.gmra.mrb[184].mxu1 %v5350_v38  ;;  %15507 = vmatprep.subr.bf16.mxu0 %v17571_v52  ;;  %v17202_v38 = vld [vmem:[%s21374_s2 + $0x388] sm:$0xff]  }
 0x612   : > { %15243 = vmatprep.mubr.msk.bf16.mxu1 %vm17572_vm14, %v17571_v52  ;;  %15260 = vmatpush3.bf16.msra.mxu1 %v17180_v19  ;;  %v5509_v19 = vld [vmem:[#allocation2 + $0x100] sm:$0xff] }
 0x613   : > { %15396 = vmatmul.mubr.bf16.gmra.mrb[72].mxu0 %v6005_v15  ;;  %15261 = vmatprep.subr.bf16.mxu1 %v17571_v52 }
 0x614   : > { %15451 = vmatprep.mubr.msk.bf16.mxu0 %vm17572_vm14, %v17571_v52 }
 0x616   : > { %15262 = vmatpush3.bf16.msra.mxu1 %v17182_v2  ;;  %v5508_v2 = vld [vmem:[#allocation2 + $0xf8] sm:$0xff] }
 0x617   : > { %15263 = vmatprep.subr.bf16.mxu1 %v17571_v52 }
 0x619   : > { %15244 = vmatmul.mubr.bf16.gmra.mrb[188].mxu1 %v5351_v18  ;;  %v5515_v18 = vpack.c.bf16 %v5509_v19, %v5508_v2  ;;  %v5832_v2 = vld [vmem:[#allocation2 + $0xe9] sm:$0xff] }
 0x61a   : > { %15247 = vmatprep.mubr.msk.bf16.mxu1 %vm17572_vm14, %v17571_v52  ;;  %15264 = vmatpush3.bf16.msra.mxu1 %v17183_v9 }
 0x61b   : > { %15452 = vmatmul.mubr.bf16.vlgmr.msra.gmra.mrb[76].mxu0 %v6327_v35  ;;  %15265 = vmatprep.subr.bf16.mxu1 %v17571_v52  ;;  %v17204_v35 = vld [vmem:[%s21374_s2 + $0x390] sm:$0xff]  }
 0x61c   : > { %15455 = vmatprep.mubr.msk.bf16.mxu0 %vm17572_vm14, %v17571_v52  ;;  %15508 = vmatpush3.bf16.msra.mxu0 %v17184_v54  ;;  %v6645_v54 = vld [vmem:[#allocation2 + $0x1b] sm:$0xff] }
 0x61d   : > { %15509 = vmatprep.subr.bf16.mxu0 %v17571_v52 }
 0x61e   : > { %15266 = vmatpush3.bf16.msra.mxu1 %v17185_v22  ;;  %v6654_v22 = vpack.c.bf16 %v6646_v44, %v6645_v54  ;;  %v17215_v44 = vld [vmem:[%s21374_s2 + $0x260] sm:$0xff]   ;;  %v6969_v54 = vld [vmem:[#allocation2 + $0xc] sm:$0xff] }
 0x61f   : > { %15267 = vmatprep.subr.bf16.mxu1 %v17571_v52 }
 0x620   : > { %15510 = vmatpush3.bf16.msra.mxu0 %v17186_v6 }
 0x621   : > { %15248 = vmatmul.mubr.bf16.gmra.mrb[192].mxu1 %v5352_v16  ;;  %15511 = vmatprep.subr.bf16.mxu0 %v17571_v52 }
 0x622   : > { %15251 = vmatprep.mubr.msk.bf16.mxu1 %vm17572_vm14, %v17571_v52  ;;  %15268 = vmatpush3.bf16.msra.mxu1 %v17187_v39  ;;  %v17206_v39 = vld [vmem:[%s21374_s2 + $0x398] sm:$0xff]  }
 0x623   : > { %15456 = vmatmul.mubr.bf16.gmra.mrb[80].mxu0 %v6328_v61  ;;  %15269 = vmatprep.subr.bf16.mxu1 %v17571_v52  ;;  %v5510_v61 = vld [vmem:[#allocation2 + $0x108] sm:$0xff] }
 0x624   : > { %15459 = vmatprep.mubr.msk.bf16.mxu0 %vm17572_vm14, %v17571_v52  ;;  %15512 = vmatpush3.bf16.msra.mxu0 %v17188_v25  ;;  %v5516_v48 = vpack.c.bf16 %v5511_v24, %v5510_v61  ;;  %v5835_v24 = vld [vmem:[#allocation2 + $0x101] sm:$0xff] }
 0x625   : > { %15513 = vmatprep.subr.bf16.mxu0 %v17571_v52 }
 0x626   : > { %15270 = vmatpush3.bf16.msra.mxu1 %v17189_v30  ;;  %v6648_v30 = vld [vmem:[#allocation2 + $0x33] sm:$0xff] }
 0x627   : > { %15327 = vmatprep.subr.bf16.mxu1 %v17571_v52 }
 0x628   : > { %15514 = vmatpush3.bf16.msra.mxu0 %v17190_v40  ;;  %v6647_v40 = vld [vmem:[#allocation2 + $0x2b] sm:$0xff] }
 0x629   : > { %15252 = vmatmul.mubr.bf16.gmra.mrb[196].mxu1 %v5353_v57  ;;  %15515 = vmatprep.subr.bf16.mxu0 %v17571_v52  ;;  %v17207_v57 = vld [vmem:[%s21374_s2 + $0x3a0] sm:$0xff]  }
 0x62a   : > { %15271 = vmatprep.mubr.msk.bf16.mxu1 %vm17572_vm14, %v17571_v52 }
 0x62b   : > { %15460 = vmatmul.mubr.bf16.gmra.mrb[84].mxu0 %v6329_v12 }
 0x62c   : > { %15463 = vmatprep.mubr.msk.bf16.mxu0 %vm17572_vm14, %v17571_v52  ;;  %15516 = vmatpush3.bf16.msra.mxu0 %v17191_v42  ;;  %v6655_v42 = vpack.c.bf16 %v6648_v30, %v6647_v40  ;;  %v17219_v40 = vld [vmem:[%s21374_s2 + $0x270] sm:$0xff]  }
 0x62d   : > { %15517 = vmatprep.subr.bf16.mxu0 %v17571_v52 }
 0x630   : > { %15518 = vmatpush3.bf16.msra.mxu0 %v17193_v8  ;;  %v17209_v8 = vld [vmem:[%s21374_s2 + $0x3a8] sm:$0xff]  }
 0x631   : > { %15272 = vmatmul.mubr.bf16.vlgmr.msra.gmra.mrb[200].mxu1 %v5512_v62  ;;  %15519 = vmatprep.subr.bf16.mxu0 %v17571_v52  ;;  %v5828_v62 = vld [vmem:[#allocation2 + $0xc9] sm:$0xff] }
 0x632   : > { %15328 = vmatpush3.bf16.msra.mxu1 %v17192_v28  ;;  %15275 = vmatprep.mubr.msk.bf16.mxu1 %vm17572_vm14, %v17571_v52  ;;  %v5838_v33 = vpack.c.bf16 %v5829_v29, %v5828_v62 }
 0x633   : > { %15464 = vmatmul.mubr.bf16.gmra.mrb[88].mxu0 %v6330_v3  ;;  %15329 = vmatprep.subr.bf16.mxu1 %v17571_v52  ;;  %v17208_v3 = vld [vmem:[%s21374_s2 + $0x240] sm:$0xff]  }
 0x634   : > { %15467 = vmatprep.mubr.msk.bf16.mxu0 %vm17572_vm14, %v17571_v52  ;;  %15520 = vmatpush3.bf16.msra.mxu0 %v17195_v63  ;;  %v6650_v63 = vld [vmem:[#allocation2 + $0x43] sm:$0xff] }
 0x635   : > { %15521 = vmatprep.subr.bf16.mxu0 %v17571_v52 }
 0x636   : > { %15330 = vmatpush3.bf16.msra.mxu1 %v17194_v56 }
 0x637   : > { %15331 = vmatprep.subr.bf16.mxu1 %v17571_v52 }
 0x638   : > { %15522 = vmatpush3.bf16.msra.mxu0 %v17197_v41  ;;  %v6649_v41 = vld [vmem:[#allocation2 + $0x3b] sm:$0xff] }
 0x639   : > { %15276 = vmatmul.mubr.bf16.gmra.mrb[204].mxu1 %v5513_v51  ;;  %15579 = vmatprep.subr.bf16.mxu0 %v17571_v52  ;;  %v6656_v59 = vpack.c.bf16 %v6650_v63, %v6649_v41  ;;  %v5831_v51 = vld [vmem:[#allocation2 + $0xe1] sm:$0xff]  ;;  %v5836_v63 = vld [vmem:[#allocation2 + $0x109] sm:$0xff] }
 0x63a   : > { %15279 = vmatprep.mubr.msk.bf16.mxu1 %vm17572_vm14, %v17571_v52  ;;  %15332 = vmatpush3.bf16.msra.mxu1 %v17196_v49 }
 0x63b   : > { %15468 = vmatmul.mubr.bf16.gmra.mrb[92].mxu0 %v6331_v7  ;;  %15333 = vmatprep.subr.bf16.mxu1 %v17571_v52  ;;  %v17213_v7 = vld [vmem:[%s21374_s2 + $0x3b8] sm:$0xff]  }
 0x63c   : > { %v19350_v55 = vpop.f32.mrb[100].mxu1  ;;  %15523 = vmatprep.mubr.msk.bf16.mxu0 %vm17572_vm14, %v17571_v52 }
 0x63d   : > { %v15093_v32 = vpop.f32.mrb[101].mxu1 }
 0x63e   : > { %v19354_v34 = vpop.f32.mrb[102].mxu1  ;;  %15334 = vmatpush3.bf16.msra.mxu1 %v17198_v20  ;;  %v5830_v32 = vld [vmem:[#allocation2 + $0xd9] sm:$0xff] }
 0x63f   : > { %v15094_v45 = vpop.f32.mrb[103].mxu1  ;;  %15335 = vmatprep.subr.bf16.mxu1 %v17571_v52 }
 0x640   : > { %v5839_v45 = vpack.c.bf16 %v5831_v51, %v5830_v32 }
 0x641   : > { %15280 = vmatmul.mubr.bf16.gmra.mrb[208].mxu1 %v5514_v27  ;;  %v6651_v27 = vld [vmem:[#allocation2 + $0x4b] sm:$0xff] }
 0x642   : > { %15283 = vmatprep.mubr.msk.bf16.mxu1 %vm17572_vm14, %v17571_v52  ;;  %15336 = vmatpush3.bf16.msra.mxu1 %v17199_v14  ;;  %v6657_v11 = vpack.c.bf16 %v6652_v43, %v6651_v27  ;;  %v6155_v43 = vld [vmem:[#allocation2 + $0xd2] sm:$0xff] }
 0x643   : > { %15524 = vmatmul.mubr.bf16.vlgmr.msra.gmra.mrb[96].mxu0 %v6653_v46  ;;  %15337 = vmatprep.subr.bf16.mxu1 %v17571_v52 }
 0x644   : > { %v19369_v50 = vpop.f32.mrb[104].mxu1  ;;  %15527 = vmatprep.mubr.msk.bf16.mxu0 %vm17572_vm14, %v17571_v52  ;;  %15580 = vmatpush3.bf16.msra.mxu0 %v17200_v10  ;;  %v17214_v10 = vld [vmem:[%s21374_s2 + $0x258] sm:$0xff]  }
 0x645   : > { %v15097_v23 = vpop.f32.mrb[105].mxu1  ;;  %15581 = vmatprep.subr.bf16.mxu0 %v17571_v52 }
 0x646   : > { %v19377_v15 = vpop.f32.mrb[106].mxu1  ;;  %15338 = vmatpush3.bf16.msra.mxu1 %v17201_v0  ;;  %v5833_v0 = vld [vmem:[#allocation2 + $0xf1] sm:$0xff] }
 0x647   : > { %v15098_v9 = vpop.f32.mrb[107].mxu1  ;;  %15339 = vmatprep.subr.bf16.mxu1 %v17571_v52 }
 0x648   : > { %15582 = vmatpush3.bf16.msra.mxu0 %v17202_v38 }
 0x649   : > { %15284 = vmatmul.mubr.bf16.gmra.mrb[212].mxu1 %v5515_v18  ;;  %15583 = vmatprep.subr.bf16.mxu0 %v17571_v52  ;;  %v5840_v18 = vpack.c.bf16 %v5833_v0, %v5832_v2  ;;  %v19538_v2 = vld [vmem:[#allocation2 + $0x3c] sm:$0xff] }
 0x64a   : > { %15287 = vmatprep.mubr.msk.bf16.mxu1 %vm17572_vm14, %v17571_v52  ;;  %15340 = vmatpush3.bf16.msra.mxu1 %v17203_v21 }
 0x64b   : > { %15528 = vmatmul.mubr.bf16.gmra.mrb[100].mxu0 %v6654_v22  ;;  %15341 = vmatprep.subr.bf16.mxu1 %v17571_v52 }
 0x64c   : > { %v19393_v6 = vpop.f32.mrb[108].mxu1  ;;  %15531 = vmatprep.mubr.msk.bf16.mxu0 %vm17572_vm14, %v17571_v52  ;;  %15584 = vmatpush3.bf16.msra.mxu0 %v17204_v35  ;;  %v17560_v35 = vld [vmem:[#allocation2 + $0x14] sm:$0xff] }
 0x64d   : > { %v15101_v16 = vpop.f32.mrb[109].mxu1  ;;  %15585 = vmatprep.subr.bf16.mxu0 %v17571_v52  ;;  %v6979_v22 = vpack.c.bf16 %v17560_v35, %v6969_v54  ;;  %v17229_v54 = vld [vmem:[%s21374_s2 + $0x438] sm:$0xff]  }
 0x64e   : > { %v19401_v25 = vpop.f32.mrb[110].mxu1  ;;  %15342 = vmatpush3.bf16.msra.mxu1 %v17205_v47 }
 0x64f   : > { %v15102_v37 = vpop.f32.mrb[111].mxu1  ;;  %15399 = vmatprep.subr.bf16.mxu1 %v17571_v52 }
 0x650   : > { %15586 = vmatpush3.bf16.msra.mxu0 %v17206_v39  ;;  %v17218_v39 = vld [vmem:[%s21374_s2 + $0x408] sm:$0xff]   ;;  %v5834_v37 = vld [vmem:[#allocation2 + $0xf9] sm:$0xff] }
 0x651   : > { %15288 = vmatmul.mubr.bf16.gmra.mrb[216].mxu1 %v5516_v48  ;;  %15587 = vmatprep.subr.bf16.mxu0 %v17571_v52  ;;  %v6972_v48 = vld [vmem:[#allocation2 + $0x24] sm:$0xff]  ;;  %v5841_v29 = vpack.c.bf16 %v5835_v24, %v5834_v37  ;;  %v17228_v24 = vld [vmem:[%s21374_s2 + $0x2d0] sm:$0xff]  }
 0x652   : > { %15343 = vmatprep.mubr.msk.bf16.mxu1 %vm17572_vm14, %v17571_v52 }
 0x653   : > { %15532 = vmatmul.mubr.bf16.gmra.mrb[104].mxu0 %v6655_v42 }
 0x654   : > { %v19410_v12 = vpop.f32.mrb[112].mxu1  ;;  %15535 = vmatprep.mubr.msk.bf16.mxu0 %vm17572_vm14, %v17571_v52  ;;  %15588 = vmatpush3.bf16.msra.mxu0 %v17207_v57 }
 0x655   : > { %v15105_v17 = vpop.f32.mrb[113].mxu1  ;;  %15589 = vmatprep.subr.bf16.mxu0 %v17571_v52 }
 0x656   : > { %v19418_v28 = vpop.f32.mrb[114].mxu1 }
 0x657   : > { %v15106_v56 = vpop.f32.mrb[115].mxu1 }
 0x658   : > { %15590 = vmatpush3.bf16.msra.mxu0 %v17209_v8  ;;  %v17561_v8 = vld [vmem:[#allocation2 + $0x1c] sm:$0xff] }
 0x659   : > { %15344 = vmatmul.mubr.bf16.vlgmr.msra.gmra.mrb[220].mxu1 %v5838_v33  ;;  %15591 = vmatprep.subr.bf16.mxu0 %v17571_v52  ;;  %v6980_v17 = vpack.c.bf16 %v6972_v48, %v17561_v8  ;;  %v17222_v56 = vld [vmem:[%s21374_s2 + $0x418] sm:$0xff]   ;;  %v19582_v8 = vld [vmem:[#allocation2 + $0xea] sm:$0xff] }
 0x65a   : > { %15400 = vmatpush3.bf16.msra.mxu1 %v17208_v3  ;;  %15347 = vmatprep.mubr.msk.bf16.mxu1 %vm17572_vm14, %v17571_v52  ;;  %v5837_v3 = vld [vmem:[#allocation2 + $0x111] sm:$0x3f] }
 0x65b   : > { %15536 = vmatmul.mubr.bf16.gmra.mrb[108].mxu0 %v6656_v59  ;;  %15401 = vmatprep.subr.bf16.mxu1 %v17571_v52  ;;  %v6974_v59 = vld [vmem:[#allocation2 + $0x34] sm:$0xff] }
 0x65c   : > { %v19433_v49 = vpop.f32.mrb[116].mxu1  ;;  %15539 = vmatprep.mubr.msk.bf16.mxu0 %vm17572_vm14, %v17571_v52  ;;  %15592 = vmatpush3.bf16.msra.mxu0 %v17211_v53 }
 0x65d   : > { %v15109_v20 = vpop.f32.mrb[117].mxu1  ;;  %15593 = vmatprep.subr.bf16.mxu0 %v17571_v52 }
 0x65e   : > { %v19441_v26 = vpop.f32.mrb[118].mxu1  ;;  %15402 = vmatpush3.bf16.msra.mxu1 %v17210_v1  ;;  %v19514_v20 = vld [vmem:[#allocation2 + $0x2c] sm:$0xff] }
 0x65f   : > { %v15110_v14 = vpop.f32.mrb[119].mxu1  ;;  %15403 = vmatprep.subr.bf16.mxu1 %v17571_v52  ;;  %v6981_v32 = vpack.c.bf16 %v6974_v59, %v19514_v20  ;;  %v6161_v59 = vld [vmem:[#allocation2 + $0x102] sm:$0xff] }
 0x660   : > { %15594 = vmatpush3.bf16.msra.mxu0 %v17213_v7  ;;  %v5842_v7 = vpack.c.bf16 %v5837_v3, %v5836_v63 }
 0x661   : > { %15348 = vmatmul.mubr.bf16.gmra.mrb[224].mxu1 %v5839_v45  ;;  %15651 = vmatprep.subr.bf16.mxu0 %v17571_v52 }
 0x662   : > { %15351 = vmatprep.mubr.msk.bf16.mxu1 %vm17572_vm14, %v17571_v52  ;;  %15404 = vmatpush3.bf16.msra.mxu1 %v17212_v60  ;;  %v17225_v60 = vld [vmem:[%s21374_s2 + $0x428] sm:$0xff]  }
 0x663   : > { %15540 = vmatmul.mubr.bf16.gmra.mrb[112].mxu0 %v6657_v11  ;;  %15405 = vmatprep.subr.bf16.mxu1 %v17571_v52  ;;  %v6154_v11 = vld [vmem:[#allocation2 + $0xca] sm:$0xff] }
 0x664   : > { %v4974_v46 = vpop.f32.mrb[120].mxu1  ;;  %15595 = vmatprep.mubr.msk.bf16.mxu0 %vm17572_vm14, %v17571_v52 }
 0x665   : > { %v19457_v19 = vadd.f32 %v4974_v46, %v19350_v55  ;;  %v15129_v38 = vpop.f32.mrb[121].mxu1  ;;  %v17216_v55 = vld [vmem:[%s21374_s2 + $0x400] sm:$0xff]  }
 0x666   : > { %v4977_v23 = vpop.f32.mrb[122].mxu1  ;;  %15406 = vmatpush3.bf16.msra.mxu1 %v17214_v10  ;;  %v6976_v10 = vld [vmem:[#allocation2 + $0x44] sm:$0xff] }
 0x667   : > { %v19463_v21 = vadd.f32 %v4977_v23, %v19354_v34  ;;  %v15130_v9 = vpop.f32.mrb[123].mxu1  ;;  %15407 = vmatprep.subr.bf16.mxu1 %v17571_v52  ;;  %v17217_v34 = vld [vmem:[%s21374_s2 + $0x268] sm:$0xff]   ;;  %v17224_v46 = vld [vmem:[%s21374_s2 + $0x2c0] sm:$0xff]   ;;  %v6164_v23 = vpack.c.bf16 %v6155_v43, %v6154_v11 }
 0x668   : > { %v7298_v43 = vld [vmem:[#allocation2 + $0x14e] sm:$0xff] }
 0x669   : > { %15352 = vmatmul.mubr.bf16.gmra.mrb[228].mxu1 %v5840_v18  ;;  %v6157_v18 = vld [vmem:[#allocation2 + $0xe2] sm:$0xff] }
 0x66a   : > { %15355 = vmatprep.mubr.msk.bf16.mxu1 %vm17572_vm14, %v17571_v52  ;;  %15408 = vmatpush3.bf16.msra.mxu1 %v17215_v44  ;;  %v6982_v44 = vpack.c.bf16 %v6976_v10, %v19538_v2  ;;  %v17236_v10 = vld [vmem:[%s21374_s2 + $0x490] sm:$0xff]  }
 0x66b   : > { %15596 = vmatmul.mubr.bf16.vlgmr.msra.gmra.mrb[116].mxu0 %v6979_v22  ;;  %15409 = vmatprep.subr.bf16.mxu1 %v17571_v52 }
 0x66c   : > { %v4982_v47 = vpop.f32.mrb[124].mxu1  ;;  %15599 = vmatprep.mubr.msk.bf16.mxu0 %vm17572_vm14, %v17571_v52  ;;  %15652 = vmatpush3.bf16.msra.mxu0 %v17216_v55 }
 0x66d   : > { %v19481_v16 = vadd.f32 %v4982_v47, %v19369_v50  ;;  %v15133_v61 = vpop.f32.mrb[125].mxu1  ;;  %15653 = vmatprep.subr.bf16.mxu0 %v17571_v52  ;;  %v17220_v50 = vld [vmem:[%s21374_s2 + $0x410] sm:$0xff]  }
 0x66e   : > { %v4985_v30 = vpop.f32.mrb[126].mxu1  ;;  %15410 = vmatpush3.bf16.msra.mxu1 %v17217_v34  ;;  %v6156_v34 = vld [vmem:[#allocation2 + $0xda] sm:$0xff]  ;;  %v6978_v47 = vld [vmem:[#allocation2 + $0x54] sm:$0x3f] }
 0x66f   : > { %v19488_v57 = vadd.f32 %v4985_v30, %v19377_v15  ;;  %v15134_v42 = vpop.f32.mrb[127].mxu1  ;;  %15411 = vmatprep.subr.bf16.mxu1 %v17571_v52  ;;  %v17221_v15 = vld [vmem:[%s21374_s2 + $0x278] sm:$0xff]   ;;  %v6165_v30 = vpack.c.bf16 %v6157_v18, %v6156_v34 }
 0x670   : > { %15654 = vmatpush3.bf16.msra.mxu0 %v17218_v39 }
 0x671   : > { %15356 = vmatmul.mubr.bf16.gmra.mrb[232].mxu1 %v5841_v29  ;;  %15655 = vmatprep.subr.bf16.mxu0 %v17571_v52 }
 0x672   : > { %15359 = vmatprep.mubr.msk.bf16.mxu1 %vm17572_vm14, %v17571_v52  ;;  %15412 = vmatpush3.bf16.msra.mxu1 %v17219_v40  ;;  %v6159_v40 = vld [vmem:[#allocation2 + $0xf2] sm:$0xff] }
 0x673   : > { %15600 = vmatmul.mubr.bf16.gmra.mrb[120].mxu0 %v6980_v17  ;;  %15413 = vmatprep.subr.bf16.mxu1 %v17571_v52  ;;  %v7296_v17 = vld [vmem:[#allocation2 + $0x13e] sm:$0xff]  ;;  %v6166_v3 = vpack.c.bf16 %v6159_v40, %v19582_v8  ;;  %v17241_v40 = vld [vmem:[%s21374_s2 + $0x4a8] sm:$0xff]  }
 0x674   : > { %v4990_v62 = vpop.f32.mrb[128].mxu1  ;;  %15603 = vmatprep.mubr.msk.bf16.mxu0 %vm17572_vm14, %v17571_v52  ;;  %15656 = vmatpush3.bf16.msra.mxu0 %v17220_v50 }
 0x675   : > { %v19507_v33 = vadd.f32 %v4990_v62, %v19393_v6  ;;  %v15137_v41 = vpop.f32.mrb[129].mxu1  ;;  %15657 = vmatprep.subr.bf16.mxu0 %v17571_v52  ;;  %v17223_v6 = vld [vmem:[%s21374_s2 + $0x420] sm:$0xff]  }
 0x676   : > { %v4993_v53 = vpop.f32.mrb[130].mxu1  ;;  %15414 = vmatpush3.bf16.msra.mxu1 %v17221_v15  ;;  %v17231_v15 = vld [vmem:[%s21374_s2 + $0x2e0] sm:$0xff]  }
 0x677   : > { %v19511_v1 = vadd.f32 %v4993_v53, %v19401_v25  ;;  %v15138_v51 = vpop.f32.mrb[131].mxu1  ;;  %15471 = vmatprep.subr.bf16.mxu1 %v17571_v52 }
 0x678   : > { %15658 = vmatpush3.bf16.msra.mxu0 %v17222_v56  ;;  %v17232_v56 = vld [vmem:[%s21374_s2 + $0x480] sm:$0xff]   ;;  %v17234_v51 = vld [vmem:[%s21374_s2 + $0x488] sm:$0xff]  }
 0x679   : > { %15360 = vmatmul.mubr.bf16.gmra.mrb[236].mxu1 %v5842_v7  ;;  %15659 = vmatprep.subr.bf16.mxu0 %v17571_v52 }
 0x67a   : > { %15415 = vmatprep.mubr.msk.bf16.mxu1 %vm17572_vm14, %v17571_v52 }
 0x67b   : > { %15604 = vmatmul.mubr.bf16.gmra.mrb[124].mxu0 %v6981_v32 }
 0x67c   : > { %v4998_v25 = vpop.f32.mrb[132].mxu1  ;;  %15607 = vmatprep.mubr.msk.bf16.mxu0 %vm17572_vm14, %v17571_v52  ;;  %15660 = vmatpush3.bf16.msra.mxu0 %v17223_v6 }
 0x67d   : > { %v19529_v14 = vadd.f32 %v4998_v25, %v19410_v12  ;;  %v15141_v45 = vpop.f32.mrb[133].mxu1  ;;  %15661 = vmatprep.subr.bf16.mxu0 %v17571_v52  ;;  %v17227_v12 = vld [vmem:[%s21374_s2 + $0x430] sm:$0xff]   ;;  %v19610_v25 = vld [vmem:[#allocation2 + $0xfa] sm:$0xff] }
 0x67e   : > { %v5001_v27 = vpop.f32.mrb[134].mxu1  ;;  %v6167_v11 = vpack.c.bf16 %v6161_v59, %v19610_v25  ;;  %v7301_v59 = vld [vmem:[#allocation2 + $0x166] sm:$0xff] }
 0x67f   : > { %v19536_v0 = vadd.f32 %v5001_v27, %v19418_v28  ;;  %v15142_v38 = vpop.f32.mrb[135].mxu1  ;;  %v17226_v28 = vld [vmem:[%s21374_s2 + $0x2c8] sm:$0xff]  }
 0x680   : > { %15662 = vmatpush3.bf16.msra.mxu0 %v17225_v60  ;;  %v17235_v60 = vld [vmem:[%s21374_s2 + $0x2f0] sm:$0xff]  }
 0x681   : > { %15416 = vmatmul.mubr.bf16.vlgmr.msra.gmra.mrb[240].mxu1 %v6164_v23  ;;  %15663 = vmatprep.subr.bf16.mxu0 %v17571_v52  ;;  %v19630_v23 = vld [vmem:[#allocation2 + $0x10a] sm:$0xff] }
 0x682   : > { %15472 = vmatpush3.bf16.msra.mxu1 %v17224_v46  ;;  %15419 = vmatprep.mubr.msk.bf16.mxu1 %vm17572_vm14, %v17571_v52 }
 0x683   : > { %15608 = vmatmul.mubr.bf16.gmra.mrb[128].mxu0 %v6982_v44  ;;  %15473 = vmatprep.subr.bf16.mxu1 %v17571_v52  ;;  %v17238_v44 = vld [vmem:[%s21374_s2 + $0x498] sm:$0xff]  }
 0x684   : > { %v5006_v9 = vpop.f32.mrb[136].mxu1  ;;  %15611 = vmatprep.mubr.msk.bf16.mxu0 %vm17572_vm14, %v17571_v52  ;;  %15664 = vmatpush3.bf16.msra.mxu0 %v17227_v12  ;;  %v6163_v12 = vld [vmem:[#allocation2 + $0x112] sm:$0x3f] }
 0x685   : > { %v19557_v55 = vadd.f32 %v5006_v9, %v19433_v49  ;;  %v15145_v35 = vpop.f32.mrb[137].mxu1  ;;  %15665 = vmatprep.subr.bf16.mxu0 %v17571_v52  ;;  %v19567_v49 = vld [vmem:[#allocation2 + $0x4c] sm:$0xff] }
 0x686   : > { %v5009_v22 = vpop.f32.mrb[138].mxu1  ;;  %15474 = vmatpush3.bf16.msra.mxu1 %v17226_v28  ;;  %v6983_v37 = vpack.c.bf16 %v6978_v47, %v19567_v49  ;;  %v7300_v35 = vld [vmem:[#allocation2 + $0x15e] sm:$0xff] }
 0x687   : > { %v19564_v39 = vadd.f32 %v5009_v22, %v19441_v26  ;;  %v15146_v61 = vpop.f32.mrb[139].mxu1  ;;  %15475 = vmatprep.subr.bf16.mxu1 %v17571_v52  ;;  %v17230_v26 = vld [vmem:[%s21374_s2 + $0x2d8] sm:$0xff]  }
 0x688   : > { %15666 = vmatpush3.bf16.msra.mxu0 %v17229_v54 }
 0x689   : > { %15420 = vmatmul.mubr.bf16.gmra.mrb[244].mxu1 %v6165_v30  ;;  %15723 = vmatprep.subr.bf16.mxu0 %v17571_v52  ;;  %v17239_v30 = vld [vmem:[%s21374_s2 + $0x4a0] sm:$0xff]  }
 0x68a   : > { %15423 = vmatprep.mubr.msk.bf16.mxu1 %vm17572_vm14, %v17571_v52  ;;  %15476 = vmatpush3.bf16.msra.mxu1 %v17228_v24  ;;  %v6168_v24 = vpack.c.bf16 %v6163_v12, %v19630_v23  ;;  %v17244_v12 = vld [vmem:[%s21374_s2 + $0x350] sm:$0xff]  }
 0x68b   : > { %15612 = vmatmul.mubr.bf16.gmra.mrb[132].mxu0 %v6983_v37  ;;  %15477 = vmatprep.subr.bf16.mxu1 %v17571_v52 }
 0x68c   : > { %v5127_v48 = vpop.f32.mrb[140].mxu1  ;;  %15667 = vmatprep.mubr.msk.bf16.mxu0 %vm17572_vm14, %v17571_v52 }
 0x68d   : > { %v19580_v42 = vadd.f32 %v5127_v48, %v19457_v19  ;;  %v15165_v29 = vpop.f32.mrb[141].mxu1  ;;  %v7295_v19 = vld [vmem:[#allocation2 + $0x136] sm:$0xff] }
 0x68e   : > { %v5130_v50 = vpop.f32.mrb[142].mxu1  ;;  %15478 = vmatpush3.bf16.msra.mxu1 %v17230_v26  ;;  %v7305_v41 = vpack.c.bf16 %v7296_v17, %v7295_v19  ;;  %v6480_v17 = vld [vmem:[#allocation2 + $0x6e] sm:$0xff]  ;;  %v17240_v19 = vld [vmem:[%s21374_s2 + $0x340] sm:$0xff]  }
 0x68f   : > { %v19588_v62 = vadd.f32 %v5130_v50, %v19463_v21  ;;  %v15166_v63 = vpop.f32.mrb[143].mxu1  ;;  %15479 = vmatprep.subr.bf16.mxu1 %v17571_v52  ;;  %v17233_v21 = vld [vmem:[%s21374_s2 + $0x2e8] sm:$0xff]  }
 0x691   : > { %15424 = vmatmul.mubr.bf16.gmra.mrb[248].mxu1 %v6166_v3  ;;  %v7302_v3 = vld [vmem:[#allocation2 + $0x16e] sm:$0xff] }
 0x692   : > { %15427 = vmatprep.mubr.msk.bf16.mxu1 %vm17572_vm14, %v17571_v52  ;;  %15480 = vmatpush3.bf16.msra.mxu1 %v17231_v15 }
 0x693   : > { %15668 = vmatmul.mubr.bf16.vlgmr.msra.gmra.mrb[136].mxu0 %v7305_v41  ;;  %15481 = vmatprep.subr.bf16.mxu1 %v17571_v52 }
 0x694   : > { %v5135_v53 = vpop.f32.mrb[144].mxu1  ;;  %15671 = vmatprep.mubr.msk.bf16.mxu0 %vm17572_vm14, %v17571_v52  ;;  %15724 = vmatpush3.bf16.msra.mxu0 %v17232_v56 }
 0x695   : > { %v19607_v7 = vadd.f32 %v5135_v53, %v19481_v16  ;;  %v15169_v6 = vpop.f32.mrb[145].mxu1  ;;  %15725 = vmatprep.subr.bf16.mxu0 %v17571_v52  ;;  %v7297_v16 = vld [vmem:[#allocation2 + $0x146] sm:$0xff] }
 0x696   : > { %v5138_v32 = vpop.f32.mrb[146].mxu1  ;;  %15482 = vmatpush3.bf16.msra.mxu1 %v17233_v21  ;;  %v7306_v46 = vpack.c.bf16 %v7298_v43, %v7297_v16 }
 0x697   : > { %v19616_v45 = vadd.f32 %v5138_v32, %v19488_v57  ;;  %v15170_v27 = vpop.f32.mrb[147].mxu1  ;;  %15483 = vmatprep.subr.bf16.mxu1 %v17571_v52  ;;  %v17237_v57 = vld [vmem:[%s21374_s2 + $0x2f8] sm:$0xff]   ;;  %v7308_v32 = vpack.c.bf16 %v7302_v3, %v7301_v59 }
 0x698   : > { %15726 = vmatpush3.bf16.msra.mxu0 %v17234_v51  ;;  %v17243_v51 = vld [vmem:[%s21374_s2 + $0x4b0] sm:$0xff]   ;;  %v17245_v27 = vld [vmem:[%s21374_s2 + $0x4b8] sm:$0xff]  }
 0x699   : > { %15428 = vmatmul.mubr.bf16.gmra.mrb[252].mxu1 %v6167_v11  ;;  %15727 = vmatprep.subr.bf16.mxu0 %v17571_v52 }
 0x69a   : > { %15431 = vmatprep.mubr.msk.bf16.mxu1 %vm17572_vm14, %v17571_v52  ;;  %15484 = vmatpush3.bf16.msra.mxu1 %v17235_v60  ;;  %v6483_v60 = vld [vmem:[#allocation2 + $0x86] sm:$0xff] }
 0x69b   : > { %15672 = vmatmul.mubr.bf16.gmra.mrb[140].mxu0 %v7306_v46  ;;  %15485 = vmatprep.subr.bf16.mxu1 %v17571_v52 }
 0x69c   : > { %v5143_v38 = vpop.f32.mrb[148].mxu1  ;;  %15675 = vmatprep.mubr.msk.bf16.mxu0 %vm17572_vm14, %v17571_v52  ;;  %15728 = vmatpush3.bf16.msra.mxu0 %v17236_v10 }
 0x69d   : > { %v19638_v28 = vadd.f32 %v5143_v38, %v19507_v33  ;;  %v15173_v9 = vpop.f32.mrb[149].mxu1  ;;  %15729 = vmatprep.subr.bf16.mxu0 %v17571_v52  ;;  %v7299_v33 = vld [vmem:[#allocation2 + $0x156] sm:$0xff]  ;;  %v7304_v38 = vld [vmem:[#allocation2 + $0x17e] sm:$0x3f] }
 0x69e   : > { %v5146_v18 = vpop.f32.mrb[150].mxu1  ;;  %v19641_v54 = vpop.f32.mrb[36].mxu0  ;;  %15486 = vmatpush3.bf16.msra.mxu1 %v17237_v57  ;;  %v7307_v26 = vpack.c.bf16 %v7300_v35, %v7299_v33  ;;  %v6482_v57 = vld [vmem:[#allocation2 + $0x7e] sm:$0xff] }
 0x69f   : > { %v19644_v22 = vadd.f32 %v5146_v18, %v19511_v1  ;;  %v15174_v34 = vpop.f32.mrb[151].mxu1  ;;  %v15309_v47 = vpop.f32.mrb[37].mxu0  ;;  %15543 = vmatprep.subr.bf16.mxu1 %v17571_v52  ;;  %v6481_v1 = vld [vmem:[#allocation2 + $0x76] sm:$0xff] }
 0x6a0   : > { %v19648_v61 = vpop.f32.mrb[38].mxu0  ;;  %15730 = vmatpush3.bf16.msra.mxu0 %v17238_v44  ;;  %v6490_v56 = vpack.c.bf16 %v6481_v1, %v6480_v17  ;;  %v7303_v34 = vld [vmem:[#allocation2 + $0x176] sm:$0xff]  ;;  %v17247_v17 = vld [vmem:[%s21374_s2 + $0x360] sm:$0xff]  }
 0x6a1   : > { %v15310_v37 = vpop.f32.mrb[39].mxu0  ;;  %15432 = vmatmul.mubr.bf16.gmra.mrb[0].mxu1 %v6168_v24  ;;  %15731 = vmatprep.subr.bf16.mxu0 %v17571_v52  ;;  %v7309_v24 = vpack.c.bf16 %v7304_v38, %v7303_v34  ;;  %v17251_v38 = vld [vmem:[%s21374_s2 + $0x370] sm:$0xff]   ;;  %v7623_v34 = vld [vmem:[#allocation2 + $0x147] sm:$0xff] }
 0x6a2   : > { %15487 = vmatprep.mubr.msk.bf16.mxu1 %vm17572_vm14, %v17571_v52 }
 0x6a3   : > { %15676 = vmatmul.mubr.bf16.gmra.mrb[144].mxu0 %v7307_v26 }
 0x6a4   : > { %v5151_v48 = vpop.f32.mrb[152].mxu1  ;;  %15679 = vmatprep.mubr.msk.bf16.mxu0 %vm17572_vm14, %v17571_v52  ;;  %15732 = vmatpush3.bf16.msra.mxu0 %v17239_v30  ;;  %v6485_v30 = vld [vmem:[#allocation2 + $0x96] sm:$0xff] }
 0x6a5   : > { %v19662_v29 = vadd.f32 %v5151_v48, %v19529_v14  ;;  %v15177_v50 = vpop.f32.mrb[153].mxu1  ;;  %15733 = vmatprep.subr.bf16.mxu0 %v17571_v52 }
 0x6a6   : > { %v5154_v15 = vpop.f32.mrb[154].mxu1  ;;  %v19665_v63 = vpop.f32.mrb[40].mxu0  ;;  %v7622_v50 = vld [vmem:[#allocation2 + $0x13f] sm:$0xff] }
 0x6a7   : > { %v19671_v41 = vadd.f32 %v5154_v15, %v19536_v0  ;;  %v15178_v21 = vpop.f32.mrb[155].mxu1  ;;  %v15313_v53 = vpop.f32.mrb[41].mxu0  ;;  %v17242_v0 = vld [vmem:[%s21374_s2 + $0x348] sm:$0xff]  }
 0x6a8   : > { %v19673_v14 = vpop.f32.mrb[42].mxu0  ;;  %15734 = vmatpush3.bf16.msra.mxu0 %v17241_v40  ;;  %v6484_v40 = vld [vmem:[#allocation2 + $0x8e] sm:$0xff]  ;;  %v7621_v21 = vld [vmem:[#allocation2 + $0x137] sm:$0xff]  ;;  %v17248_v53 = vld [vmem:[%s21374_s2 + $0x500] sm:$0xff]  }
 0x6a9   : > { %v15314_v6 = vpop.f32.mrb[43].mxu0  ;;  %15488 = vmatmul.mubr.bf16.vlgmr.msra.gmra.mrb[4].mxu1 %v6490_v56  ;;  %15735 = vmatprep.subr.bf16.mxu0 %v17571_v52  ;;  %v6492_v56 = vpack.c.bf16 %v6485_v30, %v6484_v40  ;;  %v6489_v30 = vld [vmem:[#allocation2 + $0xb6] sm:$0x3f] }
 0x6aa   : > { %15544 = vmatpush3.bf16.msra.mxu1 %v17240_v19  ;;  %15491 = vmatprep.mubr.msk.bf16.mxu1 %vm17572_vm14, %v17571_v52 }
 0x6ab   : > { %15680 = vmatmul.mubr.bf16.gmra.mrb[148].mxu0 %v7308_v32  ;;  %15545 = vmatprep.subr.bf16.mxu1 %v17571_v52  ;;  %v6487_v32 = vld [vmem:[#allocation2 + $0xa6] sm:$0xff] }
 0x6ac   : > { %v5159_v43 = vpop.f32.mrb[156].mxu1  ;;  %15683 = vmatprep.mubr.msk.bf16.mxu0 %vm17572_vm14, %v17571_v52  ;;  %15736 = vmatpush3.bf16.msra.mxu0 %v17243_v51  ;;  %v7631_v51 = vpack.c.bf16 %v7622_v50, %v7621_v21 }
 0x6ad   : > { %v19691_v11 = vadd.f32 %v5159_v43, %v19557_v55  ;;  %v15181_v16 = vpop.f32.mrb[157].mxu1  ;;  %15737 = vmatprep.subr.bf16.mxu0 %v17571_v52  ;;  %v6491_v55 = vpack.c.bf16 %v6483_v60, %v6482_v57  ;;  %v7624_v57 = vld [vmem:[#allocation2 + $0x14f] sm:$0xff] }
 0x6ae   : > { %v5162_v10 = vpop.f32.mrb[158].mxu1  ;;  %v19694_v46 = vpop.f32.mrb[44].mxu0  ;;  %15546 = vmatpush3.bf16.msra.mxu1 %v17242_v0  ;;  %v17250_v0 = vld [vmem:[%s21374_s2 + $0x508] sm:$0xff]  }
 0x6af   : > { %v19700_v44 = vadd.f32 %v5162_v10, %v19564_v39  ;;  %v15182_v9 = vpop.f32.mrb[159].mxu1  ;;  %v15317_v18 = vpop.f32.mrb[45].mxu0  ;;  %15547 = vmatprep.subr.bf16.mxu1 %v17571_v52  ;;  %v17246_v39 = vld [vmem:[%s21374_s2 + $0x358] sm:$0xff]  }
 0x6b0   : > { %v19703_v35 = vpop.f32.mrb[46].mxu0  ;;  %15738 = vmatpush3.bf16.msra.mxu0 %v17245_v27  ;;  %v6486_v10 = vld [vmem:[#allocation2 + $0x9e] sm:$0xff] }
 0x6b1   : > { %v15318_v47 = vpop.f32.mrb[47].mxu0  ;;  %15492 = vmatmul.mubr.bf16.gmra.mrb[8].mxu1 %v6491_v55  ;;  %15795 = vmatprep.subr.bf16.mxu0 %v17571_v52 }
 0x6b2   : > { %15495 = vmatprep.mubr.msk.bf16.mxu1 %vm17572_vm14, %v17571_v52  ;;  %15548 = vmatpush3.bf16.msra.mxu1 %v17244_v12  ;;  %v17252_v47 = vld [vmem:[%s21374_s2 + $0x510] sm:$0xff]  }
 0x6b3   : > { %15684 = vmatmul.mubr.bf16.gmra.mrb[152].mxu0 %v7309_v24  ;;  %15549 = vmatprep.subr.bf16.mxu1 %v17571_v52 }
 0x6b4   : > { %v5290_v33 = vpop.f32.mrb[160].mxu1  ;;  %15739 = vmatprep.mubr.msk.bf16.mxu0 %vm17572_vm14, %v17571_v52 }
 0x6b5   : > { %v19715_v37 = vadd.f32 %v5290_v33, %v19580_v42  ;;  %v15201_v26 = vpop.f32.mrb[161].mxu1 }
 0x6b6   : > { %v5293_v1 = vpop.f32.mrb[162].mxu1  ;;  %v19717_v48 = vpop.f32.mrb[48].mxu0  ;;  %15550 = vmatpush3.bf16.msra.mxu1 %v17246_v39  ;;  %v7632_v39 = vpack.c.bf16 %v7624_v57, %v7623_v34  ;;  %v17254_v26 = vld [vmem:[%s21374_s2 + $0x518] sm:$0xff]   ;;  %v6806_v57 = vld [vmem:[#allocation2 + $0x6f] sm:$0xff] }
 0x6b7   : > { %v19723_v15 = vadd.f32 %v5293_v1, %v19588_v62  ;;  %v15202_v3 = vpop.f32.mrb[163].mxu1  ;;  %v15321_v19 = vpop.f32.mrb[49].mxu0  ;;  %15551 = vmatprep.subr.bf16.mxu1 %v17571_v52  ;;  %v17249_v62 = vld [vmem:[%s21374_s2 + $0x368] sm:$0xff]  }
 0x6b8   : > { %v19726_v42 = vpop.f32.mrb[50].mxu0  ;;  %v6488_v3 = vld [vmem:[#allocation2 + $0xae] sm:$0xff]  ;;  %v7626_v19 = vld [vmem:[#allocation2 + $0x15f] sm:$0xff] }
 0x6b9   : > { %v15322_v59 = vpop.f32.mrb[51].mxu0  ;;  %15496 = vmatmul.mubr.bf16.gmra.mrb[12].mxu1 %v6492_v56 }
 0x6ba   : > { %15499 = vmatprep.mubr.msk.bf16.mxu1 %vm17572_vm14, %v17571_v52  ;;  %15552 = vmatpush3.bf16.msra.mxu1 %v17247_v17  ;;  %v6494_v59 = vpack.c.bf16 %v6489_v30, %v6488_v3  ;;  %v17261_v3 = vld [vmem:[%s21374_s2 + $0x538] sm:$0xff]  }
 0x6bb   : > { %15740 = vmatmul.mubr.bf16.vlgmr.msra.gmra.mrb[156].mxu0 %v7631_v51  ;;  %15553 = vmatprep.subr.bf16.mxu1 %v17571_v52 }
 0x6bc   : > { %v5298_v6 = vpop.f32.mrb[164].mxu1  ;;  %15743 = vmatprep.mubr.msk.bf16.mxu0 %vm17572_vm14, %v17571_v52  ;;  %15796 = vmatpush3.bf16.msra.mxu0 %v17248_v53 }
 0x6bd   : > { %v19743_v43 = vadd.f32 %v5298_v6, %v19607_v7  ;;  %v15205_v60 = vpop.f32.mrb[165].mxu1  ;;  %15797 = vmatprep.subr.bf16.mxu0 %v17571_v52  ;;  %v6493_v7 = vpack.c.bf16 %v6487_v32, %v6486_v10 }
 0x6be   : > { %v5301_v27 = vpop.f32.mrb[166].mxu1  ;;  %v19746_v16 = vpop.f32.mrb[52].mxu0  ;;  %15554 = vmatpush3.bf16.msra.mxu1 %v17249_v62  ;;  %v17255_v62 = vld [vmem:[%s21374_s2 + $0x520] sm:$0xff]   ;;  %v17257_v60 = vld [vmem:[%s21374_s2 + $0x528] sm:$0xff]  }
 0x6bf   : > { %v19752_v12 = vadd.f32 %v5301_v27, %v19616_v45  ;;  %v15206_v9 = vpop.f32.mrb[167].mxu1  ;;  %v15325_v18 = vpop.f32.mrb[53].mxu0  ;;  %15555 = vmatprep.subr.bf16.mxu1 %v17571_v52  ;;  %v17253_v45 = vld [vmem:[%s21374_s2 + $0x378] sm:$0xff]  }
 0x6c0   : > { %v19755_v55 = vpop.f32.mrb[54].mxu0  ;;  %15798 = vmatpush3.bf16.msra.mxu0 %v17250_v0  ;;  %v7628_v18 = vld [vmem:[#allocation2 + $0x16f] sm:$0xff] }
 0x6c1   : > { %v15326_v24 = vpop.f32.mrb[55].mxu0  ;;  %15500 = vmatmul.mubr.bf16.gmra.mrb[16].mxu1 %v6493_v7  ;;  %15799 = vmatprep.subr.bf16.mxu0 %v17571_v52  ;;  %v17256_v7 = vld [vmem:[%s21374_s2 + $0x3c0] sm:$0xff]  }
 0x6c2   : > { %15503 = vmatprep.mubr.msk.bf16.mxu1 %vm17572_vm14, %v17571_v52  ;;  %15556 = vmatpush3.bf16.msra.mxu1 %v17251_v38 }
 0x6c3   : > { %15744 = vmatmul.mubr.bf16.gmra.mrb[160].mxu0 %v7632_v39  ;;  %15557 = vmatprep.subr.bf16.mxu1 %v17571_v52 }
 0x6c4   : > { %v5306_v33 = vpop.f32.mrb[168].mxu1  ;;  %15747 = vmatprep.mubr.msk.bf16.mxu0 %vm17572_vm14, %v17571_v52  ;;  %15800 = vmatpush3.bf16.msra.mxu0 %v17252_v47 }
 0x6c5   : > { %v19773_v1 = vadd.f32 %v5306_v33, %v19638_v28  ;;  %v15209_v40 = vpop.f32.mrb[169].mxu1  ;;  %15801 = vmatprep.subr.bf16.mxu0 %v17571_v52  ;;  %v7625_v28 = vld [vmem:[#allocation2 + $0x157] sm:$0xff] }
 0x6c6   : > { %v5309_v50 = vpop.f32.mrb[170].mxu1  ;;  %v19776_v17 = vpop.f32.mrb[56].mxu0  ;;  %15558 = vmatpush3.bf16.msra.mxu1 %v17253_v45  ;;  %v7633_v32 = vpack.c.bf16 %v7626_v19, %v7625_v28  ;;  %v7627_v45 = vld [vmem:[#allocation2 + $0x167] sm:$0xff]  ;;  %v17259_v33 = vld [vmem:[%s21374_s2 + $0x530] sm:$0xff]   ;;  %v6808_v28 = vld [vmem:[#allocation2 + $0x7f] sm:$0xff] }
 0x6c7   : > { %v19779_v56 = vadd.f32 %v5309_v50, %v19644_v22  ;;  %v15210_v21 = vpop.f32.mrb[171].mxu1  ;;  %v15381_v53 = vpop.f32.mrb[57].mxu0  ;;  %15615 = vmatprep.subr.bf16.mxu1 %v17571_v52  ;;  %v6807_v22 = vld [vmem:[#allocation2 + $0x77] sm:$0xff]  ;;  %v6809_v50 = vld [vmem:[#allocation2 + $0x87] sm:$0xff] }
 0x6c8   : > { %v19782_v51 = vpop.f32.mrb[58].mxu0  ;;  %15802 = vmatpush3.bf16.msra.mxu0 %v17254_v26  ;;  %v6816_v34 = vpack.c.bf16 %v6807_v22, %v6806_v57  ;;  %v7634_v26 = vpack.c.bf16 %v7628_v18, %v7627_v45 }
 0x6c9   : > { %v15382_v6 = vpop.f32.mrb[59].mxu0  ;;  %15504 = vmatmul.mubr.bf16.gmra.mrb[20].mxu1 %v6494_v59  ;;  %15803 = vmatprep.subr.bf16.mxu0 %v17571_v52 }
 0x6ca   : > { %15559 = vmatprep.mubr.msk.bf16.mxu1 %vm17572_vm14, %v17571_v52  ;;  %v17260_v6 = vld [vmem:[%s21374_s2 + $0x3d0] sm:$0xff]  }
 0x6cb   : > { %15748 = vmatmul.mubr.bf16.gmra.mrb[164].mxu0 %v7633_v32 }
 0x6cc   : > { %v5314_v0 = vpop.f32.mrb[172].mxu1  ;;  %15751 = vmatprep.mubr.msk.bf16.mxu0 %vm17572_vm14, %v17571_v52  ;;  %15804 = vmatpush3.bf16.msra.mxu0 %v17255_v62  ;;  %v7630_v62 = vld [vmem:[#allocation2 + $0x17f] sm:$0x3f] }
 0x6cd   : > { %v19796_v27 = vadd.f32 %v5314_v0, %v19662_v29  ;;  %v15213_v10 = vpop.f32.mrb[173].mxu1  ;;  %15805 = vmatprep.subr.bf16.mxu0 %v17571_v52 }
 0x6ce   : > { %v5317_v38 = vpop.f32.mrb[174].mxu1  ;;  %v19799_v9 = vpop.f32.mrb[60].mxu0  ;;  %v7629_v10 = vld [vmem:[#allocation2 + $0x177] sm:$0xff] }
 0x6cf   : > { %v19805_v47 = vadd.f32 %v5317_v38, %v19671_v41  ;;  %v15214_v24 = vpop.f32.mrb[175].mxu1  ;;  %v15385_v39 = vpop.f32.mrb[61].mxu0  ;;  %v17258_v41 = vld [vmem:[%s21374_s2 + $0x3c8] sm:$0xff]   ;;  %v7635_v38 = vpack.c.bf16 %v7630_v62, %v7629_v10 }
 0x6d0   : > { %v19807_v29 = vpop.f32.mrb[62].mxu0  ;;  %15806 = vmatpush3.bf16.msra.mxu0 %v17257_v60  ;;  %v17266_v62 = vld [vmem:[%s21374_s2 + $0x588] sm:$0xff]  }
 0x6d1   : > { %v15386_v30 = vpop.f32.mrb[63].mxu0  ;;  %15560 = vmatmul.mubr.bf16.vlgmr.msra.gmra.mrb[24].mxu1 %v6816_v34  ;;  %15807 = vmatprep.subr.bf16.mxu0 %v17571_v52 }
 0x6d2   : > { %15616 = vmatpush3.bf16.msra.mxu1 %v17256_v7  ;;  %15563 = vmatprep.mubr.msk.bf16.mxu1 %vm17572_vm14, %v17571_v52  ;;  %v6811_v7 = vld [vmem:[#allocation2 + $0x97] sm:$0xff]  ;;  %v17263_v30 = vld [vmem:[%s21374_s2 + $0x3e0] sm:$0xff]  }
 0x6d3   : > { %15752 = vmatmul.mubr.bf16.gmra.mrb[168].mxu0 %v7634_v26  ;;  %15617 = vmatprep.subr.bf16.mxu1 %v17571_v52 }
 0x6d4   : > { %v5322_v40 = vpop.f32.mrb[176].mxu1  ;;  %15755 = vmatprep.mubr.msk.bf16.mxu0 %vm17572_vm14, %v17571_v52  ;;  %15808 = vmatpush3.bf16.msra.mxu0 %v17259_v33  ;;  %v6810_v33 = vld [vmem:[#allocation2 + $0x8f] sm:$0xff] }
 0x6d5   : > { %v19825_v19 = vadd.f32 %v5322_v40, %v19691_v11  ;;  %v15217_v21 = vpop.f32.mrb[177].mxu1  ;;  %15809 = vmatprep.subr.bf16.mxu0 %v17571_v52  ;;  %v6817_v11 = vpack.c.bf16 %v6809_v50, %v6808_v28  ;;  %v6818_v50 = vpack.c.bf16 %v6811_v7, %v6810_v33  ;;  %v6813_v28 = vld [vmem:[#allocation2 + $0xa7] sm:$0xff]  ;;  %v6815_v33 = vld [vmem:[#allocation2 + $0xb7] sm:$0x3f] }
 0x6d6   : > { %v5325_v53 = vpop.f32.mrb[178].mxu1  ;;  %v19828_v59 = vpop.f32.mrb[64].mxu0  ;;  %15618 = vmatpush3.bf16.msra.mxu1 %v17258_v41 }
 0x6d7   : > { %v19834_v32 = vadd.f32 %v5325_v53, %v19700_v44  ;;  %v15218_v22 = vpop.f32.mrb[179].mxu1  ;;  %v15389_v0 = vpop.f32.mrb[65].mxu0  ;;  %15619 = vmatprep.subr.bf16.mxu1 %v17571_v52  ;;  %v17262_v44 = vld [vmem:[%s21374_s2 + $0x3d8] sm:$0xff]  }
 0x6d8   : > { %v19837_v60 = vpop.f32.mrb[66].mxu0  ;;  %15810 = vmatpush3.bf16.msra.mxu0 %v17261_v3  ;;  %v17264_v3 = vld [vmem:[%s21374_s2 + $0x580] sm:$0xff]   ;;  %v17267_v0 = vld [vmem:[%s21374_s2 + $0x3f0] sm:$0xff]  }
 0x6d9   : > { %v15390_v57 = vpop.f32.mrb[67].mxu0  ;;  %15564 = vmatmul.mubr.bf16.gmra.mrb[28].mxu1 %v6817_v11  ;;  %15867 = vmatprep.subr.bf16.mxu0 %v17571_v52 }
 0x6da   : > { %15567 = vmatprep.mubr.msk.bf16.mxu1 %vm17572_vm14, %v17571_v52  ;;  %15620 = vmatpush3.bf16.msra.mxu1 %v17260_v6 }
 0x6db   : > { %15756 = vmatmul.mubr.bf16.gmra.mrb[172].mxu0 %v7635_v38  ;;  %15621 = vmatprep.subr.bf16.mxu1 %v17571_v52 }
 0x6dc   : > { %v5453_v18 = vpop.f32.mrb[180].mxu1  ;;  %15811 = vmatprep.mubr.msk.bf16.mxu0 %vm17572_vm14, %v17571_v52 }
 0x6dd   : > { %v19849_v34 = vadd.f32 %v5453_v18, %v19715_v37  ;;  %v15237_v24 = vpop.f32.mrb[181].mxu1  ;;  %v17268_v18 = vld [vmem:[%s21374_s2 + $0x590] sm:$0xff]  }
 0x6de   : > { %v5456_v39 = vpop.f32.mrb[182].mxu1  ;;  %v19851_v45 = vpop.f32.mrb[68].mxu0  ;;  %15622 = vmatpush3.bf16.msra.mxu1 %v17262_v44  ;;  %v7949_v44 = vld [vmem:[#allocation2 + $0x24] sm:$0xff] }
 0x6df   : > { %v19857_v26 = vadd.f32 %v5456_v39, %v19723_v15  ;;  %v15238_v41 = vpop.f32.mrb[183].mxu1  ;;  %v15393_v40 = vpop.f32.mrb[69].mxu0  ;;  %15623 = vmatprep.subr.bf16.mxu1 %v17571_v52  ;;  %v17265_v15 = vld [vmem:[%s21374_s2 + $0x3e8] sm:$0xff]   ;;  %v7958_v24 = vpack.c.bf16 %v19514_v20, %v7949_v44  ;;  %v17270_v20 = vld [vmem:[%s21374_s2 + $0x598] sm:$0xff]  }
 0x6e0   : > { %v19860_v37 = vpop.f32.mrb[70].mxu0 }
 0x6e1   : > { %v15394_v21 = vpop.f32.mrb[71].mxu0  ;;  %15568 = vmatmul.mubr.bf16.gmra.mrb[32].mxu1 %v6818_v50 }
 0x6e2   : > { %15571 = vmatprep.mubr.msk.bf16.mxu1 %vm17572_vm14, %v17571_v52  ;;  %15624 = vmatpush3.bf16.msra.mxu1 %v17263_v30 }
 0x6e3   : > { %15812 = vmatmul.mubr.bf16.vlgmr.msra.gmra.mrb[176].mxu0 %v7957_v5  ;;  %15625 = vmatprep.subr.bf16.mxu1 %v17571_v52  ;;  %v6812_v5 = vld [vmem:[#allocation2 + $0x9f] sm:$0xff] }
 0x6e4   : > { %v5461_v53 = vpop.f32.mrb[184].mxu1  ;;  %15815 = vmatprep.mubr.msk.bf16.mxu0 %vm17572_vm14, %v17571_v52  ;;  %15868 = vmatpush3.bf16.msra.mxu0 %v17264_v3  ;;  %v6819_v38 = vpack.c.bf16 %v6813_v28, %v6812_v5  ;;  %v6814_v3 = vld [vmem:[#allocation2 + $0xaf] sm:$0xff] }
 0x6e5   : > { %v19880_v6 = vadd.f32 %v5461_v53, %v19743_v43  ;;  %v15241_v22 = vpop.f32.mrb[185].mxu1  ;;  %15869 = vmatprep.subr.bf16.mxu0 %v17571_v52  ;;  %v6820_v28 = vpack.c.bf16 %v6815_v33, %v6814_v3 }
 0x6e6   : > { %v5464_v58 = vpop.f32.mrb[186].mxu1  ;;  %v19883_v13 = vpop.f32.mrb[72].mxu0  ;;  %15626 = vmatpush3.bf16.msra.mxu1 %v17265_v15  ;;  %v17271_v22 = vld [vmem:[%s21374_s2 + $0x5a0] sm:$0xff]  }
 0x6e7   : > { %v19889_v11 = vadd.f32 %v5464_v58, %v19752_v12  ;;  %v15242_v10 = vpop.f32.mrb[187].mxu1  ;;  %v15397_v57 = vpop.f32.mrb[73].mxu0  ;;  %15627 = vmatprep.subr.bf16.mxu1 %v17571_v52  ;;  %v17269_v12 = vld [vmem:[%s21374_s2 + $0x3f8] sm:$0xff]  }
 0x6e8   : > { %v19892_v43 = vpop.f32.mrb[74].mxu0  ;;  %15870 = vmatpush3.bf16.msra.mxu0 %v17266_v62  ;;  %v17273_v10 = vld [vmem:[%s21374_s2 + $0x5a8] sm:$0xff]  }
 0x6e9   : > { %v15398_v7 = vpop.f32.mrb[75].mxu0  ;;  %15572 = vmatmul.mubr.bf16.gmra.mrb[36].mxu1 %v6819_v38  ;;  %15871 = vmatprep.subr.bf16.mxu0 %v17571_v52  ;;  %v7132_v38 = vld [vmem:[#allocation2 + $0xd2] sm:$0xff] }
 0x6ea   : > { %15575 = vmatprep.mubr.msk.bf16.mxu1 %vm17572_vm14, %v17571_v52  ;;  %15628 = vmatpush3.bf16.msra.mxu1 %v17267_v0  ;;  %v17272_v7 = vld [vmem:[%s21374_s2 + $0x440] sm:$0xff]  }
 0x6eb   : > { %15816 = vmatmul.mubr.bf16.gmra.mrb[180].mxu0 %v7958_v24  ;;  %15629 = vmatprep.subr.bf16.mxu1 %v17571_v52 }
 0x6ec   : > { %v5469_v39 = vpop.f32.mrb[188].mxu1  ;;  %15819 = vmatprep.mubr.msk.bf16.mxu0 %vm17572_vm14, %v17571_v52  ;;  %15872 = vmatpush3.bf16.msra.mxu0 %v17268_v18 }
 0x6ed   : > { %v19911_v30 = vadd.f32 %v5469_v39, %v19773_v1  ;;  %v15245_v41 = vpop.f32.mrb[189].mxu1  ;;  %15873 = vmatprep.subr.bf16.mxu0 %v17571_v52  ;;  %v7951_v1 = vld [vmem:[#allocation2 + $0x34] sm:$0xff] }
 0x6ee   : > { %v5472_v40 = vpop.f32.mrb[190].mxu1  ;;  %v19914_v50 = vpop.f32.mrb[76].mxu0  ;;  %15630 = vmatpush3.bf16.msra.mxu1 %v17269_v12  ;;  %v7959_v5 = vpack.c.bf16 %v19538_v2, %v7951_v1  ;;  %v17275_v41 = vld [vmem:[%s21374_s2 + $0x5b0] sm:$0xff]  }
 0x6ef   : > { %v19917_v21 = vadd.f32 %v5472_v40, %v19779_v56  ;;  %v15246_v15 = vpop.f32.mrb[191].mxu1  ;;  %v15453_v53 = vpop.f32.mrb[77].mxu0  ;;  %15687 = vmatprep.subr.bf16.mxu1 %v17571_v52  ;;  %v7133_v56 = vld [vmem:[#allocation2 + $0xda] sm:$0xff] }
 0x6f0   : > { %v19920_v62 = vpop.f32.mrb[78].mxu0  ;;  %15874 = vmatpush3.bf16.msra.mxu0 %v17270_v20  ;;  %v7142_v24 = vpack.c.bf16 %v7133_v56, %v7132_v38  ;;  %v17276_v56 = vld [vmem:[%s21374_s2 + $0x450] sm:$0xff]  }
 0x6f1   : > { %v15454_v58 = vpop.f32.mrb[79].mxu0  ;;  %15576 = vmatmul.mubr.bf16.gmra.mrb[40].mxu1 %v6820_v28  ;;  %15875 = vmatprep.subr.bf16.mxu0 %v17571_v52 }
 0x6f2   : > { %15631 = vmatprep.mubr.msk.bf16.mxu1 %vm17572_vm14, %v17571_v52  ;;  %v7134_v58 = vld [vmem:[#allocation2 + $0xe2] sm:$0xff] }
 0x6f3   : > { %15820 = vmatmul.mubr.bf16.gmra.mrb[184].mxu0 %v7959_v5  ;;  %v7956_v5 = vld [vmem:[#allocation2 + $0x5c] sm:$0x3f] }
 0x6f4   : > { %v5477_v0 = vpop.f32.mrb[192].mxu1  ;;  %15823 = vmatprep.mubr.msk.bf16.mxu0 %vm17572_vm14, %v17571_v52  ;;  %15876 = vmatpush3.bf16.msra.mxu0 %v17271_v22 }
 0x6f5   : > { %v19935_v57 = vadd.f32 %v5477_v0, %v19796_v27  ;;  %v15249_v2 = vpop.f32.mrb[193].mxu1  ;;  %15877 = vmatprep.subr.bf16.mxu0 %v17571_v52  ;;  %v7953_v27 = vld [vmem:[#allocation2 + $0x44] sm:$0xff] }
 0x6f6   : > { %v5480_v44 = vpop.f32.mrb[194].mxu1  ;;  %v19938_v18 = vpop.f32.mrb[80].mxu0  ;;  %v7960_v3 = vpack.c.bf16 %v19567_v49, %v7953_v27  ;;  %v17277_v49 = vld [vmem:[%s21374_s2 + $0x5b8] sm:$0xff]  }
 0x6f7   : > { %v19944_v12 = vadd.f32 %v5480_v44, %v19805_v47  ;;  %v15250_v39 = vpop.f32.mrb[195].mxu1  ;;  %v15457_v33 = vpop.f32.mrb[81].mxu0  ;;  %v17274_v47 = vld [vmem:[%s21374_s2 + $0x448] sm:$0xff]   ;;  %v7955_v44 = vld [vmem:[#allocation2 + $0x54] sm:$0xff] }
 0x6f8   : > { %v19946_v20 = vpop.f32.mrb[82].mxu0  ;;  %15878 = vmatpush3.bf16.msra.mxu0 %v17273_v10 }
 0x6f9   : > { %v15458_v40 = vpop.f32.mrb[83].mxu0  ;;  %15632 = vmatmul.mubr.bf16.vlgmr.msra.gmra.mrb[44].mxu1 %v7142_v24  ;;  %15879 = vmatprep.subr.bf16.mxu0 %v17571_v52  ;;  %v7961_v24 = vpack.c.bf16 %v7956_v5, %v7955_v44  ;;  %v8273_v5 = vld [vmem:[#allocation2 + $0x15] sm:$0xff] }
 0x6fa   : > { %15688 = vmatpush3.bf16.msra.mxu1 %v17272_v7  ;;  %15635 = vmatprep.mubr.msk.bf16.mxu1 %vm17572_vm14, %v17571_v52  ;;  %v7136_v40 = vld [vmem:[#allocation2 + $0xf2] sm:$0xff] }
 0x6fb   : > { %15824 = vmatmul.mubr.bf16.gmra.mrb[188].mxu0 %v7960_v3  ;;  %15689 = vmatprep.subr.bf16.mxu1 %v17571_v52  ;;  %v8274_v3 = vld [vmem:[#allocation2 + $0x1d] sm:$0xff] }
 0x6fc   : > { %v5485_v15 = vpop.f32.mrb[196].mxu1  ;;  %15827 = vmatprep.mubr.msk.bf16.mxu0 %vm17572_vm14, %v17571_v52  ;;  %15880 = vmatpush3.bf16.msra.mxu0 %v17275_v41 }
 0x6fd   : > { %v19965_v53 = vadd.f32 %v5485_v15, %v19825_v19  ;;  %v15253_v28 = vpop.f32.mrb[197].mxu1  ;;  %15881 = vmatprep.subr.bf16.mxu0 %v17571_v52  ;;  %v7143_v19 = vpack.c.bf16 %v19582_v8, %v7134_v58 }
 0x6fe   : > { %v5488_v1 = vpop.f32.mrb[198].mxu1  ;;  %v19968_v22 = vpop.f32.mrb[84].mxu0  ;;  %15690 = vmatpush3.bf16.msra.mxu1 %v17274_v47  ;;  %v17279_v47 = vld [vmem:[%s21374_s2 + $0x460] sm:$0xff]  }
 0x6ff   : > { %v19974_v0 = vadd.f32 %v5488_v1, %v19834_v32  ;;  %v15254_v10 = vpop.f32.mrb[199].mxu1  ;;  %v15461_v2 = vpop.f32.mrb[85].mxu0  ;;  %15691 = vmatprep.subr.bf16.mxu1 %v17571_v52  ;;  %v17278_v32 = vld [vmem:[%s21374_s2 + $0x458] sm:$0xff]   ;;  %v7144_v1 = vpack.c.bf16 %v19610_v25, %v7136_v40  ;;  %v17281_v25 = vld [vmem:[%s21374_s2 + $0x468] sm:$0xff]  }
 0x700   : > { %v19978_v38 = vpop.f32.mrb[86].mxu0  ;;  %15882 = vmatpush3.bf16.msra.mxu0 %v17277_v49  ;;  %v8283_v2 = vpack.c.bf16 %v8274_v3, %v8273_v5  ;;  %v7140_v5 = vld [vmem:[#allocation2 + $0x112] sm:$0xff] }
 0x701   : > { %v15462_v7 = vpop.f32.mrb[87].mxu0  ;;  %15636 = vmatmul.mubr.bf16.gmra.mrb[48].mxu1 %v7143_v19  ;;  %15939 = vmatprep.subr.bf16.mxu0 %v17571_v52 }
 0x702   : > { %15639 = vmatprep.mubr.msk.bf16.mxu1 %vm17572_vm14, %v17571_v52  ;;  %15692 = vmatpush3.bf16.msra.mxu1 %v17276_v56  ;;  %v17280_v56 = vld [vmem:[%s21374_s2 + $0x600] sm:$0xff]  }
 0x703   : > { %15828 = vmatmul.mubr.bf16.gmra.mrb[192].mxu0 %v7961_v24  ;;  %15693 = vmatprep.subr.bf16.mxu1 %v17571_v52 }
 0x704   : > { %v5616_v8 = vpop.f32.mrb[200].mxu1  ;;  %15883 = vmatprep.mubr.msk.bf16.mxu0 %vm17572_vm14, %v17571_v52 }
 0x705   : > { %v5655_v39 = vadd.f32 %v5616_v8, %v19849_v34  ;;  %v15273_v33 = vpop.f32.mrb[201].mxu1  ;;  %v8276_v8 = vld [vmem:[#allocation2 + $0x2d] sm:$0xff] }
 0x706   : > { %v5619_v27 = vpop.f32.mrb[202].mxu1  ;;  %v19990_v41 = vpop.f32.mrb[88].mxu0  ;;  %15694 = vmatpush3.bf16.msra.mxu1 %v17278_v32  ;;  %v7138_v32 = vld [vmem:[#allocation2 + $0x102] sm:$0xff] }
 0x707   : > { %v5656_v15 = vadd.f32 %v5619_v27, %v19857_v26  ;;  %v15274_v49 = vpop.f32.mrb[203].mxu1  ;;  %v15465_v28 = vpop.f32.mrb[89].mxu0  ;;  %15695 = vmatprep.subr.bf16.mxu1 %v17571_v52  ;;  %v19999_v34 = vadd.f32 %v19641_v54, %v5655_v39  ;;  %v17283_v39 = vld [vmem:[%s21374_s2 + $0x470] sm:$0xff]   ;;  %v7145_v3 = vpack.c.bf16 %v19630_v23, %v7138_v32 }
 0x708   : > { %v20001_v58 = vpop.f32.mrb[90].mxu0  ;;  %v17284_v49 = vld [vmem:[%s21374_s2 + $0x610] sm:$0xff]  }
 0x709   : > { %v15466_v10 = vpop.f32.mrb[91].mxu0  ;;  %15640 = vmatmul.mubr.bf16.gmra.mrb[52].mxu1 %v7144_v1  ;;  %v20007_v26 = vadd.f32 %v19648_v61, %v5656_v15  ;;  %v17282_v61 = vld [vmem:[%s21374_s2 + $0x608] sm:$0xff]  }
 0x70a   : > { %15643 = vmatprep.mubr.msk.bf16.mxu1 %vm17572_vm14, %v17571_v52  ;;  %15696 = vmatpush3.bf16.msra.mxu1 %v17279_v47  ;;  %v8275_v15 = vld [vmem:[#allocation2 + $0x25] sm:$0xff] }
 0x70b   : > { %15884 = vmatmul.mubr.bf16.vlgmr.msra.gmra.mrb[196].mxu0 %v8283_v2  ;;  %15697 = vmatprep.subr.bf16.mxu1 %v17571_v52 }
 0x70c   : > { %v5624_v54 = vpop.f32.mrb[204].mxu1  ;;  %15887 = vmatprep.mubr.msk.bf16.mxu0 %vm17572_vm14, %v17571_v52  ;;  %15940 = vmatpush3.bf16.msra.mxu0 %v17280_v56  ;;  %v7141_v56 = vld [vmem:[#allocation2 + $0x11a] sm:$0x3f] }
 0x70d   : > { %v5657_v19 = vadd.f32 %v5624_v54, %v19880_v6  ;;  %v15277_v44 = vpop.f32.mrb[205].mxu1  ;;  %15941 = vmatprep.subr.bf16.mxu0 %v17571_v52  ;;  %v7146_v32 = vpack.c.bf16 %v7141_v56, %v7140_v5  ;;  %v17288_v5 = vld [vmem:[%s21374_s2 + $0x4c0] sm:$0xff]  }
 0x70e   : > { %v5627_v7 = vpop.f32.mrb[206].mxu1  ;;  %v20022_v24 = vpop.f32.mrb[92].mxu0  ;;  %15698 = vmatpush3.bf16.msra.mxu1 %v17281_v25 }
 0x70f   : > { %v5658_v33 = vadd.f32 %v5627_v7, %v19889_v11  ;;  %v15278_v27 = vpop.f32.mrb[207].mxu1  ;;  %v15469_v40 = vpop.f32.mrb[93].mxu0  ;;  %15699 = vmatprep.subr.bf16.mxu1 %v17571_v52  ;;  %v20031_v6 = vadd.f32 %v19665_v63, %v5657_v19  ;;  %v8284_v11 = vpack.c.bf16 %v8276_v8, %v8275_v15  ;;  %v17285_v63 = vld [vmem:[%s21374_s2 + $0x478] sm:$0xff]   ;;  %v17289_v15 = vld [vmem:[%s21374_s2 + $0x628] sm:$0xff]  }
 0x710   : > { %v20033_v47 = vpop.f32.mrb[94].mxu0  ;;  %15942 = vmatpush3.bf16.msra.mxu0 %v17282_v61  ;;  %v8278_v61 = vld [vmem:[#allocation2 + $0x3d] sm:$0xff] }
 0x711   : > { %v15470_v28 = vpop.f32.mrb[95].mxu0  ;;  %15644 = vmatmul.mubr.bf16.gmra.mrb[56].mxu1 %v7145_v3  ;;  %15943 = vmatprep.subr.bf16.mxu0 %v17571_v52  ;;  %v20040_v23 = vadd.f32 %v19673_v14, %v5658_v33  ;;  %v17286_v14 = vld [vmem:[%s21374_s2 + $0x618] sm:$0xff]   ;;  %v17287_v33 = vld [vmem:[%s21374_s2 + $0x620] sm:$0xff]  }
 0x712   : > { %15647 = vmatprep.mubr.msk.bf16.mxu1 %vm17572_vm14, %v17571_v52  ;;  %15700 = vmatpush3.bf16.msra.mxu1 %v17283_v39 }
 0x713   : > { %15888 = vmatmul.mubr.bf16.gmra.mrb[200].mxu0 %v8284_v11  ;;  %15701 = vmatprep.subr.bf16.mxu1 %v17571_v52 }
 0x714   : > { %v5632_v1 = vpop.f32.mrb[208].mxu1  ;;  %15891 = vmatprep.mubr.msk.bf16.mxu0 %vm17572_vm14, %v17571_v52  ;;  %15944 = vmatpush3.bf16.msra.mxu0 %v17284_v49 }
 0x715   : > { %v5659_v10 = vadd.f32 %v5632_v1, %v19911_v30  ;;  %v15281_v2 = vpop.f32.mrb[209].mxu1  ;;  %15945 = vmatprep.subr.bf16.mxu0 %v17571_v52  ;;  %v8277_v30 = vld [vmem:[#allocation2 + $0x35] sm:$0xff]  ;;  %v8280_v1 = vld [vmem:[#allocation2 + $0x4d] sm:$0xff] }
 0x716   : > { %v5635_v25 = vpop.f32.mrb[210].mxu1  ;;  %v20055_v54 = vpop.f32.mrb[96].mxu0  ;;  %15702 = vmatpush3.bf16.msra.mxu1 %v17285_v63  ;;  %v8285_v40 = vpack.c.bf16 %v8278_v61, %v8277_v30  ;;  %v8279_v61 = vld [vmem:[#allocation2 + $0x45] sm:$0xff] }
 0x717   : > { %v5660_v19 = vadd.f32 %v5635_v25, %v19917_v21  ;;  %v15282_v44 = vpop.f32.mrb[211].mxu1  ;;  %v15525_v7 = vpop.f32.mrb[97].mxu0  ;;  %15759 = vmatprep.subr.bf16.mxu1 %v17571_v52  ;;  %v20060_v8 = vadd.f32 %v19694_v46, %v5659_v10  ;;  %v7459_v46 = vld [vmem:[#allocation2 + $0xdb] sm:$0xff]  ;;  %v7461_v30 = vld [vmem:[#allocation2 + $0xeb] sm:$0xff] }
 0x718   : > { %v20062_v39 = vpop.f32.mrb[98].mxu0  ;;  %15946 = vmatpush3.bf16.msra.mxu0 %v17286_v14  ;;  %v8286_v7 = vpack.c.bf16 %v8280_v1, %v8279_v61  ;;  %v7463_v61 = vld [vmem:[#allocation2 + $0xfb] sm:$0xff] }
 0x719   : > { %v15526_v27 = vpop.f32.mrb[99].mxu0  ;;  %15648 = vmatmul.mubr.bf16.gmra.mrb[60].mxu1 %v7146_v32  ;;  %15947 = vmatprep.subr.bf16.mxu0 %v17571_v52  ;;  %v20069_v21 = vadd.f32 %v19703_v35, %v5660_v19  ;;  %v7458_v35 = vld [vmem:[#allocation2 + $0xd3] sm:$0xff] }
 0x71a   : > { %15703 = vmatprep.mubr.msk.bf16.mxu1 %vm17572_vm14, %v17571_v52  ;;  %v7468_v56 = vpack.c.bf16 %v7459_v46, %v7458_v35  ;;  %v17291_v19 = vld [vmem:[%s21374_s2 + $0x630] sm:$0xff]  }
 0x71b   : > { %15892 = vmatmul.mubr.bf16.gmra.mrb[204].mxu0 %v8285_v40 }
 0x71c   : > { %v5640_v3 = vpop.f32.mrb[212].mxu1  ;;  %15895 = vmatprep.mubr.msk.bf16.mxu0 %vm17572_vm14, %v17571_v52  ;;  %15948 = vmatpush3.bf16.msra.mxu0 %v17287_v33 }
 0x71d   : > { %v5661_v49 = vadd.f32 %v5640_v3, %v19935_v57  ;;  %v15285_v28 = vpop.f32.mrb[213].mxu1  ;;  %15949 = vmatprep.subr.bf16.mxu0 %v17571_v52  ;;  %v7460_v3 = vld [vmem:[#allocation2 + $0xe3] sm:$0xff] }
 0x71e   : > { %v5643_v11 = vpop.f32.mrb[214].mxu1  ;;  %v20080_v63 = vpop.f32.mrb[100].mxu0  ;;  %v7469_v1 = vpack.c.bf16 %v7461_v30, %v7460_v3  ;;  %v17295_v30 = vld [vmem:[%s21374_s2 + $0x4e0] sm:$0xff]  }
 0x71f   : > { %v5662_v14 = vadd.f32 %v5643_v11, %v19944_v12  ;;  %v15286_v10 = vpop.f32.mrb[215].mxu1  ;;  %v15529_v2 = vpop.f32.mrb[101].mxu0  ;;  %v20087_v25 = vadd.f32 %v19717_v48, %v5661_v49  ;;  %v17290_v48 = vld [vmem:[%s21374_s2 + $0x4c8] sm:$0xff]   ;;  %v17292_v49 = vld [vmem:[%s21374_s2 + $0x4d0] sm:$0xff]  }
 0x720   : > { %v20089_v57 = vpop.f32.mrb[102].mxu0  ;;  %15950 = vmatpush3.bf16.msra.mxu0 %v17289_v15  ;;  %v8282_v15 = vld [vmem:[#allocation2 + $0x5d] sm:$0x3f] }
 0x721   : > { %v15530_v44 = vpop.f32.mrb[103].mxu0  ;;  %15704 = vmatmul.mubr.bf16.vlgmr.msra.gmra.mrb[64].mxu1 %v7468_v56  ;;  %15951 = vmatprep.subr.bf16.mxu0 %v17571_v52  ;;  %v20096_v12 = vadd.f32 %v19726_v42, %v5662_v14  ;;  %v17293_v42 = vld [vmem:[%s21374_s2 + $0x638] sm:$0xff]  }
 0x722   : > { %15760 = vmatpush3.bf16.msra.mxu1 %v17288_v5  ;;  %15707 = vmatprep.mubr.msk.bf16.mxu1 %vm17572_vm14, %v17571_v52  ;;  %v8281_v56 = vld [vmem:[#allocation2 + $0x55] sm:$0xff] }
 0x723   : > { %15896 = vmatmul.mubr.bf16.gmra.mrb[208].mxu0 %v8286_v7  ;;  %15761 = vmatprep.subr.bf16.mxu1 %v17571_v52  ;;  %v8287_v10 = vpack.c.bf16 %v8282_v15, %v8281_v56  ;;  %v8599_v15 = vld [vmem:[#allocation2 + $0x16] sm:$0xff] }
 0x724   : > { %v5648_v32 = vpop.f32.mrb[216].mxu1  ;;  %15899 = vmatprep.mubr.msk.bf16.mxu0 %vm17572_vm14, %v17571_v52  ;;  %15952 = vmatpush3.bf16.msra.mxu0 %v17291_v19 }
 0x725   : > { %v5663_v33 = vadd.f32 %v5648_v32, %v19965_v53  ;;  %v15289_v27 = vpop.f32.mrb[217].mxu1  ;;  %15953 = vmatprep.subr.bf16.mxu0 %v17571_v52  ;;  %v8600_v32 = vld [vmem:[#allocation2 + $0x1e] sm:$0xff] }
 0x726   : > { %v5651_v40 = vpop.f32.mrb[218].mxu1  ;;  %v20111_v46 = vpop.f32.mrb[104].mxu0  ;;  %15762 = vmatpush3.bf16.msra.mxu1 %v17290_v48  ;;  %v7462_v48 = vld [vmem:[#allocation2 + $0xf3] sm:$0xff] }
 0x727   : > { %v5664_v28 = vadd.f32 %v5651_v40, %v19974_v0  ;;  %v15290_v35 = vpop.f32.mrb[219].mxu1  ;;  %v15533_v11 = vpop.f32.mrb[105].mxu0  ;;  %15763 = vmatprep.subr.bf16.mxu1 %v17571_v52  ;;  %v20119_v53 = vadd.f32 %v19746_v16, %v5663_v33  ;;  %v17294_v0 = vld [vmem:[%s21374_s2 + $0x4d8] sm:$0xff]   ;;  %v7470_v40 = vpack.c.bf16 %v7463_v61, %v7462_v48 }
 0x728   : > { %v20121_v5 = vpop.f32.mrb[106].mxu0  ;;  %15954 = vmatpush3.bf16.msra.mxu0 %v17293_v42  ;;  %v7465_v11 = vld [vmem:[#allocation2 + $0x10b] sm:$0xff] }
 0x729   : > { %v15534_v14 = vpop.f32.mrb[107].mxu0  ;;  %15708 = vmatmul.mubr.bf16.gmra.mrb[68].mxu1 %v7469_v1  ;;  %v20124_v2 = vadd.f32 %v19755_v55, %v5664_v28  ;;  %v8609_v28 = vpack.c.bf16 %v8600_v32, %v8599_v15  ;;  %v8601_v32 = vld [vmem:[#allocation2 + $0x26] sm:$0xff] }
 0x72a   : > { %15711 = vmatprep.mubr.msk.bf16.mxu1 %vm17572_vm14, %v17571_v52  ;;  %15764 = vmatpush3.bf16.msra.mxu1 %v17292_v49 }
 0x72b   : > { %15900 = vmatmul.mubr.bf16.gmra.mrb[212].mxu0 %v8287_v10  ;;  %15765 = vmatprep.subr.bf16.mxu1 %v17571_v52  ;;  %v7464_v10 = vld [vmem:[#allocation2 + $0x103] sm:$0xff] }
 0x72c   : > { %v5942_v16 = vpop.f32.mrb[220].mxu1  ;;  %15955 = vmatprep.mubr.msk.bf16.mxu0 %vm17572_vm14, %v17571_v52 }
 0x72d   : > { %v5981_v19 = vadd.f32 %v5942_v16, %v19999_v34  ;;  %v15345_v55 = vpop.f32.mrb[221].mxu1  ;;  %v17297_v16 = vld [vmem:[%s21374_s2 + $0x4f0] sm:$0xff]  }
 0x72e   : > { %v5945_v44 = vpop.f32.mrb[222].mxu1  ;;  %v20135_v7 = vpop.f32.mrb[108].mxu0  ;;  %15766 = vmatpush3.bf16.msra.mxu1 %v17294_v0  ;;  %v8602_v0 = vld [vmem:[#allocation2 + $0x2e] sm:$0xff] }
 0x72f   : > { %v5982_v42 = vadd.f32 %v5945_v44, %v20007_v26  ;;  %v15346_v33 = vpop.f32.mrb[223].mxu1  ;;  %v15537_v27 = vpop.f32.mrb[109].mxu0  ;;  %15767 = vmatprep.subr.bf16.mxu1 %v17571_v52  ;;  %v20143_v34 = vadd.f32 %v19776_v17, %v5981_v19  ;;  %v17296_v26 = vld [vmem:[%s21374_s2 + $0x4e8] sm:$0xff]   ;;  %v7471_v44 = vpack.c.bf16 %v7465_v11, %v7464_v10 }
 0x730   : > { %v20145_v3 = vpop.f32.mrb[110].mxu0  ;;  %v7467_v27 = vld [vmem:[#allocation2 + $0x11b] sm:$0x3f] }
 0x731   : > { %v15538_v49 = vpop.f32.mrb[111].mxu0  ;;  %15712 = vmatmul.mubr.bf16.gmra.mrb[72].mxu1 %v7470_v40  ;;  %v20148_v35 = vadd.f32 %v19782_v51, %v5982_v42  ;;  %v8610_v42 = vpack.c.bf16 %v8602_v0, %v8601_v32 }
 0x732   : > { %15715 = vmatprep.mubr.msk.bf16.mxu1 %vm17572_vm14, %v17571_v52  ;;  %15768 = vmatpush3.bf16.msra.mxu1 %v17295_v30 }
 0x733   : > { %15956 = vmatmul.mubr.bf16.vlgmr.msra.gmra.mrb[216].mxu0 %v8609_v28  ;;  %15769 = vmatprep.subr.bf16.mxu1 %v17571_v52  ;;  %v7466_v28 = vld [vmem:[#allocation2 + $0x113] sm:$0xff] }
 0x734   : > { %v5950_v17 = vpop.f32.mrb[224].mxu1  ;;  %15959 = vmatprep.mubr.msk.bf16.mxu0 %vm17572_vm14, %v17571_v52 }
 0x735   : > { %v5983_v1 = vadd.f32 %v5950_v17, %v20031_v6  ;;  %v15349_v51 = vpop.f32.mrb[225].mxu1 }
 0x736   : > { %v5953_v56 = vpop.f32.mrb[226].mxu1  ;;  %v20159_v14 = vpop.f32.mrb[112].mxu0  ;;  %15770 = vmatpush3.bf16.msra.mxu1 %v17296_v26  ;;  %v8604_v26 = vld [vmem:[#allocation2 + $0x3e] sm:$0xff]  ;;  %v7472_v51 = vpack.c.bf16 %v7467_v27, %v7466_v28 }
 0x737   : > { %v5984_v61 = vadd.f32 %v5953_v56, %v20040_v23  ;;  %v15350_v19 = vpop.f32.mrb[227].mxu1  ;;  %v15541_v55 = vpop.f32.mrb[113].mxu0  ;;  %15771 = vmatprep.subr.bf16.mxu1 %v17571_v52  ;;  %v20167_v6 = vadd.f32 %v19799_v9, %v5983_v1  ;;  %v17298_v23 = vld [vmem:[%s21374_s2 + $0x4f8] sm:$0xff]  }
 0x738   : > { %v20169_v48 = vpop.f32.mrb[114].mxu0 }
 0x739   : > { %v15542_v30 = vpop.f32.mrb[115].mxu0  ;;  %15716 = vmatmul.mubr.bf16.gmra.mrb[76].mxu1 %v7471_v44  ;;  %v20172_v33 = vadd.f32 %v19807_v29, %v5984_v61  ;;  %v7784_v44 = vld [vmem:[#allocation2 + $0xd4] sm:$0xff] }
 0x73a   : > { %15719 = vmatprep.mubr.msk.bf16.mxu1 %vm17572_vm14, %v17571_v52  ;;  %15772 = vmatpush3.bf16.msra.mxu1 %v17297_v16 }
 0x73b   : > { %15960 = vmatmul.mubr.bf16.gmra.mrb[220].mxu0 %v8610_v42  ;;  %15773 = vmatprep.subr.bf16.mxu1 %v17571_v52  ;;  %v8606_v42 = vld [vmem:[#allocation2 + $0x4e] sm:$0xff] }
 0x73c   : > { %v5958_v9 = vpop.f32.mrb[228].mxu1  ;;  %15963 = vmatprep.mubr.msk.bf16.mxu0 %vm17572_vm14, %v17571_v52 }
 0x73d   : > { %v5985_v40 = vadd.f32 %v5958_v9, %v20060_v8  ;;  %v15353_v29 = vpop.f32.mrb[229].mxu1  ;;  %v8603_v8 = vld [vmem:[#allocation2 + $0x36] sm:$0xff] }
 0x73e   : > { %v5961_v15 = vpop.f32.mrb[230].mxu1  ;;  %v20183_v49 = vpop.f32.mrb[116].mxu0  ;;  %15774 = vmatpush3.bf16.msra.mxu1 %v17298_v23  ;;  %v8611_v16 = vpack.c.bf16 %v8604_v26, %v8603_v8 }
 0x73f   : > { %v5986_v17 = vadd.f32 %v5961_v15, %v20069_v21  ;;  %v15354_v11 = vpop.f32.mrb[231].mxu1  ;;  %v15597_v1 = vpop.f32.mrb[117].mxu0  ;;  %15831 = vmatprep.subr.bf16.mxu1 %v17571_v52  ;;  %v20188_v56 = vadd.f32 %v19828_v59, %v5985_v40  ;;  %v7785_v21 = vld [vmem:[#allocation2 + $0xdc] sm:$0xff] }
 0x740   : > { %v20190_v10 = vpop.f32.mrb[118].mxu0  ;;  %v7794_v23 = vpack.c.bf16 %v7785_v21, %v7784_v44  ;;  %v7787_v11 = vld [vmem:[#allocation2 + $0xec] sm:$0xff] }
 0x741   : > { %v15598_v0 = vpop.f32.mrb[119].mxu0  ;;  %15720 = vmatmul.mubr.bf16.gmra.mrb[80].mxu1 %v7472_v51  ;;  %v20193_v61 = vadd.f32 %v19837_v60, %v5986_v17  ;;  %v17299_v60 = vld [vmem:[%s21374_s2 + $0x540] sm:$0xff]   ;;  %v17301_v21 = vld [vmem:[%s21374_s2 + $0x550] sm:$0xff]  }
 0x742   : > { %15775 = vmatprep.mubr.msk.bf16.mxu1 %vm17572_vm14, %v17571_v52  ;;  %v7786_v0 = vld [vmem:[#allocation2 + $0xe4] sm:$0xff] }
 0x743   : > { %15964 = vmatmul.mubr.bf16.gmra.mrb[224].mxu0 %v8611_v16  ;;  %v8608_v16 = vld [vmem:[#allocation2 + $0x5e] sm:$0x3f]  ;;  %v7795_v44 = vpack.c.bf16 %v7787_v11, %v7786_v0 }
 0x744   : > { %v5966_v19 = vpop.f32.mrb[232].mxu1  ;;  %15967 = vmatprep.mubr.msk.bf16.mxu0 %vm17572_vm14, %v17571_v52 }
 0x745   : > { %v5987_v59 = vadd.f32 %v5966_v19, %v20087_v25  ;;  %v15357_v55 = vpop.f32.mrb[233].mxu1  ;;  %v8605_v25 = vld [vmem:[#allocation2 + $0x46] sm:$0xff] }
 0x746   : > { %v5969_v32 = vpop.f32.mrb[234].mxu1  ;;  %v20200_v30 = vpop.f32.mrb[120].mxu0  ;;  %v8612_v26 = vpack.c.bf16 %v8606_v42, %v8605_v25  ;;  %v8607_v42 = vld [vmem:[#allocation2 + $0x56] sm:$0xff] }
 0x747   : > { %v5988_v9 = vadd.f32 %v5969_v32, %v20096_v12  ;;  %v15358_v27 = vpop.f32.mrb[235].mxu1  ;;  %v15601_v40 = vpop.f32.mrb[121].mxu0  ;;  %v20207_v29 = vadd.f32 %v19851_v45, %v5987_v59  ;;  %v17300_v12 = vld [vmem:[%s21374_s2 + $0x548] sm:$0xff]  }
 0x748   : > { %v20209_v15 = vpop.f32.mrb[122].mxu0  ;;  %v7789_v27 = vld [vmem:[#allocation2 + $0xfc] sm:$0xff] }
 0x749   : > { %v15602_v28 = vpop.f32.mrb[123].mxu0  ;;  %15776 = vmatmul.mubr.bf16.vlgmr.msra.gmra.mrb[84].mxu1 %v7794_v23  ;;  %v20212_v17 = vadd.f32 %v19860_v37, %v5988_v9  ;;  %v8613_v23 = vpack.c.bf16 %v8608_v16, %v8607_v42  ;;  %v17305_v42 = vld [vmem:[%s21374_s2 + $0x570] sm:$0xff]  }
 0x74a   : > { %15832 = vmatpush3.bf16.msra.mxu1 %v17299_v60  ;;  %15779 = vmatprep.mubr.msk.bf16.mxu1 %vm17572_vm14, %v17571_v52 }
 0x74b   : > { %15968 = vmatmul.mubr.bf16.gmra.mrb[228].mxu0 %v8612_v26  ;;  %15833 = vmatprep.subr.bf16.mxu1 %v17571_v52 }
 0x74c   : > { %v5974_v45 = vpop.f32.mrb[236].mxu1  ;;  %15971 = vmatprep.mubr.msk.bf16.mxu0 %vm17572_vm14, %v17571_v52 }
 0x74d   : > { %v5989_v1 = vadd.f32 %v5974_v45, %v20119_v53  ;;  %v15361_v37 = vpop.f32.mrb[237].mxu1 }
 0x74e   : > { %v5977_v51 = vpop.f32.mrb[238].mxu1  ;;  %v20223_v8 = vpop.f32.mrb[124].mxu0  ;;  %15834 = vmatpush3.bf16.msra.mxu1 %v17300_v12  ;;  %v17303_v12 = vld [vmem:[%s21374_s2 + $0x560] sm:$0xff]  }
 0x74f   : > { %v5990_v19 = vadd.f32 %v5977_v51, %v20124_v2  ;;  %v15362_v59 = vpop.f32.mrb[239].mxu1  ;;  %v15605_v55 = vpop.f32.mrb[125].mxu0  ;;  %15835 = vmatprep.subr.bf16.mxu1 %v17571_v52  ;;  %v20231_v53 = vadd.f32 %v19883_v13, %v5989_v1  ;;  %v17302_v2 = vld [vmem:[%s21374_s2 + $0x558] sm:$0xff]  }
 0x750   : > { %v20233_v32 = vpop.f32.mrb[126].mxu0 }
 0x751   : > { %v15606_v60 = vpop.f32.mrb[127].mxu0  ;;  %15780 = vmatmul.mubr.bf16.gmra.mrb[88].mxu1 %v7795_v44  ;;  %v20236_v9 = vadd.f32 %v19892_v43, %v5990_v19  ;;  %v7788_v43 = vld [vmem:[#allocation2 + $0xf4] sm:$0xff] }
 0x752   : > { %15783 = vmatprep.mubr.msk.bf16.mxu1 %vm17572_vm14, %v17571_v52  ;;  %15836 = vmatpush3.bf16.msra.mxu1 %v17301_v21  ;;  %v7796_v37 = vpack.c.bf16 %v7789_v27, %v7788_v43 }
 0x753   : > { %15972 = vmatmul.mubr.bf16.gmra.mrb[232].mxu0 %v8613_v23  ;;  %15837 = vmatprep.subr.bf16.mxu1 %v17571_v52 }
 0x754   : > { %v6268_v13 = vpop.f32.mrb[240].mxu1 }
 0x755   : > { %v6307_v40 = vadd.f32 %v6268_v13, %v20143_v34  ;;  %v15417_v25 = vpop.f32.mrb[241].mxu1 }
 0x756   : > { %v6271_v28 = vpop.f32.mrb[242].mxu1  ;;  %v20245_v26 = vpop.f32.mrb[128].mxu0  ;;  %15838 = vmatpush3.bf16.msra.mxu1 %v17302_v2 }
 0x757   : > { %v6308_v45 = vadd.f32 %v6271_v28, %v20148_v35  ;;  %v15418_v11 = vpop.f32.mrb[243].mxu1  ;;  %v15609_v1 = vpop.f32.mrb[129].mxu0  ;;  %15839 = vmatprep.subr.bf16.mxu1 %v17571_v52  ;;  %v20253_v51 = vadd.f32 %v19914_v50, %v6307_v40  ;;  %v17304_v35 = vld [vmem:[%s21374_s2 + $0x568] sm:$0xff]  }
 0x758   : > { %v20255_v34 = vpop.f32.mrb[130].mxu0  ;;  %v7791_v50 = vld [vmem:[#allocation2 + $0x10c] sm:$0xff] }
 0x759   : > { %v15610_v0 = vpop.f32.mrb[131].mxu0  ;;  %15784 = vmatmul.mubr.bf16.gmra.mrb[92].mxu1 %v7796_v37  ;;  %v20258_v16 = vadd.f32 %v19920_v62, %v6308_v45  ;;  %v7790_v62 = vld [vmem:[#allocation2 + $0x104] sm:$0xff] }
 0x75a   : > { %15787 = vmatprep.mubr.msk.bf16.mxu1 %vm17572_vm14, %v17571_v52  ;;  %15840 = vmatpush3.bf16.msra.mxu1 %v17303_v12  ;;  %v7797_v13 = vpack.c.bf16 %v7791_v50, %v7790_v62 }
 0x75b   : > { %15841 = vmatprep.subr.bf16.mxu1 %v17571_v52 }
 0x75c   : > { %v6276_v21 = vpop.f32.mrb[244].mxu1 }
 0x75d   : > { %v6309_v19 = vadd.f32 %v6276_v21, %v20167_v6  ;;  %v15421_v59 = vpop.f32.mrb[245].mxu1 }
 0x75e   : > { %v6279_v55 = vpop.f32.mrb[246].mxu1  ;;  %v20267_v44 = vpop.f32.mrb[132].mxu0  ;;  %15842 = vmatpush3.bf16.msra.mxu1 %v17304_v35 }
 0x75f   : > { %v6310_v60 = vadd.f32 %v6279_v55, %v20172_v33  ;;  %v15422_v23 = vpop.f32.mrb[247].mxu1  ;;  %v15613_v2 = vpop.f32.mrb[133].mxu0  ;;  %15843 = vmatprep.subr.bf16.mxu1 %v17571_v52  ;;  %v20275_v27 = vadd.f32 %v19938_v18, %v6309_v19  ;;  %v17306_v33 = vld [vmem:[%s21374_s2 + $0x578] sm:$0xff]  }
 0x760   : > { %v20277_v6 = vpop.f32.mrb[134].mxu0  ;;  %v7793_v18 = vld [vmem:[#allocation2 + $0x11c] sm:$0x3f] }
 0x761   : > { %v15614_v40 = vpop.f32.mrb[135].mxu0  ;;  %15788 = vmatmul.mubr.bf16.gmra.mrb[96].mxu1 %v7797_v13  ;;  %v20280_v25 = vadd.f32 %v19946_v20, %v6310_v60  ;;  %v7792_v20 = vld [vmem:[#allocation2 + $0x114] sm:$0xff] }
 0x762   : > { %15791 = vmatprep.mubr.msk.bf16.mxu1 %vm17572_vm14, %v17571_v52  ;;  %15844 = vmatpush3.bf16.msra.mxu1 %v17305_v42  ;;  %v7798_v35 = vpack.c.bf16 %v7793_v18, %v7792_v20 }
 0x763   : > { %15845 = vmatprep.subr.bf16.mxu1 %v17571_v52 }
 0x764   : > { %v6284_v28 = vpop.f32.mrb[248].mxu1 }
 0x765   : > { %v6311_v43 = vadd.f32 %v6284_v28, %v20188_v56  ;;  %v15425_v12 = vpop.f32.mrb[249].mxu1 }
 0x766   : > { %v6287_v45 = vpop.f32.mrb[250].mxu1  ;;  %v20289_v11 = vpop.f32.mrb[136].mxu0  ;;  %15846 = vmatpush3.bf16.msra.mxu1 %v17306_v33  ;;  %v8113_v33 = vld [vmem:[#allocation2 + $0x90] sm:$0xff] }
 0x767   : > { %v6312_v1 = vadd.f32 %v6287_v45, %v20193_v61  ;;  %v15426_v37 = vpop.f32.mrb[251].mxu1  ;;  %v15669_v0 = vpop.f32.mrb[137].mxu0  ;;  %15903 = vmatprep.subr.bf16.mxu1 %v17571_v52  ;;  %v20294_v21 = vadd.f32 %v19968_v22, %v6311_v43  ;;  %v17307_v22 = vld [vmem:[%s21374_s2 + $0x5c0] sm:$0xff]  }
 0x768   : > { %v20296_v50 = vpop.f32.mrb[138].mxu0 }
 0x769   : > { %v15670_v19 = vpop.f32.mrb[139].mxu0  ;;  %15792 = vmatmul.mubr.bf16.gmra.mrb[100].mxu1 %v7798_v35  ;;  %v20299_v56 = vadd.f32 %v19978_v38, %v6312_v1 }
 0x76a   : > { %15847 = vmatprep.mubr.msk.bf16.mxu1 %vm17572_vm14, %v17571_v52 }
 0x76c   : > { %v6292_v59 = vpop.f32.mrb[252].mxu1 }
 0x76d   : > { %v6313_v61 = vadd.f32 %v6292_v59, %v20207_v29  ;;  %v15429_v55 = vpop.f32.mrb[253].mxu1 }
 0x76e   : > { %v6295_v62 = vpop.f32.mrb[254].mxu1  ;;  %v20304_v42 = vpop.f32.mrb[140].mxu0 }
 0x76f   : > { %v6314_v60 = vadd.f32 %v6295_v62, %v20212_v17  ;;  %v15430_v23 = vpop.f32.mrb[255].mxu1  ;;  %v15673_v2 = vpop.f32.mrb[141].mxu0  ;;  %v20311_v38 = vadd.f32 %v19990_v41, %v6313_v61  ;;  %v17308_v17 = vld [vmem:[%s21374_s2 + $0x5c8] sm:$0xff]   ;;  %v17311_v62 = vld [vmem:[%s21374_s2 + $0x5e0] sm:$0xff]  }
 0x770   : > { %v20313_v13 = vpop.f32.mrb[142].mxu0 }
 0x771   : > { %v15674_v40 = vpop.f32.mrb[143].mxu0  ;;  %15848 = vmatmul.mubr.bf16.vlgmr.msra.gmra.mrb[104].mxu1 %v8120_v31  ;;  %v20319_v29 = vadd.f32 %v20001_v58, %v6314_v60  ;;  %v8112_v31 = vld [vmem:[#allocation2 + $0x88] sm:$0xff]  ;;  %v17309_v58 = vld [vmem:[%s21374_s2 + $0x5d0] sm:$0xff]  }
 0x772   : > { %15904 = vmatpush3.bf16.msra.mxu1 %v17307_v22  ;;  %15851 = vmatprep.mubr.msk.bf16.mxu1 %vm17572_vm14, %v17571_v52  ;;  %v8121_v20 = vpack.c.bf16 %v8113_v33, %v8112_v31 }
 0x773   : > { %15905 = vmatprep.subr.bf16.mxu1 %v17571_v52 }
 0x774   : > { %v6300_v41 = vpop.f32.mrb[0].mxu1 }
 0x775   : > { %v6315_v28 = vadd.f32 %v6300_v41, %v20231_v53  ;;  %v15433_v18 = vpop.f32.mrb[1].mxu1 }
 0x776   : > { %v6303_v4 = vpop.f32.mrb[2].mxu1  ;;  %v20328_v36 = vpop.f32.mrb[144].mxu0  ;;  %15906 = vmatpush3.bf16.msra.mxu1 %v17308_v17 }
 0x777   : > { %v6316_v43 = vadd.f32 %v6303_v4, %v20236_v9  ;;  %v15434_v12 = vpop.f32.mrb[3].mxu1  ;;  %v15677_v45 = vpop.f32.mrb[145].mxu0  ;;  %15907 = vmatprep.subr.bf16.mxu1 %v17571_v52  ;;  %v20336_v1 = vadd.f32 %v20022_v24, %v6315_v28  ;;  %v17310_v9 = vld [vmem:[%s21374_s2 + $0x5d8] sm:$0xff]   ;;  %v8115_v24 = vld [vmem:[#allocation2 + $0xa0] sm:$0xff] }
 0x778   : > { %v20338_v53 = vpop.f32.mrb[146].mxu0 }
 0x779   : > { %v15678_v37 = vpop.f32.mrb[147].mxu0  ;;  %15852 = vmatmul.mubr.bf16.gmra.mrb[108].mxu1 %v8121_v20  ;;  %v20341_v0 = vadd.f32 %v20033_v47, %v6316_v43  ;;  %v8114_v47 = vld [vmem:[#allocation2 + $0x98] sm:$0xff] }
 0x77a   : > { %15855 = vmatprep.mubr.msk.bf16.mxu1 %vm17572_vm14, %v17571_v52  ;;  %15908 = vmatpush3.bf16.msra.mxu1 %v17309_v58  ;;  %v8122_v2 = vpack.c.bf16 %v8115_v24, %v8114_v47  ;;  %v17313_v58 = vld [vmem:[%s21374_s2 + $0x5f0] sm:$0xff]  }
 0x77b   : > { %15909 = vmatprep.subr.bf16.mxu1 %v17571_v52 }
 0x77c   : > { %v6594_v35 = vpop.f32.mrb[4].mxu1 }
 0x77d   : > { %v6633_v19 = vadd.f32 %v6594_v35, %v20253_v51  ;;  %v15489_v59 = vpop.f32.mrb[5].mxu1 }
 0x77e   : > { %v6597_v61 = vpop.f32.mrb[6].mxu1  ;;  %v20350_v55 = vpop.f32.mrb[148].mxu0  ;;  %15910 = vmatpush3.bf16.msra.mxu1 %v17310_v9 }
 0x77f   : > { %v6634_v22 = vadd.f32 %v6597_v61, %v20258_v16  ;;  %v15490_v60 = vpop.f32.mrb[7].mxu1  ;;  %v15681_v23 = vpop.f32.mrb[149].mxu0  ;;  %15911 = vmatprep.subr.bf16.mxu1 %v17571_v52  ;;  %v20358_v40 = vadd.f32 %v20055_v54, %v6633_v19  ;;  %v17312_v16 = vld [vmem:[%s21374_s2 + $0x5e8] sm:$0xff]   ;;  %v8117_v54 = vld [vmem:[#allocation2 + $0xb0] sm:$0xff] }
 0x780   : > { %v20360_v51 = vpop.f32.mrb[150].mxu0 }
 0x781   : > { %v15682_v17 = vpop.f32.mrb[151].mxu0  ;;  %15856 = vmatmul.mubr.bf16.gmra.mrb[112].mxu1 %v8122_v2  ;;  %v20363_v41 = vadd.f32 %v20062_v39, %v6634_v22  ;;  %v8116_v39 = vld [vmem:[#allocation2 + $0xa8] sm:$0xff] }
 0x782   : > { %15859 = vmatprep.mubr.msk.bf16.mxu1 %vm17572_vm14, %v17571_v52  ;;  %15912 = vmatpush3.bf16.msra.mxu1 %v17311_v62  ;;  %v8123_v20 = vpack.c.bf16 %v8117_v54, %v8116_v39 }
 0x783   : > { %15913 = vmatprep.subr.bf16.mxu1 %v17571_v52 }
 0x784   : > { %v6602_v33 = vpop.f32.mrb[8].mxu1 }
 0x785   : > { %v6635_v28 = vadd.f32 %v6602_v33, %v20275_v27  ;;  %v15493_v18 = vpop.f32.mrb[9].mxu1  ;;  %v8437_v33 = vld [vmem:[#allocation2 + $0x81] sm:$0xff] }
 0x786   : > { %v6605_v4 = vpop.f32.mrb[10].mxu1  ;;  %v20372_v31 = vpop.f32.mrb[152].mxu0  ;;  %15914 = vmatpush3.bf16.msra.mxu1 %v17312_v16  ;;  %v8436_v18 = vld [vmem:[#allocation2 + $0x79] sm:$0xff] }
 0x787   : > { %v6636_v43 = vadd.f32 %v6605_v4, %v20280_v25  ;;  %v15494_v12 = vpop.f32.mrb[11].mxu1  ;;  %v15685_v45 = vpop.f32.mrb[153].mxu0  ;;  %15915 = vmatprep.subr.bf16.mxu1 %v17571_v52  ;;  %v20380_v37 = vadd.f32 %v20080_v63, %v6635_v28  ;;  %v17314_v25 = vld [vmem:[%s21374_s2 + $0x5f8] sm:$0xff]   ;;  %v8119_v63 = vld [vmem:[#allocation2 + $0xc0] sm:$0x3f]  ;;  %v8446_v39 = vpack.c.bf16 %v8437_v33, %v8436_v18 }
 0x788   : > { %v20382_v27 = vpop.f32.mrb[154].mxu0 }
 0x789   : > { %v15686_v9 = vpop.f32.mrb[155].mxu0  ;;  %15860 = vmatmul.mubr.bf16.gmra.mrb[116].mxu1 %v8123_v20  ;;  %v20385_v35 = vadd.f32 %v20089_v57, %v6636_v43  ;;  %v8118_v57 = vld [vmem:[#allocation2 + $0xb8] sm:$0xff] }
 0x78a   : > { %15863 = vmatprep.mubr.msk.bf16.mxu1 %vm17572_vm14, %v17571_v52  ;;  %15916 = vmatpush3.bf16.msra.mxu1 %v17313_v58  ;;  %v8124_v23 = vpack.c.bf16 %v8119_v63, %v8118_v57 }
 0x78b   : > { %15917 = vmatprep.subr.bf16.mxu1 %v17571_v52 }
 0x78c   : > { %v6610_v24 = vpop.f32.mrb[12].mxu1 }
 0x78d   : > { %v6637_v19 = vadd.f32 %v6610_v24, %v20294_v21  ;;  %v15497_v59 = vpop.f32.mrb[13].mxu1 }
 0x78e   : > { %v6613_v61 = vpop.f32.mrb[14].mxu1  ;;  %v20394_v47 = vpop.f32.mrb[156].mxu0  ;;  %15918 = vmatpush3.bf16.msra.mxu1 %v17314_v25  ;;  %v8439_v25 = vld [vmem:[#allocation2 + $0x91] sm:$0xff] }
 0x78f   : > { %v6638_v62 = vadd.f32 %v6613_v61, %v20299_v56  ;;  %v15498_v22 = vpop.f32.mrb[15].mxu1  ;;  %v15741_v60 = vpop.f32.mrb[157].mxu0  ;;  %v20398_v2 = vadd.f32 %v20111_v46, %v6637_v19  ;;  %15975 = vmatprep.subr.bf16.mxu1 %v17571_v52 }
 0x790   : > { %v20401_v17 = vpop.f32.mrb[158].mxu0 }
 0x791   : > { %v15742_v16 = vpop.f32.mrb[159].mxu0  ;;  %15864 = vmatmul.mubr.bf16.gmra.mrb[120].mxu1 %v8124_v23  ;;  %v20404_v21 = vadd.f32 %v20121_v5, %v6638_v62 }
 0x792   : > { %15919 = vmatprep.mubr.msk.bf16.mxu1 %vm17572_vm14, %v17571_v52  ;;  %v8441_v16 = vld [vmem:[#allocation2 + $0xa1] sm:$0xff] }
 0x794   : > { %v6618_v56 = vpop.f32.mrb[16].mxu1 }
 0x795   : > { %v6639_v54 = vadd.f32 %v6618_v56, %v20311_v38  ;;  %v15501_v28 = vpop.f32.mrb[17].mxu1 }
 0x796   : > { %v6621_v46 = vpop.f32.mrb[18].mxu1  ;;  %v20409_v4 = vpop.f32.mrb[160].mxu0 }
 0x797   : > { %v6640_v58 = vadd.f32 %v6621_v46, %v20319_v29  ;;  %v15502_v43 = vpop.f32.mrb[19].mxu1  ;;  %v15745_v12 = vpop.f32.mrb[161].mxu0  ;;  %v20413_v5 = vadd.f32 %v20135_v7, %v6639_v54  ;;  %v8438_v7 = vld [vmem:[#allocation2 + $0x89] sm:$0xff] }
 0x798   : > { %v20415_v45 = vpop.f32.mrb[162].mxu0  ;;  %v8447_v62 = vpack.c.bf16 %v8439_v25, %v8438_v7 }
 0x799   : > { %v15746_v20 = vpop.f32.mrb[163].mxu0  ;;  %15920 = vmatmul.mubr.bf16.vlgmr.msra.gmra.mrb[124].mxu1 %v8446_v39  ;;  %v20418_v9 = vadd.f32 %v20145_v3, %v6640_v58 }
 0x79a   : > { %15923 = vmatprep.mubr.msk.bf16.mxu1 %vm17572_vm14, %v17571_v52  ;;  %v8443_v20 = vld [vmem:[#allocation2 + $0xb1] sm:$0xff] }
 0x79c   : > { %v6626_v38 = vpop.f32.mrb[20].mxu1 }
 0x79d   : > { %v6641_v24 = vadd.f32 %v6626_v38, %v20336_v1  ;;  %v15505_v29 = vpop.f32.mrb[21].mxu1 }
 0x79e   : > { %v6629_v63 = vpop.f32.mrb[22].mxu1  ;;  %v20423_v19 = vpop.f32.mrb[164].mxu0 }
 0x79f   : > { %v6642_v59 = vadd.f32 %v6629_v63, %v20341_v0  ;;  %v15506_v61 = vpop.f32.mrb[23].mxu1  ;;  %v15749_v57 = vpop.f32.mrb[165].mxu0  ;;  %v20427_v3 = vadd.f32 %v20159_v14, %v6641_v24  ;;  %v8440_v14 = vld [vmem:[#allocation2 + $0x99] sm:$0xff] }
 0x7a0   : > { %v20429_v22 = vpop.f32.mrb[166].mxu0  ;;  %v8448_v39 = vpack.c.bf16 %v8441_v16, %v8440_v14 }
 0x7a1   : > { %v15750_v60 = vpop.f32.mrb[167].mxu0  ;;  %15924 = vmatmul.mubr.bf16.gmra.mrb[128].mxu1 %v8447_v62  ;;  %v20432_v23 = vadd.f32 %v20169_v48, %v6642_v59 }
 0x7a2   : > { %15927 = vmatprep.mubr.msk.bf16.mxu1 %vm17572_vm14, %v17571_v52  ;;  %v8444_v60 = vld [vmem:[#allocation2 + $0xb9] sm:$0xff] }
 0x7a4   : > { %v6920_v1 = vpop.f32.mrb[24].mxu1 }
 0x7a5   : > { %v6959_v0 = vadd.f32 %v6920_v1, %v20358_v40  ;;  %v15561_v33 = vpop.f32.mrb[25].mxu1  ;;  %v8445_v1 = vld [vmem:[#allocation2 + $0xc1] sm:$0x3f] }
 0x7a6   : > { %v6923_v56 = vpop.f32.mrb[26].mxu1  ;;  %v20437_v54 = vpop.f32.mrb[168].mxu0 }
 0x7a7   : > { %v6960_v28 = vadd.f32 %v6923_v56, %v20363_v41  ;;  %v15562_v18 = vpop.f32.mrb[27].mxu1  ;;  %v15753_v46 = vpop.f32.mrb[169].mxu0  ;;  %v20441_v48 = vadd.f32 %v20183_v49, %v6959_v0  ;;  %v8442_v49 = vld [vmem:[#allocation2 + $0xa9] sm:$0xff] }
 0x7a8   : > { %v20443_v58 = vpop.f32.mrb[170].mxu0  ;;  %v8449_v59 = vpack.c.bf16 %v8443_v20, %v8442_v49 }
 0x7a9   : > { %v15754_v43 = vpop.f32.mrb[171].mxu0  ;;  %15928 = vmatmul.mubr.bf16.gmra.mrb[132].mxu1 %v8448_v39  ;;  %v20446_v12 = vadd.f32 %v20190_v10, %v6960_v28  ;;  %v8450_v28 = vpack.c.bf16 %v8445_v1, %v8444_v60 }
 0x7aa   : > { %15931 = vmatprep.mubr.msk.bf16.mxu1 %vm17572_vm14, %v17571_v52 }
 0x7ac   : > { %v6928_v40 = vpop.f32.mrb[28].mxu1 }
 0x7ad   : > { %v6961_v41 = vadd.f32 %v6928_v40, %v20380_v37  ;;  %v15565_v38 = vpop.f32.mrb[29].mxu1 }
 0x7ae   : > { %v6931_v25 = vpop.f32.mrb[30].mxu1  ;;  %v20451_v24 = vpop.f32.mrb[172].mxu0 }
 0x7af   : > { %v6962_v29 = vadd.f32 %v6931_v25, %v20385_v35  ;;  %v15566_v63 = vpop.f32.mrb[31].mxu1  ;;  %v15757_v7 = vpop.f32.mrb[173].mxu0  ;;  %v7124_v10 = vadd.f32 %v20200_v30, %v6961_v41 }
 0x7b0   : > { %v20455_v61 = vpop.f32.mrb[174].mxu0 }
 0x7b1   : > { %v15758_v57 = vpop.f32.mrb[175].mxu0  ;;  %15932 = vmatmul.mubr.bf16.gmra.mrb[136].mxu1 %v8449_v59  ;;  %v7125_v62 = vadd.f32 %v20209_v15, %v6962_v29 }
 0x7b2   : > { %15935 = vmatprep.mubr.msk.bf16.mxu1 %vm17572_vm14, %v17571_v52 }
 0x7b4   : > { %v6936_v37 = vpop.f32.mrb[32].mxu1 }
 0x7b5   : > { %v6963_v16 = vadd.f32 %v6936_v37, %v20398_v2  ;;  %v15569_v35 = vpop.f32.mrb[33].mxu1 }
 0x7b6   : > { %v6939_v0 = vpop.f32.mrb[34].mxu1  ;;  %v20461_v33 = vpop.f32.mrb[176].mxu0 }
 0x7b7   : > { %v6964_v30 = vadd.f32 %v6939_v0, %v20404_v21  ;;  %v15570_v56 = vpop.f32.mrb[35].mxu1  ;;  %v15813_v14 = vpop.f32.mrb[177].mxu0  ;;  %v7126_v18 = vadd.f32 %v20223_v8, %v6963_v16 }
 0x7b8   : > { %v20465_v15 = vpop.f32.mrb[178].mxu0 }
 0x7b9   : > { %v15814_v46 = vpop.f32.mrb[179].mxu0  ;;  %15936 = vmatmul.mubr.bf16.gmra.mrb[140].mxu1 %v8450_v28  ;;  %v7127_v39 = vadd.f32 %v20233_v32, %v6964_v30 }
 0x7ba   : > { %15985 = vmatprep.mubr.msk.bf16.mxu1 %vm17572_vm14, %v17571_v52 }
 0x7bc   : > { %v6944_v2 = vpop.f32.mrb[36].mxu1 }
 0x7bd   : > { %v6965_v43 = vadd.f32 %v6944_v2, %v20413_v5  ;;  %v15573_v40 = vpop.f32.mrb[37].mxu1 }
 0x7be   : > { %v6947_v20 = vpop.f32.mrb[38].mxu1  ;;  %v20471_v21 = vpop.f32.mrb[180].mxu0 }
 0x7bf   : > { %v6966_v41 = vadd.f32 %v6947_v20, %v20418_v9  ;;  %v15574_v38 = vpop.f32.mrb[39].mxu1  ;;  %v15817_v8 = vpop.f32.mrb[181].mxu0  ;;  %v7128_v25 = vadd.f32 %v20245_v26, %v6965_v43 }
 0x7c0   : > { %v20475_v49 = vpop.f32.mrb[182].mxu0 }
 0x7c1   : > { %v15818_v29 = vpop.f32.mrb[183].mxu0  ;;  %v7129_v32 = vadd.f32 %v20255_v34, %v6966_v41 }
 0x7c4   : > { %v6952_v63 = vpop.f32.mrb[40].mxu1 }
 0x7c5   : > { %v6967_v7 = vadd.f32 %v6952_v63, %v20427_v3  ;;  %v15577_v59 = vpop.f32.mrb[41].mxu1 }
 0x7c6   : > { %v6955_v5 = vpop.f32.mrb[42].mxu1  ;;  %v20479_v57 = vpop.f32.mrb[184].mxu0 }
 0x7c7   : > { %v6968_v37 = vadd.f32 %v6955_v5, %v20432_v23  ;;  %v15578_v60 = vpop.f32.mrb[43].mxu1  ;;  %v15821_v9 = vpop.f32.mrb[185].mxu0  ;;  %v7130_v1 = vadd.f32 %v20267_v44, %v6967_v7 }
 0x7c8   : > { %v20483_v16 = vpop.f32.mrb[186].mxu0 }
 0x7c9   : > { %v15822_v26 = vpop.f32.mrb[187].mxu0  ;;  %v7131_v35 = vadd.f32 %v20277_v6, %v6968_v37 }
 0x7cc   : > { %v7246_v0 = vpop.f32.mrb[44].mxu1 }
 0x7cd   : > { %v7285_v34 = vadd.f32 %v7246_v0, %v20441_v48  ;;  %v15633_v30 = vpop.f32.mrb[45].mxu1 }
 0x7ce   : > { %v7249_v3 = vpop.f32.mrb[46].mxu1  ;;  %v20487_v56 = vpop.f32.mrb[188].mxu0 }
 0x7cf   : > { %v7286_v14 = vadd.f32 %v7249_v3, %v20446_v12  ;;  %v15634_v28 = vpop.f32.mrb[47].mxu1  ;;  %v15825_v23 = vpop.f32.mrb[189].mxu0  ;;  %v7448_v46 = vadd.f32 %v20289_v11, %v7285_v34 }
 0x7d0   : > { %v20491_v2 = vpop.f32.mrb[190].mxu0 }
 0x7d1   : > { %v15826_v44 = vpop.f32.mrb[191].mxu0  ;;  %v7449_v43 = vadd.f32 %v20296_v50, %v7286_v14 }
 0x7d4   : > { %v7254_v40 = vpop.f32.mrb[48].mxu1 }
 0x7d5   : > { %v7287_v6 = vadd.f32 %v7254_v40, %v7124_v10  ;;  %v15637_v20 = vpop.f32.mrb[49].mxu1 }
 0x7d6   : > { %v7257_v41 = vpop.f32.mrb[50].mxu1  ;;  %v20494_v48 = vpop.f32.mrb[192].mxu0 }
 0x7d7   : > { %v7288_v38 = vadd.f32 %v7257_v41, %v7125_v62  ;;  %v15638_v8 = vpop.f32.mrb[51].mxu1  ;;  %v15829_v29 = vpop.f32.mrb[193].mxu0  ;;  %v7450_v12 = vadd.f32 %v20304_v42, %v7287_v6 }
 0x7d8   : > { %v20497_v63 = vpop.f32.mrb[194].mxu0 }
 0x7d9   : > { %v15830_v7 = vpop.f32.mrb[195].mxu0  ;;  %v7451_v11 = vadd.f32 %v20313_v13, %v7288_v38 }
 0x7dc   : > { %v7262_v59 = vpop.f32.mrb[52].mxu1 }
 0x7dd   : > { %v7289_v5 = vadd.f32 %v7262_v59, %v7126_v18  ;;  %v15641_v37 = vpop.f32.mrb[53].mxu1 }
 0x7de   : > { %v7265_v50 = vpop.f32.mrb[54].mxu1  ;;  %v20500_v60 = vpop.f32.mrb[196].mxu0 }
 0x7df   : > { %v7290_v10 = vadd.f32 %v7265_v50, %v7127_v39  ;;  %v15642_v9 = vpop.f32.mrb[55].mxu1  ;;  %v15885_v26 = vpop.f32.mrb[197].mxu0  ;;  %v7452_v62 = vadd.f32 %v20328_v36, %v7289_v5 }
 0x7e0   : > { %v20503_v0 = vpop.f32.mrb[198].mxu0 }
 0x7e1   : > { %v15886_v34 = vpop.f32.mrb[199].mxu0  ;;  %v7453_v42 = vadd.f32 %v20338_v53, %v7290_v10 }
 0x7e4   : > { %v7270_v30 = vpop.f32.mrb[56].mxu1 }
 0x7e5   : > { %v7291_v3 = vadd.f32 %v7270_v30, %v7128_v25  ;;  %v15645_v14 = vpop.f32.mrb[57].mxu1 }
 0x7e6   : > { %v7273_v13 = vpop.f32.mrb[58].mxu1  ;;  %v20506_v28 = vpop.f32.mrb[200].mxu0 }
 0x7e7   : > { %v7292_v18 = vadd.f32 %v7273_v13, %v7129_v32  ;;  %v15646_v23 = vpop.f32.mrb[59].mxu1  ;;  %v15889_v44 = vpop.f32.mrb[201].mxu0  ;;  %v7454_v39 = vadd.f32 %v20350_v55, %v7291_v3 }
 0x7e8   : > { %v20509_v40 = vpop.f32.mrb[202].mxu0 }
 0x7e9   : > { %v15890_v6 = vpop.f32.mrb[203].mxu0  ;;  %v7455_v36 = vadd.f32 %v20360_v51, %v7292_v18 }
 0x7ec   : > { %v7278_v20 = vpop.f32.mrb[60].mxu1 }
 0x7ed   : > { %v7293_v41 = vadd.f32 %v7278_v20, %v7130_v1  ;;  %v15649_v38 = vpop.f32.mrb[61].mxu1 }
 0x7ee   : > { %v7281_v53 = vpop.f32.mrb[62].mxu1  ;;  %v20512_v8 = vpop.f32.mrb[204].mxu0 }
 0x7ef   : > { %v7294_v25 = vadd.f32 %v7281_v53, %v7131_v35  ;;  %v15650_v29 = vpop.f32.mrb[63].mxu1  ;;  %v15893_v7 = vpop.f32.mrb[205].mxu0  ;;  %v7456_v32 = vadd.f32 %v20372_v31, %v7293_v41 }
 0x7f0   : > { %v20515_v59 = vpop.f32.mrb[206].mxu0 }
 0x7f1   : > { %v15894_v5 = vpop.f32.mrb[207].mxu0  ;;  %v7457_v55 = vadd.f32 %v20382_v27, %v7294_v25 }
 0x7f4   : > { %v7572_v37 = vpop.f32.mrb[64].mxu1 }
 0x7f5   : > { %v7611_v50 = vadd.f32 %v7572_v37, %v7448_v46  ;;  %v15705_v10 = vpop.f32.mrb[65].mxu1 }
 0x7f6   : > { %v7575_v51 = vpop.f32.mrb[66].mxu1  ;;  %v20518_v9 = vpop.f32.mrb[208].mxu0 }
 0x7f7   : > { %v7612_v1 = vadd.f32 %v7575_v51, %v7449_v43  ;;  %v15706_v26 = vpop.f32.mrb[67].mxu1  ;;  %v15897_v34 = vpop.f32.mrb[209].mxu0  ;;  %v7774_v35 = vadd.f32 %v20394_v47, %v7611_v50 }
 0x7f8   : > { %v20521_v30 = vpop.f32.mrb[210].mxu0 }
 0x7f9   : > { %v15898_v3 = vpop.f32.mrb[211].mxu0  ;;  %v7775_v31 = vadd.f32 %v20401_v17, %v7612_v1 }
 0x7fc   : > { %v7580_v14 = vpop.f32.mrb[68].mxu1 }
 0x7fd   : > { %v7613_v13 = vadd.f32 %v7580_v14, %v7450_v12  ;;  %v15709_v18 = vpop.f32.mrb[69].mxu1 }
 0x7fe   : > { %v7583_v27 = vpop.f32.mrb[70].mxu1  ;;  %v20524_v23 = vpop.f32.mrb[212].mxu0 }
 0x7ff   : > { %v7614_v46 = vadd.f32 %v7583_v27, %v7451_v11  ;;  %v15710_v44 = vpop.f32.mrb[71].mxu1  ;;  %v15901_v6 = vpop.f32.mrb[213].mxu0  ;;  %v7776_v43 = vadd.f32 %v20409_v4, %v7613_v13 }
 0x800   : > { %v20527_v20 = vpop.f32.mrb[214].mxu0 }
 0x801   : > { %v15902_v41 = vpop.f32.mrb[215].mxu0  ;;  %v7777_v47 = vadd.f32 %v20415_v45, %v7614_v46 }
 0x804   : > { %v7588_v38 = vpop.f32.mrb[72].mxu1 }
 0x805   : > { %v7615_v53 = vadd.f32 %v7588_v38, %v7452_v62  ;;  %v15713_v25 = vpop.f32.mrb[73].mxu1 }
 0x806   : > { %v7591_v17 = vpop.f32.mrb[74].mxu1  ;;  %v20530_v29 = vpop.f32.mrb[216].mxu0 }
 0x807   : > { %v7616_v12 = vadd.f32 %v7591_v17, %v7453_v42  ;;  %v15714_v7 = vpop.f32.mrb[75].mxu1  ;;  %v15957_v5 = vpop.f32.mrb[217].mxu0  ;;  %v7778_v11 = vadd.f32 %v20423_v19, %v7615_v53 }
 0x808   : > { %v20533_v37 = vpop.f32.mrb[218].mxu0 }
 0x809   : > { %v15958_v50 = vpop.f32.mrb[219].mxu0  ;;  %v7779_v4 = vadd.f32 %v20429_v22, %v7616_v12 }
 0x80c   : > { %v7596_v10 = vpop.f32.mrb[76].mxu1 }
 0x80d   : > { %v7617_v51 = vadd.f32 %v7596_v10, %v7454_v39  ;;  %v15717_v1 = vpop.f32.mrb[77].mxu1 }
 0x80e   : > { %v7599_v45 = vpop.f32.mrb[78].mxu1  ;;  %v20536_v26 = vpop.f32.mrb[220].mxu0 }
 0x80f   : > { %v7618_v62 = vadd.f32 %v7599_v45, %v7455_v36  ;;  %v15718_v34 = vpop.f32.mrb[79].mxu1  ;;  %v15961_v3 = vpop.f32.mrb[221].mxu0  ;;  %v7780_v42 = vadd.f32 %v20437_v54, %v7617_v51 }
 0x810   : > { %v20539_v14 = vpop.f32.mrb[222].mxu0 }
 0x811   : > { %v15962_v13 = vpop.f32.mrb[223].mxu0  ;;  %v7781_v19 = vadd.f32 %v20443_v58, %v7618_v62 }
 0x814   : > { %v7604_v18 = vpop.f32.mrb[80].mxu1 }
 0x815   : > { %v7619_v27 = vadd.f32 %v7604_v18, %v7456_v32  ;;  %v15721_v46 = vpop.f32.mrb[81].mxu1 }
 0x816   : > { %v7607_v22 = vpop.f32.mrb[82].mxu1  ;;  %v20542_v44 = vpop.f32.mrb[224].mxu0 }
 0x817   : > { %v7620_v39 = vadd.f32 %v7607_v22, %v7457_v55  ;;  %v15722_v6 = vpop.f32.mrb[83].mxu1  ;;  %v15965_v41 = vpop.f32.mrb[225].mxu0  ;;  %v7782_v36 = vadd.f32 %v20451_v24, %v7619_v27 }
 0x818   : > { %v20545_v38 = vpop.f32.mrb[226].mxu0 }
 0x819   : > { %v15966_v53 = vpop.f32.mrb[227].mxu0  ;;  %v7783_v54 = vadd.f32 %v20455_v61, %v7620_v39 }
 0x81c   : > { %v7898_v25 = vpop.f32.mrb[84].mxu1 }
 0x81d   : > { %v7937_v17 = vadd.f32 %v7898_v25, %v7774_v35  ;;  %v15777_v12 = vpop.f32.mrb[85].mxu1 }
 0x81e   : > { %v7901_v58 = vpop.f32.mrb[86].mxu1  ;;  %v20548_v7 = vpop.f32.mrb[228].mxu0 }
 0x81f   : > { %v7938_v32 = vadd.f32 %v7901_v58, %v7775_v31  ;;  %v15778_v5 = vpop.f32.mrb[87].mxu1  ;;  %v15969_v50 = vpop.f32.mrb[229].mxu0  ;;  %v8100_v55 = vadd.f32 %v20461_v33, %v7937_v17 }
 0x820   : > { %v20551_v10 = vpop.f32.mrb[230].mxu0 }
 0x821   : > { %v15970_v51 = vpop.f32.mrb[231].mxu0  ;;  %v8101_v24 = vadd.f32 %v20465_v15, %v7938_v32 }
 0x824   : > { %v7906_v1 = vpop.f32.mrb[88].mxu1 }
 0x825   : > { %v7939_v45 = vadd.f32 %v7906_v1, %v7776_v43  ;;  %v15781_v62 = vpop.f32.mrb[89].mxu1 }
 0x826   : > { %v7909_v61 = vpop.f32.mrb[90].mxu1  ;;  %v20554_v34 = vpop.f32.mrb[232].mxu0 }
 0x827   : > { %v7940_v35 = vadd.f32 %v7909_v61, %v7777_v47  ;;  %v15782_v3 = vpop.f32.mrb[91].mxu1  ;;  %v15973_v13 = vpop.f32.mrb[233].mxu0  ;;  %v8102_v31 = vadd.f32 %v20471_v21, %v7939_v45 }
 0x828   : > { %v20557_v18 = vpop.f32.mrb[234].mxu0 }
 0x829   : > { %v15974_v27 = vpop.f32.mrb[235].mxu0  ;;  %v8103_v33 = vadd.f32 %v20475_v49, %v7940_v35 }
 0x82c   : > { %v7914_v46 = vpop.f32.mrb[92].mxu1 }
 0x82d   : > { %v7941_v22 = vadd.f32 %v7914_v46, %v7778_v11  ;;  %v15785_v39 = vpop.f32.mrb[93].mxu1 }
 0x82e   : > { %v7917_v15 = vpop.f32.mrb[94].mxu1 }
 0x82f   : > { %v7942_v6 = vadd.f32 %v7917_v15, %v7779_v4  ;;  %v15786_v43 = vpop.f32.mrb[95].mxu1  ;;  %v8104_v41 = vadd.f32 %v20479_v57, %v7941_v22 }
 0x831   : > { %v8105_v53 = vadd.f32 %v20483_v16, %v7942_v6 }
 0x834   : > { %v7922_v47 = vpop.f32.mrb[96].mxu1 }
 0x835   : > { %v7943_v25 = vadd.f32 %v7922_v47, %v7780_v42  ;;  %v15789_v17 = vpop.f32.mrb[97].mxu1 }
 0x836   : > { %v7925_v12 = vpop.f32.mrb[98].mxu1 }
 0x837   : > { %v7944_v21 = vadd.f32 %v7925_v12, %v7781_v19  ;;  %v15790_v58 = vpop.f32.mrb[99].mxu1  ;;  %v8106_v32 = vadd.f32 %v20487_v56, %v7943_v25 }
 0x839   : > { %v8107_v49 = vadd.f32 %v20491_v2, %v7944_v21 }
 0x83c   : > { %v7930_v5 = vpop.f32.mrb[100].mxu1 }
 0x83d   : > { %v7945_v11 = vadd.f32 %v7930_v5, %v7782_v36  ;;  %v15793_v50 = vpop.f32.mrb[101].mxu1 }
 0x83e   : > { %v7933_v51 = vpop.f32.mrb[102].mxu1 }
 0x83f   : > { %v7946_v4 = vadd.f32 %v7933_v51, %v7783_v54  ;;  %v15794_v1 = vpop.f32.mrb[103].mxu1  ;;  %v8108_v57 = vadd.f32 %v20494_v48, %v7945_v11 }
 0x841   : > { %v8109_v16 = vadd.f32 %v20497_v63, %v7946_v4 }
 0x844   : > { %v8224_v45 = vpop.f32.mrb[104].mxu1 }
 0x845   : > { %v8263_v42 = vadd.f32 %v8224_v45, %v8100_v55  ;;  %v15849_v62 = vpop.f32.mrb[105].mxu1 }
 0x846   : > { %v8227_v61 = vpop.f32.mrb[106].mxu1 }
 0x847   : > { %v8264_v19 = vadd.f32 %v8227_v61, %v8101_v24  ;;  %v15850_v35 = vpop.f32.mrb[107].mxu1  ;;  %v8426_v56 = vadd.f32 %v20500_v60, %v8263_v42 }
 0x849   : > { %v8427_v2 = vadd.f32 %v20503_v0, %v8264_v19 }
 0x84c   : > { %v8232_v3 = vpop.f32.mrb[108].mxu1 }
 0x84d   : > { %v8265_v36 = vadd.f32 %v8232_v3, %v8102_v31  ;;  %v15853_v13 = vpop.f32.mrb[109].mxu1 }
 0x84e   : > { %v8235_v27 = vpop.f32.mrb[110].mxu1 }
 0x84f   : > { %v8266_v54 = vadd.f32 %v8235_v27, %v8103_v33  ;;  %v15854_v46 = vpop.f32.mrb[111].mxu1  ;;  %v8428_v48 = vadd.f32 %v20506_v28, %v8265_v36 }
 0x851   : > { %v8429_v63 = vadd.f32 %v20509_v40, %v8266_v54  ;;  %v17328_v40 = vld [vmem:[%s21375_s3 + $0x40] sm:$0xff]  }
 0x852   : > { %16021 = vmatprep.subr.bf16.mxu0 %v17328_v40 }
 0x853   : > { %16022 = vmatpush3.bf16.msra.mxu0 %v17328_v40 }
 0x854   : > { %v8240_v22 = vpop.f32.mrb[112].mxu1 }
 0x855   : > { %v8267_v55 = vadd.f32 %v8240_v22, %v8104_v41  ;;  %v15857_v39 = vpop.f32.mrb[113].mxu1 }
 0x856   : > { %v8243_v15 = vpop.f32.mrb[114].mxu1 }
 0x857   : > { %v8268_v24 = vadd.f32 %v8243_v15, %v8105_v53  ;;  %v15858_v6 = vpop.f32.mrb[115].mxu1  ;;  %v8430_v60 = vadd.f32 %v20512_v8, %v8267_v55 }
 0x859   : > { %v8431_v0 = vadd.f32 %v20515_v59, %v8268_v24 }
 0x85c   : > { %v8248_v43 = vpop.f32.mrb[116].mxu1 }
 0x85d   : > { %v8269_v31 = vadd.f32 %v8248_v43, %v8106_v32  ;;  %v15861_v47 = vpop.f32.mrb[117].mxu1 }
 0x85e   : > { %v8251_v25 = vpop.f32.mrb[118].mxu1 }
 0x85f   : > { %v8270_v33 = vadd.f32 %v8251_v25, %v8107_v49  ;;  %v15862_v17 = vpop.f32.mrb[119].mxu1  ;;  %v20573_v28 = vadd.f32 %v20518_v9, %v8269_v31 }
 0x861   : > { %v20579_v41 = vadd.f32 %v20521_v30, %v8270_v33  ;;  %v20590_v30 = vld [vmem:[%s21377_s5] ss:$0 sm:$0xff] }
 0x864   : > { %v8256_v8 = vpop.f32.mrb[120].mxu1 }
 0x865   : > { %v8271_v59 = vadd.f32 %v8256_v8, %v8108_v57  ;;  %v15865_v53 = vpop.f32.mrb[121].mxu1 }
 0x866   : > { %v8259_v12 = vpop.f32.mrb[122].mxu1 }
 0x867   : > { %v8272_v21 = vadd.f32 %v8259_v12, %v8109_v16  ;;  %v15866_v58 = vpop.f32.mrb[123].mxu1  ;;  %v20582_v32 = vadd.f32 %v20524_v23, %v8271_v59 }
 0x869   : > { %v20585_v9 = vadd.f32 %v20527_v20, %v8272_v21 }
 0x86c   : > { %v8550_v49 = vpop.f32.mrb[124].mxu1 }
 0x86d   : > { %v8589_v5 = vadd.f32 %v8550_v49, %v8426_v56  ;;  %v15921_v11 = vpop.f32.mrb[125].mxu1 }
 0x86e   : > { %v8553_v50 = vpop.f32.mrb[126].mxu1 }
 0x86f   : > { %v8752_v51 = vadd.f32 %v20530_v29, %v8589_v5  ;;  %v8590_v4 = vadd.f32 %v8553_v50, %v8427_v2  ;;  %v15922_v1 = vpop.f32.mrb[127].mxu1 }
 0x871   : > { %v8769_v57 = vadd.f32 %v20590_v30, %v8752_v51  ;;  %v8753_v23 = vadd.f32 %v20533_v37, %v8590_v4 }
 0x873   : > { %v8789_v16 = vmul.f32 0.01, %v8769_v57  ;;  %v8770_v20 = vadd.f32 %v20590_v30, %v8753_v23  ;;  %vm8779_vm0 = vcmp.ge.f32.partialorder %v8769_v57, 0.0 }
 0x874   : > { %v8558_v45 = vpop.f32.mrb[128].mxu1 }
 0x875   : > { %vm8780_vm2 = vcmp.ge.f32.partialorder %v8770_v20, 0.0  ;;  %v8790_v42 = vmul.f32 0.01, %v8770_v20  ;;  %v8591_v62 = vadd.f32 %v8558_v45, %v8428_v48  ;;  %v15925_v61 = vpop.f32.mrb[129].mxu1  ;;  %v8799_v2 = vsel %vm8779_vm0, %v8769_v57, %v8789_v16 }
 0x876   : > { %v8561_v19 = vpop.f32.mrb[130].mxu1  ;;  %v17324_v61 = vld [vmem:[%s21375_s3 + $0x80] sm:$0xff]  }
 0x877   : > { %v8754_v35 = vadd.f32 %v20536_v26, %v8591_v62  ;;  %v8592_v56 = vadd.f32 %v8561_v19, %v8429_v63  ;;  %v15926_v29 = vpop.f32.mrb[131].mxu1  ;;  %v8800_v3 = vsel %vm8780_vm2, %v8770_v20, %v8790_v42 }
 0x878   : > { %v8827_v36 = vpack.c.bf16 %v8800_v3, %v8799_v2  ;;  %v17327_v29 = vld [vmem:[%s21375_s3 + $0x98] sm:$0xff]   ;;  %v17317_v2 = vld [vmem:[%s21380_s8 + $0x10] sm:$0xff]  }
 0x879   : > { %v8771_v13 = vadd.f32 %v20590_v30, %v8754_v35  ;;  %v8755_v37 = vadd.f32 %v20539_v14, %v8592_v56  ;;  %v17326_v35 = vld [vmem:[%s21375_s3 + $0x90] sm:$0xff]   ;;  %v17316_v56 = vld [vmem:[%s21380_s8 + $0x8] sm:$0xff]   ;;  %v17318_v3 = vld [vmem:[%s21380_s8 + $0x18] sm:$0xff]  }
 0x87a   : > { %15976 = vmatpush3.bf16.msra.mxu1 %v8827_v36  ;;  %v17319_v36 = vld [vmem:[%s21380_s8 + $0x20] sm:$0xff]  }
 0x87b   : > { %v8791_v27 = vmul.f32 0.01, %v8771_v13  ;;  %v8772_v54 = vadd.f32 %v20590_v30, %v8755_v37  ;;  %15977 = vmatprep.subr.bf16.mxu1 %v17571_v52  ;;  %vm8781_vm4 = vcmp.ge.f32.partialorder %v8771_v13, 0.0  ;;  %v17321_v37 = vld [vmem:[%s21380_s8 + $0x30] sm:$0xff]  }
 0x87c   : > { %v8566_v46 = vpop.f32.mrb[132].mxu1 }
 0x87d   : > { %vm8782_vm5 = vcmp.ge.f32.partialorder %v8772_v54, 0.0  ;;  %v8792_v48 = vmul.f32 0.01, %v8772_v54  ;;  %v8593_v26 = vadd.f32 %v8566_v46, %v8430_v60  ;;  %v15929_v63 = vpop.f32.mrb[133].mxu1  ;;  %v8801_v24 = vsel %vm8781_vm4, %v8771_v13, %v8791_v27  ;;  %v17320_v13 = vld [vmem:[%s21380_s8 + $0x28] sm:$0xff]   ;;  %v17322_v27 = vld [vmem:[%s21380_s8 + $0x38] sm:$0xff]  }
 0x87e   : > { %v8569_v22 = vpop.f32.mrb[134].mxu1  ;;  %v17329_v46 = vld [vmem:[%s21375_s3 + $0xa0] sm:$0xff]   ;;  %v17332_v63 = vld [vmem:[%s21375_s3 + $0x50] sm:$0xff]  }
 0x87f   : > { %v8756_v55 = vadd.f32 %v20542_v44, %v8593_v26  ;;  %v8594_v39 = vadd.f32 %v8569_v22, %v8431_v0  ;;  %v15930_v15 = vpop.f32.mrb[135].mxu1  ;;  %v8802_v6 = vsel %vm8782_vm5, %v8772_v54, %v8792_v48  ;;  %v17323_v54 = vld [vmem:[%s21380_s8 + $0x40] sm:$0xff]   ;;  %v17330_v48 = vld [vmem:[%s21375_s3 + $0x48] sm:$0xff]   ;;  %v17334_v22 = vld [vmem:[%s21375_s3 + $0xb8] sm:$0xff]  }
 0x880   : > { %v8828_v14 = vpack.c.bf16 %v8802_v6, %v8801_v24  ;;  %v17331_v26 = vld [vmem:[%s21375_s3 + $0xa8] sm:$0xff]   ;;  %16023 = vmatprep.subr.bf16.mxu0 %v17330_v48  ;;  %v17337_v15 = vld [vmem:[%s21375_s3 + $0x60] sm:$0xff]   ;;  %v17341_v6 = vld [vmem:[%s21375_s3 + $0x70] sm:$0xff]  }
 0x881   : > { %v8773_v43 = vadd.f32 %v20590_v30, %v8756_v55  ;;  %v8757_v31 = vadd.f32 %v20545_v38, %v8594_v39  ;;  %16024 = vmatpush3.bf16.msra.mxu0 %v17330_v48  ;;  %v17335_v55 = vld [vmem:[%s21375_s3 + $0x58] sm:$0xff]   ;;  %v17336_v39 = vld [vmem:[%s21375_s3 + $0x100] sm:$0xff]   ;;  %v17339_v24 = vld [vmem:[%s21375_s3 + $0x68] sm:$0xff]  }
 0x882   : > { %15978 = vmatpush3.bf16.msra.mxu1 %v8828_v14  ;;  %16025 = vmatprep.subr.bf16.mxu0 %v17332_v63  ;;  %v17343_v14 = vld [vmem:[%s21375_s3 + $0x78] sm:$0xff]  }
 0x883   : > { %v8793_v47 = vmul.f32 0.01, %v8773_v43  ;;  %v8774_v25 = vadd.f32 %v20590_v30, %v8757_v31  ;;  %15979 = vmatprep.subr.bf16.mxu1 %v17571_v52  ;;  %vm8783_vm6 = vcmp.ge.f32.partialorder %v8773_v43, 0.0 }
 0x884   : > { %v8574_v60 = vpop.f32.mrb[136].mxu1 }
 0x885   : > { %vm8784_vm7 = vcmp.ge.f32.partialorder %v8774_v25, 0.0  ;;  %v8794_v33 = vmul.f32 0.01, %v8774_v25  ;;  %v8595_v44 = vadd.f32 %v8574_v60, %v20573_v28  ;;  %v15933_v0 = vpop.f32.mrb[137].mxu1  ;;  %v8803_v38 = vsel %vm8783_vm6, %v8773_v43, %v8793_v47  ;;  %16026 = vmatpush3.bf16.msra.mxu0 %v17332_v63  ;;  %v20724_v43 = vld [vmem:[%s21375_s3] sm:$0xff]   ;;  %v17354_v63 = vld [vmem:[%s21375_s3 + $0x188] sm:$0xff]  }
 0x886   : > { %v8577_v17 = vpop.f32.mrb[138].mxu1  ;;  %16027 = vmatprep.subr.bf16.mxu0 %v17335_v55 }
 0x887   : > { %v8758_v40 = vadd.f32 %v20548_v7, %v8595_v44  ;;  %v8596_v8 = vadd.f32 %v8577_v17, %v20579_v41  ;;  %v15934_v59 = vpop.f32.mrb[139].mxu1  ;;  %v8804_v53 = vsel %vm8784_vm7, %v8774_v25, %v8794_v33 }
 0x888   : > { %v8829_v12 = vpack.c.bf16 %v8804_v53, %v8803_v38 }
 0x889   : > { %v8775_v21 = vadd.f32 %v20590_v30, %v8758_v40  ;;  %v8759_v58 = vadd.f32 %v20551_v10, %v8596_v8  ;;  %16028 = vmatpush3.bf16.msra.mxu0 %v17335_v55  ;;  %v17355_v55 = vld [vmem:[%s21375_s3 + $0x28] sm:$0xff]  }
 0x88a   : > { %15980 = vmatpush3.bf16.msra.mxu1 %v8829_v12  ;;  %16029 = vmatprep.subr.bf16.mxu0 %v17337_v15 }
 0x88b   : > { %v8795_v49 = vmul.f32 0.01, %v8775_v21  ;;  %v8776_v5 = vadd.f32 %v20590_v30, %v8759_v58  ;;  %15981 = vmatprep.subr.bf16.mxu1 %v17571_v52  ;;  %vm8785_vm8 = vcmp.ge.f32.partialorder %v8775_v21, 0.0 }
 0x88c   : > { %v8582_v28 = vpop.f32.mrb[140].mxu1 }
 0x88d   : > { %vm8786_vm9 = vcmp.ge.f32.partialorder %v8776_v5, 0.0  ;;  %v8796_v7 = vmul.f32 0.01, %v8776_v5  ;;  %v8597_v41 = vadd.f32 %v8582_v28, %v20582_v32  ;;  %v15937_v11 = vpop.f32.mrb[141].mxu1  ;;  %v8805_v10 = vsel %vm8785_vm8, %v8775_v21, %v8795_v49  ;;  %16030 = vmatpush3.bf16.msra.mxu0 %v17337_v15  ;;  %v17356_v15 = vld [vmem:[%s21375_s3 + $0x190] sm:$0xff]  }
 0x88e   : > { %v8585_v50 = vpop.f32.mrb[142].mxu1  ;;  %16031 = vmatprep.subr.bf16.mxu0 %v17339_v24 }
 0x88f   : > { %v8760_v51 = vadd.f32 %v20554_v34, %v8597_v41  ;;  %v8598_v4 = vadd.f32 %v8585_v50, %v20585_v9  ;;  %v15938_v1 = vpop.f32.mrb[143].mxu1  ;;  %v8806_v57 = vsel %vm8786_vm9, %v8776_v5, %v8796_v7  ;;  %v17338_v7 = vld [vmem:[%s21375_s3 + $0x108] sm:$0xff]   ;;  %v17340_v50 = vld [vmem:[%s21375_s3 + $0x110] sm:$0xff]  }
 0x890   : > { %v8830_v23 = vpack.c.bf16 %v8806_v57, %v8805_v10  ;;  %v17342_v10 = vld [vmem:[%s21375_s3 + $0x118] sm:$0xff]  }
 0x891   : > { %v8777_v16 = vadd.f32 %v20590_v30, %v8760_v51  ;;  %v8761_v20 = vadd.f32 %v20557_v18, %v8598_v4  ;;  %v17315_v18 = vld [vmem:[%s21380_s8] sm:$0xff]   ;;  %16032 = vmatpush3.bf16.msra.mxu0 %v17339_v24  ;;  %v17357_v24 = vld [vmem:[%s21375_s3 + $0x30] sm:$0xff]  }
 0x892   : > { %15982 = vmatpush3.bf16.msra.mxu1 %v8830_v23  ;;  %16033 = vmatprep.subr.bf16.mxu0 %v17341_v6  ;;  %v17344_v23 = vld [vmem:[%s21375_s3 + $0x120] sm:$0xff]  }
 0x893   : > { %v8797_v45 = vmul.f32 0.01, %v8777_v16  ;;  %v8778_v42 = vadd.f32 %v20590_v30, %v8761_v20  ;;  %15983 = vmatprep.subr.bf16.mxu1 %v17571_v52  ;;  %vm8787_vm10 = vcmp.ge.f32.partialorder %v8777_v16, 0.0  ;;  %v17325_v30 = vld [vmem:[%s21375_s3 + $0x88] sm:$0xff]  }
 0x895   : > { %v8798_v32 = vmul.f32 0.01, %v8778_v42  ;;  %vm8788_vm11 = vcmp.ge.f32.partialorder %v8778_v42, 0.0  ;;  %v8807_v34 = vsel %vm8787_vm10, %v8777_v16, %v8797_v45  ;;  %16034 = vmatpush3.bf16.msra.mxu0 %v17341_v6 }
 0x896   : > { %16035 = vmatprep.subr.bf16.mxu0 %v17343_v14 }
 0x897   : > { %v8808_v62 = vsel %vm8788_vm11, %v8778_v42, %v8798_v32 }
 0x898   : > { %v8831_v9 = vpack.c.bf16 %v8808_v62, %v8807_v34 }
 0x899   : > { %16036 = vmatpush3.bf16.msra.mxu0 %v17343_v14 }
 0x89a   : > { %v8906_v19 = vsel %vm1145_vm1, %v8831_v9, 0  ;;  %16041 = vmatprep.subr.bf16.mxu0 %v20724_v43  ;;  %vm12071_vm1 = vcmask 1043456  }
 0x89b   : > { %15984 = vmatpush3.bf16.msra.mxu1 %v8906_v19  ;;  %v17347_v19 = vld [vmem:[%s21375_s3 + $0x8] sm:$0xff]  }
 0x89c   : > { %16061 = vmatprep.subr.bf16.mxu1 %v17324_v61 }
 0x89e   : > { %15986 = vmatmul.mubr.msk.bf16.vlgmr.msra.gmra.mrb[144].mxu1 %vm8877_vm12, %v17315_v18 }
 0x89f   : > { %15989 = vmatprep.mubr.msk.bf16.mxu1 %vm17572_vm14, %v17571_v52  ;;  %16062 = vmatpush3.bf16.msra.mxu1 %v17324_v61  ;;  %v17346_v61 = vld [vmem:[%s21375_s3 + $0x128] sm:$0xff]  }
 0x8a0   : > { %16063 = vmatprep.subr.bf16.mxu1 %v17325_v30 }
 0x8a3   : > { %16064 = vmatpush3.bf16.msra.mxu1 %v17325_v30  ;;  %v17348_v30 = vld [vmem:[%s21375_s3 + $0x130] sm:$0xff]  }
 0x8a4   : > { %16065 = vmatprep.subr.bf16.mxu1 %v17326_v35 }
 0x8a6   : > { %15990 = vmatmul.mubr.msk.bf16.gmra.mrb[148].mxu1 %vm8877_vm12, %v17316_v56 }
 0x8a7   : > { %15993 = vmatprep.mubr.msk.bf16.mxu1 %vm17572_vm14, %v17571_v52  ;;  %16066 = vmatpush3.bf16.msra.mxu1 %v17326_v35  ;;  %v17349_v35 = vld [vmem:[%s21375_s3 + $0x10] sm:$0xff]  }
 0x8a8   : > { %16067 = vmatprep.subr.bf16.mxu1 %v17327_v29 }
 0x8ab   : > { %16068 = vmatpush3.bf16.msra.mxu1 %v17327_v29 }
 0x8ac   : > { %16069 = vmatprep.subr.bf16.mxu1 %v17329_v46 }
 0x8ae   : > { %15994 = vmatmul.mubr.msk.bf16.gmra.mrb[152].mxu1 %vm8877_vm12, %v17317_v2 }
 0x8af   : > { %15997 = vmatprep.mubr.msk.bf16.mxu1 %vm17572_vm14, %v17571_v52  ;;  %16070 = vmatpush3.bf16.msra.mxu1 %v17329_v46  ;;  %v17353_v46 = vld [vmem:[%s21375_s3 + $0x20] sm:$0xff]  }
 0x8b0   : > { %16071 = vmatprep.subr.bf16.mxu1 %v17331_v26 }
 0x8b3   : > { %16072 = vmatpush3.bf16.msra.mxu1 %v17331_v26 }
 0x8b6   : > { %15998 = vmatmul.mubr.msk.bf16.gmra.mrb[156].mxu1 %vm8877_vm12, %v17318_v3  ;;  %v17350_v3 = vld [vmem:[%s21375_s3 + $0x138] sm:$0xff]  }
 0x8b7   : > { %16001 = vmatprep.mubr.msk.bf16.mxu1 %vm17572_vm14, %v17571_v52 }
 0x8be   : > { %16002 = vmatmul.mubr.msk.bf16.gmra.mrb[160].mxu1 %vm8877_vm12, %v17319_v36 }
 0x8bf   : > { %16005 = vmatprep.mubr.msk.bf16.mxu1 %vm17572_vm14, %v17571_v52 }
 0x8c6   : > { %16006 = vmatmul.mubr.msk.bf16.gmra.mrb[164].mxu1 %vm8877_vm12, %v17320_v13  ;;  %v17351_v13 = vld [vmem:[%s21375_s3 + $0x18] sm:$0xff]  }
 0x8c7   : > { %16009 = vmatprep.mubr.msk.bf16.mxu1 %vm17572_vm14, %v17571_v52 }
 0x8ce   : > { %16010 = vmatmul.mubr.msk.bf16.gmra.mrb[168].mxu1 %vm8877_vm12, %v17321_v37 }
 0x8cf   : > { %16013 = vmatprep.mubr.msk.bf16.mxu1 %vm17572_vm14, %v17571_v52 }
 0x8d6   : > { %16014 = vmatmul.mubr.msk.bf16.gmra.mrb[172].mxu1 %vm8877_vm12, %v17322_v27  ;;  %v17352_v27 = vld [vmem:[%s21375_s3 + $0x180] sm:$0xff]  }
 0x8d7   : > { %16017 = vmatprep.mubr.msk.bf16.mxu1 %vm17572_vm14, %v17571_v52  ;;  %v17333_v52 = vld [vmem:[%s21375_s3 + $0xb0] sm:$0xff]  }
 0x8d8   : > { %16073 = vmatprep.subr.bf16.mxu1 %v17333_v52 }
 0x8d9   : > { %16074 = vmatpush3.bf16.msra.mxu1 %v17333_v52 }
 0x8da   : > { %16075 = vmatprep.subr.bf16.mxu1 %v17334_v22 }
 0x8dd   : > { %16076 = vmatpush3.bf16.msra.mxu1 %v17334_v22 }
 0x8de   : > { %16018 = vmatmul.mubr.msk.bf16.gmra.mrb[176].mxu1 %vm8877_vm12, %v17323_v54  ;;  %16101 = vmatprep.subr.bf16.mxu1 %v17336_v39 }
 0x971   : > { %v20727_v31 = vpop.f32.mrb[144].mxu1 }
 0x972   : > { %9013 = vst [vmem:[#allocation3] sm:$0xff] %v20727_v31  ;;  %v15987_v47 = vpop.f32.mrb[145].mxu1 }
 0x973   : > { %v8945_v25 = vpop.f32.mrb[146].mxu1  ;;  %v17359_v47 = vld [vmem:[%s21375_s3 + $0x38] sm:$0xff]  }
 0x974   : > { %9014 = vst [vmem:[#allocation3 + $0x8] sm:$0xff] %v8945_v25  ;;  %v15988_v60 = vpop.f32.mrb[147].mxu1  ;;  %v9034_v33 = vpack.c.bf16 %v8945_v25, %v20727_v31 }
 0x975   : > { %v17360_v60 = vld [vmem:[%s21375_s3 + $0x1a0] sm:$0xff]  }
 0x979   : > { %v8950_v44 = vpop.f32.mrb[148].mxu1 }
 0x97a   : > { %9015 = vst [vmem:[#allocation3 + $0x10] sm:$0xff] %v8950_v44  ;;  %v15991_v0 = vpop.f32.mrb[149].mxu1 }
 0x97b   : > { %v8953_v17 = vpop.f32.mrb[150].mxu1  ;;  %v9266_v8 = vld [vmem:[#allocation3 + $0x1] sm:$0xff] }
 0x97c   : > { %9016 = vst [vmem:[#allocation3 + $0x18] sm:$0xff] %v8953_v17  ;;  %v15992_v40 = vpop.f32.mrb[151].mxu1  ;;  %v9508_v28 = vld [vmem:[#allocation3 + $0x2] sm:$0xff] }
 0x981   : > { %v9268_v59 = vld [vmem:[#allocation3 + $0x11] sm:$0x3f]  ;;  %v8958_v38 = vpop.f32.mrb[152].mxu1  ;;  %v9267_v53 = vld [vmem:[#allocation3 + $0x9] sm:$0xff] }
 0x982   : > { %v9509_v12 = vld [vmem:[#allocation3 + $0xa] sm:$0xff]  ;;  %v9270_v21 = vpack.c.bf16 %v9268_v59, %v9268_v59  ;;  %9017 = vst [vmem:[#allocation3 + $0x20] sm:$0xff] %v8958_v38  ;;  %v15995_v58 = vpop.f32.mrb[153].mxu1  ;;  %v9269_v49 = vpack.c.bf16 %v9267_v53, %v9266_v8  ;;  %v9510_v54 = vld [vmem:[#allocation3 + $0x12] sm:$0x3f] }
 0x983   : > { %v8961_v5 = vpop.f32.mrb[154].mxu1  ;;  %v9511_v11 = vpack.c.bf16 %v9509_v12, %v9508_v28  ;;  %v9512_v52 = vpack.c.bf16 %v9510_v54, %v9510_v54  ;;  %v9033_v44 = vld [vmem:[#allocation3 + $0x10] sm:$0x3f]  ;;  %v17363_v58 = vld [vmem:[%s21375_s3 + $0xc8] sm:$0xff]  }
 0x984   : > { %16077 = vmatprep.mubr.bf16.mxu1 %v9269_v49  ;;  %9018 = vst [vmem:[#allocation3 + $0x28] sm:$0xff] %v8961_v5  ;;  %v15996_v41 = vpop.f32.mrb[155].mxu1  ;;  %v9035_v53 = vpack.c.bf16 %v9033_v44, %v9033_v44  ;;  %v10235_v54 = vld [vmem:[#allocation3 + $0xe] sm:$0xff]  ;;  %v17397_v44 = vld [vmem:[%s21375_s3 + $0x1d0] sm:$0xff]  }
 0x985   : > { %16078 = vmatmul.mubr.bf16.vlgmr.msra.gmra.mrb[180].mxu1 %v9270_v21  ;;  %v17362_v21 = vld [vmem:[%s21375_s3 + $0x1a8] sm:$0xff]   ;;  %v17365_v41 = vld [vmem:[%s21375_s3 + $0xd0] sm:$0xff]  }
 0x986   : > { %16102 = vmatpush3.bf16.msra.mxu1 %v17336_v39  ;;  %16117 = vmatprep.mubr.bf16.mxu1 %v9511_v11  ;;  %v17366_v11 = vld [vmem:[%s21375_s3 + $0x1b8] sm:$0xff]  }
 0x987   : > { %16103 = vmatprep.subr.bf16.mxu1 %v17338_v7 }
 0x989   : > { %v8966_v51 = vpop.f32.mrb[156].mxu1 }
 0x98a   : > { %9019 = vst [vmem:[#allocation3 + $0x30] sm:$0xff] %v8966_v51  ;;  %16104 = vmatpush3.bf16.msra.mxu1 %v17338_v7  ;;  %v15999_v4 = vpop.f32.mrb[157].mxu1  ;;  %v17364_v7 = vld [vmem:[%s21375_s3 + $0x1b0] sm:$0xff]  }
 0x98b   : > { %v8969_v1 = vpop.f32.mrb[158].mxu1  ;;  %16105 = vmatprep.subr.bf16.mxu1 %v17340_v50  ;;  %v9052_v20 = vld [vmem:[#allocation3 + $0x24] sm:$0xff]  ;;  %v17368_v4 = vld [vmem:[%s21375_s3 + $0x200] sm:$0xff]  }
 0x98c   : > { %9020 = vst [vmem:[#allocation3 + $0x38] sm:$0xff] %v8969_v1  ;;  %v16000_v57 = vpop.f32.mrb[159].mxu1  ;;  %v9387_v12 = vld [vmem:[#allocation3 + $0x25] sm:$0xff] }
 0x98d   : > { %v17369_v57 = vld [vmem:[%s21375_s3 + $0xe0] sm:$0xff]  }
 0x98e   : > { %16106 = vmatpush3.bf16.msra.mxu1 %v17340_v50  ;;  %v17367_v50 = vld [vmem:[%s21375_s3 + $0xd8] sm:$0xff]  }
 0x98f   : > { %16107 = vmatprep.subr.bf16.mxu1 %v17342_v10 }
 0x991   : > { %v8974_v16 = vpop.f32.mrb[160].mxu1  ;;  %v9053_v45 = vld [vmem:[#allocation3 + $0x2c] sm:$0xff] }
 0x992   : > { %9021 = vst [vmem:[#allocation3 + $0x40] sm:$0xff] %v8974_v16  ;;  %16108 = vmatpush3.bf16.msra.mxu1 %v17342_v10  ;;  %v9055_v42 = vpack.c.bf16 %v9053_v45, %v9052_v20  ;;  %v16003_v32 = vpop.f32.mrb[161].mxu1  ;;  %v9388_v17 = vld [vmem:[#allocation3 + $0x2d] sm:$0xff]  ;;  %v17370_v20 = vld [vmem:[%s21375_s3 + $0x208] sm:$0xff]  }
 0x993   : > { %16109 = vmatprep.subr.bf16.mxu1 %v17344_v23  ;;  %v9054_v34 = vld [vmem:[#allocation3 + $0x34] sm:$0x3f]  ;;  %v20743_v62 = vpop.f32.mrb[162].mxu1  ;;  %v9390_v5 = vpack.c.bf16 %v9388_v17, %v9387_v12  ;;  %v17373_v32 = vld [vmem:[%s21375_s3 + $0xf0] sm:$0xff]   ;;  %v17399_v17 = vld [vmem:[%s21375_s3 + $0x1d8] sm:$0xff]  }
 0x994   : > { %16037 = vmatprep.mubr.bf16.mxu0 %v9055_v42  ;;  %v9056_v9 = vpack.c.bf16 %v9054_v34, %v9054_v34  ;;  %9022 = vst [vmem:[#allocation3 + $0x48] sm:$0xff] %v20743_v62  ;;  %v16004_v18 = vpop.f32.mrb[163].mxu1  ;;  %v17371_v45 = vld [vmem:[%s21375_s3 + $0xe8] sm:$0xff]   ;;  %v17372_v42 = vld [vmem:[%s21375_s3 + $0x210] sm:$0xff]   ;;  %v17374_v34 = vld [vmem:[%s21375_s3 + $0x218] sm:$0xff]  }
 0x995   : > { %v9389_v18 = vld [vmem:[#allocation3 + $0x35] sm:$0x3f]  ;;  %v10476_v12 = vld [vmem:[#allocation3 + $0x7] sm:$0xff] }
 0x996   : > { %16110 = vmatpush3.bf16.msra.mxu1 %v17344_v23  ;;  %16038 = vmatmul.mubr.bf16.vlgmr.msra.gmra.mrb[236].mxu0 %v9056_v9  ;;  %v17375_v9 = vld [vmem:[%s21375_s3 + $0xf8] sm:$0xff]  }
 0x997   : > { %16042 = vmatpush3.bf16.msra.mxu0 %v20724_v43  ;;  %16057 = vmatprep.mubr.bf16.mxu0 %v9034_v33  ;;  %v17358_v43 = vld [vmem:[%s21375_s3 + $0x198] sm:$0xff]   ;;  %v17361_v33 = vld [vmem:[%s21375_s3 + $0xc0] sm:$0xff]  }
 0x998   : > { %16111 = vmatprep.subr.bf16.mxu1 %v17346_v61  ;;  %16043 = vmatprep.subr.bf16.mxu0 %v17347_v19 }
 0x999   : > { %v20759_v56 = vpop.f32.mrb[164].mxu1 }
 0x99a   : > { %16112 = vmatpush3.bf16.msra.mxu1 %v17346_v61  ;;  %9023 = vst [vmem:[#allocation3 + $0x50] sm:$0xff] %v20759_v56  ;;  %v16007_v29 = vpop.f32.mrb[165].mxu1  ;;  %v9632_v2 = vpack.c.bf16 %v20759_v56, %v20743_v62  ;;  %v17376_v61 = vld [vmem:[%s21375_s3 + $0x220] sm:$0xff]  }
 0x99b   : > { %16044 = vmatpush3.bf16.msra.mxu0 %v17347_v19  ;;  %16113 = vmatprep.subr.bf16.mxu1 %v17348_v30  ;;  %v8985_v36 = vpop.f32.mrb[166].mxu1  ;;  %v17377_v19 = vld [vmem:[%s21375_s3 + $0x140] sm:$0xff]   ;;  %v17379_v29 = vld [vmem:[%s21375_s3 + $0x148] sm:$0xff]  }
 0x99c   : > { %16045 = vmatprep.subr.bf16.mxu0 %v17349_v35  ;;  %9024 = vst [vmem:[#allocation3 + $0x58] sm:$0xff] %v8985_v36  ;;  %v16008_v37 = vpop.f32.mrb[167].mxu1  ;;  %v17381_v36 = vld [vmem:[%s21375_s3 + $0x150] sm:$0xff]   ;;  %v17384_v62 = vld [vmem:[%s21375_s3 + $0x280] sm:$0xff]  }
 0x99d   : > { %v17383_v37 = vld [vmem:[%s21375_s3 + $0x158] sm:$0xff]   ;;  %v17385_v56 = vld [vmem:[%s21375_s3 + $0x160] sm:$0xff]  }
 0x99e   : > { %16114 = vmatpush3.bf16.msra.mxu1 %v17348_v30  ;;  %v17378_v30 = vld [vmem:[%s21375_s3 + $0x228] sm:$0xff]  }
 0x99f   : > { %16046 = vmatpush3.bf16.msra.mxu0 %v17349_v35  ;;  %16115 = vmatprep.subr.bf16.mxu1 %v17350_v3  ;;  %v9391_v35 = vpack.c.bf16 %v9389_v18, %v9389_v18 }
 0x9a0   : > { %16047 = vmatprep.subr.bf16.mxu0 %v17351_v13 }
 0x9a1   : > { %v8990_v48 = vpop.f32.mrb[168].mxu1 }
 0x9a2   : > { %16116 = vmatpush3.bf16.msra.mxu1 %v17350_v3  ;;  %9025 = vst [vmem:[#allocation3 + $0x60] sm:$0xff] %v8990_v48  ;;  %v16011_v26 = vpop.f32.mrb[169].mxu1  ;;  %v17380_v3 = vld [vmem:[%s21375_s3 + $0x230] sm:$0xff]   ;;  %v17386_v48 = vld [vmem:[%s21375_s3 + $0x288] sm:$0xff]  }
 0x9a3   : > { %16048 = vmatpush3.bf16.msra.mxu0 %v17351_v13  ;;  %16141 = vmatprep.subr.bf16.mxu1 %v17352_v27  ;;  %v8993_v22 = vpop.f32.mrb[170].mxu1  ;;  %v17382_v13 = vld [vmem:[%s21375_s3 + $0x238] sm:$0xff]  }
 0x9a4   : > { %16049 = vmatprep.subr.bf16.mxu0 %v17353_v46  ;;  %9026 = vst [vmem:[#allocation3 + $0x68] sm:$0xff] %v8993_v22  ;;  %v16012_v39 = vpop.f32.mrb[171].mxu1  ;;  %v17389_v22 = vld [vmem:[%s21375_s3 + $0x170] sm:$0xff]  }
 0x9a5   : > { %16118 = vmatmul.mubr.bf16.vlgmr.msra.gmra.mrb[184].mxu1 %v9512_v52  ;;  %v17387_v52 = vld [vmem:[%s21375_s3 + $0x168] sm:$0xff]   ;;  %v17391_v39 = vld [vmem:[%s21375_s3 + $0x178] sm:$0xff]  }
 0x9a6   : > { %16142 = vmatpush3.bf16.msra.mxu1 %v17352_v27 }
 0x9a7   : > { %16050 = vmatpush3.bf16.msra.mxu0 %v17353_v46  ;;  %16143 = vmatprep.subr.bf16.mxu1 %v17354_v63  ;;  %v10234_v46 = vld [vmem:[#allocation3 + $0x6] sm:$0xff] }
 0x9a8   : > { %16051 = vmatprep.subr.bf16.mxu0 %v17355_v55  ;;  %v10237_v26 = vpack.c.bf16 %v10235_v54, %v10234_v46  ;;  %v10356_v54 = vld [vmem:[#allocation3 + $0x32] sm:$0xff] }
 0x9a9   : > { %v8998_v6 = vpop.f32.mrb[172].mxu1 }
 0x9aa   : > { %16144 = vmatpush3.bf16.msra.mxu1 %v17354_v63  ;;  %9027 = vst [vmem:[#allocation3 + $0x70] sm:$0xff] %v8998_v6  ;;  %v16015_v14 = vpop.f32.mrb[173].mxu1  ;;  %v17388_v63 = vld [vmem:[%s21375_s3 + $0x290] sm:$0xff]   ;;  %v9631_v6 = vld [vmem:[#allocation3 + $0x58] sm:$0x3f] }
 0x9ab   : > { %16052 = vmatpush3.bf16.msra.mxu0 %v17355_v55  ;;  %16145 = vmatprep.subr.bf16.mxu1 %v17356_v15  ;;  %v9001_v31 = vpop.f32.mrb[174].mxu1  ;;  %v17390_v55 = vld [vmem:[%s21375_s3 + $0x298] sm:$0xff]  }
 0x9ac   : > { %16053 = vmatprep.subr.bf16.mxu0 %v17357_v24  ;;  %9028 = vst [vmem:[#allocation3 + $0x78] sm:$0xff] %v9001_v31  ;;  %v16016_v25 = vpop.f32.mrb[175].mxu1  ;;  %v9871_v14 = vld [vmem:[#allocation3 + $0x49] sm:$0xff]  ;;  %v9633_v31 = vpack.c.bf16 %v9631_v6, %v9631_v6  ;;  %v10720_v6 = vld [vmem:[#allocation3 + $0x18] sm:$0x3f] }
 0x9ad   : > { %v17395_v25 = vld [vmem:[%s21375_s3 + $0x1c8] sm:$0xff]  }
 0x9ae   : > { %16146 = vmatpush3.bf16.msra.mxu1 %v17356_v15  ;;  %v17392_v15 = vld [vmem:[%s21375_s3 + $0x2a0] sm:$0xff]  }
 0x9af   : > { %16054 = vmatpush3.bf16.msra.mxu0 %v17357_v24  ;;  %16147 = vmatprep.subr.bf16.mxu1 %v17358_v43  ;;  %v17393_v24 = vld [vmem:[%s21375_s3 + $0x1c0] sm:$0xff]  }
 0x9b0   : > { %16055 = vmatprep.subr.bf16.mxu0 %v17359_v47 }
 0x9b1   : > { %v9006_v0 = vpop.f32.mrb[176].mxu1  ;;  %v9750_v40 = vld [vmem:[#allocation3 + $0x6c] sm:$0xff] }
 0x9b2   : > { %16148 = vmatpush3.bf16.msra.mxu1 %v17358_v43  ;;  %9029 = vst [vmem:[#allocation3 + $0x80] sm:$0xff] %v9006_v0  ;;  %v16019_v8 = vpop.f32.mrb[177].mxu1  ;;  %v9992_v1 = vld [vmem:[#allocation3 + $0x6d] sm:$0xff] }
 0x9b3   : > { %16056 = vmatpush3.bf16.msra.mxu0 %v17359_v47  ;;  %16149 = vmatprep.subr.bf16.mxu1 %v17360_v60  ;;  %v9751_v59 = vld [vmem:[#allocation3 + $0x74] sm:$0xff]  ;;  %v9009_v38 = vpop.f32.mrb[178].mxu1  ;;  %v17398_v0 = vld [vmem:[%s21375_s3 + $0x2b8] sm:$0xff]  }
 0x9b4   : > { %16081 = vmatprep.subr.bf16.mxu0 %v17361_v33  ;;  %9030 = vst [vmem:[#allocation3 + $0x88] sm:$0xff] %v9009_v38  ;;  %v16020_v49 = vpop.f32.mrb[179].mxu1  ;;  %v9753_v28 = vpack.c.bf16 %v9751_v59, %v9750_v40  ;;  %v9993_v10 = vld [vmem:[#allocation3 + $0x75] sm:$0xff] }
 0x9b5   : > { %v9995_v16 = vpack.c.bf16 %v9993_v10, %v9992_v1  ;;  %v9872_v43 = vld [vmem:[#allocation3 + $0x51] sm:$0xff] }
 0x9b6   : > { %16058 = vmatmul.mubr.bf16.vlgmr.msra.gmra.mrb[240].mxu0 %v9035_v53  ;;  %16150 = vmatpush3.bf16.msra.mxu1 %v17360_v60  ;;  %v17394_v47 = vld [vmem:[%s21375_s3 + $0x2a8] sm:$0xff]   ;;  %v9874_v60 = vpack.c.bf16 %v9872_v43, %v9871_v14  ;;  %v17400_v40 = vld [vmem:[%s21375_s3 + $0x300] sm:$0xff]  }
 0x9b7   : > { %16082 = vmatpush3.bf16.msra.mxu0 %v17361_v33  ;;  %16097 = vmatprep.mubr.bf16.mxu0 %v9390_v5  ;;  %v17396_v33 = vld [vmem:[%s21375_s3 + $0x2b0] sm:$0xff]   ;;  %v10236_v8 = vld [vmem:[#allocation3 + $0x16] sm:$0x3f] }
 0x9b8   : > { %16151 = vmatprep.subr.bf16.mxu1 %v17362_v21  ;;  %16083 = vmatprep.subr.bf16.mxu0 %v17363_v58  ;;  %v17401_v59 = vld [vmem:[%s21375_s3 + $0x1e0] sm:$0xff]   ;;  %v10238_v53 = vpack.c.bf16 %v10236_v8, %v10236_v8  ;;  %v17403_v49 = vld [vmem:[%s21375_s3 + $0x1e8] sm:$0xff]   ;;  %v17404_v5 = vld [vmem:[%s21375_s3 + $0x310] sm:$0xff]  }
 0x9b9   : > { %16157 = vmatprep.mubr.bf16.mxu1 %v9753_v28  ;;  %v9752_v51 = vld [vmem:[#allocation3 + $0x7c] sm:$0x3f]  ;;  %v10477_v38 = vld [vmem:[#allocation3 + $0xf] sm:$0xff] }
 0x9ba   : > { %16152 = vmatpush3.bf16.msra.mxu1 %v17362_v21  ;;  %v9754_v23 = vpack.c.bf16 %v9752_v51, %v9752_v51  ;;  %v9994_v27 = vld [vmem:[#allocation3 + $0x7d] sm:$0x3f]  ;;  %v10114_v1 = vld [vmem:[#allocation3 + $0x52] sm:$0xff] }
 0x9bb   : > { %16084 = vmatpush3.bf16.msra.mxu0 %v17363_v58  ;;  %16153 = vmatprep.subr.bf16.mxu1 %v17364_v7  ;;  %v17402_v21 = vld [vmem:[%s21375_s3 + $0x308] sm:$0xff]   ;;  %v10479_v58 = vpack.c.bf16 %v10477_v38, %v10476_v12  ;;  %v17405_v28 = vld [vmem:[%s21375_s3 + $0x1f0] sm:$0xff]   ;;  %v17433_v14 = vld [vmem:[%s21375_s3 + $0x2e0] sm:$0xff]  }
 0x9bc   : > { %16085 = vmatprep.subr.bf16.mxu0 %v17365_v41  ;;  %v9873_v51 = vld [vmem:[#allocation3 + $0x59] sm:$0x3f]  ;;  %v17440_v8 = vld [vmem:[%s21375_s3 + $0x420] sm:$0xff]  }
 0x9bd   : > { %v9875_v10 = vpack.c.bf16 %v9873_v51, %v9873_v51  ;;  %v10960_v43 = vld [vmem:[#allocation3 + $0x72] sm:$0xff]  ;;  %v10357_v38 = vld [vmem:[#allocation3 + $0x3a] sm:$0x3f] }
 0x9be   : > { %16154 = vmatpush3.bf16.msra.mxu1 %v17364_v7  ;;  %v17406_v7 = vld [vmem:[%s21375_s3 + $0x318] sm:$0xff]   ;;  %v10359_v12 = vpack.c.bf16 %v10357_v38, %v10357_v38 }
 0x9bf   : > { %16086 = vmatpush3.bf16.msra.mxu0 %v17365_v41  ;;  %16155 = vmatprep.subr.bf16.mxu1 %v17366_v11  ;;  %v17407_v41 = vld [vmem:[%s21375_s3 + $0x1f8] sm:$0xff]  }
 0x9c0   : > { %16087 = vmatprep.subr.bf16.mxu0 %v17367_v50 }
 0x9c2   : > { %16156 = vmatpush3.bf16.msra.mxu1 %v17366_v11  ;;  %v17408_v11 = vld [vmem:[%s21375_s3 + $0x320] sm:$0xff]  }
 0x9c3   : > { %16088 = vmatpush3.bf16.msra.mxu0 %v17367_v50  ;;  %16181 = vmatprep.subr.bf16.mxu1 %v17368_v4  ;;  %v17409_v50 = vld [vmem:[%s21375_s3 + $0x240] sm:$0xff]  }
 0x9c4   : > { %16089 = vmatprep.subr.bf16.mxu0 %v17369_v57 }
 0x9c5   : > { %16158 = vmatmul.mubr.bf16.vlgmr.msra.gmra.mrb[188].mxu1 %v9754_v23  ;;  %v17411_v23 = vld [vmem:[%s21375_s3 + $0x248] sm:$0xff]  }
 0x9c6   : > { %16182 = vmatpush3.bf16.msra.mxu1 %v17368_v4  ;;  %16197 = vmatprep.mubr.bf16.mxu1 %v9995_v16  ;;  %v10113_v4 = vld [vmem:[#allocation3 + $0x4a] sm:$0xff] }
 0x9c7   : > { %16090 = vmatpush3.bf16.msra.mxu0 %v17369_v57  ;;  %16183 = vmatprep.subr.bf16.mxu1 %v17370_v20  ;;  %v17410_v57 = vld [vmem:[%s21375_s3 + $0x328] sm:$0xff]   ;;  %v10116_v16 = vpack.c.bf16 %v10114_v1, %v10113_v4  ;;  %v17446_v4 = vld [vmem:[%s21375_s3 + $0x438] sm:$0xff]  }
 0x9c8   : > { %16091 = vmatprep.subr.bf16.mxu0 %v17371_v45  ;;  %v17447_v1 = vld [vmem:[%s21375_s3 + $0x358] sm:$0xff]  }
 0x9ca   : > { %16184 = vmatpush3.bf16.msra.mxu1 %v17370_v20  ;;  %v17412_v20 = vld [vmem:[%s21375_s3 + $0x330] sm:$0xff]  }
 0x9cb   : > { %16092 = vmatpush3.bf16.msra.mxu0 %v17371_v45  ;;  %16185 = vmatprep.subr.bf16.mxu1 %v17372_v42  ;;  %v17413_v45 = vld [vmem:[%s21375_s3 + $0x250] sm:$0xff]  }
 0x9cc   : > { %16093 = vmatprep.subr.bf16.mxu0 %v17373_v32 }
 0x9ce   : > { %16186 = vmatpush3.bf16.msra.mxu1 %v17372_v42  ;;  %v17414_v42 = vld [vmem:[%s21375_s3 + $0x338] sm:$0xff]  }
 0x9cf   : > { %16094 = vmatpush3.bf16.msra.mxu0 %v17373_v32  ;;  %16187 = vmatprep.subr.bf16.mxu1 %v17374_v34  ;;  %v17415_v32 = vld [vmem:[%s21375_s3 + $0x258] sm:$0xff]  }
 0x9d0   : > { %16095 = vmatprep.subr.bf16.mxu0 %v17375_v9 }
 0x9d2   : > { %16188 = vmatpush3.bf16.msra.mxu1 %v17374_v34  ;;  %v17416_v34 = vld [vmem:[%s21375_s3 + $0x380] sm:$0xff]  }
 0x9d3   : > { %16096 = vmatpush3.bf16.msra.mxu0 %v17375_v9  ;;  %16189 = vmatprep.subr.bf16.mxu1 %v17376_v61  ;;  %v10478_v9 = vld [vmem:[#allocation3 + $0x17] sm:$0x3f] }
 0x9d4   : > { %16121 = vmatprep.subr.bf16.mxu0 %v17377_v19  ;;  %v10480_v18 = vpack.c.bf16 %v10478_v9, %v10478_v9  ;;  %v17452_v9 = vld [vmem:[%s21375_s3 + $0x490] sm:$0xff]  }
 0x9d6   : > { %16098 = vmatmul.mubr.bf16.vlgmr.msra.gmra.mrb[244].mxu0 %v9391_v35  ;;  %16190 = vmatpush3.bf16.msra.mxu1 %v17376_v61  ;;  %v17417_v61 = vld [vmem:[%s21375_s3 + $0x260] sm:$0xff]   ;;  %v17418_v35 = vld [vmem:[%s21375_s3 + $0x388] sm:$0xff]  }
 0x9d7   : > { %16122 = vmatpush3.bf16.msra.mxu0 %v17377_v19  ;;  %16191 = vmatprep.subr.bf16.mxu1 %v17378_v30  ;;  %v10719_v19 = vld [vmem:[#allocation3 + $0x10] sm:$0xff] }
 0x9d8   : > { %16123 = vmatprep.subr.bf16.mxu0 %v17379_v29  ;;  %16137 = vmatprep.mubr.bf16.mxu0 %v9632_v2  ;;  %v9996_v2 = vpack.c.bf16 %v9994_v27, %v9994_v27  ;;  %v17423_v27 = vld [vmem:[%s21375_s3 + $0x278] sm:$0xff]  }
 0x9da   : > { %16192 = vmatpush3.bf16.msra.mxu1 %v17378_v30  ;;  %v10718_v30 = vld [vmem:[#allocation3 + $0x8] sm:$0xff] }
 0x9db   : > { %16124 = vmatpush3.bf16.msra.mxu0 %v17379_v29  ;;  %16193 = vmatprep.subr.bf16.mxu1 %v17380_v3  ;;  %v10721_v29 = vpack.c.bf16 %v10719_v19, %v10718_v30 }
 0x9dc   : > { %16125 = vmatprep.subr.bf16.mxu0 %v17381_v36 }
 0x9de   : > { %16194 = vmatpush3.bf16.msra.mxu1 %v17380_v3  ;;  %v17419_v3 = vld [vmem:[%s21375_s3 + $0x268] sm:$0xff]  }
 0x9df   : > { %16126 = vmatpush3.bf16.msra.mxu0 %v17381_v36  ;;  %16195 = vmatprep.subr.bf16.mxu1 %v17382_v13  ;;  %v17420_v36 = vld [vmem:[%s21375_s3 + $0x390] sm:$0xff]  }
 0x9e0   : > { %16127 = vmatprep.subr.bf16.mxu0 %v17383_v37 }
 0x9e2   : > { %16196 = vmatpush3.bf16.msra.mxu1 %v17382_v13  ;;  %v17421_v13 = vld [vmem:[%s21375_s3 + $0x270] sm:$0xff]  }
 0x9e3   : > { %16128 = vmatpush3.bf16.msra.mxu0 %v17383_v37  ;;  %16221 = vmatprep.subr.bf16.mxu1 %v17384_v62  ;;  %v17422_v37 = vld [vmem:[%s21375_s3 + $0x398] sm:$0xff]  }
 0x9e4   : > { %16129 = vmatprep.subr.bf16.mxu0 %v17385_v56 }
 0x9e5   : > { %16198 = vmatmul.mubr.bf16.vlgmr.msra.gmra.mrb[192].mxu1 %v9996_v2  ;;  %v10115_v2 = vld [vmem:[#allocation3 + $0x5a] sm:$0x3f] }
 0x9e6   : > { %16222 = vmatpush3.bf16.msra.mxu1 %v17384_v62  ;;  %16237 = vmatprep.mubr.bf16.mxu1 %v10237_v26  ;;  %v17424_v62 = vld [vmem:[%s21375_s3 + $0x3a0] sm:$0xff]   ;;  %v10117_v46 = vpack.c.bf16 %v10115_v2, %v10115_v2  ;;  %v17426_v26 = vld [vmem:[%s21375_s3 + $0x3a8] sm:$0xff]  }
 0x9e7   : > { %16130 = vmatpush3.bf16.msra.mxu0 %v17385_v56  ;;  %16223 = vmatprep.subr.bf16.mxu1 %v17386_v48  ;;  %v17425_v56 = vld [vmem:[%s21375_s3 + $0x2c0] sm:$0xff]   ;;  %v17458_v2 = vld [vmem:[%s21375_s3 + $0x4a8] sm:$0xff]  }
 0x9e8   : > { %16131 = vmatprep.subr.bf16.mxu0 %v17387_v52 }
 0x9ea   : > { %16224 = vmatpush3.bf16.msra.mxu1 %v17386_v48  ;;  %v10355_v48 = vld [vmem:[#allocation3 + $0x2a] sm:$0xff] }
 0x9eb   : > { %16132 = vmatpush3.bf16.msra.mxu0 %v17387_v52  ;;  %16225 = vmatprep.subr.bf16.mxu1 %v17388_v63  ;;  %v17427_v52 = vld [vmem:[%s21375_s3 + $0x2c8] sm:$0xff]  }
 0x9ec   : > { %16133 = vmatprep.subr.bf16.mxu0 %v17389_v22 }
 0x9ee   : > { %16226 = vmatpush3.bf16.msra.mxu1 %v17388_v63  ;;  %v10358_v63 = vpack.c.bf16 %v10356_v54, %v10355_v48  ;;  %v17459_v54 = vld [vmem:[%s21375_s3 + $0x3c8] sm:$0xff]   ;;  %v17460_v48 = vld [vmem:[%s21375_s3 + $0x4b0] sm:$0xff]  }
 0x9ef   : > { %16134 = vmatpush3.bf16.msra.mxu0 %v17389_v22  ;;  %16227 = vmatprep.subr.bf16.mxu1 %v17390_v55  ;;  %v17428_v22 = vld [vmem:[%s21375_s3 + $0x3b0] sm:$0xff]  }
 0x9f0   : > { %16135 = vmatprep.subr.bf16.mxu0 %v17391_v39 }
 0x9f2   : > { %16228 = vmatpush3.bf16.msra.mxu1 %v17390_v55  ;;  %v17429_v55 = vld [vmem:[%s21375_s3 + $0x2d0] sm:$0xff]  }
 0x9f3   : > { %16136 = vmatpush3.bf16.msra.mxu0 %v17391_v39  ;;  %16229 = vmatprep.subr.bf16.mxu1 %v17392_v15  ;;  %v17430_v39 = vld [vmem:[%s21375_s3 + $0x3b8] sm:$0xff]  }
 0x9f4   : > { %16161 = vmatprep.subr.bf16.mxu0 %v17393_v24 }
 0x9f6   : > { %16138 = vmatmul.mubr.bf16.vlgmr.msra.gmra.mrb[248].mxu0 %v9633_v31  ;;  %16230 = vmatpush3.bf16.msra.mxu1 %v17392_v15  ;;  %v17431_v15 = vld [vmem:[%s21375_s3 + $0x2d8] sm:$0xff]   ;;  %v10961_v31 = vld [vmem:[#allocation3 + $0x7a] sm:$0xff] }
 0x9f7   : > { %16162 = vmatpush3.bf16.msra.mxu0 %v17393_v24  ;;  %16177 = vmatprep.mubr.bf16.mxu0 %v9874_v60  ;;  %v17432_v24 = vld [vmem:[%s21375_s3 + $0x400] sm:$0xff]   ;;  %v10963_v60 = vpack.c.bf16 %v10961_v31, %v10960_v43 }
 0x9f8   : > { %16231 = vmatprep.subr.bf16.mxu1 %v17394_v47  ;;  %16163 = vmatprep.subr.bf16.mxu0 %v17395_v25  ;;  %v11445_v43 = vld [vmem:[#allocation3 + $0x14] sm:$0xff] }
 0x9fa   : > { %16232 = vmatpush3.bf16.msra.mxu1 %v17394_v47  ;;  %v10722_v47 = vpack.c.bf16 %v10720_v6, %v10720_v6  ;;  %v11204_v6 = vld [vmem:[#allocation3 + $0x83] sm:$0x3f] }
 0x9fb   : > { %16164 = vmatpush3.bf16.msra.mxu0 %v17395_v25  ;;  %16233 = vmatprep.subr.bf16.mxu1 %v17396_v33  ;;  %v17434_v25 = vld [vmem:[%s21375_s3 + $0x408] sm:$0xff]   ;;  %v11206_v31 = vpack.c.bf16 %v11204_v6, %v11204_v6  ;;  %v17488_v6 = vld [vmem:[%s21375_s3 + $0x5a0] sm:$0xff]  }
 0x9fc   : > { %16165 = vmatprep.subr.bf16.mxu0 %v17397_v44 }
 0x9fe   : > { %16234 = vmatpush3.bf16.msra.mxu1 %v17396_v33  ;;  %v17435_v33 = vld [vmem:[%s21375_s3 + $0x2e8] sm:$0xff]  }
 0x9ff   : > { %16166 = vmatpush3.bf16.msra.mxu0 %v17397_v44  ;;  %16235 = vmatprep.subr.bf16.mxu1 %v17398_v0  ;;  %v17436_v44 = vld [vmem:[%s21375_s3 + $0x410] sm:$0xff]  }
 0xa00   : > { %16167 = vmatprep.subr.bf16.mxu0 %v17399_v17 }
 0xa02   : > { %16236 = vmatpush3.bf16.msra.mxu1 %v17398_v0  ;;  %v17437_v0 = vld [vmem:[%s21375_s3 + $0x2f0] sm:$0xff]  }
 0xa03   : > { %16168 = vmatpush3.bf16.msra.mxu0 %v17399_v17  ;;  %16261 = vmatprep.subr.bf16.mxu1 %v17400_v40  ;;  %v17438_v17 = vld [vmem:[%s21375_s3 + $0x418] sm:$0xff]  }
 0xa04   : > { %16169 = vmatprep.subr.bf16.mxu0 %v17401_v59 }
 0xa05   : > { %16238 = vmatmul.mubr.bf16.vlgmr.msra.gmra.mrb[196].mxu1 %v10238_v53  ;;  %v10598_v53 = vld [vmem:[#allocation3 + $0x33] sm:$0xff] }
 0xa06   : > { %16262 = vmatpush3.bf16.msra.mxu1 %v17400_v40  ;;  %16277 = vmatprep.mubr.bf16.mxu1 %v10479_v58  ;;  %v17439_v40 = vld [vmem:[%s21375_s3 + $0x2f8] sm:$0xff]   ;;  %v17442_v58 = vld [vmem:[%s21375_s3 + $0x428] sm:$0xff]  }
 0xa07   : > { %16170 = vmatpush3.bf16.msra.mxu0 %v17401_v59  ;;  %16263 = vmatprep.subr.bf16.mxu1 %v17402_v21  ;;  %v17441_v59 = vld [vmem:[%s21375_s3 + $0x340] sm:$0xff]  }
 0xa08   : > { %16171 = vmatprep.subr.bf16.mxu0 %v17403_v49 }
 0xa0a   : > { %16264 = vmatpush3.bf16.msra.mxu1 %v17402_v21  ;;  %v10597_v21 = vld [vmem:[#allocation3 + $0x2b] sm:$0xff] }
 0xa0b   : > { %16172 = vmatpush3.bf16.msra.mxu0 %v17403_v49  ;;  %16265 = vmatprep.subr.bf16.mxu1 %v17404_v5  ;;  %v17443_v49 = vld [vmem:[%s21375_s3 + $0x348] sm:$0xff]  }
 0xa0c   : > { %16173 = vmatprep.subr.bf16.mxu0 %v17405_v28 }
 0xa0e   : > { %16266 = vmatpush3.bf16.msra.mxu1 %v17404_v5  ;;  %v10600_v5 = vpack.c.bf16 %v10598_v53, %v10597_v21  ;;  %v17470_v53 = vld [vmem:[%s21375_s3 + $0x518] sm:$0xff]  }
 0xa0f   : > { %16174 = vmatpush3.bf16.msra.mxu0 %v17405_v28  ;;  %16267 = vmatprep.subr.bf16.mxu1 %v17406_v7  ;;  %v17444_v28 = vld [vmem:[%s21375_s3 + $0x430] sm:$0xff]   ;;  %v17471_v21 = vld [vmem:[%s21375_s3 + $0x3f8] sm:$0xff]  }
 0xa10   : > { %16175 = vmatprep.subr.bf16.mxu0 %v17407_v41 }
 0xa12   : > { %16268 = vmatpush3.bf16.msra.mxu1 %v17406_v7 }
 0xa13   : > { %16176 = vmatpush3.bf16.msra.mxu0 %v17407_v41  ;;  %16269 = vmatprep.subr.bf16.mxu1 %v17408_v11  ;;  %v17445_v41 = vld [vmem:[%s21375_s3 + $0x350] sm:$0xff]  }
 0xa14   : > { %16201 = vmatprep.subr.bf16.mxu0 %v17409_v50 }
 0xa16   : > { %16178 = vmatmul.mubr.bf16.vlgmr.msra.gmra.mrb[252].mxu0 %v9875_v10  ;;  %16270 = vmatpush3.bf16.msra.mxu1 %v17408_v11  ;;  %v17448_v10 = vld [vmem:[%s21375_s3 + $0x480] sm:$0xff]  }
 0xa17   : > { %16202 = vmatpush3.bf16.msra.mxu0 %v17409_v50  ;;  %16217 = vmatprep.mubr.bf16.mxu0 %v10116_v16  ;;  %v11202_v16 = vld [vmem:[#allocation3 + $0x73] sm:$0xff] }
 0xa18   : > { %16271 = vmatprep.subr.bf16.mxu1 %v17410_v57  ;;  %16203 = vmatprep.subr.bf16.mxu0 %v17411_v23 }
 0xa1a   : > { %16272 = vmatpush3.bf16.msra.mxu1 %v17410_v57  ;;  %v10962_v57 = vld [vmem:[#allocation3 + $0x82] sm:$0x3f] }
 0xa1b   : > { %16204 = vmatpush3.bf16.msra.mxu0 %v17411_v23  ;;  %16273 = vmatprep.subr.bf16.mxu1 %v17412_v20  ;;  %v17449_v23 = vld [vmem:[%s21375_s3 + $0x360] sm:$0xff]  }
 0xa1c   : > { %16205 = vmatprep.subr.bf16.mxu0 %v17413_v45 }
 0xa1e   : > { %16274 = vmatpush3.bf16.msra.mxu1 %v17412_v20  ;;  %v11203_v20 = vld [vmem:[#allocation3 + $0x7b] sm:$0xff] }
 0xa1f   : > { %16206 = vmatpush3.bf16.msra.mxu0 %v17413_v45  ;;  %16275 = vmatprep.subr.bf16.mxu1 %v17414_v42  ;;  %v10964_v45 = vpack.c.bf16 %v10962_v57, %v10962_v57 }
 0xa20   : > { %16207 = vmatprep.subr.bf16.mxu0 %v17415_v32 }
 0xa22   : > { %16276 = vmatpush3.bf16.msra.mxu1 %v17414_v42  ;;  %v17450_v42 = vld [vmem:[%s21375_s3 + $0x488] sm:$0xff]  }
 0xa23   : > { %16208 = vmatpush3.bf16.msra.mxu0 %v17415_v32  ;;  %16301 = vmatprep.subr.bf16.mxu1 %v17416_v34  ;;  %v11205_v32 = vpack.c.bf16 %v11203_v20, %v11202_v16  ;;  %v17477_v16 = vld [vmem:[%s21375_s3 + $0x450] sm:$0xff]  }
 0xa24   : > { %16209 = vmatprep.subr.bf16.mxu0 %v17417_v61 }
 0xa25   : > { %16278 = vmatmul.mubr.bf16.vlgmr.msra.gmra.mrb[200].mxu1 %v10480_v18 }
 0xa26   : > { %16302 = vmatpush3.bf16.msra.mxu1 %v17416_v34  ;;  %16317 = vmatprep.mubr.bf16.mxu1 %v10721_v29  ;;  %v17451_v34 = vld [vmem:[%s21375_s3 + $0x368] sm:$0xff]  }
 0xa27   : > { %16210 = vmatpush3.bf16.msra.mxu0 %v17417_v61  ;;  %16303 = vmatprep.subr.bf16.mxu1 %v17418_v35  ;;  %v17453_v61 = vld [vmem:[%s21375_s3 + $0x370] sm:$0xff]  }
 0xa28   : > { %16211 = vmatprep.subr.bf16.mxu0 %v17419_v3 }
 0xa2a   : > { %16304 = vmatpush3.bf16.msra.mxu1 %v17418_v35  ;;  %v17454_v35 = vld [vmem:[%s21375_s3 + $0x498] sm:$0xff]  }
 0xa2b   : > { %16212 = vmatpush3.bf16.msra.mxu0 %v17419_v3  ;;  %16305 = vmatprep.subr.bf16.mxu1 %v17420_v36  ;;  %v17455_v3 = vld [vmem:[%s21375_s3 + $0x378] sm:$0xff]  }
 0xa2c   : > { %16213 = vmatprep.subr.bf16.mxu0 %v17421_v13 }
 0xa2e   : > { %16306 = vmatpush3.bf16.msra.mxu1 %v17420_v36  ;;  %v17456_v36 = vld [vmem:[%s21375_s3 + $0x4a0] sm:$0xff]  }
 0xa2f   : > { %16214 = vmatpush3.bf16.msra.mxu0 %v17421_v13  ;;  %16307 = vmatprep.subr.bf16.mxu1 %v17422_v37  ;;  %v17457_v13 = vld [vmem:[%s21375_s3 + $0x3c0] sm:$0xff]  }
 0xa30   : > { %16215 = vmatprep.subr.bf16.mxu0 %v17423_v27 }
 0xa32   : > { %16308 = vmatpush3.bf16.msra.mxu1 %v17422_v37  ;;  %v10599_v37 = vld [vmem:[#allocation3 + $0x3b] sm:$0x3f] }
 0xa33   : > { %16216 = vmatpush3.bf16.msra.mxu0 %v17423_v27  ;;  %16309 = vmatprep.subr.bf16.mxu1 %v17424_v62  ;;  %v10839_v27 = vld [vmem:[#allocation3 + $0x4e] sm:$0xff] }
 0xa34   : > { %16241 = vmatprep.subr.bf16.mxu0 %v17425_v56 }
 0xa36   : > { %16218 = vmatmul.mubr.bf16.vlgmr.msra.gmra.mrb[0].mxu0 %v10117_v46  ;;  %16310 = vmatpush3.bf16.msra.mxu1 %v17424_v62  ;;  %v10840_v62 = vld [vmem:[#allocation3 + $0x56] sm:$0xff] }
 0xa37   : > { %16242 = vmatpush3.bf16.msra.mxu0 %v17425_v56  ;;  %16257 = vmatprep.mubr.bf16.mxu0 %v10358_v63  ;;  %v10601_v56 = vpack.c.bf16 %v10599_v37, %v10599_v37  ;;  %v10842_v46 = vpack.c.bf16 %v10840_v62, %v10839_v27  ;;  %v17484_v37 = vld [vmem:[%s21375_s3 + $0x590] sm:$0xff]  }
 0xa38   : > { %16311 = vmatprep.subr.bf16.mxu1 %v17426_v26  ;;  %16243 = vmatprep.subr.bf16.mxu0 %v17427_v52  ;;  %v17485_v27 = vld [vmem:[%s21375_s3 + $0x470] sm:$0xff]  }
 0xa3a   : > { %16312 = vmatpush3.bf16.msra.mxu1 %v17426_v26 }
 0xa3b   : > { %16244 = vmatpush3.bf16.msra.mxu0 %v17427_v52  ;;  %16313 = vmatprep.subr.bf16.mxu1 %v17428_v22  ;;  %v17461_v52 = vld [vmem:[%s21375_s3 + $0x3d0] sm:$0xff]  }
 0xa3c   : > { %16245 = vmatprep.subr.bf16.mxu0 %v17429_v55 }
 0xa3e   : > { %16314 = vmatpush3.bf16.msra.mxu1 %v17428_v22 }
 0xa3f   : > { %16246 = vmatpush3.bf16.msra.mxu0 %v17429_v55  ;;  %16315 = vmatprep.subr.bf16.mxu1 %v17430_v39 }
 0xa40   : > { %16247 = vmatprep.subr.bf16.mxu0 %v17431_v15 }
 0xa42   : > { %16316 = vmatpush3.bf16.msra.mxu1 %v17430_v39  ;;  %v17462_v39 = vld [vmem:[%s21375_s3 + $0x4b8] sm:$0xff]  }
 0xa43   : > { %16248 = vmatpush3.bf16.msra.mxu0 %v17431_v15  ;;  %16341 = vmatprep.subr.bf16.mxu1 %v17432_v24  ;;  %v17463_v15 = vld [vmem:[%s21375_s3 + $0x3d8] sm:$0xff]  }
 0xa44   : > { %16249 = vmatprep.subr.bf16.mxu0 %v17433_v14 }
 0xa45   : > { %16318 = vmatmul.mubr.bf16.vlgmr.msra.gmra.mrb[204].mxu1 %v10722_v47  ;;  %v11444_v47 = vld [vmem:[#allocation3 + $0xc] sm:$0xff] }
 0xa46   : > { %16342 = vmatpush3.bf16.msra.mxu1 %v17432_v24  ;;  %16357 = vmatprep.mubr.bf16.mxu1 %v10963_v60  ;;  %v17464_v24 = vld [vmem:[%s21375_s3 + $0x500] sm:$0xff]   ;;  %v11447_v60 = vpack.c.bf16 %v11445_v43, %v11444_v47  ;;  %v11083_v43 = vld [vmem:[#allocation3 + $0x5f] sm:$0x3f] }
 0xa47   : > { %16250 = vmatpush3.bf16.msra.mxu0 %v17433_v14  ;;  %16343 = vmatprep.subr.bf16.mxu1 %v17434_v25  ;;  %v17465_v14 = vld [vmem:[%s21375_s3 + $0x3e0] sm:$0xff]   ;;  %v11085_v47 = vpack.c.bf16 %v11083_v43, %v11083_v43 }
 0xa48   : > { %16251 = vmatprep.subr.bf16.mxu0 %v17435_v33 }
 0xa4a   : > { %16344 = vmatpush3.bf16.msra.mxu1 %v17434_v25  ;;  %v17466_v25 = vld [vmem:[%s21375_s3 + $0x508] sm:$0xff]  }
 0xa4b   : > { %16252 = vmatpush3.bf16.msra.mxu0 %v17435_v33  ;;  %16345 = vmatprep.subr.bf16.mxu1 %v17436_v44  ;;  %v17467_v33 = vld [vmem:[%s21375_s3 + $0x3e8] sm:$0xff]  }
 0xa4c   : > { %16253 = vmatprep.subr.bf16.mxu0 %v17437_v0 }
 0xa4e   : > { %16346 = vmatpush3.bf16.msra.mxu1 %v17436_v44  ;;  %v17468_v44 = vld [vmem:[%s21375_s3 + $0x510] sm:$0xff]  }
 0xa4f   : > { %16254 = vmatpush3.bf16.msra.mxu0 %v17437_v0  ;;  %16347 = vmatprep.subr.bf16.mxu1 %v17438_v17  ;;  %v17469_v0 = vld [vmem:[%s21375_s3 + $0x3f0] sm:$0xff]  }
 0xa50   : > { %16255 = vmatprep.subr.bf16.mxu0 %v17439_v40 }
 0xa52   : > { %16348 = vmatpush3.bf16.msra.mxu1 %v17438_v17 }
 0xa53   : > { %16256 = vmatpush3.bf16.msra.mxu0 %v17439_v40  ;;  %16349 = vmatprep.subr.bf16.mxu1 %v17440_v8 }
 0xa54   : > { %16281 = vmatprep.subr.bf16.mxu0 %v17441_v59 }
 0xa56   : > { %16258 = vmatmul.mubr.bf16.vlgmr.msra.gmra.mrb[4].mxu0 %v10359_v12  ;;  %16350 = vmatpush3.bf16.msra.mxu1 %v17440_v8 }
 0xa57   : > { %16282 = vmatpush3.bf16.msra.mxu0 %v17441_v59  ;;  %16297 = vmatprep.mubr.bf16.mxu0 %v10600_v5 }
 0xa58   : > { %16351 = vmatprep.subr.bf16.mxu1 %v17442_v58  ;;  %v21052_v7 = vpop.f32.mrb[180].mxu1  ;;  %16283 = vmatprep.subr.bf16.mxu0 %v17443_v49 }
 0xa59   : > { %v21057_v11 = vpop.f32.mrb[181].mxu1 }
 0xa5a   : > { %16352 = vmatpush3.bf16.msra.mxu1 %v17442_v58  ;;  %v16080_v50 = vpop.f32.mrb[182].mxu1 }
 0xa5b   : > { %16284 = vmatpush3.bf16.msra.mxu0 %v17443_v49  ;;  %v21059_v51 = vpop.f32.mrb[183].mxu1  ;;  %16353 = vmatprep.subr.bf16.mxu1 %v17444_v28  ;;  %v10841_v50 = vld [vmem:[#allocation3 + $0x5e] sm:$0x3f] }
 0xa5c   : > { %16285 = vmatprep.subr.bf16.mxu0 %v17445_v41 }
 0xa5e   : > { %16354 = vmatpush3.bf16.msra.mxu1 %v17444_v28  ;;  %v17472_v28 = vld [vmem:[%s21375_s3 + $0x520] sm:$0xff]  }
 0xa5f   : > { %16286 = vmatpush3.bf16.msra.mxu0 %v17445_v41  ;;  %16355 = vmatprep.subr.bf16.mxu1 %v17446_v4 }
 0xa60   : > { %16287 = vmatprep.subr.bf16.mxu0 %v17447_v1 }
 0xa62   : > { %16356 = vmatpush3.bf16.msra.mxu1 %v17446_v4  ;;  %v11081_v4 = vld [vmem:[#allocation3 + $0x4f] sm:$0xff] }
 0xa63   : > { %16288 = vmatpush3.bf16.msra.mxu0 %v17447_v1  ;;  %16381 = vmatprep.subr.bf16.mxu1 %v17448_v10  ;;  %v10843_v1 = vpack.c.bf16 %v10841_v50, %v10841_v50  ;;  %v17500_v50 = vld [vmem:[%s21375_s3 + $0x610] sm:$0xff]  }
 0xa64   : > { %16289 = vmatprep.subr.bf16.mxu0 %v17449_v23 }
 0xa65   : > { %16358 = vmatmul.mubr.bf16.vlgmr.msra.gmra.mrb[208].mxu1 %v10964_v45 }
 0xa66   : > { %16382 = vmatpush3.bf16.msra.mxu1 %v17448_v10  ;;  %16397 = vmatprep.mubr.bf16.mxu1 %v11205_v32  ;;  %v17474_v10 = vld [vmem:[%s21375_s3 + $0x528] sm:$0xff]   ;;  %v17478_v32 = vld [vmem:[%s21375_s3 + $0x538] sm:$0xff]  }
 0xa67   : > { %16290 = vmatpush3.bf16.msra.mxu0 %v17449_v23  ;;  %16383 = vmatprep.subr.bf16.mxu1 %v17450_v42  ;;  %v17476_v23 = vld [vmem:[%s21375_s3 + $0x530] sm:$0xff]  }
 0xa68   : > { %16291 = vmatprep.subr.bf16.mxu0 %v17451_v34 }
 0xa69   : > { %v21085_v19 = vpop.f32.mrb[236].mxu0 }
 0xa6a   : > { %16384 = vmatpush3.bf16.msra.mxu1 %v17450_v42  ;;  %v21087_v18 = vpop.f32.mrb[237].mxu0 }
 0xa6b   : > { %16292 = vmatpush3.bf16.msra.mxu0 %v17451_v34  ;;  %v16040_v30 = vpop.f32.mrb[238].mxu0  ;;  %16385 = vmatprep.subr.bf16.mxu1 %v17452_v9 }
 0xa6c   : > { %v21092_v29 = vpop.f32.mrb[239].mxu0  ;;  %16293 = vmatprep.subr.bf16.mxu0 %v17453_v61  ;;  %v11687_v30 = vld [vmem:[#allocation3 + $0x15] sm:$0xff] }
 0xa6e   : > { %16386 = vmatpush3.bf16.msra.mxu1 %v17452_v9  ;;  %v17479_v9 = vld [vmem:[%s21375_s3 + $0x458] sm:$0xff]  }
 0xa6f   : > { %16294 = vmatpush3.bf16.msra.mxu0 %v17453_v61  ;;  %16387 = vmatprep.subr.bf16.mxu1 %v17454_v35  ;;  %v17480_v61 = vld [vmem:[%s21375_s3 + $0x580] sm:$0xff]  }
 0xa70   : > { %16295 = vmatprep.subr.bf16.mxu0 %v17455_v3 }
 0xa72   : > { %16388 = vmatpush3.bf16.msra.mxu1 %v17454_v35 }
 0xa73   : > { %16296 = vmatpush3.bf16.msra.mxu0 %v17455_v3  ;;  %16389 = vmatprep.subr.bf16.mxu1 %v17456_v36  ;;  %v17482_v3 = vld [vmem:[%s21375_s3 + $0x588] sm:$0xff]  }
 0xa74   : > { %16321 = vmatprep.subr.bf16.mxu0 %v17457_v13 }
 0xa76   : > { %16298 = vmatmul.mubr.bf16.vlgmr.msra.gmra.mrb[8].mxu0 %v10601_v56  ;;  %16390 = vmatpush3.bf16.msra.mxu1 %v17456_v36 }
 0xa77   : > { %16322 = vmatpush3.bf16.msra.mxu0 %v17457_v13  ;;  %16337 = vmatprep.mubr.bf16.mxu0 %v10842_v46  ;;  %v17483_v13 = vld [vmem:[%s21375_s3 + $0x468] sm:$0xff]  }
 0xa78   : > { %v21112_v26 = vpop.f32.mrb[184].mxu1  ;;  %16391 = vmatprep.subr.bf16.mxu1 %v17458_v2  ;;  %16323 = vmatprep.subr.bf16.mxu0 %v17459_v54 }
 0xa79   : > { %v21117_v63 = vpop.f32.mrb[185].mxu1 }
 0xa7a   : > { %v16120_v22 = vpop.f32.mrb[186].mxu1  ;;  %16392 = vmatpush3.bf16.msra.mxu1 %v17458_v2 }
 0xa7b   : > { %v21119_v55 = vpop.f32.mrb[187].mxu1  ;;  %16324 = vmatpush3.bf16.msra.mxu0 %v17459_v54  ;;  %16393 = vmatprep.subr.bf16.mxu1 %v17460_v48  ;;  %v17487_v22 = vld [vmem:[%s21375_s3 + $0x478] sm:$0xff]  }
 0xa7c   : > { %16325 = vmatprep.subr.bf16.mxu0 %v17461_v52 }
 0xa7e   : > { %16394 = vmatpush3.bf16.msra.mxu1 %v17460_v48  ;;  %v17486_v48 = vld [vmem:[%s21375_s3 + $0x598] sm:$0xff]  }
 0xa7f   : > { %16326 = vmatpush3.bf16.msra.mxu0 %v17461_v52  ;;  %16395 = vmatprep.subr.bf16.mxu1 %v17462_v39 }
 0xa80   : > { %16327 = vmatprep.subr.bf16.mxu0 %v17463_v15 }
 0xa82   : > { %16396 = vmatpush3.bf16.msra.mxu1 %v17462_v39 }
 0xa83   : > { %16328 = vmatpush3.bf16.msra.mxu0 %v17463_v15  ;;  %16421 = vmatprep.subr.bf16.mxu1 %v17464_v24 }
 0xa84   : > { %16329 = vmatprep.subr.bf16.mxu0 %v17465_v14 }
 0xa85   : > { %16398 = vmatmul.mubr.bf16.vlgmr.msra.gmra.mrb[212].mxu1 %v11206_v31  ;;  %v11323_v31 = vld [vmem:[#allocation3 + $0x50] sm:$0xff] }
 0xa86   : > { %16422 = vmatpush3.bf16.msra.mxu1 %v17464_v24  ;;  %16437 = vmatprep.mubr.bf16.mxu1 %v11447_v60 }
 0xa87   : > { %16330 = vmatpush3.bf16.msra.mxu0 %v17465_v14  ;;  %16423 = vmatprep.subr.bf16.mxu1 %v17466_v25 }
 0xa88   : > { %16331 = vmatprep.subr.bf16.mxu0 %v17467_v33 }
 0xa89   : > { %v16059_v17 = vpop.f32.mrb[240].mxu0 }
 0xa8a   : > { %v9261_v40 = vadd.f32 %v16059_v17, %v21085_v19  ;;  %v9252_v8 = vpop.f32.mrb[241].mxu0  ;;  %16424 = vmatpush3.bf16.msra.mxu1 %v17466_v25  ;;  %v11446_v19 = vld [vmem:[#allocation3 + $0x1c] sm:$0x3f] }
 0xa8b   : > { %v9253_v59 = vadd.f32 %v9252_v8, %v21087_v18  ;;  %v16060_v38 = vpop.f32.mrb[242].mxu0  ;;  %16332 = vmatpush3.bf16.msra.mxu0 %v17467_v33  ;;  %16425 = vmatprep.subr.bf16.mxu1 %v17468_v44  ;;  %v17481_v18 = vld [vmem:[%s21375_s3 + $0x460] sm:$0xff]   ;;  %v11448_v35 = vpack.c.bf16 %v11446_v19, %v11446_v19  ;;  %v17490_v25 = vld [vmem:[%s21375_s3 + $0x5a8] sm:$0xff]   ;;  %v17492_v33 = vld [vmem:[%s21375_s3 + $0x5b0] sm:$0xff]  }
 0xa8c   : > { %v9255_v12 = vpop.f32.mrb[243].mxu0  ;;  %16333 = vmatprep.subr.bf16.mxu0 %v17469_v0  ;;  %v21154_v58 = vadd.f32 %v21052_v7, %v9261_v40  ;;  %v17473_v7 = vld [vmem:[%s21375_s3 + $0x440] sm:$0xff]   ;;  %v17494_v8 = vld [vmem:[%s21375_s3 + $0x5b8] sm:$0xff]  }
 0xa8d   : > { %v9256_v49 = vadd.f32 %v9255_v12, %v21092_v29  ;;  %v21158_v5 = vadd.f32 %v21057_v11, %v9253_v59  ;;  %v11082_v11 = vld [vmem:[#allocation3 + $0x57] sm:$0xff]  ;;  %v11686_v29 = vld [vmem:[#allocation3 + $0xd] sm:$0xff] }
 0xa8e   : > { %16426 = vmatpush3.bf16.msra.mxu1 %v17468_v44  ;;  %v11084_v57 = vpack.c.bf16 %v11082_v11, %v11081_v4  ;;  %v11689_v36 = vpack.c.bf16 %v11687_v30, %v11686_v29  ;;  %v17493_v44 = vld [vmem:[%s21375_s3 + $0x4d0] sm:$0xff]   ;;  %v17495_v38 = vld [vmem:[%s21375_s3 + $0x4d8] sm:$0xff]   ;;  %v17504_v19 = vld [vmem:[%s21375_s3 + $0x620] sm:$0xff]  }
 0xa8f   : > { %16334 = vmatpush3.bf16.msra.mxu0 %v17469_v0  ;;  %16427 = vmatprep.subr.bf16.mxu1 %v17470_v53  ;;  %v21164_v41 = vadd.f32 %v21059_v51, %v9256_v49  ;;  %v17475_v51 = vld [vmem:[%s21375_s3 + $0x448] sm:$0xff]   ;;  %v17501_v4 = vld [vmem:[%s21375_s3 + $0x4f0] sm:$0xff]   ;;  %v17505_v30 = vld [vmem:[%s21375_s3 + $0x540] sm:$0xff]  }
 0xa90   : > { %16335 = vmatprep.subr.bf16.mxu0 %v17471_v21  ;;  %v11688_v12 = vld [vmem:[#allocation3 + $0x1d] sm:$0x3f]  ;;  %v11565_v29 = vld [vmem:[#allocation3 + $0x30] sm:$0xff] }
 0xa91   : > { %v11690_v49 = vpack.c.bf16 %v11688_v12, %v11688_v12 }
 0xa92   : > { %16428 = vmatpush3.bf16.msra.mxu1 %v17470_v53  ;;  %v17496_v53 = vld [vmem:[%s21375_s3 + $0x600] sm:$0xff]  }
 0xa93   : > { %16336 = vmatpush3.bf16.msra.mxu0 %v17471_v21  ;;  %16429 = vmatprep.subr.bf16.mxu1 %v17472_v28  ;;  %v17497_v21 = vld [vmem:[%s21375_s3 + $0x4e0] sm:$0xff]  }
 0xa94   : > { %16361 = vmatprep.subr.bf16.mxu0 %v17473_v7 }
 0xa96   : > { %16338 = vmatmul.mubr.bf16.vlgmr.msra.gmra.mrb[12].mxu0 %v10843_v1  ;;  %16430 = vmatpush3.bf16.msra.mxu1 %v17472_v28  ;;  %v17498_v28 = vld [vmem:[%s21375_s3 + $0x608] sm:$0xff]  }
 0xa97   : > { %16362 = vmatpush3.bf16.msra.mxu0 %v17473_v7  ;;  %16377 = vmatprep.mubr.bf16.mxu0 %v11084_v57  ;;  %v17499_v7 = vld [vmem:[%s21375_s3 + $0x4e8] sm:$0xff]  }
 0xa98   : > { %16431 = vmatprep.subr.bf16.mxu1 %v17474_v10  ;;  %16363 = vmatprep.subr.bf16.mxu0 %v17475_v51  ;;  %v21181_v20 = vpop.f32.mrb[188].mxu1 }
 0xa99   : > { %v21183_v45 = vpop.f32.mrb[189].mxu1 }
 0xa9a   : > { %16432 = vmatpush3.bf16.msra.mxu1 %v17474_v10  ;;  %v16160_v42 = vpop.f32.mrb[190].mxu1 }
 0xa9b   : > { %16364 = vmatpush3.bf16.msra.mxu0 %v17475_v51  ;;  %16433 = vmatprep.subr.bf16.mxu1 %v17476_v23  ;;  %v21188_v34 = vpop.f32.mrb[191].mxu1  ;;  %v17503_v42 = vld [vmem:[%s21375_s3 + $0x4f8] sm:$0xff]  }
 0xa9c   : > { %16365 = vmatprep.subr.bf16.mxu0 %v17477_v16 }
 0xa9e   : > { %16434 = vmatpush3.bf16.msra.mxu1 %v17476_v23  ;;  %v17502_v23 = vld [vmem:[%s21375_s3 + $0x618] sm:$0xff]  }
 0xa9f   : > { %16366 = vmatpush3.bf16.msra.mxu0 %v17477_v16  ;;  %16435 = vmatprep.subr.bf16.mxu1 %v17478_v32 }
 0xaa0   : > { %16367 = vmatprep.subr.bf16.mxu0 %v17479_v9 }
 0xaa2   : > { %16436 = vmatpush3.bf16.msra.mxu1 %v17478_v32 }
 0xaa3   : > { %16368 = vmatpush3.bf16.msra.mxu0 %v17479_v9  ;;  %16461 = vmatprep.subr.bf16.mxu1 %v17480_v61 }
 0xaa4   : > { %16369 = vmatprep.subr.bf16.mxu0 %v17481_v18 }
 0xaa5   : > { %16438 = vmatmul.mubr.bf16.vlgmr.msra.gmra.mrb[216].mxu1 %v11448_v35  ;;  %v11325_v35 = vld [vmem:[#allocation3 + $0x60] sm:$0x3f] }
 0xaa6   : > { %16462 = vmatpush3.bf16.msra.mxu1 %v17480_v61  ;;  %16477 = vmatprep.mubr.bf16.mxu1 %v11689_v36 }
 0xaa7   : > { %16370 = vmatpush3.bf16.msra.mxu0 %v17481_v18  ;;  %16463 = vmatprep.subr.bf16.mxu1 %v17482_v3 }
 0xaa8   : > { %16371 = vmatprep.subr.bf16.mxu0 %v17483_v13 }
 0xaa9   : > { %v16099_v62 = vpop.f32.mrb[244].mxu0 }
 0xaaa   : > { %v9507_v56 = vadd.f32 %v16099_v62, %v21154_v58  ;;  %v9491_v2 = vpop.f32.mrb[245].mxu0  ;;  %16464 = vmatpush3.bf16.msra.mxu1 %v17482_v3  ;;  %v11929_v58 = vld [vmem:[#allocation3 + $0x16] sm:$0xff] }
 0xaab   : > { %v9505_v54 = vadd.f32 %v9491_v2, %v21158_v5  ;;  %v16100_v46 = vpop.f32.mrb[246].mxu0  ;;  %16372 = vmatpush3.bf16.msra.mxu0 %v17483_v13  ;;  %16465 = vmatprep.subr.bf16.mxu1 %v17484_v37  ;;  %v11928_v5 = vld [vmem:[#allocation3 + $0xe] sm:$0xff]  ;;  %v17506_v3 = vld [vmem:[%s21375_s3 + $0x628] sm:$0xff]   ;;  %v17508_v13 = vld [vmem:[%s21375_s3 + $0x630] sm:$0xff]  }
 0xaac   : > { %v9494_v52 = vpop.f32.mrb[247].mxu0  ;;  %16373 = vmatprep.subr.bf16.mxu0 %v17485_v27  ;;  %v21220_v39 = vadd.f32 %v21112_v26, %v9507_v56  ;;  %v17489_v26 = vld [vmem:[%s21375_s3 + $0x4c0] sm:$0xff]   ;;  %v17511_v46 = vld [vmem:[%s21375_s3 + $0x558] sm:$0xff]  }
 0xaad   : > { %v9506_v15 = vadd.f32 %v9494_v52, %v21164_v41  ;;  %v21224_v24 = vadd.f32 %v21117_v63, %v9505_v54  ;;  %v11324_v63 = vld [vmem:[#allocation3 + $0x58] sm:$0xff]  ;;  %v11931_v41 = vpack.c.bf16 %v11929_v58, %v11928_v5  ;;  %v17510_v54 = vld [vmem:[%s21375_s3 + $0x638] sm:$0xff]   ;;  %v17512_v52 = vld [vmem:[%s21375_s3 + $0x560] sm:$0xff]  }
 0xaae   : > { %16466 = vmatpush3.bf16.msra.mxu1 %v17484_v37  ;;  %v11326_v60 = vpack.c.bf16 %v11324_v63, %v11323_v31  ;;  %v17515_v63 = vld [vmem:[%s21375_s3 + $0x578] sm:$0xff]   ;;  %v17520_v5 = vld [vmem:[%s21375_s3 + $0x5e0] sm:$0xff]  }
 0xaaf   : > { %16374 = vmatpush3.bf16.msra.mxu0 %v17485_v27  ;;  %16467 = vmatprep.subr.bf16.mxu1 %v17486_v48  ;;  %v21230_v14 = vadd.f32 %v21119_v55, %v9506_v15  ;;  %v17491_v55 = vld [vmem:[%s21375_s3 + $0x4c8] sm:$0xff]   ;;  %v17509_v27 = vld [vmem:[%s21375_s3 + $0x550] sm:$0xff]  }
 0xab0   : > { %16375 = vmatprep.subr.bf16.mxu0 %v17487_v22  ;;  %v17514_v15 = vld [vmem:[%s21375_s3 + $0x570] sm:$0xff]  }
 0xab2   : > { %16468 = vmatpush3.bf16.msra.mxu1 %v17486_v48  ;;  %v11930_v48 = vld [vmem:[#allocation3 + $0x1e] sm:$0x3f] }
 0xab3   : > { %16376 = vmatpush3.bf16.msra.mxu0 %v17487_v22  ;;  %16469 = vmatprep.subr.bf16.mxu1 %v17488_v6  ;;  %v11932_v22 = vpack.c.bf16 %v11930_v48, %v11930_v48 }
 0xab4   : > { %16401 = vmatprep.subr.bf16.mxu0 %v17489_v26 }
 0xab6   : > { %16378 = vmatmul.mubr.bf16.vlgmr.msra.gmra.mrb[16].mxu0 %v11085_v47  ;;  %16470 = vmatpush3.bf16.msra.mxu1 %v17488_v6 }
 0xab7   : > { %16402 = vmatpush3.bf16.msra.mxu0 %v17489_v26  ;;  %16417 = vmatprep.mubr.bf16.mxu0 %v11326_v60 }
 0xab8   : > { %16471 = vmatprep.subr.bf16.mxu1 %v17490_v25  ;;  %16403 = vmatprep.subr.bf16.mxu0 %v17491_v55  ;;  %v21247_v0 = vpop.f32.mrb[192].mxu1 }
 0xab9   : > { %v21249_v17 = vpop.f32.mrb[193].mxu1 }
 0xaba   : > { %16472 = vmatpush3.bf16.msra.mxu1 %v17490_v25  ;;  %v16200_v40 = vpop.f32.mrb[194].mxu1 }
 0xabb   : > { %16404 = vmatpush3.bf16.msra.mxu0 %v17491_v55  ;;  %16473 = vmatprep.subr.bf16.mxu1 %v17492_v33  ;;  %v21254_v59 = vpop.f32.mrb[195].mxu1  ;;  %v11808_v40 = vld [vmem:[#allocation3 + $0x39] sm:$0xff] }
 0xabc   : > { %16405 = vmatprep.subr.bf16.mxu0 %v17493_v44 }
 0xabe   : > { %16474 = vmatpush3.bf16.msra.mxu1 %v17492_v33  ;;  %v17516_v33 = vld [vmem:[%s21375_s3 + $0x5c0] sm:$0xff]  }
 0xabf   : > { %16406 = vmatpush3.bf16.msra.mxu0 %v17493_v44  ;;  %16475 = vmatprep.subr.bf16.mxu1 %v17494_v8  ;;  %v11567_v44 = vld [vmem:[#allocation3 + $0x40] sm:$0x3f] }
 0xac0   : > { %16407 = vmatprep.subr.bf16.mxu0 %v17495_v38 }
 0xac2   : > { %16476 = vmatpush3.bf16.msra.mxu1 %v17494_v8  ;;  %v11569_v8 = vpack.c.bf16 %v11567_v44, %v11567_v44 }
 0xac3   : > { %16408 = vmatpush3.bf16.msra.mxu0 %v17495_v38  ;;  %16501 = vmatprep.subr.bf16.mxu1 %v17496_v53  ;;  %v11807_v38 = vld [vmem:[#allocation3 + $0x31] sm:$0xff] }
 0xac4   : > { %16409 = vmatprep.subr.bf16.mxu0 %v17497_v21 }
 0xac5   : > { %16478 = vmatmul.mubr.bf16.vlgmr.msra.gmra.mrb[220].mxu1 %v11690_v49  ;;  %v17519_v49 = vld [vmem:[%s21375_s3 + $0x5d8] sm:$0xff]  }
 0xac6   : > { %16502 = vmatpush3.bf16.msra.mxu1 %v17496_v53  ;;  %16517 = vmatprep.mubr.bf16.mxu1 %v11931_v41  ;;  %v11810_v53 = vpack.c.bf16 %v11808_v40, %v11807_v38  ;;  %v17522_v41 = vld [vmem:[%s21375_s3 + $0x5f0] sm:$0xff]  }
 0xac7   : > { %16410 = vmatpush3.bf16.msra.mxu0 %v17497_v21  ;;  %16503 = vmatprep.subr.bf16.mxu1 %v17498_v28 }
 0xac8   : > { %16411 = vmatprep.subr.bf16.mxu0 %v17499_v7 }
 0xac9   : > { %v16139_v11 = vpop.f32.mrb[248].mxu0 }
 0xaca   : > { %v9749_v1 = vadd.f32 %v16139_v11, %v21220_v39  ;;  %v9733_v10 = vpop.f32.mrb[249].mxu0  ;;  %16504 = vmatpush3.bf16.msra.mxu1 %v17498_v28  ;;  %v17513_v39 = vld [vmem:[%s21375_s3 + $0x568] sm:$0xff]  }
 0xacb   : > { %v9747_v51 = vadd.f32 %v9733_v10, %v21224_v24  ;;  %v16140_v57 = vpop.f32.mrb[250].mxu0  ;;  %16412 = vmatpush3.bf16.msra.mxu0 %v17499_v7  ;;  %16505 = vmatprep.subr.bf16.mxu1 %v17500_v50  ;;  %v17521_v28 = vld [vmem:[%s21375_s3 + $0x5e8] sm:$0xff]  }
 0xacc   : > { %v9736_v16 = vpop.f32.mrb[251].mxu0  ;;  %16413 = vmatprep.subr.bf16.mxu0 %v17501_v4  ;;  %v9870_v32 = vadd.f32 %v21181_v20, %v9749_v1  ;;  %v11566_v20 = vld [vmem:[#allocation3 + $0x38] sm:$0xff] }
 0xacd   : > { %v9748_v9 = vadd.f32 %v9736_v16, %v21230_v14  ;;  %v9868_v61 = vadd.f32 %v21183_v45, %v9747_v51  ;;  %v11327_v45 = vpack.c.bf16 %v11325_v35, %v11325_v35  ;;  %v11568_v36 = vpack.c.bf16 %v11566_v20, %v11565_v29  ;;  %v17523_v51 = vld [vmem:[%s21375_s3 + $0x5f8] sm:$0xff]  }
 0xace   : > { %16506 = vmatpush3.bf16.msra.mxu1 %v17500_v50 }
 0xacf   : > { %16414 = vmatpush3.bf16.msra.mxu0 %v17501_v4  ;;  %16507 = vmatprep.subr.bf16.mxu1 %v17502_v23  ;;  %v9869_v18 = vadd.f32 %v21188_v34, %v9748_v9  ;;  %v17507_v34 = vld [vmem:[%s21375_s3 + $0x548] sm:$0xff]  }
 0xad0   : > { %16415 = vmatprep.subr.bf16.mxu0 %v17503_v42 }
 0xad2   : > { %16508 = vmatpush3.bf16.msra.mxu1 %v17502_v23 }
 0xad3   : > { %16416 = vmatpush3.bf16.msra.mxu0 %v17503_v42  ;;  %16509 = vmatprep.subr.bf16.mxu1 %v17504_v19 }
 0xad4   : > { %16441 = vmatprep.subr.bf16.mxu0 %v17505_v30 }
 0xad6   : > { %16418 = vmatmul.mubr.bf16.vlgmr.msra.gmra.mrb[20].mxu0 %v11327_v45  ;;  %16510 = vmatpush3.bf16.msra.mxu1 %v17504_v19 }
 0xad7   : > { %16442 = vmatpush3.bf16.msra.mxu0 %v17505_v30  ;;  %16457 = vmatprep.mubr.bf16.mxu0 %v11568_v36 }
 0xad8   : > { %v21304_v37 = vpop.f32.mrb[196].mxu1  ;;  %16511 = vmatprep.subr.bf16.mxu1 %v17506_v3  ;;  %16443 = vmatprep.subr.bf16.mxu0 %v17507_v34 }
 0xad9   : > { %v21309_v62 = vpop.f32.mrb[197].mxu1 }
 0xada   : > { %v16240_v56 = vpop.f32.mrb[198].mxu1  ;;  %16512 = vmatpush3.bf16.msra.mxu1 %v17506_v3 }
 0xadb   : > { %v21311_v2 = vpop.f32.mrb[199].mxu1  ;;  %16444 = vmatpush3.bf16.msra.mxu0 %v17507_v34  ;;  %16513 = vmatprep.subr.bf16.mxu1 %v17508_v13 }
 0xadc   : > { %16445 = vmatprep.subr.bf16.mxu0 %v17509_v27 }
 0xade   : > { %16514 = vmatpush3.bf16.msra.mxu1 %v17508_v13 }
 0xadf   : > { %16446 = vmatpush3.bf16.msra.mxu0 %v17509_v27  ;;  %16515 = vmatprep.subr.bf16.mxu1 %v17510_v54 }
 0xae0   : > { %16447 = vmatprep.subr.bf16.mxu0 %v17511_v46 }
 0xae2   : > { %16516 = vmatpush3.bf16.msra.mxu1 %v17510_v54 }
 0xae3   : > { %16448 = vmatpush3.bf16.msra.mxu0 %v17511_v46 }
 0xae4   : > { %16449 = vmatprep.subr.bf16.mxu0 %v17512_v52 }
 0xae5   : > { %16518 = vmatmul.mubr.bf16.vlgmr.msra.gmra.mrb[224].mxu1 %v11932_v22 }
 0xae7   : > { %16450 = vmatpush3.bf16.msra.mxu0 %v17512_v52 }
 0xae8   : > { %16451 = vmatprep.subr.bf16.mxu0 %v17513_v39 }
 0xae9   : > { %v16179_v24 = vpop.f32.mrb[252].mxu0 }
 0xaea   : > { %v9991_v6 = vadd.f32 %v16179_v24, %v9870_v32  ;;  %v9975_v14 = vpop.f32.mrb[253].mxu0  ;;  %v11809_v32 = vld [vmem:[#allocation3 + $0x41] sm:$0x3f] }
 0xaeb   : > { %v9989_v26 = vadd.f32 %v9975_v14, %v9868_v61  ;;  %v16180_v43 = vpop.f32.mrb[254].mxu0  ;;  %16452 = vmatpush3.bf16.msra.mxu0 %v17513_v39  ;;  %v11811_v9 = vpack.c.bf16 %v11809_v32, %v11809_v32 }
 0xaec   : > { %v9978_v31 = vpop.f32.mrb[255].mxu0  ;;  %16453 = vmatprep.subr.bf16.mxu0 %v17514_v15  ;;  %v10112_v47 = vadd.f32 %v21247_v0, %v9991_v6  ;;  %v17517_v0 = vld [vmem:[%s21375_s3 + $0x5c8] sm:$0xff]  }
 0xaed   : > { %v9990_v25 = vadd.f32 %v9978_v31, %v9869_v18  ;;  %v10110_v55 = vadd.f32 %v21249_v17, %v9989_v26 }
 0xaef   : > { %16454 = vmatpush3.bf16.msra.mxu0 %v17514_v15  ;;  %v10111_v60 = vadd.f32 %v21254_v59, %v9990_v25  ;;  %v17518_v59 = vld [vmem:[%s21375_s3 + $0x5d0] sm:$0xff]  }
 0xaf0   : > { %16455 = vmatprep.subr.bf16.mxu0 %v17515_v63 }
 0xaf3   : > { %16456 = vmatpush3.bf16.msra.mxu0 %v17515_v63 }
 0xaf4   : > { %16481 = vmatprep.subr.bf16.mxu0 %v17516_v33 }
 0xaf6   : > { %16458 = vmatmul.mubr.bf16.vlgmr.msra.gmra.mrb[24].mxu0 %v11569_v8 }
 0xaf7   : > { %16482 = vmatpush3.bf16.msra.mxu0 %v17516_v33  ;;  %16497 = vmatprep.mubr.bf16.mxu0 %v11810_v53 }
 0xaf8   : > { %v16279_v17 = vpop.f32.mrb[200].mxu1  ;;  %16483 = vmatprep.subr.bf16.mxu0 %v17517_v0 }
 0xaf9   : > { %v10580_v12 = vpop.f32.mrb[201].mxu1 }
 0xafa   : > { %v16280_v21 = vpop.f32.mrb[202].mxu1 }
 0xafb   : > { %v10583_v58 = vpop.f32.mrb[203].mxu1  ;;  %16484 = vmatpush3.bf16.msra.mxu0 %v17517_v0 }
 0xafc   : > { %16485 = vmatprep.subr.bf16.mxu0 %v17518_v59 }
 0xaff   : > { %16486 = vmatpush3.bf16.msra.mxu0 %v17518_v59 }
 0xb00   : > { %16487 = vmatprep.subr.bf16.mxu0 %v17519_v49 }
 0xb03   : > { %16488 = vmatpush3.bf16.msra.mxu0 %v17519_v49 }
 0xb04   : > { %16489 = vmatprep.subr.bf16.mxu0 %v17520_v5 }
 0xb07   : > { %16490 = vmatpush3.bf16.msra.mxu0 %v17520_v5 }
 0xb08   : > { %16491 = vmatprep.subr.bf16.mxu0 %v17521_v28 }
 0xb09   : > { %v16219_v7 = vpop.f32.mrb[0].mxu0 }
 0xb0a   : > { %v10233_v50 = vadd.f32 %v16219_v7, %v10112_v47  ;;  %v10217_v4 = vpop.f32.mrb[1].mxu0 }
 0xb0b   : > { %v10231_v11 = vadd.f32 %v10217_v4, %v10110_v55  ;;  %v16220_v1 = vpop.f32.mrb[2].mxu0  ;;  %16492 = vmatpush3.bf16.msra.mxu0 %v17521_v28 }
 0xb0c   : > { %v10220_v10 = vpop.f32.mrb[3].mxu0  ;;  %16493 = vmatprep.subr.bf16.mxu0 %v17522_v41  ;;  %v10354_v57 = vadd.f32 %v21304_v37, %v10233_v50 }
 0xb0d   : > { %v10232_v23 = vadd.f32 %v10220_v10, %v10111_v60  ;;  %v10352_v16 = vadd.f32 %v21309_v62, %v10231_v11 }
 0xb0f   : > { %16494 = vmatpush3.bf16.msra.mxu0 %v17522_v41  ;;  %v10353_v42 = vadd.f32 %v21311_v2, %v10232_v23 }
 0xb10   : > { %16495 = vmatprep.subr.bf16.mxu0 %v17523_v51 }
 0xb13   : > { %16496 = vmatpush3.bf16.msra.mxu0 %v17523_v51 }
 0xb16   : > { %16498 = vmatmul.mubr.bf16.vlgmr.msra.gmra.mrb[28].mxu0 %v11811_v9 }
 0xb18   : > { %v16319_v61 = vpop.f32.mrb[204].mxu1 }
 0xb19   : > { %v10822_v19 = vpop.f32.mrb[205].mxu1 }
 0xb1a   : > { %v16320_v18 = vpop.f32.mrb[206].mxu1 }
 0xb1b   : > { %v10825_v30 = vpop.f32.mrb[207].mxu1 }
 0xb29   : > { %v16259_v35 = vpop.f32.mrb[4].mxu0 }
 0xb2a   : > { %v10475_v20 = vadd.f32 %v16259_v35, %v10354_v57  ;;  %v10459_v45 = vpop.f32.mrb[5].mxu0 }
 0xb2b   : > { %v10473_v29 = vadd.f32 %v10459_v45, %v10352_v16  ;;  %v16260_v3 = vpop.f32.mrb[6].mxu0 }
 0xb2c   : > { %v10462_v34 = vpop.f32.mrb[7].mxu0  ;;  %v10596_v36 = vadd.f32 %v16279_v17, %v10475_v20 }
 0xb2d   : > { %v10474_v13 = vadd.f32 %v10462_v34, %v10353_v42  ;;  %v10594_v37 = vadd.f32 %v10580_v12, %v10473_v29 }
 0xb2f   : > { %v10595_v27 = vadd.f32 %v10583_v58, %v10474_v13 }
 0xb38   : > { %v16359_v62 = vpop.f32.mrb[208].mxu1 }
 0xb39   : > { %v11064_v56 = vpop.f32.mrb[209].mxu1 }
 0xb3a   : > { %v16360_v2 = vpop.f32.mrb[210].mxu1 }
 0xb3b   : > { %v11067_v54 = vpop.f32.mrb[211].mxu1 }
 0xb49   : > { %v16299_v46 = vpop.f32.mrb[8].mxu0 }
 0xb4a   : > { %v10717_v48 = vadd.f32 %v16299_v46, %v10596_v36  ;;  %v10701_v52 = vpop.f32.mrb[9].mxu0 }
 0xb4b   : > { %v10715_v22 = vadd.f32 %v10701_v52, %v10594_v37  ;;  %v16300_v39 = vpop.f32.mrb[10].mxu0 }
 0xb4c   : > { %v10704_v15 = vpop.f32.mrb[11].mxu0  ;;  %v10838_v24 = vadd.f32 %v16319_v61, %v10717_v48 }
 0xb4d   : > { %v10716_v6 = vadd.f32 %v10704_v15, %v10595_v27  ;;  %v10836_v14 = vadd.f32 %v10822_v19, %v10715_v22 }
 0xb4f   : > { %v10837_v26 = vadd.f32 %v10825_v30, %v10716_v6 }
 0xb58   : > { %v16399_v43 = vpop.f32.mrb[212].mxu1 }
 0xb59   : > { %v11306_v31 = vpop.f32.mrb[213].mxu1 }
 0xb5a   : > { %v16400_v63 = vpop.f32.mrb[214].mxu1 }
 0xb5b   : > { %v11309_v47 = vpop.f32.mrb[215].mxu1 }
 0xb69   : > { %v16339_v25 = vpop.f32.mrb[12].mxu0 }
 0xb6a   : > { %v10959_v55 = vadd.f32 %v16339_v25, %v10838_v24  ;;  %v10943_v60 = vpop.f32.mrb[13].mxu0 }
 0xb6b   : > { %v10957_v33 = vadd.f32 %v10943_v60, %v10836_v14  ;;  %v16340_v44 = vpop.f32.mrb[14].mxu0  ;;  %v13649_v14 = vld [vmem:[%s21378_s6] ss:$0 sm:$0xff] }
 0xb6c   : > { %v10946_v40 = vpop.f32.mrb[15].mxu0  ;;  %v11080_v8 = vadd.f32 %v16359_v62, %v10959_v55 }
 0xb6d   : > { %v10958_v38 = vadd.f32 %v10946_v40, %v10837_v26  ;;  %v11078_v0 = vadd.f32 %v11064_v56, %v10957_v33 }
 0xb6f   : > { %v11079_v53 = vadd.f32 %v11067_v54, %v10958_v38 }
 0xb78   : > { %v16439_v17 = vpop.f32.mrb[216].mxu1 }
 0xb79   : > { %v11548_v59 = vpop.f32.mrb[217].mxu1 }
 0xb7a   : > { %v16440_v12 = vpop.f32.mrb[218].mxu1 }
 0xb7b   : > { %v11551_v21 = vpop.f32.mrb[219].mxu1 }
 0xb89   : > { %v16379_v58 = vpop.f32.mrb[16].mxu0 }
 0xb8a   : > { %v11201_v49 = vadd.f32 %v16379_v58, %v11080_v8  ;;  %v11185_v5 = vpop.f32.mrb[17].mxu0 }
 0xb8b   : > { %v11199_v28 = vadd.f32 %v11185_v5, %v11078_v0  ;;  %v16380_v41 = vpop.f32.mrb[18].mxu0 }
 0xb8c   : > { %v11188_v7 = vpop.f32.mrb[19].mxu0  ;;  %v11322_v50 = vadd.f32 %v16399_v43, %v11201_v49 }
 0xb8d   : > { %v11200_v4 = vadd.f32 %v11188_v7, %v11079_v53  ;;  %v11320_v11 = vadd.f32 %v11306_v31, %v11199_v28 }
 0xb8f   : > { %v11321_v1 = vadd.f32 %v11309_v47, %v11200_v4 }
 0xb98   : > { %v16479_v10 = vpop.f32.mrb[220].mxu1 }
 0xb99   : > { %v11790_v51 = vpop.f32.mrb[221].mxu1 }
 0xb9a   : > { %v16480_v57 = vpop.f32.mrb[222].mxu1 }
 0xb9b   : > { %v11793_v23 = vpop.f32.mrb[223].mxu1 }
 0xba9   : > { %v16419_v16 = vpop.f32.mrb[20].mxu0 }
 0xbaa   : > { %v11443_v42 = vadd.f32 %v16419_v16, %v11322_v50  ;;  %v11427_v32 = vpop.f32.mrb[21].mxu0 }
 0xbab   : > { %v11441_v9 = vadd.f32 %v11427_v32, %v11320_v11  ;;  %v16420_v61 = vpop.f32.mrb[22].mxu0 }
 0xbac   : > { %v11430_v19 = vpop.f32.mrb[23].mxu0  ;;  %v11564_v18 = vadd.f32 %v16439_v17, %v11443_v42 }
 0xbad   : > { %v11442_v30 = vadd.f32 %v11430_v19, %v11321_v1  ;;  %v11562_v35 = vadd.f32 %v11548_v59, %v11441_v9 }
 0xbaf   : > { %v11563_v20 = vadd.f32 %v11551_v21, %v11442_v30 }
 0xbb8   : > { %v16519_v45 = vpop.f32.mrb[224].mxu1 }
 0xbb9   : > { %v12032_v29 = vpop.f32.mrb[225].mxu1 }
 0xbba   : > { %v16520_v3 = vpop.f32.mrb[226].mxu1 }
 0xbbb   : > { %v12035_v34 = vpop.f32.mrb[227].mxu1 }
 0xbc9   : > { %v16459_v36 = vpop.f32.mrb[24].mxu0 }
 0xbca   : > { %v11685_v13 = vadd.f32 %v16459_v36, %v11564_v18  ;;  %v11669_v37 = vpop.f32.mrb[25].mxu0 }
 0xbcb   : > { %v11683_v27 = vadd.f32 %v11669_v37, %v11562_v35  ;;  %v16460_v62 = vpop.f32.mrb[26].mxu0 }
 0xbcc   : > { %v11672_v56 = vpop.f32.mrb[27].mxu0  ;;  %v11806_v2 = vadd.f32 %v16479_v10, %v11685_v13 }
 0xbcd   : > { %v11684_v54 = vadd.f32 %v11672_v56, %v11563_v20  ;;  %v11804_v46 = vadd.f32 %v11790_v51, %v11683_v27 }
 0xbcf   : > { %v11805_v48 = vadd.f32 %v11793_v23, %v11684_v54 }
 0xbe9   : > { %v16499_v52 = vpop.f32.mrb[28].mxu0 }
 0xbea   : > { %v11927_v22 = vadd.f32 %v16499_v52, %v11806_v2  ;;  %v11911_v39 = vpop.f32.mrb[29].mxu0 }
 0xbeb   : > { %v11925_v15 = vadd.f32 %v11911_v39, %v11804_v46  ;;  %v16500_v24 = vpop.f32.mrb[30].mxu0 }
 0xbec   : > { %v12048_v6 = vadd.f32 %v16519_v45, %v11927_v22  ;;  %v11914_v26 = vpop.f32.mrb[31].mxu0 }
 0xbed   : > { %v12046_v43 = vadd.f32 %v12032_v29, %v11925_v15  ;;  %v11926_v31 = vadd.f32 %v11914_v26, %v11805_v48 }
 0xbee   : > { %v12058_v63 = vadd.f32 %v13649_v14, %v12048_v6 }
 0xbef   : > { %v12056_v47 = vadd.f32 %v13649_v14, %v12046_v43  ;;  %v12047_v25 = vadd.f32 %v12035_v34, %v11926_v31 }
 0xbf0   : > { %v12069_v60 = vrot.slane %v12058_v63, 6 }
 0xbf1   : > { %v12057_v55 = vadd.f32 %v13649_v14, %v12047_v25  ;;  %v12062_v33 = vrot.slane %v12056_v47, 2 }
 0xbf3   : > { %v12063_v44 = vrot.slane %v12057_v55, 2  ;;  %v12066_v40 = vrot.slane %v12057_v55, 4 }
 0xbf5   : > { %v12064_v8 = vsel %vm2145_vm3, %v12062_v33, %v12063_v44  ;;  %v12073_v38 = vsel %vm12071_vm1, %v12066_v40, %v12069_v60 }
 0xbf6   : > { %v12072_v0 = vsel %vm12071_vm1, %v12056_v47, %v12064_v8  ;;  %12075 = vst [vmem:[%s332_s21 + $0x8] sm:$0xff] %v12073_v38 }
 0xbf7   : > { %12074 = vst [vmem:[%s332_s21] sm:$0xff] %v12072_v0 }
 0xbf8 PF: > { %s19_s30 = sadd.s32 1, %s17568_s30  }
 0xbf9   : > { %p16_p4 = scmp.ge.s32.totalorder %s19_s30, 4  }
 0xbfb   :  { %18 = sbr.rel (!%p16_p4) target bundleno = 1 (0x1), region = 142 }

</bundles_post_ra>
